<compile_context>
chip_gen: v6e
topology: v6e:2x2x1
jax: 0.10.0
libtpu: 0.0.40
codegen_flags: <defaults>
</compile_context>

<pallas_src>
import math
from functools import partial

import numpy as np
import jax
import jax.numpy as jnp
from jax.experimental import pallas as pl
from jax.experimental.pallas import tpu as pltpu

_EPS_LN = 1e-5
_EPS_BN = 1e-5
_NEG = -1e30      # finite "minus infinity" (avoids inf-inf -> NaN paths)


# ----------------------------------------------------------------------------
# In-kernel building blocks (operate on VMEM refs / f32 arrays)
# ----------------------------------------------------------------------------

def _layer_norm(y, g_ref, b_ref):
    mu = jnp.mean(y, axis=-1, keepdims=True)
    yc = y - mu
    var = jnp.mean(yc * yc, axis=-1, keepdims=True)
    return yc * jax.lax.rsqrt(var + _EPS_LN) * g_ref[...] + b_ref[...]


def _embed(x, mark, ep):
    """Value embedding (circular conv k=3 as 3 accumulated matmuls) + timeF
    linear + positional add."""
    L = x.shape[0]
    xm1 = pltpu.roll(x, shift=1, axis=0).astype(jnp.bfloat16)       # x[(t-1) % L]
    xp1 = pltpu.roll(x, shift=L - 1, axis=0).astype(jnp.bfloat16)   # x[(t+1) % L]
    x16 = x.astype(jnp.bfloat16)
    taps = ep["taps"]                                                # (3, Cin, D) bf16
    v = (jnp.dot(xm1, taps[0], preferred_element_type=jnp.float32)
         + jnp.dot(x16, taps[1], preferred_element_type=jnp.float32)
         + jnp.dot(xp1, taps[2], preferred_element_type=jnp.float32))
    t = jnp.dot(mark.astype(jnp.bfloat16), ep["time_w"][...],
                preferred_element_type=jnp.float32)
    return v + t + ep["bias"][...] + ep["pos"][...]


def _attention(xq, xkv, ap, mask_bias):
    """Multi-head softmax attention with per-head packed weights; head outputs
    are accumulated through per-head slices of the output projection (no lane
    concatenation, no activation lane slicing)."""
    L, D = xq.shape
    H, _, E = ap["wq"].shape
    scale = 1.0 / math.sqrt(E)
    xq16 = xq.astype(jnp.bfloat16)
    xkv16 = xkv.astype(jnp.bfloat16)
    ctx = jnp.zeros((L, D), jnp.float32)
    for h in range(H):                                # static unroll, H is small
        qh = jnp.dot(xq16, ap["wq"][h], preferred_element_type=jnp.float32) + ap["bq"][h]
        kh = jnp.dot(xkv16, ap["wk"][h], preferred_element_type=jnp.float32) + ap["bk"][h]
        vh = jnp.dot(xkv16, ap["wv"][h], preferred_element_type=jnp.float32) + ap["bv"][h]
        s = jax.lax.dot_general((qh * scale).astype(jnp.bfloat16),
                                kh.astype(jnp.bfloat16),
                                (((1,), (1,)), ((), ())),
                                preferred_element_type=jnp.float32)   # (L, S)
        if mask_bias is not None:
            s = s + mask_bias                          # additive -1e30 causal bias
        m = jnp.max(s, axis=-1, keepdims=True)
        p = jnp.exp(s - m)
        a = p * pl.reciprocal(jnp.sum(p, axis=-1, keepdims=True), approx=True)
        oh = jnp.dot(a.astype(jnp.bfloat16), vh.astype(jnp.bfloat16),
                     preferred_element_type=jnp.float32)              # (L, E)
        ctx = ctx + jnp.dot(oh.astype(jnp.bfloat16), ap["wo"][h],
                            preferred_element_type=jnp.float32)       # (L, D)
    return ctx + ap["bo"][...]


def _attn_block(xq, xkv, ap, g_ref, b_ref, mask_bias):
    """LayerNorm(xq + MHA(xq, xkv))."""
    return _layer_norm(xq + _attention(xq, xkv, ap, mask_bias), g_ref, b_ref)


def _ffn_block(x, lp, g_key, b_key):
    """LayerNorm(x + W2 GELU(W1 x))."""
    h = jnp.dot(x.astype(jnp.bfloat16), lp["ff1_w"][...],
                preferred_element_type=jnp.float32) + lp["ff1_b"][...]
    # TODO(synk): PyTorch F.gelu is the exact erf GELU; tanh approximation used
    # because Mosaic erf lowering is not guaranteed.
    c = jnp.float32(math.sqrt(2.0 / math.pi))
    h = 0.5 * h * (1.0 + jnp.tanh(c * (h + 0.044715 * h * h * h)))
    y = x + jnp.dot(h.astype(jnp.bfloat16), lp["ff2_w"][...],
                    preferred_element_type=jnp.float32) + lp["ff2_b"][...]
    return _layer_norm(y, lp[g_key], lp[b_key])


def _distil(x, cp):
    """ConvLayer: circular conv (k=3) + eval BatchNorm (folded scale/shift) +
    ELU + MaxPool1d(kernel=3, stride=2, padding=1) via a baked 0/1 row-select."""
    L, D = x.shape
    xm1 = pltpu.roll(x, shift=1, axis=0).astype(jnp.bfloat16)
    xp1 = pltpu.roll(x, shift=L - 1, axis=0).astype(jnp.bfloat16)
    x16 = x.astype(jnp.bfloat16)
    taps = cp["taps"]                                  # (3, D, D) bf16
    y = (jnp.dot(xm1, taps[0], preferred_element_type=jnp.float32)
         + jnp.dot(x16, taps[1], preferred_element_type=jnp.float32)
         + jnp.dot(xp1, taps[2], preferred_element_type=jnp.float32))
    y = y * cp["s"][...] + cp["t"][...]                # conv bias + BatchNorm(eval)
    y = jnp.where(y > 0, y, jnp.exp(jnp.minimum(y, 0.0)) - 1.0)   # ELU(alpha=1)

    sel = cp["sel"][...]                               # (l_out, 2*l_out-1) 0/1 f32
    l_out, n = sel.shape
    pad = jnp.full((1, D), _NEG, jnp.float32)          # ELU output >= -1, so exact
    parts = [pad, y]
    back = 2 * l_out - L
    if back > 0:
        parts.append(jnp.broadcast_to(pad, (back, D)))
    yp = jnp.concatenate(parts, axis=0)                # (2*l_out + 1, D)
    m = jnp.maximum(jnp.maximum(yp[0:n], yp[1:n + 1]), yp[2:n + 2])
    return jnp.dot(sel, m, preferred_element_type=jnp.float32)   # keep rows 2t


# ----------------------------------------------------------------------------
# The single fused kernel (one batch element per grid step)
# ----------------------------------------------------------------------------

def _informer_kernel(xe_ref, me_ref, xd_ref, md_ref, *rest, treedef):
    out_ref = rest[-1]
    assert len(rest) - 1 == treedef.num_leaves
    P = jax.tree_util.tree_unflatten(treedef, list(rest[:-1]))

    # ---- encoder: embedding -> [attn + FFN (+ distil conv)]* -> LayerNorm ----
    x = _embed(xe_ref[0], me_ref[0], P["enc_emb"])
    convs = P["enc_convs"]
    for li, lp in enumerate(P["enc_layers"]):
        x = _attn_block(x, x, lp["attn"], lp["norm1_g"], lp["norm1_b"], None)
        x = _ffn_block(x, lp, "norm2_g", "norm2_b")
        if li < len(convs):
            x = _distil(x, convs[li])
    enc_out = _layer_norm(x, P["enc_norm_g"], P["enc_norm_b"])

    # ---- decoder: embedding -> [self-attn, cross-attn, FFN]* -> norm + proj --
    causal = P["causal"][...]
    y = _embed(xd_ref[0], md_ref[0], P["dec_emb"])
    for lp in P["dec_layers"]:
        y = _attn_block(y, y, lp["self_attn"], lp["norm1_g"], lp["norm1_b"], causal)
        y = _attn_block(y, enc_out, lp["cross_attn"], lp["norm2_g"], lp["norm2_b"], None)
        y = _ffn_block(y, lp, "norm3_g", "norm3_b")
    y = _layer_norm(y, P["dec_norm_g"], P["dec_norm_b"])

    # final projection into a 128-lane zero-padded slab (lane-dense store)
    out_ref[0] = (jnp.dot(y.astype(jnp.bfloat16), P["proj_w"][...],
                          preferred_element_type=jnp.float32) + P["proj_b"][...])


# ----------------------------------------------------------------------------
# Host-side constants & wrapper
# ----------------------------------------------------------------------------

def _const_spec(shape):
    zeros = (0,) * len(shape)
    return pl.BlockSpec(tuple(shape), lambda i: zeros)


def positional_embedding(L, d_model):
    position = np.arange(L, dtype=np.float32)[:, None]
    div_term = np.exp(np.arange(0, d_model, 2, dtype=np.float32)
                      * -(math.log(10000.0) / d_model))
    pe = np.zeros((L, d_model), np.float32)
    pe[:, 0::2] = np.sin(position * div_term)
    pe[:, 1::2] = np.cos(position * div_term)
    return pe


def _causal_bias(L):
    return np.triu(np.full((L, L), _NEG, np.float32), k=1)


def _pool_select(L):
    l_out = (L - 1) // 2 + 1
    n = 2 * l_out - 1
    sel = np.zeros((l_out, n), np.float32)
    sel[np.arange(l_out), 2 * np.arange(l_out)] = 1.0
    return sel, l_out


def informer_forward(params, x_enc, x_mark_enc, x_dec, x_mark_dec,
                     *, seq_len, pred_len, c_out):
    # TODO(synk): ProbAttention (attn='prob') top-u sampling not implemented;
    # this is the FullAttention ('full') eval-mode variant (dropout = identity).
    B, L_enc, cin_e = x_enc.shape
    _, L_dec, cin_d = x_dec.shape
    n_time = x_mark_enc.shape[-1]
    D = params["enc_norm_g"].shape[-1]
    p_out = params["proj_w"].shape[-1]

    # Baked constants: positional embeddings, causal bias, maxpool selections.
    sels, L = [], L_enc
    for _ in params["enc_convs"]:
        sel, L = _pool_select(L)
        sels.append(sel)

    consts = dict(
        enc_emb=dict(params["enc_emb"], pos=positional_embedding(L_enc, D)),
        dec_emb=dict(params["dec_emb"], pos=positional_embedding(L_dec, D)),
        enc_layers=params["enc_layers"],
        enc_convs=[dict(cp, sel=s) for cp, s in zip(params["enc_convs"], sels)],
        enc_norm_g=params["enc_norm_g"], enc_norm_b=params["enc_norm_b"],
        dec_layers=params["dec_layers"],
        dec_norm_g=params["dec_norm_g"], dec_norm_b=params["dec_norm_b"],
        causal=_causal_bias(L_dec),
        proj_w=params["proj_w"], proj_b=params["proj_b"],
    )
    flat, treedef = jax.tree_util.tree_flatten(consts)
    flat = [jnp.asarray(a) for a in flat]

    data_specs = [pl.BlockSpec((1, L_enc, cin_e), lambda i: (i, 0, 0)),
                  pl.BlockSpec((1, L_enc, n_time), lambda i: (i, 0, 0)),
                  pl.BlockSpec((1, L_dec, cin_d), lambda i: (i, 0, 0)),
                  pl.BlockSpec((1, L_dec, n_time), lambda i: (i, 0, 0))]
    const_specs = [_const_spec(a.shape) for a in flat]

    dec_out = pl.pallas_call(
        partial(_informer_kernel, treedef=treedef),
        out_shape=jax.ShapeDtypeStruct((B, L_dec, p_out), jnp.float32),
        grid=(B,),                        # v7x: one batch element per TensorCore
        in_specs=data_specs + const_specs,
        out_specs=pl.BlockSpec((1, L_dec, p_out), lambda i: (i, 0, 0)),
        compiler_params=pltpu.CompilerParams(
            dimension_semantics=("parallel",)),
    )(x_enc, x_mark_enc, x_dec, x_mark_dec, *flat)

    assert dec_out.shape[1] == seq_len + pred_len, dec_out.shape
    x_hat = dec_out[:, :seq_len, :c_out]
    y_hat = dec_out[:, -pred_len:, :c_out]
    attns = [None] * len(params["enc_layers"])        # output_attention=False
    return x_hat, y_hat, attns


informer_forward_jit = jax.jit(
    informer_forward, static_argnames=("seq_len", "pred_len", "c_out"))


# ----------------------------------------------------------------------------
# Deterministic parameter initialization (pre-packed, matmul weights in bf16)
# ----------------------------------------------------------------------------

def init_informer_params(key, enc_in, dec_in, c_out, d_model, n_heads,
                         e_layers, d_layers, d_ff, n_time):
    keys = iter(jax.random.split(key, 1024))
    E = d_model // n_heads

    def w(shape, scale=0.05):
        return (scale * jax.random.normal(next(keys), shape, jnp.float32)
                ).astype(jnp.bfloat16)

    def zeros(s): return jnp.zeros(s, jnp.float32)
    def ones(s): return jnp.ones(s, jnp.float32)

    def emb(c_in):
        # circular-conv taps packed (3, Cin, D): [t-1, t, t+1];
        # conv bias + timeF-linear bias folded into one vector.
        return dict(taps=w((3, c_in, d_model)), time_w=w((n_time, d_model)),
                    bias=zeros((1, d_model)))

    def attn_p():
        # per-head packed projections: q/k/v (H, D, E), out-proj (H, E, D)
        return dict(wq=w((n_heads, d_model, E)), bq=zeros((n_heads, 1, E)),
                    wk=w((n_heads, d_model, E)), bk=zeros((n_heads, 1, E)),
                    wv=w((n_heads, d_model, E)), bv=zeros((n_heads, 1, E)),
                    wo=w((n_heads, E, d_model)), bo=zeros((1, d_model)))

    def enc_layer_p():
        return dict(attn=attn_p(),
                    ff1_w=w((d_model, d_ff)), ff1_b=zeros((1, d_ff)),
                    ff2_w=w((d_ff, d_model)), ff2_b=zeros((1, d_model)),
                    norm1_g=ones((1, d_model)), norm1_b=zeros((1, d_model)),
                    norm2_g=ones((1, d_model)), norm2_b=zeros((1, d_model)))

    def conv_layer_p():
        # eval BatchNorm (running mean=0, var=1) + conv bias folded: y*s + t
        gamma, beta, conv_b = ones((1, d_model)), zeros((1, d_model)), zeros((1, d_model))
        s = gamma / float(np.sqrt(1.0 + _EPS_BN))
        return dict(taps=w((3, d_model, d_model)), s=s, t=conv_b * s + beta)

    def dec_layer_p():
        return dict(self_attn=attn_p(), cross_attn=attn_p(),
                    ff1_w=w((d_model, d_ff)), ff1_b=zeros((1, d_ff)),
                    ff2_w=w((d_ff, d_model)), ff2_b=zeros((1, d_model)),
                    norm1_g=ones((1, d_model)), norm1_b=zeros((1, d_model)),
                    norm2_g=ones((1, d_model)), norm2_b=zeros((1, d_model)),
                    norm3_g=ones((1, d_model)), norm3_b=zeros((1, d_model)))

    # output projection zero-padded to a 128-lane slab for a lane-dense store
    p_out = ((c_out + 127) // 128) * 128
    proj = 0.05 * jax.random.normal(next(keys), (d_model, c_out), jnp.float32)
    proj_w = jnp.zeros((d_model, p_out), jnp.float32).at[:, :c_out].set(proj)

    return dict(
        enc_emb=emb(enc_in), dec_emb=emb(dec_in),
        enc_layers=[enc_layer_p() for _ in range(e_layers)],
        enc_convs=[conv_layer_p() for _ in range(e_layers - 1)],
        enc_norm_g=ones((1, d_model)), enc_norm_b=zeros((1, d_model)),
        dec_layers=[dec_layer_p() for _ in range(d_layers)],
        dec_norm_g=ones((1, d_model)), dec_norm_b=zeros((1, d_model)),
        proj_w=proj_w.astype(jnp.bfloat16), proj_b=zeros((1, p_out)),
    )


# ----------------------------------------------------------------------------
# Main
# ----------------------------------------------------------------------------

if __name__ == "__main__":
    B = 2
    enc_in = dec_in = 4
    c_out = 4
    seq_len, label_len, pred_len = 16, 8, 8
    d_model, n_heads, e_layers, d_layers, d_ff = 32, 4, 2, 1, 64
    n_time = 4   # embed='timeF', freq='h' -> 4 time features

    key = jax.random.PRNGKey(0)
    k_param, k_xe, k_me, k_xd, k_md = jax.random.split(key, 5)
    params = init_informer_params(k_param, enc_in, dec_in, c_out, d_model,
                                  n_heads, e_layers, d_layers, d_ff, n_time)

    x_enc = jax.random.normal(k_xe, (B, seq_len, enc_in), jnp.float32)
    x_mark_enc = jax.random.normal(k_me, (B, seq_len, n_time), jnp.float32)
    dec_len = seq_len + pred_len    # forward asserts dec len == seq_len + pred_len
    x_dec = jax.random.normal(k_xd, (B, dec_len, dec_in), jnp.float32)
    x_mark_dec = jax.random.normal(k_md, (B, dec_len, n_time), jnp.float32)

    x_hat, y_hat, attns = informer_forward_jit(
        params, x_enc, x_mark_enc, x_dec, x_mark_dec,
        seq_len=seq_len, pred_len=pred_len, c_out=c_out)
    jax.block_until_ready((x_hat, y_hat))

    assert x_hat.shape == (B, seq_len, c_out), x_hat.shape
    assert y_hat.shape == (B, pred_len, c_out), y_hat.shape
    assert jnp.all(jnp.isfinite(x_hat)) and jnp.all(jnp.isfinite(y_hat))
    print("KERNEL_OK")
</pallas_src>

<mosaic_0001>
module attributes {stable_mosaic.version = 11 : i64} {
  func.func @_informer_kernel(%arg0: i32, %arg1: memref<1x16x4xf32, #tpu.memory_space<vmem>>, %arg2: memref<1x16x4xf32, #tpu.memory_space<vmem>>, %arg3: memref<1x24x4xf32, #tpu.memory_space<vmem>>, %arg4: memref<1x24x4xf32, #tpu.memory_space<vmem>>, %arg5: memref<24x24xf32, #tpu.memory_space<vmem>>, %arg6: memref<1x32xf32, #tpu.memory_space<vmem>>, %arg7: memref<24x32xf32, #tpu.memory_space<vmem>>, %arg8: memref<3x4x32xbf16, #tpu.memory_space<vmem>>, %arg9: memref<4x32xbf16, #tpu.memory_space<vmem>>, %arg10: memref<4x1x8xf32, #tpu.memory_space<vmem>>, %arg11: memref<1x32xf32, #tpu.memory_space<vmem>>, %arg12: memref<4x1x8xf32, #tpu.memory_space<vmem>>, %arg13: memref<4x1x8xf32, #tpu.memory_space<vmem>>, %arg14: memref<4x32x8xbf16, #tpu.memory_space<vmem>>, %arg15: memref<4x8x32xbf16, #tpu.memory_space<vmem>>, %arg16: memref<4x32x8xbf16, #tpu.memory_space<vmem>>, %arg17: memref<4x32x8xbf16, #tpu.memory_space<vmem>>, %arg18: memref<1x64xf32, #tpu.memory_space<vmem>>, %arg19: memref<32x64xbf16, #tpu.memory_space<vmem>>, %arg20: memref<1x32xf32, #tpu.memory_space<vmem>>, %arg21: memref<64x32xbf16, #tpu.memory_space<vmem>>, %arg22: memref<1x32xf32, #tpu.memory_space<vmem>>, %arg23: memref<1x32xf32, #tpu.memory_space<vmem>>, %arg24: memref<1x32xf32, #tpu.memory_space<vmem>>, %arg25: memref<1x32xf32, #tpu.memory_space<vmem>>, %arg26: memref<1x32xf32, #tpu.memory_space<vmem>>, %arg27: memref<1x32xf32, #tpu.memory_space<vmem>>, %arg28: memref<4x1x8xf32, #tpu.memory_space<vmem>>, %arg29: memref<1x32xf32, #tpu.memory_space<vmem>>, %arg30: memref<4x1x8xf32, #tpu.memory_space<vmem>>, %arg31: memref<4x1x8xf32, #tpu.memory_space<vmem>>, %arg32: memref<4x32x8xbf16, #tpu.memory_space<vmem>>, %arg33: memref<4x8x32xbf16, #tpu.memory_space<vmem>>, %arg34: memref<4x32x8xbf16, #tpu.memory_space<vmem>>, %arg35: memref<4x32x8xbf16, #tpu.memory_space<vmem>>, %arg36: memref<1x32xf32, #tpu.memory_space<vmem>>, %arg37: memref<1x32xf32, #tpu.memory_space<vmem>>, %arg38: memref<1x32xf32, #tpu.memory_space<vmem>>, %arg39: memref<8x15xf32, #tpu.memory_space<vmem>>, %arg40: memref<1x32xf32, #tpu.memory_space<vmem>>, %arg41: memref<3x32x32xbf16, #tpu.memory_space<vmem>>, %arg42: memref<1x32xf32, #tpu.memory_space<vmem>>, %arg43: memref<16x32xf32, #tpu.memory_space<vmem>>, %arg44: memref<3x4x32xbf16, #tpu.memory_space<vmem>>, %arg45: memref<4x32xbf16, #tpu.memory_space<vmem>>, %arg46: memref<4x1x8xf32, #tpu.memory_space<vmem>>, %arg47: memref<1x32xf32, #tpu.memory_space<vmem>>, %arg48: memref<4x1x8xf32, #tpu.memory_space<vmem>>, %arg49: memref<4x1x8xf32, #tpu.memory_space<vmem>>, %arg50: memref<4x32x8xbf16, #tpu.memory_space<vmem>>, %arg51: memref<4x8x32xbf16, #tpu.memory_space<vmem>>, %arg52: memref<4x32x8xbf16, #tpu.memory_space<vmem>>, %arg53: memref<4x32x8xbf16, #tpu.memory_space<vmem>>, %arg54: memref<1x64xf32, #tpu.memory_space<vmem>>, %arg55: memref<32x64xbf16, #tpu.memory_space<vmem>>, %arg56: memref<1x32xf32, #tpu.memory_space<vmem>>, %arg57: memref<64x32xbf16, #tpu.memory_space<vmem>>, %arg58: memref<1x32xf32, #tpu.memory_space<vmem>>, %arg59: memref<1x32xf32, #tpu.memory_space<vmem>>, %arg60: memref<1x32xf32, #tpu.memory_space<vmem>>, %arg61: memref<1x32xf32, #tpu.memory_space<vmem>>, %arg62: memref<4x1x8xf32, #tpu.memory_space<vmem>>, %arg63: memref<1x32xf32, #tpu.memory_space<vmem>>, %arg64: memref<4x1x8xf32, #tpu.memory_space<vmem>>, %arg65: memref<4x1x8xf32, #tpu.memory_space<vmem>>, %arg66: memref<4x32x8xbf16, #tpu.memory_space<vmem>>, %arg67: memref<4x8x32xbf16, #tpu.memory_space<vmem>>, %arg68: memref<4x32x8xbf16, #tpu.memory_space<vmem>>, %arg69: memref<4x32x8xbf16, #tpu.memory_space<vmem>>, %arg70: memref<1x64xf32, #tpu.memory_space<vmem>>, %arg71: memref<32x64xbf16, #tpu.memory_space<vmem>>, %arg72: memref<1x32xf32, #tpu.memory_space<vmem>>, %arg73: memref<64x32xbf16, #tpu.memory_space<vmem>>, %arg74: memref<1x32xf32, #tpu.memory_space<vmem>>, %arg75: memref<1x32xf32, #tpu.memory_space<vmem>>, %arg76: memref<1x32xf32, #tpu.memory_space<vmem>>, %arg77: memref<1x32xf32, #tpu.memory_space<vmem>>, %arg78: memref<1x32xf32, #tpu.memory_space<vmem>>, %arg79: memref<1x32xf32, #tpu.memory_space<vmem>>, %arg80: memref<1x128xf32, #tpu.memory_space<vmem>>, %arg81: memref<32x128xbf16, #tpu.memory_space<vmem>>, %arg82: memref<1x24x128xf32, #tpu.memory_space<vmem>>) attributes {dimension_semantics = [#tpu.dimension_semantics<parallel>], iteration_bounds = array<i64: 2>, scalar_prefetch = 0 : i64, scratch_operands = 0 : i64, tpu.core_type = #tpu.core_type<tc>, window_params = [{transform_indices = @transform_0, window_bounds = array<i64: 1, 16, 4>}, {transform_indices = @transform_1, window_bounds = array<i64: 1, 16, 4>}, {transform_indices = @transform_2, window_bounds = array<i64: 1, 24, 4>}, {transform_indices = @transform_3, window_bounds = array<i64: 1, 24, 4>}, {pipeline_mode = #tpu.pipeline_mode<synchronous>, transform_indices = @transform_4, window_bounds = array<i64: 24, 24>}, {pipeline_mode = #tpu.pipeline_mode<synchronous>, transform_indices = @transform_5, window_bounds = array<i64: 1, 32>}, {pipeline_mode = #tpu.pipeline_mode<synchronous>, transform_indices = @transform_6, window_bounds = array<i64: 24, 32>}, {pipeline_mode = #tpu.pipeline_mode<synchronous>, transform_indices = @transform_7, window_bounds = array<i64: 3, 4, 32>}, {pipeline_mode = #tpu.pipeline_mode<synchronous>, transform_indices = @transform_8, window_bounds = array<i64: 4, 32>}, {pipeline_mode = #tpu.pipeline_mode<synchronous>, transform_indices = @transform_9, window_bounds = array<i64: 4, 1, 8>}, {pipeline_mode = #tpu.pipeline_mode<synchronous>, transform_indices = @transform_10, window_bounds = array<i64: 1, 32>}, {pipeline_mode = #tpu.pipeline_mode<synchronous>, transform_indices = @transform_11, window_bounds = array<i64: 4, 1, 8>}, {pipeline_mode = #tpu.pipeline_mode<synchronous>, transform_indices = @transform_12, window_bounds = array<i64: 4, 1, 8>}, {pipeline_mode = #tpu.pipeline_mode<synchronous>, transform_indices = @transform_13, window_bounds = array<i64: 4, 32, 8>}, {pipeline_mode = #tpu.pipeline_mode<synchronous>, transform_indices = @transform_14, window_bounds = array<i64: 4, 8, 32>}, {pipeline_mode = #tpu.pipeline_mode<synchronous>, transform_indices = @transform_15, window_bounds = array<i64: 4, 32, 8>}, {pipeline_mode = #tpu.pipeline_mode<synchronous>, transform_indices = @transform_16, window_bounds = array<i64: 4, 32, 8>}, {pipeline_mode = #tpu.pipeline_mode<synchronous>, transform_indices = @transform_17, window_bounds = array<i64: 1, 64>}, {pipeline_mode = #tpu.pipeline_mode<synchronous>, transform_indices = @transform_18, window_bounds = array<i64: 32, 64>}, {pipeline_mode = #tpu.pipeline_mode<synchronous>, transform_indices = @transform_19, window_bounds = array<i64: 1, 32>}, {pipeline_mode = #tpu.pipeline_mode<synchronous>, transform_indices = @transform_20, window_bounds = array<i64: 64, 32>}, {pipeline_mode = #tpu.pipeline_mode<synchronous>, transform_indices = @transform_21, window_bounds = array<i64: 1, 32>}, {pipeline_mode = #tpu.pipeline_mode<synchronous>, transform_indices = @transform_22, window_bounds = array<i64: 1, 32>}, {pipeline_mode = #tpu.pipeline_mode<synchronous>, transform_indices = @transform_23, window_bounds = array<i64: 1, 32>}, {pipeline_mode = #tpu.pipeline_mode<synchronous>, transform_indices = @transform_24, window_bounds = array<i64: 1, 32>}, {pipeline_mode = #tpu.pipeline_mode<synchronous>, transform_indices = @transform_25, window_bounds = array<i64: 1, 32>}, {pipeline_mode = #tpu.pipeline_mode<synchronous>, transform_indices = @transform_26, window_bounds = array<i64: 1, 32>}, {pipeline_mode = #tpu.pipeline_mode<synchronous>, transform_indices = @transform_27, window_bounds = array<i64: 4, 1, 8>}, {pipeline_mode = #tpu.pipeline_mode<synchronous>, transform_indices = @transform_28, window_bounds = array<i64: 1, 32>}, {pipeline_mode = #tpu.pipeline_mode<synchronous>, transform_indices = @transform_29, window_bounds = array<i64: 4, 1, 8>}, {pipeline_mode = #tpu.pipeline_mode<synchronous>, transform_indices = @transform_30, window_bounds = array<i64: 4, 1, 8>}, {pipeline_mode = #tpu.pipeline_mode<synchronous>, transform_indices = @transform_31, window_bounds = array<i64: 4, 32, 8>}, {pipeline_mode = #tpu.pipeline_mode<synchronous>, transform_indices = @transform_32, window_bounds = array<i64: 4, 8, 32>}, {pipeline_mode = #tpu.pipeline_mode<synchronous>, transform_indices = @transform_33, window_bounds = array<i64: 4, 32, 8>}, {pipeline_mode = #tpu.pipeline_mode<synchronous>, transform_indices = @transform_34, window_bounds = array<i64: 4, 32, 8>}, {pipeline_mode = #tpu.pipeline_mode<synchronous>, transform_indices = @transform_35, window_bounds = array<i64: 1, 32>}, {pipeline_mode = #tpu.pipeline_mode<synchronous>, transform_indices = @transform_36, window_bounds = array<i64: 1, 32>}, {pipeline_mode = #tpu.pipeline_mode<synchronous>, transform_indices = @transform_37, window_bounds = array<i64: 1, 32>}, {pipeline_mode = #tpu.pipeline_mode<synchronous>, transform_indices = @transform_38, window_bounds = array<i64: 8, 15>}, {pipeline_mode = #tpu.pipeline_mode<synchronous>, transform_indices = @transform_39, window_bounds = array<i64: 1, 32>}, {pipeline_mode = #tpu.pipeline_mode<synchronous>, transform_indices = @transform_40, window_bounds = array<i64: 3, 32, 32>}, {pipeline_mode = #tpu.pipeline_mode<synchronous>, transform_indices = @transform_41, window_bounds = array<i64: 1, 32>}, {pipeline_mode = #tpu.pipeline_mode<synchronous>, transform_indices = @transform_42, window_bounds = array<i64: 16, 32>}, {pipeline_mode = #tpu.pipeline_mode<synchronous>, transform_indices = @transform_43, window_bounds = array<i64: 3, 4, 32>}, {pipeline_mode = #tpu.pipeline_mode<synchronous>, transform_indices = @transform_44, window_bounds = array<i64: 4, 32>}, {pipeline_mode = #tpu.pipeline_mode<synchronous>, transform_indices = @transform_45, window_bounds = array<i64: 4, 1, 8>}, {pipeline_mode = #tpu.pipeline_mode<synchronous>, transform_indices = @transform_46, window_bounds = array<i64: 1, 32>}, {pipeline_mode = #tpu.pipeline_mode<synchronous>, transform_indices = @transform_47, window_bounds = array<i64: 4, 1, 8>}, {pipeline_mode = #tpu.pipeline_mode<synchronous>, transform_indices = @transform_48, window_bounds = array<i64: 4, 1, 8>}, {pipeline_mode = #tpu.pipeline_mode<synchronous>, transform_indices = @transform_49, window_bounds = array<i64: 4, 32, 8>}, {pipeline_mode = #tpu.pipeline_mode<synchronous>, transform_indices = @transform_50, window_bounds = array<i64: 4, 8, 32>}, {pipeline_mode = #tpu.pipeline_mode<synchronous>, transform_indices = @transform_51, window_bounds = array<i64: 4, 32, 8>}, {pipeline_mode = #tpu.pipeline_mode<synchronous>, transform_indices = @transform_52, window_bounds = array<i64: 4, 32, 8>}, {pipeline_mode = #tpu.pipeline_mode<synchronous>, transform_indices = @transform_53, window_bounds = array<i64: 1, 64>}, {pipeline_mode = #tpu.pipeline_mode<synchronous>, transform_indices = @transform_54, window_bounds = array<i64: 32, 64>}, {pipeline_mode = #tpu.pipeline_mode<synchronous>, transform_indices = @transform_55, window_bounds = array<i64: 1, 32>}, {pipeline_mode = #tpu.pipeline_mode<synchronous>, transform_indices = @transform_56, window_bounds = array<i64: 64, 32>}, {pipeline_mode = #tpu.pipeline_mode<synchronous>, transform_indices = @transform_57, window_bounds = array<i64: 1, 32>}, {pipeline_mode = #tpu.pipeline_mode<synchronous>, transform_indices = @transform_58, window_bounds = array<i64: 1, 32>}, {pipeline_mode = #tpu.pipeline_mode<synchronous>, transform_indices = @transform_59, window_bounds = array<i64: 1, 32>}, {pipeline_mode = #tpu.pipeline_mode<synchronous>, transform_indices = @transform_60, window_bounds = array<i64: 1, 32>}, {pipeline_mode = #tpu.pipeline_mode<synchronous>, transform_indices = @transform_61, window_bounds = array<i64: 4, 1, 8>}, {pipeline_mode = #tpu.pipeline_mode<synchronous>, transform_indices = @transform_62, window_bounds = array<i64: 1, 32>}, {pipeline_mode = #tpu.pipeline_mode<synchronous>, transform_indices = @transform_63, window_bounds = array<i64: 4, 1, 8>}, {pipeline_mode = #tpu.pipeline_mode<synchronous>, transform_indices = @transform_64, window_bounds = array<i64: 4, 1, 8>}, {pipeline_mode = #tpu.pipeline_mode<synchronous>, transform_indices = @transform_65, window_bounds = array<i64: 4, 32, 8>}, {pipeline_mode = #tpu.pipeline_mode<synchronous>, transform_indices = @transform_66, window_bounds = array<i64: 4, 8, 32>}, {pipeline_mode = #tpu.pipeline_mode<synchronous>, transform_indices = @transform_67, window_bounds = array<i64: 4, 32, 8>}, {pipeline_mode = #tpu.pipeline_mode<synchronous>, transform_indices = @transform_68, window_bounds = array<i64: 4, 32, 8>}, {pipeline_mode = #tpu.pipeline_mode<synchronous>, transform_indices = @transform_69, window_bounds = array<i64: 1, 64>}, {pipeline_mode = #tpu.pipeline_mode<synchronous>, transform_indices = @transform_70, window_bounds = array<i64: 32, 64>}, {pipeline_mode = #tpu.pipeline_mode<synchronous>, transform_indices = @transform_71, window_bounds = array<i64: 1, 32>}, {pipeline_mode = #tpu.pipeline_mode<synchronous>, transform_indices = @transform_72, window_bounds = array<i64: 64, 32>}, {pipeline_mode = #tpu.pipeline_mode<synchronous>, transform_indices = @transform_73, window_bounds = array<i64: 1, 32>}, {pipeline_mode = #tpu.pipeline_mode<synchronous>, transform_indices = @transform_74, window_bounds = array<i64: 1, 32>}, {pipeline_mode = #tpu.pipeline_mode<synchronous>, transform_indices = @transform_75, window_bounds = array<i64: 1, 32>}, {pipeline_mode = #tpu.pipeline_mode<synchronous>, transform_indices = @transform_76, window_bounds = array<i64: 1, 32>}, {pipeline_mode = #tpu.pipeline_mode<synchronous>, transform_indices = @transform_77, window_bounds = array<i64: 1, 32>}, {pipeline_mode = #tpu.pipeline_mode<synchronous>, transform_indices = @transform_78, window_bounds = array<i64: 1, 32>}, {pipeline_mode = #tpu.pipeline_mode<synchronous>, transform_indices = @transform_79, window_bounds = array<i64: 1, 128>}, {pipeline_mode = #tpu.pipeline_mode<synchronous>, transform_indices = @transform_80, window_bounds = array<i64: 32, 128>}, {transform_indices = @transform_81, window_bounds = array<i64: 1, 24, 128>}]} {
    %c0 = arith.constant 0 : index
    %c0_0 = arith.constant 0 : index
    %c0_1 = arith.constant 0 : index
    %0 = vector.load %arg1[%c0, %c0_0, %c0_1] : memref<1x16x4xf32, #tpu.memory_space<vmem>>, vector<1x16x4xf32>
    %1 = vector.shape_cast %0 : vector<1x16x4xf32> to vector<16x4xf32>
    %c0_2 = arith.constant 0 : index
    %c0_3 = arith.constant 0 : index
    %c0_4 = arith.constant 0 : index
    %2 = vector.load %arg2[%c0_2, %c0_3, %c0_4] : memref<1x16x4xf32, #tpu.memory_space<vmem>>, vector<1x16x4xf32>
    %3 = vector.shape_cast %2 : vector<1x16x4xf32> to vector<16x4xf32>
    %c1_i32 = arith.constant 1 : i32
    %4 = tpu.dynamic_rotate %1 by %c1_i32 dim 0 : vector<16x4xf32>, i32 -> vector<16x4xf32>
    %5 = arith.truncf %4 : vector<16x4xf32> to vector<16x4xbf16>
    %c15_i32 = arith.constant 15 : i32
    %6 = tpu.dynamic_rotate %1 by %c15_i32 dim 0 : vector<16x4xf32>, i32 -> vector<16x4xf32>
    %7 = arith.truncf %6 : vector<16x4xf32> to vector<16x4xbf16>
    %8 = arith.truncf %1 : vector<16x4xf32> to vector<16x4xbf16>
    %c0_5 = arith.constant 0 : index
    %c0_6 = arith.constant 0 : index
    %c0_7 = arith.constant 0 : index
    %9 = vector.load %arg44[%c0_5, %c0_6, %c0_7] : memref<3x4x32xbf16, #tpu.memory_space<vmem>>, vector<1x4x32xbf16>
    %10 = vector.shape_cast %9 : vector<1x4x32xbf16> to vector<4x32xbf16>
    %cst = arith.constant dense<0.000000e+00> : vector<16x32xf32>
    %11 = tpu.matmul %5, %10, %cst {dimension_numbers = #tpu.dot_dimension_numbers<[1], [0], [0], [1], [0, 0, 1, 1], [], []>} : vector<16x4xbf16>, vector<4x32xbf16>, vector<16x32xf32> -> vector<16x32xf32>
    %c1 = arith.constant 1 : index
    %c0_8 = arith.constant 0 : index
    %c0_9 = arith.constant 0 : index
    %12 = vector.load %arg44[%c1, %c0_8, %c0_9] : memref<3x4x32xbf16, #tpu.memory_space<vmem>>, vector<1x4x32xbf16>
    %13 = vector.shape_cast %12 : vector<1x4x32xbf16> to vector<4x32xbf16>
    %cst_10 = arith.constant dense<0.000000e+00> : vector<16x32xf32>
    %14 = tpu.matmul %8, %13, %cst_10 {dimension_numbers = #tpu.dot_dimension_numbers<[1], [0], [0], [1], [0, 0, 1, 1], [], []>} : vector<16x4xbf16>, vector<4x32xbf16>, vector<16x32xf32> -> vector<16x32xf32>
    %15 = arith.addf %11, %14 : vector<16x32xf32>
    %c2 = arith.constant 2 : index
    %c0_11 = arith.constant 0 : index
    %c0_12 = arith.constant 0 : index
    %16 = vector.load %arg44[%c2, %c0_11, %c0_12] : memref<3x4x32xbf16, #tpu.memory_space<vmem>>, vector<1x4x32xbf16>
    %17 = vector.shape_cast %16 : vector<1x4x32xbf16> to vector<4x32xbf16>
    %cst_13 = arith.constant dense<0.000000e+00> : vector<16x32xf32>
    %18 = tpu.matmul %7, %17, %cst_13 {dimension_numbers = #tpu.dot_dimension_numbers<[1], [0], [0], [1], [0, 0, 1, 1], [], []>} : vector<16x4xbf16>, vector<4x32xbf16>, vector<16x32xf32> -> vector<16x32xf32>
    %19 = arith.addf %15, %18 : vector<16x32xf32>
    %20 = arith.truncf %3 : vector<16x4xf32> to vector<16x4xbf16>
    %c0_14 = arith.constant 0 : index
    %c0_15 = arith.constant 0 : index
    %21 = vector.load %arg45[%c0_14, %c0_15] : memref<4x32xbf16, #tpu.memory_space<vmem>>, vector<4x32xbf16>
    %cst_16 = arith.constant dense<0.000000e+00> : vector<16x32xf32>
    %22 = tpu.matmul %20, %21, %cst_16 {dimension_numbers = #tpu.dot_dimension_numbers<[1], [0], [0], [1], [0, 0, 1, 1], [], []>} : vector<16x4xbf16>, vector<4x32xbf16>, vector<16x32xf32> -> vector<16x32xf32>
    %23 = arith.addf %19, %22 : vector<16x32xf32>
    %c0_17 = arith.constant 0 : index
    %c0_18 = arith.constant 0 : index
    %24 = vector.load %arg42[%c0_17, %c0_18] : memref<1x32xf32, #tpu.memory_space<vmem>>, vector<1x32xf32>
    %25 = vector.broadcast %24 : vector<1x32xf32> to vector<16x32xf32>
    %26 = arith.addf %23, %25 : vector<16x32xf32>
    %c0_19 = arith.constant 0 : index
    %c0_20 = arith.constant 0 : index
    %27 = vector.load %arg43[%c0_19, %c0_20] : memref<16x32xf32, #tpu.memory_space<vmem>>, vector<16x32xf32>
    %28 = arith.addf %26, %27 : vector<16x32xf32>
    %29 = arith.truncf %28 : vector<16x32xf32> to vector<16x32xbf16>
    %30 = arith.truncf %28 : vector<16x32xf32> to vector<16x32xbf16>
    %cst_21 = arith.constant 0.000000e+00 : f32
    %31 = vector.broadcast %cst_21 : f32 to vector<16x32xf32>
    %c0_22 = arith.constant 0 : index
    %c0_23 = arith.constant 0 : index
    %c0_24 = arith.constant 0 : index
    %32 = vector.load %arg52[%c0_22, %c0_23, %c0_24] : memref<4x32x8xbf16, #tpu.memory_space<vmem>>, vector<1x32x8xbf16>
    %33 = vector.shape_cast %32 : vector<1x32x8xbf16> to vector<32x8xbf16>
    %cst_25 = arith.constant dense<0.000000e+00> : vector<16x8xf32>
    %34 = tpu.matmul %29, %33, %cst_25 {dimension_numbers = #tpu.dot_dimension_numbers<[1], [0], [0], [1], [0, 0, 1, 1], [], []>} : vector<16x32xbf16>, vector<32x8xbf16>, vector<16x8xf32> -> vector<16x8xf32>
    %c0_26 = arith.constant 0 : index
    %c0_27 = arith.constant 0 : index
    %c0_28 = arith.constant 0 : index
    %35 = vector.load %arg48[%c0_26, %c0_27, %c0_28] : memref<4x1x8xf32, #tpu.memory_space<vmem>>, vector<1x1x8xf32>
    %36 = vector.shape_cast %35 : vector<1x1x8xf32> to vector<1x8xf32>
    %37 = vector.broadcast %36 : vector<1x8xf32> to vector<16x8xf32>
    %38 = arith.addf %34, %37 : vector<16x8xf32>
    %c0_29 = arith.constant 0 : index
    %c0_30 = arith.constant 0 : index
    %c0_31 = arith.constant 0 : index
    %39 = vector.load %arg50[%c0_29, %c0_30, %c0_31] : memref<4x32x8xbf16, #tpu.memory_space<vmem>>, vector<1x32x8xbf16>
    %40 = vector.shape_cast %39 : vector<1x32x8xbf16> to vector<32x8xbf16>
    %cst_32 = arith.constant dense<0.000000e+00> : vector<16x8xf32>
    %41 = tpu.matmul %30, %40, %cst_32 {dimension_numbers = #tpu.dot_dimension_numbers<[1], [0], [0], [1], [0, 0, 1, 1], [], []>} : vector<16x32xbf16>, vector<32x8xbf16>, vector<16x8xf32> -> vector<16x8xf32>
    %c0_33 = arith.constant 0 : index
    %c0_34 = arith.constant 0 : index
    %c0_35 = arith.constant 0 : index
    %42 = vector.load %arg46[%c0_33, %c0_34, %c0_35] : memref<4x1x8xf32, #tpu.memory_space<vmem>>, vector<1x1x8xf32>
    %43 = vector.shape_cast %42 : vector<1x1x8xf32> to vector<1x8xf32>
    %44 = vector.broadcast %43 : vector<1x8xf32> to vector<16x8xf32>
    %45 = arith.addf %41, %44 : vector<16x8xf32>
    %c0_36 = arith.constant 0 : index
    %c0_37 = arith.constant 0 : index
    %c0_38 = arith.constant 0 : index
    %46 = vector.load %arg53[%c0_36, %c0_37, %c0_38] : memref<4x32x8xbf16, #tpu.memory_space<vmem>>, vector<1x32x8xbf16>
    %47 = vector.shape_cast %46 : vector<1x32x8xbf16> to vector<32x8xbf16>
    %cst_39 = arith.constant dense<0.000000e+00> : vector<16x8xf32>
    %48 = tpu.matmul %30, %47, %cst_39 {dimension_numbers = #tpu.dot_dimension_numbers<[1], [0], [0], [1], [0, 0, 1, 1], [], []>} : vector<16x32xbf16>, vector<32x8xbf16>, vector<16x8xf32> -> vector<16x8xf32>
    %c0_40 = arith.constant 0 : index
    %c0_41 = arith.constant 0 : index
    %c0_42 = arith.constant 0 : index
    %49 = vector.load %arg49[%c0_40, %c0_41, %c0_42] : memref<4x1x8xf32, #tpu.memory_space<vmem>>, vector<1x1x8xf32>
    %50 = vector.shape_cast %49 : vector<1x1x8xf32> to vector<1x8xf32>
    %51 = vector.broadcast %50 : vector<1x8xf32> to vector<16x8xf32>
    %52 = arith.addf %48, %51 : vector<16x8xf32>
    %cst_43 = arith.constant 0.353553385 : f32
    %53 = vector.broadcast %cst_43 : f32 to vector<16x8xf32>
    %54 = arith.mulf %38, %53 : vector<16x8xf32>
    %55 = arith.truncf %54 : vector<16x8xf32> to vector<16x8xbf16>
    %56 = arith.truncf %45 : vector<16x8xf32> to vector<16x8xbf16>
    %cst_44 = arith.constant dense<0.000000e+00> : vector<16x16xf32>
    %57 = tpu.matmul %55, %56, %cst_44 {dimension_numbers = #tpu.dot_dimension_numbers<[1], [1], [0], [0], [0, 0, 1, 0], [], []>} : vector<16x8xbf16>, vector<16x8xbf16>, vector<16x16xf32> -> vector<16x16xf32>
    %cst_45 = arith.constant dense<0xFF800000> : vector<16xf32>
    %58 = vector.multi_reduction <maximumf>, %57, %cst_45 [1] : vector<16x16xf32> to vector<16xf32>
    %59 = vector.shape_cast %58 : vector<16xf32> to vector<16x1xf32>
    %60 = vector.broadcast %59 : vector<16x1xf32> to vector<16x16xf32>
    %61 = arith.subf %57, %60 : vector<16x16xf32>
    %62 = math.exp %61 : vector<16x16xf32>
    %cst_46 = arith.constant dense<0.000000e+00> : vector<16xf32>
    %63 = vector.multi_reduction <add>, %62, %cst_46 [1] : vector<16x16xf32> to vector<16xf32>
    %64 = vector.shape_cast %63 : vector<16xf32> to vector<16x1xf32>
    %65 = tpu.reciprocal %64 {approx = true} : vector<16x1xf32> -> vector<16x1xf32>
    %66 = vector.broadcast %65 : vector<16x1xf32> to vector<16x16xf32>
    %67 = arith.mulf %62, %66 : vector<16x16xf32>
    %68 = arith.truncf %67 : vector<16x16xf32> to vector<16x16xbf16>
    %69 = arith.truncf %52 : vector<16x8xf32> to vector<16x8xbf16>
    %cst_47 = arith.constant dense<0.000000e+00> : vector<16x8xf32>
    %70 = tpu.matmul %68, %69, %cst_47 {dimension_numbers = #tpu.dot_dimension_numbers<[1], [0], [0], [1], [0, 0, 1, 1], [], []>} : vector<16x16xbf16>, vector<16x8xbf16>, vector<16x8xf32> -> vector<16x8xf32>
    %71 = arith.truncf %70 : vector<16x8xf32> to vector<16x8xbf16>
    %c0_48 = arith.constant 0 : index
    %c0_49 = arith.constant 0 : index
    %c0_50 = arith.constant 0 : index
    %72 = vector.load %arg51[%c0_48, %c0_49, %c0_50] : memref<4x8x32xbf16, #tpu.memory_space<vmem>>, vector<1x8x32xbf16>
    %73 = vector.shape_cast %72 : vector<1x8x32xbf16> to vector<8x32xbf16>
    %cst_51 = arith.constant dense<0.000000e+00> : vector<16x32xf32>
    %74 = tpu.matmul %71, %73, %cst_51 {dimension_numbers = #tpu.dot_dimension_numbers<[1], [0], [0], [1], [0, 0, 1, 1], [], []>} : vector<16x8xbf16>, vector<8x32xbf16>, vector<16x32xf32> -> vector<16x32xf32>
    %75 = arith.addf %31, %74 : vector<16x32xf32>
    %c1_52 = arith.constant 1 : index
    %c0_53 = arith.constant 0 : index
    %c0_54 = arith.constant 0 : index
    %76 = vector.load %arg52[%c1_52, %c0_53, %c0_54] : memref<4x32x8xbf16, #tpu.memory_space<vmem>>, vector<1x32x8xbf16>
    %77 = vector.shape_cast %76 : vector<1x32x8xbf16> to vector<32x8xbf16>
    %cst_55 = arith.constant dense<0.000000e+00> : vector<16x8xf32>
    %78 = tpu.matmul %29, %77, %cst_55 {dimension_numbers = #tpu.dot_dimension_numbers<[1], [0], [0], [1], [0, 0, 1, 1], [], []>} : vector<16x32xbf16>, vector<32x8xbf16>, vector<16x8xf32> -> vector<16x8xf32>
    %c1_56 = arith.constant 1 : index
    %c0_57 = arith.constant 0 : index
    %c0_58 = arith.constant 0 : index
    %79 = vector.load %arg48[%c1_56, %c0_57, %c0_58] : memref<4x1x8xf32, #tpu.memory_space<vmem>>, vector<1x1x8xf32>
    %80 = vector.shape_cast %79 : vector<1x1x8xf32> to vector<1x8xf32>
    %81 = vector.broadcast %80 : vector<1x8xf32> to vector<16x8xf32>
    %82 = arith.addf %78, %81 : vector<16x8xf32>
    %c1_59 = arith.constant 1 : index
    %c0_60 = arith.constant 0 : index
    %c0_61 = arith.constant 0 : index
    %83 = vector.load %arg50[%c1_59, %c0_60, %c0_61] : memref<4x32x8xbf16, #tpu.memory_space<vmem>>, vector<1x32x8xbf16>
    %84 = vector.shape_cast %83 : vector<1x32x8xbf16> to vector<32x8xbf16>
    %cst_62 = arith.constant dense<0.000000e+00> : vector<16x8xf32>
    %85 = tpu.matmul %30, %84, %cst_62 {dimension_numbers = #tpu.dot_dimension_numbers<[1], [0], [0], [1], [0, 0, 1, 1], [], []>} : vector<16x32xbf16>, vector<32x8xbf16>, vector<16x8xf32> -> vector<16x8xf32>
    %c1_63 = arith.constant 1 : index
    %c0_64 = arith.constant 0 : index
    %c0_65 = arith.constant 0 : index
    %86 = vector.load %arg46[%c1_63, %c0_64, %c0_65] : memref<4x1x8xf32, #tpu.memory_space<vmem>>, vector<1x1x8xf32>
    %87 = vector.shape_cast %86 : vector<1x1x8xf32> to vector<1x8xf32>
    %88 = vector.broadcast %87 : vector<1x8xf32> to vector<16x8xf32>
    %89 = arith.addf %85, %88 : vector<16x8xf32>
    %c1_66 = arith.constant 1 : index
    %c0_67 = arith.constant 0 : index
    %c0_68 = arith.constant 0 : index
    %90 = vector.load %arg53[%c1_66, %c0_67, %c0_68] : memref<4x32x8xbf16, #tpu.memory_space<vmem>>, vector<1x32x8xbf16>
    %91 = vector.shape_cast %90 : vector<1x32x8xbf16> to vector<32x8xbf16>
    %cst_69 = arith.constant dense<0.000000e+00> : vector<16x8xf32>
    %92 = tpu.matmul %30, %91, %cst_69 {dimension_numbers = #tpu.dot_dimension_numbers<[1], [0], [0], [1], [0, 0, 1, 1], [], []>} : vector<16x32xbf16>, vector<32x8xbf16>, vector<16x8xf32> -> vector<16x8xf32>
    %c1_70 = arith.constant 1 : index
    %c0_71 = arith.constant 0 : index
    %c0_72 = arith.constant 0 : index
    %93 = vector.load %arg49[%c1_70, %c0_71, %c0_72] : memref<4x1x8xf32, #tpu.memory_space<vmem>>, vector<1x1x8xf32>
    %94 = vector.shape_cast %93 : vector<1x1x8xf32> to vector<1x8xf32>
    %95 = vector.broadcast %94 : vector<1x8xf32> to vector<16x8xf32>
    %96 = arith.addf %92, %95 : vector<16x8xf32>
    %cst_73 = arith.constant 0.353553385 : f32
    %97 = vector.broadcast %cst_73 : f32 to vector<16x8xf32>
    %98 = arith.mulf %82, %97 : vector<16x8xf32>
    %99 = arith.truncf %98 : vector<16x8xf32> to vector<16x8xbf16>
    %100 = arith.truncf %89 : vector<16x8xf32> to vector<16x8xbf16>
    %cst_74 = arith.constant dense<0.000000e+00> : vector<16x16xf32>
    %101 = tpu.matmul %99, %100, %cst_74 {dimension_numbers = #tpu.dot_dimension_numbers<[1], [1], [0], [0], [0, 0, 1, 0], [], []>} : vector<16x8xbf16>, vector<16x8xbf16>, vector<16x16xf32> -> vector<16x16xf32>
    %cst_75 = arith.constant dense<0xFF800000> : vector<16xf32>
    %102 = vector.multi_reduction <maximumf>, %101, %cst_75 [1] : vector<16x16xf32> to vector<16xf32>
    %103 = vector.shape_cast %102 : vector<16xf32> to vector<16x1xf32>
    %104 = vector.broadcast %103 : vector<16x1xf32> to vector<16x16xf32>
    %105 = arith.subf %101, %104 : vector<16x16xf32>
    %106 = math.exp %105 : vector<16x16xf32>
    %cst_76 = arith.constant dense<0.000000e+00> : vector<16xf32>
    %107 = vector.multi_reduction <add>, %106, %cst_76 [1] : vector<16x16xf32> to vector<16xf32>
    %108 = vector.shape_cast %107 : vector<16xf32> to vector<16x1xf32>
    %109 = tpu.reciprocal %108 {approx = true} : vector<16x1xf32> -> vector<16x1xf32>
    %110 = vector.broadcast %109 : vector<16x1xf32> to vector<16x16xf32>
    %111 = arith.mulf %106, %110 : vector<16x16xf32>
    %112 = arith.truncf %111 : vector<16x16xf32> to vector<16x16xbf16>
    %113 = arith.truncf %96 : vector<16x8xf32> to vector<16x8xbf16>
    %cst_77 = arith.constant dense<0.000000e+00> : vector<16x8xf32>
    %114 = tpu.matmul %112, %113, %cst_77 {dimension_numbers = #tpu.dot_dimension_numbers<[1], [0], [0], [1], [0, 0, 1, 1], [], []>} : vector<16x16xbf16>, vector<16x8xbf16>, vector<16x8xf32> -> vector<16x8xf32>
    %115 = arith.truncf %114 : vector<16x8xf32> to vector<16x8xbf16>
    %c1_78 = arith.constant 1 : index
    %c0_79 = arith.constant 0 : index
    %c0_80 = arith.constant 0 : index
    %116 = vector.load %arg51[%c1_78, %c0_79, %c0_80] : memref<4x8x32xbf16, #tpu.memory_space<vmem>>, vector<1x8x32xbf16>
    %117 = vector.shape_cast %116 : vector<1x8x32xbf16> to vector<8x32xbf16>
    %cst_81 = arith.constant dense<0.000000e+00> : vector<16x32xf32>
    %118 = tpu.matmul %115, %117, %cst_81 {dimension_numbers = #tpu.dot_dimension_numbers<[1], [0], [0], [1], [0, 0, 1, 1], [], []>} : vector<16x8xbf16>, vector<8x32xbf16>, vector<16x32xf32> -> vector<16x32xf32>
    %119 = arith.addf %75, %118 : vector<16x32xf32>
    %c2_82 = arith.constant 2 : index
    %c0_83 = arith.constant 0 : index
    %c0_84 = arith.constant 0 : index
    %120 = vector.load %arg52[%c2_82, %c0_83, %c0_84] : memref<4x32x8xbf16, #tpu.memory_space<vmem>>, vector<1x32x8xbf16>
    %121 = vector.shape_cast %120 : vector<1x32x8xbf16> to vector<32x8xbf16>
    %cst_85 = arith.constant dense<0.000000e+00> : vector<16x8xf32>
    %122 = tpu.matmul %29, %121, %cst_85 {dimension_numbers = #tpu.dot_dimension_numbers<[1], [0], [0], [1], [0, 0, 1, 1], [], []>} : vector<16x32xbf16>, vector<32x8xbf16>, vector<16x8xf32> -> vector<16x8xf32>
    %c2_86 = arith.constant 2 : index
    %c0_87 = arith.constant 0 : index
    %c0_88 = arith.constant 0 : index
    %123 = vector.load %arg48[%c2_86, %c0_87, %c0_88] : memref<4x1x8xf32, #tpu.memory_space<vmem>>, vector<1x1x8xf32>
    %124 = vector.shape_cast %123 : vector<1x1x8xf32> to vector<1x8xf32>
    %125 = vector.broadcast %124 : vector<1x8xf32> to vector<16x8xf32>
    %126 = arith.addf %122, %125 : vector<16x8xf32>
    %c2_89 = arith.constant 2 : index
    %c0_90 = arith.constant 0 : index
    %c0_91 = arith.constant 0 : index
    %127 = vector.load %arg50[%c2_89, %c0_90, %c0_91] : memref<4x32x8xbf16, #tpu.memory_space<vmem>>, vector<1x32x8xbf16>
    %128 = vector.shape_cast %127 : vector<1x32x8xbf16> to vector<32x8xbf16>
    %cst_92 = arith.constant dense<0.000000e+00> : vector<16x8xf32>
    %129 = tpu.matmul %30, %128, %cst_92 {dimension_numbers = #tpu.dot_dimension_numbers<[1], [0], [0], [1], [0, 0, 1, 1], [], []>} : vector<16x32xbf16>, vector<32x8xbf16>, vector<16x8xf32> -> vector<16x8xf32>
    %c2_93 = arith.constant 2 : index
    %c0_94 = arith.constant 0 : index
    %c0_95 = arith.constant 0 : index
    %130 = vector.load %arg46[%c2_93, %c0_94, %c0_95] : memref<4x1x8xf32, #tpu.memory_space<vmem>>, vector<1x1x8xf32>
    %131 = vector.shape_cast %130 : vector<1x1x8xf32> to vector<1x8xf32>
    %132 = vector.broadcast %131 : vector<1x8xf32> to vector<16x8xf32>
    %133 = arith.addf %129, %132 : vector<16x8xf32>
    %c2_96 = arith.constant 2 : index
    %c0_97 = arith.constant 0 : index
    %c0_98 = arith.constant 0 : index
    %134 = vector.load %arg53[%c2_96, %c0_97, %c0_98] : memref<4x32x8xbf16, #tpu.memory_space<vmem>>, vector<1x32x8xbf16>
    %135 = vector.shape_cast %134 : vector<1x32x8xbf16> to vector<32x8xbf16>
    %cst_99 = arith.constant dense<0.000000e+00> : vector<16x8xf32>
    %136 = tpu.matmul %30, %135, %cst_99 {dimension_numbers = #tpu.dot_dimension_numbers<[1], [0], [0], [1], [0, 0, 1, 1], [], []>} : vector<16x32xbf16>, vector<32x8xbf16>, vector<16x8xf32> -> vector<16x8xf32>
    %c2_100 = arith.constant 2 : index
    %c0_101 = arith.constant 0 : index
    %c0_102 = arith.constant 0 : index
    %137 = vector.load %arg49[%c2_100, %c0_101, %c0_102] : memref<4x1x8xf32, #tpu.memory_space<vmem>>, vector<1x1x8xf32>
    %138 = vector.shape_cast %137 : vector<1x1x8xf32> to vector<1x8xf32>
    %139 = vector.broadcast %138 : vector<1x8xf32> to vector<16x8xf32>
    %140 = arith.addf %136, %139 : vector<16x8xf32>
    %cst_103 = arith.constant 0.353553385 : f32
    %141 = vector.broadcast %cst_103 : f32 to vector<16x8xf32>
    %142 = arith.mulf %126, %141 : vector<16x8xf32>
    %143 = arith.truncf %142 : vector<16x8xf32> to vector<16x8xbf16>
    %144 = arith.truncf %133 : vector<16x8xf32> to vector<16x8xbf16>
    %cst_104 = arith.constant dense<0.000000e+00> : vector<16x16xf32>
    %145 = tpu.matmul %143, %144, %cst_104 {dimension_numbers = #tpu.dot_dimension_numbers<[1], [1], [0], [0], [0, 0, 1, 0], [], []>} : vector<16x8xbf16>, vector<16x8xbf16>, vector<16x16xf32> -> vector<16x16xf32>
    %cst_105 = arith.constant dense<0xFF800000> : vector<16xf32>
    %146 = vector.multi_reduction <maximumf>, %145, %cst_105 [1] : vector<16x16xf32> to vector<16xf32>
    %147 = vector.shape_cast %146 : vector<16xf32> to vector<16x1xf32>
    %148 = vector.broadcast %147 : vector<16x1xf32> to vector<16x16xf32>
    %149 = arith.subf %145, %148 : vector<16x16xf32>
    %150 = math.exp %149 : vector<16x16xf32>
    %cst_106 = arith.constant dense<0.000000e+00> : vector<16xf32>
    %151 = vector.multi_reduction <add>, %150, %cst_106 [1] : vector<16x16xf32> to vector<16xf32>
    %152 = vector.shape_cast %151 : vector<16xf32> to vector<16x1xf32>
    %153 = tpu.reciprocal %152 {approx = true} : vector<16x1xf32> -> vector<16x1xf32>
    %154 = vector.broadcast %153 : vector<16x1xf32> to vector<16x16xf32>
    %155 = arith.mulf %150, %154 : vector<16x16xf32>
    %156 = arith.truncf %155 : vector<16x16xf32> to vector<16x16xbf16>
    %157 = arith.truncf %140 : vector<16x8xf32> to vector<16x8xbf16>
    %cst_107 = arith.constant dense<0.000000e+00> : vector<16x8xf32>
    %158 = tpu.matmul %156, %157, %cst_107 {dimension_numbers = #tpu.dot_dimension_numbers<[1], [0], [0], [1], [0, 0, 1, 1], [], []>} : vector<16x16xbf16>, vector<16x8xbf16>, vector<16x8xf32> -> vector<16x8xf32>
    %159 = arith.truncf %158 : vector<16x8xf32> to vector<16x8xbf16>
    %c2_108 = arith.constant 2 : index
    %c0_109 = arith.constant 0 : index
    %c0_110 = arith.constant 0 : index
    %160 = vector.load %arg51[%c2_108, %c0_109, %c0_110] : memref<4x8x32xbf16, #tpu.memory_space<vmem>>, vector<1x8x32xbf16>
    %161 = vector.shape_cast %160 : vector<1x8x32xbf16> to vector<8x32xbf16>
    %cst_111 = arith.constant dense<0.000000e+00> : vector<16x32xf32>
    %162 = tpu.matmul %159, %161, %cst_111 {dimension_numbers = #tpu.dot_dimension_numbers<[1], [0], [0], [1], [0, 0, 1, 1], [], []>} : vector<16x8xbf16>, vector<8x32xbf16>, vector<16x32xf32> -> vector<16x32xf32>
    %163 = arith.addf %119, %162 : vector<16x32xf32>
    %c3 = arith.constant 3 : index
    %c0_112 = arith.constant 0 : index
    %c0_113 = arith.constant 0 : index
    %164 = vector.load %arg52[%c3, %c0_112, %c0_113] : memref<4x32x8xbf16, #tpu.memory_space<vmem>>, vector<1x32x8xbf16>
    %165 = vector.shape_cast %164 : vector<1x32x8xbf16> to vector<32x8xbf16>
    %cst_114 = arith.constant dense<0.000000e+00> : vector<16x8xf32>
    %166 = tpu.matmul %29, %165, %cst_114 {dimension_numbers = #tpu.dot_dimension_numbers<[1], [0], [0], [1], [0, 0, 1, 1], [], []>} : vector<16x32xbf16>, vector<32x8xbf16>, vector<16x8xf32> -> vector<16x8xf32>
    %c3_115 = arith.constant 3 : index
    %c0_116 = arith.constant 0 : index
    %c0_117 = arith.constant 0 : index
    %167 = vector.load %arg48[%c3_115, %c0_116, %c0_117] : memref<4x1x8xf32, #tpu.memory_space<vmem>>, vector<1x1x8xf32>
    %168 = vector.shape_cast %167 : vector<1x1x8xf32> to vector<1x8xf32>
    %169 = vector.broadcast %168 : vector<1x8xf32> to vector<16x8xf32>
    %170 = arith.addf %166, %169 : vector<16x8xf32>
    %c3_118 = arith.constant 3 : index
    %c0_119 = arith.constant 0 : index
    %c0_120 = arith.constant 0 : index
    %171 = vector.load %arg50[%c3_118, %c0_119, %c0_120] : memref<4x32x8xbf16, #tpu.memory_space<vmem>>, vector<1x32x8xbf16>
    %172 = vector.shape_cast %171 : vector<1x32x8xbf16> to vector<32x8xbf16>
    %cst_121 = arith.constant dense<0.000000e+00> : vector<16x8xf32>
    %173 = tpu.matmul %30, %172, %cst_121 {dimension_numbers = #tpu.dot_dimension_numbers<[1], [0], [0], [1], [0, 0, 1, 1], [], []>} : vector<16x32xbf16>, vector<32x8xbf16>, vector<16x8xf32> -> vector<16x8xf32>
    %c3_122 = arith.constant 3 : index
    %c0_123 = arith.constant 0 : index
    %c0_124 = arith.constant 0 : index
    %174 = vector.load %arg46[%c3_122, %c0_123, %c0_124] : memref<4x1x8xf32, #tpu.memory_space<vmem>>, vector<1x1x8xf32>
    %175 = vector.shape_cast %174 : vector<1x1x8xf32> to vector<1x8xf32>
    %176 = vector.broadcast %175 : vector<1x8xf32> to vector<16x8xf32>
    %177 = arith.addf %173, %176 : vector<16x8xf32>
    %c3_125 = arith.constant 3 : index
    %c0_126 = arith.constant 0 : index
    %c0_127 = arith.constant 0 : index
    %178 = vector.load %arg53[%c3_125, %c0_126, %c0_127] : memref<4x32x8xbf16, #tpu.memory_space<vmem>>, vector<1x32x8xbf16>
    %179 = vector.shape_cast %178 : vector<1x32x8xbf16> to vector<32x8xbf16>
    %cst_128 = arith.constant dense<0.000000e+00> : vector<16x8xf32>
    %180 = tpu.matmul %30, %179, %cst_128 {dimension_numbers = #tpu.dot_dimension_numbers<[1], [0], [0], [1], [0, 0, 1, 1], [], []>} : vector<16x32xbf16>, vector<32x8xbf16>, vector<16x8xf32> -> vector<16x8xf32>
    %c3_129 = arith.constant 3 : index
    %c0_130 = arith.constant 0 : index
    %c0_131 = arith.constant 0 : index
    %181 = vector.load %arg49[%c3_129, %c0_130, %c0_131] : memref<4x1x8xf32, #tpu.memory_space<vmem>>, vector<1x1x8xf32>
    %182 = vector.shape_cast %181 : vector<1x1x8xf32> to vector<1x8xf32>
    %183 = vector.broadcast %182 : vector<1x8xf32> to vector<16x8xf32>
    %184 = arith.addf %180, %183 : vector<16x8xf32>
    %cst_132 = arith.constant 0.353553385 : f32
    %185 = vector.broadcast %cst_132 : f32 to vector<16x8xf32>
    %186 = arith.mulf %170, %185 : vector<16x8xf32>
    %187 = arith.truncf %186 : vector<16x8xf32> to vector<16x8xbf16>
    %188 = arith.truncf %177 : vector<16x8xf32> to vector<16x8xbf16>
    %cst_133 = arith.constant dense<0.000000e+00> : vector<16x16xf32>
    %189 = tpu.matmul %187, %188, %cst_133 {dimension_numbers = #tpu.dot_dimension_numbers<[1], [1], [0], [0], [0, 0, 1, 0], [], []>} : vector<16x8xbf16>, vector<16x8xbf16>, vector<16x16xf32> -> vector<16x16xf32>
    %cst_134 = arith.constant dense<0xFF800000> : vector<16xf32>
    %190 = vector.multi_reduction <maximumf>, %189, %cst_134 [1] : vector<16x16xf32> to vector<16xf32>
    %191 = vector.shape_cast %190 : vector<16xf32> to vector<16x1xf32>
    %192 = vector.broadcast %191 : vector<16x1xf32> to vector<16x16xf32>
    %193 = arith.subf %189, %192 : vector<16x16xf32>
    %194 = math.exp %193 : vector<16x16xf32>
    %cst_135 = arith.constant dense<0.000000e+00> : vector<16xf32>
    %195 = vector.multi_reduction <add>, %194, %cst_135 [1] : vector<16x16xf32> to vector<16xf32>
    %196 = vector.shape_cast %195 : vector<16xf32> to vector<16x1xf32>
    %197 = tpu.reciprocal %196 {approx = true} : vector<16x1xf32> -> vector<16x1xf32>
    %198 = vector.broadcast %197 : vector<16x1xf32> to vector<16x16xf32>
    %199 = arith.mulf %194, %198 : vector<16x16xf32>
    %200 = arith.truncf %199 : vector<16x16xf32> to vector<16x16xbf16>
    %201 = arith.truncf %184 : vector<16x8xf32> to vector<16x8xbf16>
    %cst_136 = arith.constant dense<0.000000e+00> : vector<16x8xf32>
    %202 = tpu.matmul %200, %201, %cst_136 {dimension_numbers = #tpu.dot_dimension_numbers<[1], [0], [0], [1], [0, 0, 1, 1], [], []>} : vector<16x16xbf16>, vector<16x8xbf16>, vector<16x8xf32> -> vector<16x8xf32>
    %203 = arith.truncf %202 : vector<16x8xf32> to vector<16x8xbf16>
    %c3_137 = arith.constant 3 : index
    %c0_138 = arith.constant 0 : index
    %c0_139 = arith.constant 0 : index
    %204 = vector.load %arg51[%c3_137, %c0_138, %c0_139] : memref<4x8x32xbf16, #tpu.memory_space<vmem>>, vector<1x8x32xbf16>
    %205 = vector.shape_cast %204 : vector<1x8x32xbf16> to vector<8x32xbf16>
    %cst_140 = arith.constant dense<0.000000e+00> : vector<16x32xf32>
    %206 = tpu.matmul %203, %205, %cst_140 {dimension_numbers = #tpu.dot_dimension_numbers<[1], [0], [0], [1], [0, 0, 1, 1], [], []>} : vector<16x8xbf16>, vector<8x32xbf16>, vector<16x32xf32> -> vector<16x32xf32>
    %207 = arith.addf %163, %206 : vector<16x32xf32>
    %c0_141 = arith.constant 0 : index
    %c0_142 = arith.constant 0 : index
    %208 = vector.load %arg47[%c0_141, %c0_142] : memref<1x32xf32, #tpu.memory_space<vmem>>, vector<1x32xf32>
    %209 = vector.broadcast %208 : vector<1x32xf32> to vector<16x32xf32>
    %210 = arith.addf %207, %209 : vector<16x32xf32>
    %211 = arith.addf %28, %210 : vector<16x32xf32>
    %cst_143 = arith.constant dense<0.000000e+00> : vector<16xf32>
    %212 = vector.multi_reduction <add>, %211, %cst_143 [1] : vector<16x32xf32> to vector<16xf32>
    %213 = vector.shape_cast %212 : vector<16xf32> to vector<16x1xf32>
    %cst_144 = arith.constant 3.200000e+01 : f32
    %214 = vector.broadcast %cst_144 : f32 to vector<16x1xf32>
    %215 = arith.divf %213, %214 : vector<16x1xf32>
    %216 = vector.broadcast %215 : vector<16x1xf32> to vector<16x32xf32>
    %217 = arith.subf %211, %216 : vector<16x32xf32>
    %218 = arith.mulf %217, %217 : vector<16x32xf32>
    %cst_145 = arith.constant dense<0.000000e+00> : vector<16xf32>
    %219 = vector.multi_reduction <add>, %218, %cst_145 [1] : vector<16x32xf32> to vector<16xf32>
    %220 = vector.shape_cast %219 : vector<16xf32> to vector<16x1xf32>
    %cst_146 = arith.constant 3.200000e+01 : f32
    %221 = vector.broadcast %cst_146 : f32 to vector<16x1xf32>
    %222 = arith.divf %220, %221 : vector<16x1xf32>
    %cst_147 = arith.constant 9.99999974E-6 : f32
    %223 = vector.broadcast %cst_147 : f32 to vector<16x1xf32>
    %224 = arith.addf %222, %223 : vector<16x1xf32>
    %225 = math.rsqrt %224 : vector<16x1xf32>
    %226 = vector.broadcast %225 : vector<16x1xf32> to vector<16x32xf32>
    %227 = arith.mulf %217, %226 : vector<16x32xf32>
    %c0_148 = arith.constant 0 : index
    %c0_149 = arith.constant 0 : index
    %228 = vector.load %arg59[%c0_148, %c0_149] : memref<1x32xf32, #tpu.memory_space<vmem>>, vector<1x32xf32>
    %229 = vector.broadcast %228 : vector<1x32xf32> to vector<16x32xf32>
    %230 = arith.mulf %227, %229 : vector<16x32xf32>
    %c0_150 = arith.constant 0 : index
    %c0_151 = arith.constant 0 : index
    %231 = vector.load %arg58[%c0_150, %c0_151] : memref<1x32xf32, #tpu.memory_space<vmem>>, vector<1x32xf32>
    %232 = vector.broadcast %231 : vector<1x32xf32> to vector<16x32xf32>
    %233 = arith.addf %230, %232 : vector<16x32xf32>
    %234 = arith.truncf %233 : vector<16x32xf32> to vector<16x32xbf16>
    %c0_152 = arith.constant 0 : index
    %c0_153 = arith.constant 0 : index
    %235 = vector.load %arg55[%c0_152, %c0_153] : memref<32x64xbf16, #tpu.memory_space<vmem>>, vector<32x64xbf16>
    %cst_154 = arith.constant dense<0.000000e+00> : vector<16x64xf32>
    %236 = tpu.matmul %234, %235, %cst_154 {dimension_numbers = #tpu.dot_dimension_numbers<[1], [0], [0], [1], [0, 0, 1, 1], [], []>} : vector<16x32xbf16>, vector<32x64xbf16>, vector<16x64xf32> -> vector<16x64xf32>
    %c0_155 = arith.constant 0 : index
    %c0_156 = arith.constant 0 : index
    %237 = vector.load %arg54[%c0_155, %c0_156] : memref<1x64xf32, #tpu.memory_space<vmem>>, vector<1x64xf32>
    %238 = vector.broadcast %237 : vector<1x64xf32> to vector<16x64xf32>
    %239 = arith.addf %236, %238 : vector<16x64xf32>
    %cst_157 = arith.constant 5.000000e-01 : f32
    %240 = vector.broadcast %cst_157 : f32 to vector<16x64xf32>
    %241 = arith.mulf %240, %239 : vector<16x64xf32>
    %cst_158 = arith.constant 4.471500e-02 : f32
    %242 = vector.broadcast %cst_158 : f32 to vector<16x64xf32>
    %243 = arith.mulf %242, %239 : vector<16x64xf32>
    %244 = arith.mulf %243, %239 : vector<16x64xf32>
    %245 = arith.mulf %244, %239 : vector<16x64xf32>
    %246 = arith.addf %239, %245 : vector<16x64xf32>
    %cst_159 = arith.constant 0.797884583 : f32
    %247 = vector.broadcast %cst_159 : f32 to vector<16x64xf32>
    %248 = arith.mulf %247, %246 : vector<16x64xf32>
    %249 = math.tanh %248 : vector<16x64xf32>
    %cst_160 = arith.constant 1.000000e+00 : f32
    %250 = vector.broadcast %cst_160 : f32 to vector<16x64xf32>
    %251 = arith.addf %250, %249 : vector<16x64xf32>
    %252 = arith.mulf %241, %251 : vector<16x64xf32>
    %253 = arith.truncf %252 : vector<16x64xf32> to vector<16x64xbf16>
    %c0_161 = arith.constant 0 : index
    %c0_162 = arith.constant 0 : index
    %254 = vector.load %arg57[%c0_161, %c0_162] : memref<64x32xbf16, #tpu.memory_space<vmem>>, vector<64x32xbf16>
    %cst_163 = arith.constant dense<0.000000e+00> : vector<16x32xf32>
    %255 = tpu.matmul %253, %254, %cst_163 {dimension_numbers = #tpu.dot_dimension_numbers<[1], [0], [0], [1], [0, 0, 1, 1], [], []>} : vector<16x64xbf16>, vector<64x32xbf16>, vector<16x32xf32> -> vector<16x32xf32>
    %256 = arith.addf %233, %255 : vector<16x32xf32>
    %c0_164 = arith.constant 0 : index
    %c0_165 = arith.constant 0 : index
    %257 = vector.load %arg56[%c0_164, %c0_165] : memref<1x32xf32, #tpu.memory_space<vmem>>, vector<1x32xf32>
    %258 = vector.broadcast %257 : vector<1x32xf32> to vector<16x32xf32>
    %259 = arith.addf %256, %258 : vector<16x32xf32>
    %cst_166 = arith.constant dense<0.000000e+00> : vector<16xf32>
    %260 = vector.multi_reduction <add>, %259, %cst_166 [1] : vector<16x32xf32> to vector<16xf32>
    %261 = vector.shape_cast %260 : vector<16xf32> to vector<16x1xf32>
    %cst_167 = arith.constant 3.200000e+01 : f32
    %262 = vector.broadcast %cst_167 : f32 to vector<16x1xf32>
    %263 = arith.divf %261, %262 : vector<16x1xf32>
    %264 = vector.broadcast %263 : vector<16x1xf32> to vector<16x32xf32>
    %265 = arith.subf %259, %264 : vector<16x32xf32>
    %266 = arith.mulf %265, %265 : vector<16x32xf32>
    %cst_168 = arith.constant dense<0.000000e+00> : vector<16xf32>
    %267 = vector.multi_reduction <add>, %266, %cst_168 [1] : vector<16x32xf32> to vector<16xf32>
    %268 = vector.shape_cast %267 : vector<16xf32> to vector<16x1xf32>
    %cst_169 = arith.constant 3.200000e+01 : f32
    %269 = vector.broadcast %cst_169 : f32 to vector<16x1xf32>
    %270 = arith.divf %268, %269 : vector<16x1xf32>
    %cst_170 = arith.constant 9.99999974E-6 : f32
    %271 = vector.broadcast %cst_170 : f32 to vector<16x1xf32>
    %272 = arith.addf %270, %271 : vector<16x1xf32>
    %273 = math.rsqrt %272 : vector<16x1xf32>
    %274 = vector.broadcast %273 : vector<16x1xf32> to vector<16x32xf32>
    %275 = arith.mulf %265, %274 : vector<16x32xf32>
    %c0_171 = arith.constant 0 : index
    %c0_172 = arith.constant 0 : index
    %276 = vector.load %arg61[%c0_171, %c0_172] : memref<1x32xf32, #tpu.memory_space<vmem>>, vector<1x32xf32>
    %277 = vector.broadcast %276 : vector<1x32xf32> to vector<16x32xf32>
    %278 = arith.mulf %275, %277 : vector<16x32xf32>
    %c0_173 = arith.constant 0 : index
    %c0_174 = arith.constant 0 : index
    %279 = vector.load %arg60[%c0_173, %c0_174] : memref<1x32xf32, #tpu.memory_space<vmem>>, vector<1x32xf32>
    %280 = vector.broadcast %279 : vector<1x32xf32> to vector<16x32xf32>
    %281 = arith.addf %278, %280 : vector<16x32xf32>
    %c1_i32_175 = arith.constant 1 : i32
    %282 = tpu.dynamic_rotate %281 by %c1_i32_175 dim 0 : vector<16x32xf32>, i32 -> vector<16x32xf32>
    %283 = arith.truncf %282 : vector<16x32xf32> to vector<16x32xbf16>
    %c15_i32_176 = arith.constant 15 : i32
    %284 = tpu.dynamic_rotate %281 by %c15_i32_176 dim 0 : vector<16x32xf32>, i32 -> vector<16x32xf32>
    %285 = arith.truncf %284 : vector<16x32xf32> to vector<16x32xbf16>
    %286 = arith.truncf %281 : vector<16x32xf32> to vector<16x32xbf16>
    %c0_177 = arith.constant 0 : index
    %c0_178 = arith.constant 0 : index
    %c0_179 = arith.constant 0 : index
    %287 = vector.load %arg41[%c0_177, %c0_178, %c0_179] : memref<3x32x32xbf16, #tpu.memory_space<vmem>>, vector<1x32x32xbf16>
    %288 = vector.shape_cast %287 : vector<1x32x32xbf16> to vector<32x32xbf16>
    %cst_180 = arith.constant dense<0.000000e+00> : vector<16x32xf32>
    %289 = tpu.matmul %283, %288, %cst_180 {dimension_numbers = #tpu.dot_dimension_numbers<[1], [0], [0], [1], [0, 0, 1, 1], [], []>} : vector<16x32xbf16>, vector<32x32xbf16>, vector<16x32xf32> -> vector<16x32xf32>
    %c1_181 = arith.constant 1 : index
    %c0_182 = arith.constant 0 : index
    %c0_183 = arith.constant 0 : index
    %290 = vector.load %arg41[%c1_181, %c0_182, %c0_183] : memref<3x32x32xbf16, #tpu.memory_space<vmem>>, vector<1x32x32xbf16>
    %291 = vector.shape_cast %290 : vector<1x32x32xbf16> to vector<32x32xbf16>
    %cst_184 = arith.constant dense<0.000000e+00> : vector<16x32xf32>
    %292 = tpu.matmul %286, %291, %cst_184 {dimension_numbers = #tpu.dot_dimension_numbers<[1], [0], [0], [1], [0, 0, 1, 1], [], []>} : vector<16x32xbf16>, vector<32x32xbf16>, vector<16x32xf32> -> vector<16x32xf32>
    %293 = arith.addf %289, %292 : vector<16x32xf32>
    %c2_185 = arith.constant 2 : index
    %c0_186 = arith.constant 0 : index
    %c0_187 = arith.constant 0 : index
    %294 = vector.load %arg41[%c2_185, %c0_186, %c0_187] : memref<3x32x32xbf16, #tpu.memory_space<vmem>>, vector<1x32x32xbf16>
    %295 = vector.shape_cast %294 : vector<1x32x32xbf16> to vector<32x32xbf16>
    %cst_188 = arith.constant dense<0.000000e+00> : vector<16x32xf32>
    %296 = tpu.matmul %285, %295, %cst_188 {dimension_numbers = #tpu.dot_dimension_numbers<[1], [0], [0], [1], [0, 0, 1, 1], [], []>} : vector<16x32xbf16>, vector<32x32xbf16>, vector<16x32xf32> -> vector<16x32xf32>
    %297 = arith.addf %293, %296 : vector<16x32xf32>
    %c0_189 = arith.constant 0 : index
    %c0_190 = arith.constant 0 : index
    %298 = vector.load %arg38[%c0_189, %c0_190] : memref<1x32xf32, #tpu.memory_space<vmem>>, vector<1x32xf32>
    %299 = vector.broadcast %298 : vector<1x32xf32> to vector<16x32xf32>
    %300 = arith.mulf %297, %299 : vector<16x32xf32>
    %c0_191 = arith.constant 0 : index
    %c0_192 = arith.constant 0 : index
    %301 = vector.load %arg40[%c0_191, %c0_192] : memref<1x32xf32, #tpu.memory_space<vmem>>, vector<1x32xf32>
    %302 = vector.broadcast %301 : vector<1x32xf32> to vector<16x32xf32>
    %303 = arith.addf %300, %302 : vector<16x32xf32>
    %cst_193 = arith.constant 0.000000e+00 : f32
    %304 = vector.broadcast %cst_193 : f32 to vector<16x32xf32>
    %305 = arith.cmpf ogt, %303, %304 : vector<16x32xf32>
    %cst_194 = arith.constant 0.000000e+00 : f32
    %306 = vector.broadcast %cst_194 : f32 to vector<16x32xf32>
    %307 = arith.minimumf %303, %306 : vector<16x32xf32>
    %308 = math.exp %307 : vector<16x32xf32>
    %cst_195 = arith.constant 1.000000e+00 : f32
    %309 = vector.broadcast %cst_195 : f32 to vector<16x32xf32>
    %310 = arith.subf %308, %309 : vector<16x32xf32>
    %311 = arith.select %305, %303, %310 : vector<16x32xi1>, vector<16x32xf32>
    %c0_196 = arith.constant 0 : index
    %c0_197 = arith.constant 0 : index
    %312 = vector.load %arg39[%c0_196, %c0_197] : memref<8x15xf32, #tpu.memory_space<vmem>>, vector<8x15xf32>
    %cst_198 = arith.constant -1.000000e+30 : f32
    %313 = vector.broadcast %cst_198 : f32 to vector<1x32xf32>
    %314 = tpu.concatenate %313, %311 in 0 : vector<1x32xf32>, vector<16x32xf32> -> vector<17x32xf32>
    %315 = vector.extract_strided_slice %314 {offsets = [0, 0], sizes = [15, 32], strides = [1, 1]} : vector<17x32xf32> to vector<15x32xf32>
    %316 = vector.extract_strided_slice %314 {offsets = [1, 0], sizes = [15, 32], strides = [1, 1]} : vector<17x32xf32> to vector<15x32xf32>
    %317 = arith.maximumf %315, %316 : vector<15x32xf32>
    %318 = vector.extract_strided_slice %314 {offsets = [2, 0], sizes = [15, 32], strides = [1, 1]} : vector<17x32xf32> to vector<15x32xf32>
    %319 = arith.maximumf %317, %318 : vector<15x32xf32>
    %cst_199 = arith.constant dense<0.000000e+00> : vector<8x32xf32>
    %320 = tpu.matmul %312, %319, %cst_199 {dimension_numbers = #tpu.dot_dimension_numbers<[1], [0], [0], [1], [0, 0, 1, 1], [], []>} : vector<8x15xf32>, vector<15x32xf32>, vector<8x32xf32> -> vector<8x32xf32>
    %321 = arith.truncf %320 : vector<8x32xf32> to vector<8x32xbf16>
    %322 = arith.truncf %320 : vector<8x32xf32> to vector<8x32xbf16>
    %cst_200 = arith.constant 0.000000e+00 : f32
    %323 = vector.broadcast %cst_200 : f32 to vector<8x32xf32>
    %c0_201 = arith.constant 0 : index
    %c0_202 = arith.constant 0 : index
    %c0_203 = arith.constant 0 : index
    %324 = vector.load %arg68[%c0_201, %c0_202, %c0_203] : memref<4x32x8xbf16, #tpu.memory_space<vmem>>, vector<1x32x8xbf16>
    %325 = vector.shape_cast %324 : vector<1x32x8xbf16> to vector<32x8xbf16>
    %cst_204 = arith.constant dense<0.000000e+00> : vector<8x8xf32>
    %326 = tpu.matmul %321, %325, %cst_204 {dimension_numbers = #tpu.dot_dimension_numbers<[1], [0], [0], [1], [0, 0, 1, 1], [], []>} : vector<8x32xbf16>, vector<32x8xbf16>, vector<8x8xf32> -> vector<8x8xf32>
    %c0_205 = arith.constant 0 : index
    %c0_206 = arith.constant 0 : index
    %c0_207 = arith.constant 0 : index
    %327 = vector.load %arg64[%c0_205, %c0_206, %c0_207] : memref<4x1x8xf32, #tpu.memory_space<vmem>>, vector<1x1x8xf32>
    %328 = vector.shape_cast %327 : vector<1x1x8xf32> to vector<1x8xf32>
    %329 = vector.broadcast %328 : vector<1x8xf32> to vector<8x8xf32>
    %330 = arith.addf %326, %329 : vector<8x8xf32>
    %c0_208 = arith.constant 0 : index
    %c0_209 = arith.constant 0 : index
    %c0_210 = arith.constant 0 : index
    %331 = vector.load %arg66[%c0_208, %c0_209, %c0_210] : memref<4x32x8xbf16, #tpu.memory_space<vmem>>, vector<1x32x8xbf16>
    %332 = vector.shape_cast %331 : vector<1x32x8xbf16> to vector<32x8xbf16>
    %cst_211 = arith.constant dense<0.000000e+00> : vector<8x8xf32>
    %333 = tpu.matmul %322, %332, %cst_211 {dimension_numbers = #tpu.dot_dimension_numbers<[1], [0], [0], [1], [0, 0, 1, 1], [], []>} : vector<8x32xbf16>, vector<32x8xbf16>, vector<8x8xf32> -> vector<8x8xf32>
    %c0_212 = arith.constant 0 : index
    %c0_213 = arith.constant 0 : index
    %c0_214 = arith.constant 0 : index
    %334 = vector.load %arg62[%c0_212, %c0_213, %c0_214] : memref<4x1x8xf32, #tpu.memory_space<vmem>>, vector<1x1x8xf32>
    %335 = vector.shape_cast %334 : vector<1x1x8xf32> to vector<1x8xf32>
    %336 = vector.broadcast %335 : vector<1x8xf32> to vector<8x8xf32>
    %337 = arith.addf %333, %336 : vector<8x8xf32>
    %c0_215 = arith.constant 0 : index
    %c0_216 = arith.constant 0 : index
    %c0_217 = arith.constant 0 : index
    %338 = vector.load %arg69[%c0_215, %c0_216, %c0_217] : memref<4x32x8xbf16, #tpu.memory_space<vmem>>, vector<1x32x8xbf16>
    %339 = vector.shape_cast %338 : vector<1x32x8xbf16> to vector<32x8xbf16>
    %cst_218 = arith.constant dense<0.000000e+00> : vector<8x8xf32>
    %340 = tpu.matmul %322, %339, %cst_218 {dimension_numbers = #tpu.dot_dimension_numbers<[1], [0], [0], [1], [0, 0, 1, 1], [], []>} : vector<8x32xbf16>, vector<32x8xbf16>, vector<8x8xf32> -> vector<8x8xf32>
    %c0_219 = arith.constant 0 : index
    %c0_220 = arith.constant 0 : index
    %c0_221 = arith.constant 0 : index
    %341 = vector.load %arg65[%c0_219, %c0_220, %c0_221] : memref<4x1x8xf32, #tpu.memory_space<vmem>>, vector<1x1x8xf32>
    %342 = vector.shape_cast %341 : vector<1x1x8xf32> to vector<1x8xf32>
    %343 = vector.broadcast %342 : vector<1x8xf32> to vector<8x8xf32>
    %344 = arith.addf %340, %343 : vector<8x8xf32>
    %cst_222 = arith.constant 0.353553385 : f32
    %345 = vector.broadcast %cst_222 : f32 to vector<8x8xf32>
    %346 = arith.mulf %330, %345 : vector<8x8xf32>
    %347 = arith.truncf %346 : vector<8x8xf32> to vector<8x8xbf16>
    %348 = arith.truncf %337 : vector<8x8xf32> to vector<8x8xbf16>
    %cst_223 = arith.constant dense<0.000000e+00> : vector<8x8xf32>
    %349 = tpu.matmul %347, %348, %cst_223 {dimension_numbers = #tpu.dot_dimension_numbers<[1], [1], [0], [0], [0, 0, 1, 0], [], []>} : vector<8x8xbf16>, vector<8x8xbf16>, vector<8x8xf32> -> vector<8x8xf32>
    %cst_224 = arith.constant dense<0xFF800000> : vector<8xf32>
    %350 = vector.multi_reduction <maximumf>, %349, %cst_224 [1] : vector<8x8xf32> to vector<8xf32>
    %351 = vector.shape_cast %350 : vector<8xf32> to vector<8x1xf32>
    %352 = vector.broadcast %351 : vector<8x1xf32> to vector<8x8xf32>
    %353 = arith.subf %349, %352 : vector<8x8xf32>
    %354 = math.exp %353 : vector<8x8xf32>
    %cst_225 = arith.constant dense<0.000000e+00> : vector<8xf32>
    %355 = vector.multi_reduction <add>, %354, %cst_225 [1] : vector<8x8xf32> to vector<8xf32>
    %356 = vector.shape_cast %355 : vector<8xf32> to vector<8x1xf32>
    %357 = tpu.reciprocal %356 {approx = true} : vector<8x1xf32> -> vector<8x1xf32>
    %358 = vector.broadcast %357 : vector<8x1xf32> to vector<8x8xf32>
    %359 = arith.mulf %354, %358 : vector<8x8xf32>
    %360 = arith.truncf %359 : vector<8x8xf32> to vector<8x8xbf16>
    %361 = arith.truncf %344 : vector<8x8xf32> to vector<8x8xbf16>
    %cst_226 = arith.constant dense<0.000000e+00> : vector<8x8xf32>
    %362 = tpu.matmul %360, %361, %cst_226 {dimension_numbers = #tpu.dot_dimension_numbers<[1], [0], [0], [1], [0, 0, 1, 1], [], []>} : vector<8x8xbf16>, vector<8x8xbf16>, vector<8x8xf32> -> vector<8x8xf32>
    %363 = arith.truncf %362 : vector<8x8xf32> to vector<8x8xbf16>
    %c0_227 = arith.constant 0 : index
    %c0_228 = arith.constant 0 : index
    %c0_229 = arith.constant 0 : index
    %364 = vector.load %arg67[%c0_227, %c0_228, %c0_229] : memref<4x8x32xbf16, #tpu.memory_space<vmem>>, vector<1x8x32xbf16>
    %365 = vector.shape_cast %364 : vector<1x8x32xbf16> to vector<8x32xbf16>
    %cst_230 = arith.constant dense<0.000000e+00> : vector<8x32xf32>
    %366 = tpu.matmul %363, %365, %cst_230 {dimension_numbers = #tpu.dot_dimension_numbers<[1], [0], [0], [1], [0, 0, 1, 1], [], []>} : vector<8x8xbf16>, vector<8x32xbf16>, vector<8x32xf32> -> vector<8x32xf32>
    %367 = arith.addf %323, %366 : vector<8x32xf32>
    %c1_231 = arith.constant 1 : index
    %c0_232 = arith.constant 0 : index
    %c0_233 = arith.constant 0 : index
    %368 = vector.load %arg68[%c1_231, %c0_232, %c0_233] : memref<4x32x8xbf16, #tpu.memory_space<vmem>>, vector<1x32x8xbf16>
    %369 = vector.shape_cast %368 : vector<1x32x8xbf16> to vector<32x8xbf16>
    %cst_234 = arith.constant dense<0.000000e+00> : vector<8x8xf32>
    %370 = tpu.matmul %321, %369, %cst_234 {dimension_numbers = #tpu.dot_dimension_numbers<[1], [0], [0], [1], [0, 0, 1, 1], [], []>} : vector<8x32xbf16>, vector<32x8xbf16>, vector<8x8xf32> -> vector<8x8xf32>
    %c1_235 = arith.constant 1 : index
    %c0_236 = arith.constant 0 : index
    %c0_237 = arith.constant 0 : index
    %371 = vector.load %arg64[%c1_235, %c0_236, %c0_237] : memref<4x1x8xf32, #tpu.memory_space<vmem>>, vector<1x1x8xf32>
    %372 = vector.shape_cast %371 : vector<1x1x8xf32> to vector<1x8xf32>
    %373 = vector.broadcast %372 : vector<1x8xf32> to vector<8x8xf32>
    %374 = arith.addf %370, %373 : vector<8x8xf32>
    %c1_238 = arith.constant 1 : index
    %c0_239 = arith.constant 0 : index
    %c0_240 = arith.constant 0 : index
    %375 = vector.load %arg66[%c1_238, %c0_239, %c0_240] : memref<4x32x8xbf16, #tpu.memory_space<vmem>>, vector<1x32x8xbf16>
    %376 = vector.shape_cast %375 : vector<1x32x8xbf16> to vector<32x8xbf16>
    %cst_241 = arith.constant dense<0.000000e+00> : vector<8x8xf32>
    %377 = tpu.matmul %322, %376, %cst_241 {dimension_numbers = #tpu.dot_dimension_numbers<[1], [0], [0], [1], [0, 0, 1, 1], [], []>} : vector<8x32xbf16>, vector<32x8xbf16>, vector<8x8xf32> -> vector<8x8xf32>
    %c1_242 = arith.constant 1 : index
    %c0_243 = arith.constant 0 : index
    %c0_244 = arith.constant 0 : index
    %378 = vector.load %arg62[%c1_242, %c0_243, %c0_244] : memref<4x1x8xf32, #tpu.memory_space<vmem>>, vector<1x1x8xf32>
    %379 = vector.shape_cast %378 : vector<1x1x8xf32> to vector<1x8xf32>
    %380 = vector.broadcast %379 : vector<1x8xf32> to vector<8x8xf32>
    %381 = arith.addf %377, %380 : vector<8x8xf32>
    %c1_245 = arith.constant 1 : index
    %c0_246 = arith.constant 0 : index
    %c0_247 = arith.constant 0 : index
    %382 = vector.load %arg69[%c1_245, %c0_246, %c0_247] : memref<4x32x8xbf16, #tpu.memory_space<vmem>>, vector<1x32x8xbf16>
    %383 = vector.shape_cast %382 : vector<1x32x8xbf16> to vector<32x8xbf16>
    %cst_248 = arith.constant dense<0.000000e+00> : vector<8x8xf32>
    %384 = tpu.matmul %322, %383, %cst_248 {dimension_numbers = #tpu.dot_dimension_numbers<[1], [0], [0], [1], [0, 0, 1, 1], [], []>} : vector<8x32xbf16>, vector<32x8xbf16>, vector<8x8xf32> -> vector<8x8xf32>
    %c1_249 = arith.constant 1 : index
    %c0_250 = arith.constant 0 : index
    %c0_251 = arith.constant 0 : index
    %385 = vector.load %arg65[%c1_249, %c0_250, %c0_251] : memref<4x1x8xf32, #tpu.memory_space<vmem>>, vector<1x1x8xf32>
    %386 = vector.shape_cast %385 : vector<1x1x8xf32> to vector<1x8xf32>
    %387 = vector.broadcast %386 : vector<1x8xf32> to vector<8x8xf32>
    %388 = arith.addf %384, %387 : vector<8x8xf32>
    %cst_252 = arith.constant 0.353553385 : f32
    %389 = vector.broadcast %cst_252 : f32 to vector<8x8xf32>
    %390 = arith.mulf %374, %389 : vector<8x8xf32>
    %391 = arith.truncf %390 : vector<8x8xf32> to vector<8x8xbf16>
    %392 = arith.truncf %381 : vector<8x8xf32> to vector<8x8xbf16>
    %cst_253 = arith.constant dense<0.000000e+00> : vector<8x8xf32>
    %393 = tpu.matmul %391, %392, %cst_253 {dimension_numbers = #tpu.dot_dimension_numbers<[1], [1], [0], [0], [0, 0, 1, 0], [], []>} : vector<8x8xbf16>, vector<8x8xbf16>, vector<8x8xf32> -> vector<8x8xf32>
    %cst_254 = arith.constant dense<0xFF800000> : vector<8xf32>
    %394 = vector.multi_reduction <maximumf>, %393, %cst_254 [1] : vector<8x8xf32> to vector<8xf32>
    %395 = vector.shape_cast %394 : vector<8xf32> to vector<8x1xf32>
    %396 = vector.broadcast %395 : vector<8x1xf32> to vector<8x8xf32>
    %397 = arith.subf %393, %396 : vector<8x8xf32>
    %398 = math.exp %397 : vector<8x8xf32>
    %cst_255 = arith.constant dense<0.000000e+00> : vector<8xf32>
    %399 = vector.multi_reduction <add>, %398, %cst_255 [1] : vector<8x8xf32> to vector<8xf32>
    %400 = vector.shape_cast %399 : vector<8xf32> to vector<8x1xf32>
    %401 = tpu.reciprocal %400 {approx = true} : vector<8x1xf32> -> vector<8x1xf32>
    %402 = vector.broadcast %401 : vector<8x1xf32> to vector<8x8xf32>
    %403 = arith.mulf %398, %402 : vector<8x8xf32>
    %404 = arith.truncf %403 : vector<8x8xf32> to vector<8x8xbf16>
    %405 = arith.truncf %388 : vector<8x8xf32> to vector<8x8xbf16>
    %cst_256 = arith.constant dense<0.000000e+00> : vector<8x8xf32>
    %406 = tpu.matmul %404, %405, %cst_256 {dimension_numbers = #tpu.dot_dimension_numbers<[1], [0], [0], [1], [0, 0, 1, 1], [], []>} : vector<8x8xbf16>, vector<8x8xbf16>, vector<8x8xf32> -> vector<8x8xf32>
    %407 = arith.truncf %406 : vector<8x8xf32> to vector<8x8xbf16>
    %c1_257 = arith.constant 1 : index
    %c0_258 = arith.constant 0 : index
    %c0_259 = arith.constant 0 : index
    %408 = vector.load %arg67[%c1_257, %c0_258, %c0_259] : memref<4x8x32xbf16, #tpu.memory_space<vmem>>, vector<1x8x32xbf16>
    %409 = vector.shape_cast %408 : vector<1x8x32xbf16> to vector<8x32xbf16>
    %cst_260 = arith.constant dense<0.000000e+00> : vector<8x32xf32>
    %410 = tpu.matmul %407, %409, %cst_260 {dimension_numbers = #tpu.dot_dimension_numbers<[1], [0], [0], [1], [0, 0, 1, 1], [], []>} : vector<8x8xbf16>, vector<8x32xbf16>, vector<8x32xf32> -> vector<8x32xf32>
    %411 = arith.addf %367, %410 : vector<8x32xf32>
    %c2_261 = arith.constant 2 : index
    %c0_262 = arith.constant 0 : index
    %c0_263 = arith.constant 0 : index
    %412 = vector.load %arg68[%c2_261, %c0_262, %c0_263] : memref<4x32x8xbf16, #tpu.memory_space<vmem>>, vector<1x32x8xbf16>
    %413 = vector.shape_cast %412 : vector<1x32x8xbf16> to vector<32x8xbf16>
    %cst_264 = arith.constant dense<0.000000e+00> : vector<8x8xf32>
    %414 = tpu.matmul %321, %413, %cst_264 {dimension_numbers = #tpu.dot_dimension_numbers<[1], [0], [0], [1], [0, 0, 1, 1], [], []>} : vector<8x32xbf16>, vector<32x8xbf16>, vector<8x8xf32> -> vector<8x8xf32>
    %c2_265 = arith.constant 2 : index
    %c0_266 = arith.constant 0 : index
    %c0_267 = arith.constant 0 : index
    %415 = vector.load %arg64[%c2_265, %c0_266, %c0_267] : memref<4x1x8xf32, #tpu.memory_space<vmem>>, vector<1x1x8xf32>
    %416 = vector.shape_cast %415 : vector<1x1x8xf32> to vector<1x8xf32>
    %417 = vector.broadcast %416 : vector<1x8xf32> to vector<8x8xf32>
    %418 = arith.addf %414, %417 : vector<8x8xf32>
    %c2_268 = arith.constant 2 : index
    %c0_269 = arith.constant 0 : index
    %c0_270 = arith.constant 0 : index
    %419 = vector.load %arg66[%c2_268, %c0_269, %c0_270] : memref<4x32x8xbf16, #tpu.memory_space<vmem>>, vector<1x32x8xbf16>
    %420 = vector.shape_cast %419 : vector<1x32x8xbf16> to vector<32x8xbf16>
    %cst_271 = arith.constant dense<0.000000e+00> : vector<8x8xf32>
    %421 = tpu.matmul %322, %420, %cst_271 {dimension_numbers = #tpu.dot_dimension_numbers<[1], [0], [0], [1], [0, 0, 1, 1], [], []>} : vector<8x32xbf16>, vector<32x8xbf16>, vector<8x8xf32> -> vector<8x8xf32>
    %c2_272 = arith.constant 2 : index
    %c0_273 = arith.constant 0 : index
    %c0_274 = arith.constant 0 : index
    %422 = vector.load %arg62[%c2_272, %c0_273, %c0_274] : memref<4x1x8xf32, #tpu.memory_space<vmem>>, vector<1x1x8xf32>
    %423 = vector.shape_cast %422 : vector<1x1x8xf32> to vector<1x8xf32>
    %424 = vector.broadcast %423 : vector<1x8xf32> to vector<8x8xf32>
    %425 = arith.addf %421, %424 : vector<8x8xf32>
    %c2_275 = arith.constant 2 : index
    %c0_276 = arith.constant 0 : index
    %c0_277 = arith.constant 0 : index
    %426 = vector.load %arg69[%c2_275, %c0_276, %c0_277] : memref<4x32x8xbf16, #tpu.memory_space<vmem>>, vector<1x32x8xbf16>
    %427 = vector.shape_cast %426 : vector<1x32x8xbf16> to vector<32x8xbf16>
    %cst_278 = arith.constant dense<0.000000e+00> : vector<8x8xf32>
    %428 = tpu.matmul %322, %427, %cst_278 {dimension_numbers = #tpu.dot_dimension_numbers<[1], [0], [0], [1], [0, 0, 1, 1], [], []>} : vector<8x32xbf16>, vector<32x8xbf16>, vector<8x8xf32> -> vector<8x8xf32>
    %c2_279 = arith.constant 2 : index
    %c0_280 = arith.constant 0 : index
    %c0_281 = arith.constant 0 : index
    %429 = vector.load %arg65[%c2_279, %c0_280, %c0_281] : memref<4x1x8xf32, #tpu.memory_space<vmem>>, vector<1x1x8xf32>
    %430 = vector.shape_cast %429 : vector<1x1x8xf32> to vector<1x8xf32>
    %431 = vector.broadcast %430 : vector<1x8xf32> to vector<8x8xf32>
    %432 = arith.addf %428, %431 : vector<8x8xf32>
    %cst_282 = arith.constant 0.353553385 : f32
    %433 = vector.broadcast %cst_282 : f32 to vector<8x8xf32>
    %434 = arith.mulf %418, %433 : vector<8x8xf32>
    %435 = arith.truncf %434 : vector<8x8xf32> to vector<8x8xbf16>
    %436 = arith.truncf %425 : vector<8x8xf32> to vector<8x8xbf16>
    %cst_283 = arith.constant dense<0.000000e+00> : vector<8x8xf32>
    %437 = tpu.matmul %435, %436, %cst_283 {dimension_numbers = #tpu.dot_dimension_numbers<[1], [1], [0], [0], [0, 0, 1, 0], [], []>} : vector<8x8xbf16>, vector<8x8xbf16>, vector<8x8xf32> -> vector<8x8xf32>
    %cst_284 = arith.constant dense<0xFF800000> : vector<8xf32>
    %438 = vector.multi_reduction <maximumf>, %437, %cst_284 [1] : vector<8x8xf32> to vector<8xf32>
    %439 = vector.shape_cast %438 : vector<8xf32> to vector<8x1xf32>
    %440 = vector.broadcast %439 : vector<8x1xf32> to vector<8x8xf32>
    %441 = arith.subf %437, %440 : vector<8x8xf32>
    %442 = math.exp %441 : vector<8x8xf32>
    %cst_285 = arith.constant dense<0.000000e+00> : vector<8xf32>
    %443 = vector.multi_reduction <add>, %442, %cst_285 [1] : vector<8x8xf32> to vector<8xf32>
    %444 = vector.shape_cast %443 : vector<8xf32> to vector<8x1xf32>
    %445 = tpu.reciprocal %444 {approx = true} : vector<8x1xf32> -> vector<8x1xf32>
    %446 = vector.broadcast %445 : vector<8x1xf32> to vector<8x8xf32>
    %447 = arith.mulf %442, %446 : vector<8x8xf32>
    %448 = arith.truncf %447 : vector<8x8xf32> to vector<8x8xbf16>
    %449 = arith.truncf %432 : vector<8x8xf32> to vector<8x8xbf16>
    %cst_286 = arith.constant dense<0.000000e+00> : vector<8x8xf32>
    %450 = tpu.matmul %448, %449, %cst_286 {dimension_numbers = #tpu.dot_dimension_numbers<[1], [0], [0], [1], [0, 0, 1, 1], [], []>} : vector<8x8xbf16>, vector<8x8xbf16>, vector<8x8xf32> -> vector<8x8xf32>
    %451 = arith.truncf %450 : vector<8x8xf32> to vector<8x8xbf16>
    %c2_287 = arith.constant 2 : index
    %c0_288 = arith.constant 0 : index
    %c0_289 = arith.constant 0 : index
    %452 = vector.load %arg67[%c2_287, %c0_288, %c0_289] : memref<4x8x32xbf16, #tpu.memory_space<vmem>>, vector<1x8x32xbf16>
    %453 = vector.shape_cast %452 : vector<1x8x32xbf16> to vector<8x32xbf16>
    %cst_290 = arith.constant dense<0.000000e+00> : vector<8x32xf32>
    %454 = tpu.matmul %451, %453, %cst_290 {dimension_numbers = #tpu.dot_dimension_numbers<[1], [0], [0], [1], [0, 0, 1, 1], [], []>} : vector<8x8xbf16>, vector<8x32xbf16>, vector<8x32xf32> -> vector<8x32xf32>
    %455 = arith.addf %411, %454 : vector<8x32xf32>
    %c3_291 = arith.constant 3 : index
    %c0_292 = arith.constant 0 : index
    %c0_293 = arith.constant 0 : index
    %456 = vector.load %arg68[%c3_291, %c0_292, %c0_293] : memref<4x32x8xbf16, #tpu.memory_space<vmem>>, vector<1x32x8xbf16>
    %457 = vector.shape_cast %456 : vector<1x32x8xbf16> to vector<32x8xbf16>
    %cst_294 = arith.constant dense<0.000000e+00> : vector<8x8xf32>
    %458 = tpu.matmul %321, %457, %cst_294 {dimension_numbers = #tpu.dot_dimension_numbers<[1], [0], [0], [1], [0, 0, 1, 1], [], []>} : vector<8x32xbf16>, vector<32x8xbf16>, vector<8x8xf32> -> vector<8x8xf32>
    %c3_295 = arith.constant 3 : index
    %c0_296 = arith.constant 0 : index
    %c0_297 = arith.constant 0 : index
    %459 = vector.load %arg64[%c3_295, %c0_296, %c0_297] : memref<4x1x8xf32, #tpu.memory_space<vmem>>, vector<1x1x8xf32>
    %460 = vector.shape_cast %459 : vector<1x1x8xf32> to vector<1x8xf32>
    %461 = vector.broadcast %460 : vector<1x8xf32> to vector<8x8xf32>
    %462 = arith.addf %458, %461 : vector<8x8xf32>
    %c3_298 = arith.constant 3 : index
    %c0_299 = arith.constant 0 : index
    %c0_300 = arith.constant 0 : index
    %463 = vector.load %arg66[%c3_298, %c0_299, %c0_300] : memref<4x32x8xbf16, #tpu.memory_space<vmem>>, vector<1x32x8xbf16>
    %464 = vector.shape_cast %463 : vector<1x32x8xbf16> to vector<32x8xbf16>
    %cst_301 = arith.constant dense<0.000000e+00> : vector<8x8xf32>
    %465 = tpu.matmul %322, %464, %cst_301 {dimension_numbers = #tpu.dot_dimension_numbers<[1], [0], [0], [1], [0, 0, 1, 1], [], []>} : vector<8x32xbf16>, vector<32x8xbf16>, vector<8x8xf32> -> vector<8x8xf32>
    %c3_302 = arith.constant 3 : index
    %c0_303 = arith.constant 0 : index
    %c0_304 = arith.constant 0 : index
    %466 = vector.load %arg62[%c3_302, %c0_303, %c0_304] : memref<4x1x8xf32, #tpu.memory_space<vmem>>, vector<1x1x8xf32>
    %467 = vector.shape_cast %466 : vector<1x1x8xf32> to vector<1x8xf32>
    %468 = vector.broadcast %467 : vector<1x8xf32> to vector<8x8xf32>
    %469 = arith.addf %465, %468 : vector<8x8xf32>
    %c3_305 = arith.constant 3 : index
    %c0_306 = arith.constant 0 : index
    %c0_307 = arith.constant 0 : index
    %470 = vector.load %arg69[%c3_305, %c0_306, %c0_307] : memref<4x32x8xbf16, #tpu.memory_space<vmem>>, vector<1x32x8xbf16>
    %471 = vector.shape_cast %470 : vector<1x32x8xbf16> to vector<32x8xbf16>
    %cst_308 = arith.constant dense<0.000000e+00> : vector<8x8xf32>
    %472 = tpu.matmul %322, %471, %cst_308 {dimension_numbers = #tpu.dot_dimension_numbers<[1], [0], [0], [1], [0, 0, 1, 1], [], []>} : vector<8x32xbf16>, vector<32x8xbf16>, vector<8x8xf32> -> vector<8x8xf32>
    %c3_309 = arith.constant 3 : index
    %c0_310 = arith.constant 0 : index
    %c0_311 = arith.constant 0 : index
    %473 = vector.load %arg65[%c3_309, %c0_310, %c0_311] : memref<4x1x8xf32, #tpu.memory_space<vmem>>, vector<1x1x8xf32>
    %474 = vector.shape_cast %473 : vector<1x1x8xf32> to vector<1x8xf32>
    %475 = vector.broadcast %474 : vector<1x8xf32> to vector<8x8xf32>
    %476 = arith.addf %472, %475 : vector<8x8xf32>
    %cst_312 = arith.constant 0.353553385 : f32
    %477 = vector.broadcast %cst_312 : f32 to vector<8x8xf32>
    %478 = arith.mulf %462, %477 : vector<8x8xf32>
    %479 = arith.truncf %478 : vector<8x8xf32> to vector<8x8xbf16>
    %480 = arith.truncf %469 : vector<8x8xf32> to vector<8x8xbf16>
    %cst_313 = arith.constant dense<0.000000e+00> : vector<8x8xf32>
    %481 = tpu.matmul %479, %480, %cst_313 {dimension_numbers = #tpu.dot_dimension_numbers<[1], [1], [0], [0], [0, 0, 1, 0], [], []>} : vector<8x8xbf16>, vector<8x8xbf16>, vector<8x8xf32> -> vector<8x8xf32>
    %cst_314 = arith.constant dense<0xFF800000> : vector<8xf32>
    %482 = vector.multi_reduction <maximumf>, %481, %cst_314 [1] : vector<8x8xf32> to vector<8xf32>
    %483 = vector.shape_cast %482 : vector<8xf32> to vector<8x1xf32>
    %484 = vector.broadcast %483 : vector<8x1xf32> to vector<8x8xf32>
    %485 = arith.subf %481, %484 : vector<8x8xf32>
    %486 = math.exp %485 : vector<8x8xf32>
    %cst_315 = arith.constant dense<0.000000e+00> : vector<8xf32>
    %487 = vector.multi_reduction <add>, %486, %cst_315 [1] : vector<8x8xf32> to vector<8xf32>
    %488 = vector.shape_cast %487 : vector<8xf32> to vector<8x1xf32>
    %489 = tpu.reciprocal %488 {approx = true} : vector<8x1xf32> -> vector<8x1xf32>
    %490 = vector.broadcast %489 : vector<8x1xf32> to vector<8x8xf32>
    %491 = arith.mulf %486, %490 : vector<8x8xf32>
    %492 = arith.truncf %491 : vector<8x8xf32> to vector<8x8xbf16>
    %493 = arith.truncf %476 : vector<8x8xf32> to vector<8x8xbf16>
    %cst_316 = arith.constant dense<0.000000e+00> : vector<8x8xf32>
    %494 = tpu.matmul %492, %493, %cst_316 {dimension_numbers = #tpu.dot_dimension_numbers<[1], [0], [0], [1], [0, 0, 1, 1], [], []>} : vector<8x8xbf16>, vector<8x8xbf16>, vector<8x8xf32> -> vector<8x8xf32>
    %495 = arith.truncf %494 : vector<8x8xf32> to vector<8x8xbf16>
    %c3_317 = arith.constant 3 : index
    %c0_318 = arith.constant 0 : index
    %c0_319 = arith.constant 0 : index
    %496 = vector.load %arg67[%c3_317, %c0_318, %c0_319] : memref<4x8x32xbf16, #tpu.memory_space<vmem>>, vector<1x8x32xbf16>
    %497 = vector.shape_cast %496 : vector<1x8x32xbf16> to vector<8x32xbf16>
    %cst_320 = arith.constant dense<0.000000e+00> : vector<8x32xf32>
    %498 = tpu.matmul %495, %497, %cst_320 {dimension_numbers = #tpu.dot_dimension_numbers<[1], [0], [0], [1], [0, 0, 1, 1], [], []>} : vector<8x8xbf16>, vector<8x32xbf16>, vector<8x32xf32> -> vector<8x32xf32>
    %499 = arith.addf %455, %498 : vector<8x32xf32>
    %c0_321 = arith.constant 0 : index
    %c0_322 = arith.constant 0 : index
    %500 = vector.load %arg63[%c0_321, %c0_322] : memref<1x32xf32, #tpu.memory_space<vmem>>, vector<1x32xf32>
    %501 = vector.broadcast %500 : vector<1x32xf32> to vector<8x32xf32>
    %502 = arith.addf %499, %501 : vector<8x32xf32>
    %503 = arith.addf %320, %502 : vector<8x32xf32>
    %cst_323 = arith.constant dense<0.000000e+00> : vector<8xf32>
    %504 = vector.multi_reduction <add>, %503, %cst_323 [1] : vector<8x32xf32> to vector<8xf32>
    %505 = vector.shape_cast %504 : vector<8xf32> to vector<8x1xf32>
    %cst_324 = arith.constant 3.200000e+01 : f32
    %506 = vector.broadcast %cst_324 : f32 to vector<8x1xf32>
    %507 = arith.divf %505, %506 : vector<8x1xf32>
    %508 = vector.broadcast %507 : vector<8x1xf32> to vector<8x32xf32>
    %509 = arith.subf %503, %508 : vector<8x32xf32>
    %510 = arith.mulf %509, %509 : vector<8x32xf32>
    %cst_325 = arith.constant dense<0.000000e+00> : vector<8xf32>
    %511 = vector.multi_reduction <add>, %510, %cst_325 [1] : vector<8x32xf32> to vector<8xf32>
    %512 = vector.shape_cast %511 : vector<8xf32> to vector<8x1xf32>
    %cst_326 = arith.constant 3.200000e+01 : f32
    %513 = vector.broadcast %cst_326 : f32 to vector<8x1xf32>
    %514 = arith.divf %512, %513 : vector<8x1xf32>
    %cst_327 = arith.constant 9.99999974E-6 : f32
    %515 = vector.broadcast %cst_327 : f32 to vector<8x1xf32>
    %516 = arith.addf %514, %515 : vector<8x1xf32>
    %517 = math.rsqrt %516 : vector<8x1xf32>
    %518 = vector.broadcast %517 : vector<8x1xf32> to vector<8x32xf32>
    %519 = arith.mulf %509, %518 : vector<8x32xf32>
    %c0_328 = arith.constant 0 : index
    %c0_329 = arith.constant 0 : index
    %520 = vector.load %arg75[%c0_328, %c0_329] : memref<1x32xf32, #tpu.memory_space<vmem>>, vector<1x32xf32>
    %521 = vector.broadcast %520 : vector<1x32xf32> to vector<8x32xf32>
    %522 = arith.mulf %519, %521 : vector<8x32xf32>
    %c0_330 = arith.constant 0 : index
    %c0_331 = arith.constant 0 : index
    %523 = vector.load %arg74[%c0_330, %c0_331] : memref<1x32xf32, #tpu.memory_space<vmem>>, vector<1x32xf32>
    %524 = vector.broadcast %523 : vector<1x32xf32> to vector<8x32xf32>
    %525 = arith.addf %522, %524 : vector<8x32xf32>
    %526 = arith.truncf %525 : vector<8x32xf32> to vector<8x32xbf16>
    %c0_332 = arith.constant 0 : index
    %c0_333 = arith.constant 0 : index
    %527 = vector.load %arg71[%c0_332, %c0_333] : memref<32x64xbf16, #tpu.memory_space<vmem>>, vector<32x64xbf16>
    %cst_334 = arith.constant dense<0.000000e+00> : vector<8x64xf32>
    %528 = tpu.matmul %526, %527, %cst_334 {dimension_numbers = #tpu.dot_dimension_numbers<[1], [0], [0], [1], [0, 0, 1, 1], [], []>} : vector<8x32xbf16>, vector<32x64xbf16>, vector<8x64xf32> -> vector<8x64xf32>
    %c0_335 = arith.constant 0 : index
    %c0_336 = arith.constant 0 : index
    %529 = vector.load %arg70[%c0_335, %c0_336] : memref<1x64xf32, #tpu.memory_space<vmem>>, vector<1x64xf32>
    %530 = vector.broadcast %529 : vector<1x64xf32> to vector<8x64xf32>
    %531 = arith.addf %528, %530 : vector<8x64xf32>
    %cst_337 = arith.constant 5.000000e-01 : f32
    %532 = vector.broadcast %cst_337 : f32 to vector<8x64xf32>
    %533 = arith.mulf %532, %531 : vector<8x64xf32>
    %cst_338 = arith.constant 4.471500e-02 : f32
    %534 = vector.broadcast %cst_338 : f32 to vector<8x64xf32>
    %535 = arith.mulf %534, %531 : vector<8x64xf32>
    %536 = arith.mulf %535, %531 : vector<8x64xf32>
    %537 = arith.mulf %536, %531 : vector<8x64xf32>
    %538 = arith.addf %531, %537 : vector<8x64xf32>
    %cst_339 = arith.constant 0.797884583 : f32
    %539 = vector.broadcast %cst_339 : f32 to vector<8x64xf32>
    %540 = arith.mulf %539, %538 : vector<8x64xf32>
    %541 = math.tanh %540 : vector<8x64xf32>
    %cst_340 = arith.constant 1.000000e+00 : f32
    %542 = vector.broadcast %cst_340 : f32 to vector<8x64xf32>
    %543 = arith.addf %542, %541 : vector<8x64xf32>
    %544 = arith.mulf %533, %543 : vector<8x64xf32>
    %545 = arith.truncf %544 : vector<8x64xf32> to vector<8x64xbf16>
    %c0_341 = arith.constant 0 : index
    %c0_342 = arith.constant 0 : index
    %546 = vector.load %arg73[%c0_341, %c0_342] : memref<64x32xbf16, #tpu.memory_space<vmem>>, vector<64x32xbf16>
    %cst_343 = arith.constant dense<0.000000e+00> : vector<8x32xf32>
    %547 = tpu.matmul %545, %546, %cst_343 {dimension_numbers = #tpu.dot_dimension_numbers<[1], [0], [0], [1], [0, 0, 1, 1], [], []>} : vector<8x64xbf16>, vector<64x32xbf16>, vector<8x32xf32> -> vector<8x32xf32>
    %548 = arith.addf %525, %547 : vector<8x32xf32>
    %c0_344 = arith.constant 0 : index
    %c0_345 = arith.constant 0 : index
    %549 = vector.load %arg72[%c0_344, %c0_345] : memref<1x32xf32, #tpu.memory_space<vmem>>, vector<1x32xf32>
    %550 = vector.broadcast %549 : vector<1x32xf32> to vector<8x32xf32>
    %551 = arith.addf %548, %550 : vector<8x32xf32>
    %cst_346 = arith.constant dense<0.000000e+00> : vector<8xf32>
    %552 = vector.multi_reduction <add>, %551, %cst_346 [1] : vector<8x32xf32> to vector<8xf32>
    %553 = vector.shape_cast %552 : vector<8xf32> to vector<8x1xf32>
    %cst_347 = arith.constant 3.200000e+01 : f32
    %554 = vector.broadcast %cst_347 : f32 to vector<8x1xf32>
    %555 = arith.divf %553, %554 : vector<8x1xf32>
    %556 = vector.broadcast %555 : vector<8x1xf32> to vector<8x32xf32>
    %557 = arith.subf %551, %556 : vector<8x32xf32>
    %558 = arith.mulf %557, %557 : vector<8x32xf32>
    %cst_348 = arith.constant dense<0.000000e+00> : vector<8xf32>
    %559 = vector.multi_reduction <add>, %558, %cst_348 [1] : vector<8x32xf32> to vector<8xf32>
    %560 = vector.shape_cast %559 : vector<8xf32> to vector<8x1xf32>
    %cst_349 = arith.constant 3.200000e+01 : f32
    %561 = vector.broadcast %cst_349 : f32 to vector<8x1xf32>
    %562 = arith.divf %560, %561 : vector<8x1xf32>
    %cst_350 = arith.constant 9.99999974E-6 : f32
    %563 = vector.broadcast %cst_350 : f32 to vector<8x1xf32>
    %564 = arith.addf %562, %563 : vector<8x1xf32>
    %565 = math.rsqrt %564 : vector<8x1xf32>
    %566 = vector.broadcast %565 : vector<8x1xf32> to vector<8x32xf32>
    %567 = arith.mulf %557, %566 : vector<8x32xf32>
    %c0_351 = arith.constant 0 : index
    %c0_352 = arith.constant 0 : index
    %568 = vector.load %arg77[%c0_351, %c0_352] : memref<1x32xf32, #tpu.memory_space<vmem>>, vector<1x32xf32>
    %569 = vector.broadcast %568 : vector<1x32xf32> to vector<8x32xf32>
    %570 = arith.mulf %567, %569 : vector<8x32xf32>
    %c0_353 = arith.constant 0 : index
    %c0_354 = arith.constant 0 : index
    %571 = vector.load %arg76[%c0_353, %c0_354] : memref<1x32xf32, #tpu.memory_space<vmem>>, vector<1x32xf32>
    %572 = vector.broadcast %571 : vector<1x32xf32> to vector<8x32xf32>
    %573 = arith.addf %570, %572 : vector<8x32xf32>
    %cst_355 = arith.constant dense<0.000000e+00> : vector<8xf32>
    %574 = vector.multi_reduction <add>, %573, %cst_355 [1] : vector<8x32xf32> to vector<8xf32>
    %575 = vector.shape_cast %574 : vector<8xf32> to vector<8x1xf32>
    %cst_356 = arith.constant 3.200000e+01 : f32
    %576 = vector.broadcast %cst_356 : f32 to vector<8x1xf32>
    %577 = arith.divf %575, %576 : vector<8x1xf32>
    %578 = vector.broadcast %577 : vector<8x1xf32> to vector<8x32xf32>
    %579 = arith.subf %573, %578 : vector<8x32xf32>
    %580 = arith.mulf %579, %579 : vector<8x32xf32>
    %cst_357 = arith.constant dense<0.000000e+00> : vector<8xf32>
    %581 = vector.multi_reduction <add>, %580, %cst_357 [1] : vector<8x32xf32> to vector<8xf32>
    %582 = vector.shape_cast %581 : vector<8xf32> to vector<8x1xf32>
    %cst_358 = arith.constant 3.200000e+01 : f32
    %583 = vector.broadcast %cst_358 : f32 to vector<8x1xf32>
    %584 = arith.divf %582, %583 : vector<8x1xf32>
    %cst_359 = arith.constant 9.99999974E-6 : f32
    %585 = vector.broadcast %cst_359 : f32 to vector<8x1xf32>
    %586 = arith.addf %584, %585 : vector<8x1xf32>
    %587 = math.rsqrt %586 : vector<8x1xf32>
    %588 = vector.broadcast %587 : vector<8x1xf32> to vector<8x32xf32>
    %589 = arith.mulf %579, %588 : vector<8x32xf32>
    %c0_360 = arith.constant 0 : index
    %c0_361 = arith.constant 0 : index
    %590 = vector.load %arg79[%c0_360, %c0_361] : memref<1x32xf32, #tpu.memory_space<vmem>>, vector<1x32xf32>
    %591 = vector.broadcast %590 : vector<1x32xf32> to vector<8x32xf32>
    %592 = arith.mulf %589, %591 : vector<8x32xf32>
    %c0_362 = arith.constant 0 : index
    %c0_363 = arith.constant 0 : index
    %593 = vector.load %arg78[%c0_362, %c0_363] : memref<1x32xf32, #tpu.memory_space<vmem>>, vector<1x32xf32>
    %594 = vector.broadcast %593 : vector<1x32xf32> to vector<8x32xf32>
    %595 = arith.addf %592, %594 : vector<8x32xf32>
    %c0_364 = arith.constant 0 : index
    %c0_365 = arith.constant 0 : index
    %596 = vector.load %arg5[%c0_364, %c0_365] : memref<24x24xf32, #tpu.memory_space<vmem>>, vector<24x24xf32>
    %c0_366 = arith.constant 0 : index
    %c0_367 = arith.constant 0 : index
    %c0_368 = arith.constant 0 : index
    %597 = vector.load %arg3[%c0_366, %c0_367, %c0_368] : memref<1x24x4xf32, #tpu.memory_space<vmem>>, vector<1x24x4xf32>
    %598 = vector.shape_cast %597 : vector<1x24x4xf32> to vector<24x4xf32>
    %c0_369 = arith.constant 0 : index
    %c0_370 = arith.constant 0 : index
    %c0_371 = arith.constant 0 : index
    %599 = vector.load %arg4[%c0_369, %c0_370, %c0_371] : memref<1x24x4xf32, #tpu.memory_space<vmem>>, vector<1x24x4xf32>
    %600 = vector.shape_cast %599 : vector<1x24x4xf32> to vector<24x4xf32>
    %c1_i32_372 = arith.constant 1 : i32
    %601 = tpu.dynamic_rotate %598 by %c1_i32_372 dim 0 : vector<24x4xf32>, i32 -> vector<24x4xf32>
    %602 = arith.truncf %601 : vector<24x4xf32> to vector<24x4xbf16>
    %c23_i32 = arith.constant 23 : i32
    %603 = tpu.dynamic_rotate %598 by %c23_i32 dim 0 : vector<24x4xf32>, i32 -> vector<24x4xf32>
    %604 = arith.truncf %603 : vector<24x4xf32> to vector<24x4xbf16>
    %605 = arith.truncf %598 : vector<24x4xf32> to vector<24x4xbf16>
    %c0_373 = arith.constant 0 : index
    %c0_374 = arith.constant 0 : index
    %c0_375 = arith.constant 0 : index
    %606 = vector.load %arg8[%c0_373, %c0_374, %c0_375] : memref<3x4x32xbf16, #tpu.memory_space<vmem>>, vector<1x4x32xbf16>
    %607 = vector.shape_cast %606 : vector<1x4x32xbf16> to vector<4x32xbf16>
    %cst_376 = arith.constant dense<0.000000e+00> : vector<24x32xf32>
    %608 = tpu.matmul %602, %607, %cst_376 {dimension_numbers = #tpu.dot_dimension_numbers<[1], [0], [0], [1], [0, 0, 1, 1], [], []>} : vector<24x4xbf16>, vector<4x32xbf16>, vector<24x32xf32> -> vector<24x32xf32>
    %c1_377 = arith.constant 1 : index
    %c0_378 = arith.constant 0 : index
    %c0_379 = arith.constant 0 : index
    %609 = vector.load %arg8[%c1_377, %c0_378, %c0_379] : memref<3x4x32xbf16, #tpu.memory_space<vmem>>, vector<1x4x32xbf16>
    %610 = vector.shape_cast %609 : vector<1x4x32xbf16> to vector<4x32xbf16>
    %cst_380 = arith.constant dense<0.000000e+00> : vector<24x32xf32>
    %611 = tpu.matmul %605, %610, %cst_380 {dimension_numbers = #tpu.dot_dimension_numbers<[1], [0], [0], [1], [0, 0, 1, 1], [], []>} : vector<24x4xbf16>, vector<4x32xbf16>, vector<24x32xf32> -> vector<24x32xf32>
    %612 = arith.addf %608, %611 : vector<24x32xf32>
    %c2_381 = arith.constant 2 : index
    %c0_382 = arith.constant 0 : index
    %c0_383 = arith.constant 0 : index
    %613 = vector.load %arg8[%c2_381, %c0_382, %c0_383] : memref<3x4x32xbf16, #tpu.memory_space<vmem>>, vector<1x4x32xbf16>
    %614 = vector.shape_cast %613 : vector<1x4x32xbf16> to vector<4x32xbf16>
    %cst_384 = arith.constant dense<0.000000e+00> : vector<24x32xf32>
    %615 = tpu.matmul %604, %614, %cst_384 {dimension_numbers = #tpu.dot_dimension_numbers<[1], [0], [0], [1], [0, 0, 1, 1], [], []>} : vector<24x4xbf16>, vector<4x32xbf16>, vector<24x32xf32> -> vector<24x32xf32>
    %616 = arith.addf %612, %615 : vector<24x32xf32>
    %617 = arith.truncf %600 : vector<24x4xf32> to vector<24x4xbf16>
    %c0_385 = arith.constant 0 : index
    %c0_386 = arith.constant 0 : index
    %618 = vector.load %arg9[%c0_385, %c0_386] : memref<4x32xbf16, #tpu.memory_space<vmem>>, vector<4x32xbf16>
    %cst_387 = arith.constant dense<0.000000e+00> : vector<24x32xf32>
    %619 = tpu.matmul %617, %618, %cst_387 {dimension_numbers = #tpu.dot_dimension_numbers<[1], [0], [0], [1], [0, 0, 1, 1], [], []>} : vector<24x4xbf16>, vector<4x32xbf16>, vector<24x32xf32> -> vector<24x32xf32>
    %620 = arith.addf %616, %619 : vector<24x32xf32>
    %c0_388 = arith.constant 0 : index
    %c0_389 = arith.constant 0 : index
    %621 = vector.load %arg6[%c0_388, %c0_389] : memref<1x32xf32, #tpu.memory_space<vmem>>, vector<1x32xf32>
    %622 = vector.broadcast %621 : vector<1x32xf32> to vector<24x32xf32>
    %623 = arith.addf %620, %622 : vector<24x32xf32>
    %c0_390 = arith.constant 0 : index
    %c0_391 = arith.constant 0 : index
    %624 = vector.load %arg7[%c0_390, %c0_391] : memref<24x32xf32, #tpu.memory_space<vmem>>, vector<24x32xf32>
    %625 = arith.addf %623, %624 : vector<24x32xf32>
    %626 = arith.truncf %625 : vector<24x32xf32> to vector<24x32xbf16>
    %627 = arith.truncf %625 : vector<24x32xf32> to vector<24x32xbf16>
    %cst_392 = arith.constant 0.000000e+00 : f32
    %628 = vector.broadcast %cst_392 : f32 to vector<24x32xf32>
    %c0_393 = arith.constant 0 : index
    %c0_394 = arith.constant 0 : index
    %c0_395 = arith.constant 0 : index
    %629 = vector.load %arg34[%c0_393, %c0_394, %c0_395] : memref<4x32x8xbf16, #tpu.memory_space<vmem>>, vector<1x32x8xbf16>
    %630 = vector.shape_cast %629 : vector<1x32x8xbf16> to vector<32x8xbf16>
    %cst_396 = arith.constant dense<0.000000e+00> : vector<24x8xf32>
    %631 = tpu.matmul %626, %630, %cst_396 {dimension_numbers = #tpu.dot_dimension_numbers<[1], [0], [0], [1], [0, 0, 1, 1], [], []>} : vector<24x32xbf16>, vector<32x8xbf16>, vector<24x8xf32> -> vector<24x8xf32>
    %c0_397 = arith.constant 0 : index
    %c0_398 = arith.constant 0 : index
    %c0_399 = arith.constant 0 : index
    %632 = vector.load %arg30[%c0_397, %c0_398, %c0_399] : memref<4x1x8xf32, #tpu.memory_space<vmem>>, vector<1x1x8xf32>
    %633 = vector.shape_cast %632 : vector<1x1x8xf32> to vector<1x8xf32>
    %634 = vector.broadcast %633 : vector<1x8xf32> to vector<24x8xf32>
    %635 = arith.addf %631, %634 : vector<24x8xf32>
    %c0_400 = arith.constant 0 : index
    %c0_401 = arith.constant 0 : index
    %c0_402 = arith.constant 0 : index
    %636 = vector.load %arg32[%c0_400, %c0_401, %c0_402] : memref<4x32x8xbf16, #tpu.memory_space<vmem>>, vector<1x32x8xbf16>
    %637 = vector.shape_cast %636 : vector<1x32x8xbf16> to vector<32x8xbf16>
    %cst_403 = arith.constant dense<0.000000e+00> : vector<24x8xf32>
    %638 = tpu.matmul %627, %637, %cst_403 {dimension_numbers = #tpu.dot_dimension_numbers<[1], [0], [0], [1], [0, 0, 1, 1], [], []>} : vector<24x32xbf16>, vector<32x8xbf16>, vector<24x8xf32> -> vector<24x8xf32>
    %c0_404 = arith.constant 0 : index
    %c0_405 = arith.constant 0 : index
    %c0_406 = arith.constant 0 : index
    %639 = vector.load %arg28[%c0_404, %c0_405, %c0_406] : memref<4x1x8xf32, #tpu.memory_space<vmem>>, vector<1x1x8xf32>
    %640 = vector.shape_cast %639 : vector<1x1x8xf32> to vector<1x8xf32>
    %641 = vector.broadcast %640 : vector<1x8xf32> to vector<24x8xf32>
    %642 = arith.addf %638, %641 : vector<24x8xf32>
    %c0_407 = arith.constant 0 : index
    %c0_408 = arith.constant 0 : index
    %c0_409 = arith.constant 0 : index
    %643 = vector.load %arg35[%c0_407, %c0_408, %c0_409] : memref<4x32x8xbf16, #tpu.memory_space<vmem>>, vector<1x32x8xbf16>
    %644 = vector.shape_cast %643 : vector<1x32x8xbf16> to vector<32x8xbf16>
    %cst_410 = arith.constant dense<0.000000e+00> : vector<24x8xf32>
    %645 = tpu.matmul %627, %644, %cst_410 {dimension_numbers = #tpu.dot_dimension_numbers<[1], [0], [0], [1], [0, 0, 1, 1], [], []>} : vector<24x32xbf16>, vector<32x8xbf16>, vector<24x8xf32> -> vector<24x8xf32>
    %c0_411 = arith.constant 0 : index
    %c0_412 = arith.constant 0 : index
    %c0_413 = arith.constant 0 : index
    %646 = vector.load %arg31[%c0_411, %c0_412, %c0_413] : memref<4x1x8xf32, #tpu.memory_space<vmem>>, vector<1x1x8xf32>
    %647 = vector.shape_cast %646 : vector<1x1x8xf32> to vector<1x8xf32>
    %648 = vector.broadcast %647 : vector<1x8xf32> to vector<24x8xf32>
    %649 = arith.addf %645, %648 : vector<24x8xf32>
    %cst_414 = arith.constant 0.353553385 : f32
    %650 = vector.broadcast %cst_414 : f32 to vector<24x8xf32>
    %651 = arith.mulf %635, %650 : vector<24x8xf32>
    %652 = arith.truncf %651 : vector<24x8xf32> to vector<24x8xbf16>
    %653 = arith.truncf %642 : vector<24x8xf32> to vector<24x8xbf16>
    %cst_415 = arith.constant dense<0.000000e+00> : vector<24x24xf32>
    %654 = tpu.matmul %652, %653, %cst_415 {dimension_numbers = #tpu.dot_dimension_numbers<[1], [1], [0], [0], [0, 0, 1, 0], [], []>} : vector<24x8xbf16>, vector<24x8xbf16>, vector<24x24xf32> -> vector<24x24xf32>
    %655 = arith.addf %654, %596 : vector<24x24xf32>
    %cst_416 = arith.constant dense<0xFF800000> : vector<24xf32>
    %656 = vector.multi_reduction <maximumf>, %655, %cst_416 [1] : vector<24x24xf32> to vector<24xf32>
    %657 = vector.shape_cast %656 : vector<24xf32> to vector<24x1xf32>
    %658 = vector.broadcast %657 : vector<24x1xf32> to vector<24x24xf32>
    %659 = arith.subf %655, %658 : vector<24x24xf32>
    %660 = math.exp %659 : vector<24x24xf32>
    %cst_417 = arith.constant dense<0.000000e+00> : vector<24xf32>
    %661 = vector.multi_reduction <add>, %660, %cst_417 [1] : vector<24x24xf32> to vector<24xf32>
    %662 = vector.shape_cast %661 : vector<24xf32> to vector<24x1xf32>
    %663 = tpu.reciprocal %662 {approx = true} : vector<24x1xf32> -> vector<24x1xf32>
    %664 = vector.broadcast %663 : vector<24x1xf32> to vector<24x24xf32>
    %665 = arith.mulf %660, %664 : vector<24x24xf32>
    %666 = arith.truncf %665 : vector<24x24xf32> to vector<24x24xbf16>
    %667 = arith.truncf %649 : vector<24x8xf32> to vector<24x8xbf16>
    %cst_418 = arith.constant dense<0.000000e+00> : vector<24x8xf32>
    %668 = tpu.matmul %666, %667, %cst_418 {dimension_numbers = #tpu.dot_dimension_numbers<[1], [0], [0], [1], [0, 0, 1, 1], [], []>} : vector<24x24xbf16>, vector<24x8xbf16>, vector<24x8xf32> -> vector<24x8xf32>
    %669 = arith.truncf %668 : vector<24x8xf32> to vector<24x8xbf16>
    %c0_419 = arith.constant 0 : index
    %c0_420 = arith.constant 0 : index
    %c0_421 = arith.constant 0 : index
    %670 = vector.load %arg33[%c0_419, %c0_420, %c0_421] : memref<4x8x32xbf16, #tpu.memory_space<vmem>>, vector<1x8x32xbf16>
    %671 = vector.shape_cast %670 : vector<1x8x32xbf16> to vector<8x32xbf16>
    %cst_422 = arith.constant dense<0.000000e+00> : vector<24x32xf32>
    %672 = tpu.matmul %669, %671, %cst_422 {dimension_numbers = #tpu.dot_dimension_numbers<[1], [0], [0], [1], [0, 0, 1, 1], [], []>} : vector<24x8xbf16>, vector<8x32xbf16>, vector<24x32xf32> -> vector<24x32xf32>
    %673 = arith.addf %628, %672 : vector<24x32xf32>
    %c1_423 = arith.constant 1 : index
    %c0_424 = arith.constant 0 : index
    %c0_425 = arith.constant 0 : index
    %674 = vector.load %arg34[%c1_423, %c0_424, %c0_425] : memref<4x32x8xbf16, #tpu.memory_space<vmem>>, vector<1x32x8xbf16>
    %675 = vector.shape_cast %674 : vector<1x32x8xbf16> to vector<32x8xbf16>
    %cst_426 = arith.constant dense<0.000000e+00> : vector<24x8xf32>
    %676 = tpu.matmul %626, %675, %cst_426 {dimension_numbers = #tpu.dot_dimension_numbers<[1], [0], [0], [1], [0, 0, 1, 1], [], []>} : vector<24x32xbf16>, vector<32x8xbf16>, vector<24x8xf32> -> vector<24x8xf32>
    %c1_427 = arith.constant 1 : index
    %c0_428 = arith.constant 0 : index
    %c0_429 = arith.constant 0 : index
    %677 = vector.load %arg30[%c1_427, %c0_428, %c0_429] : memref<4x1x8xf32, #tpu.memory_space<vmem>>, vector<1x1x8xf32>
    %678 = vector.shape_cast %677 : vector<1x1x8xf32> to vector<1x8xf32>
    %679 = vector.broadcast %678 : vector<1x8xf32> to vector<24x8xf32>
    %680 = arith.addf %676, %679 : vector<24x8xf32>
    %c1_430 = arith.constant 1 : index
    %c0_431 = arith.constant 0 : index
    %c0_432 = arith.constant 0 : index
    %681 = vector.load %arg32[%c1_430, %c0_431, %c0_432] : memref<4x32x8xbf16, #tpu.memory_space<vmem>>, vector<1x32x8xbf16>
    %682 = vector.shape_cast %681 : vector<1x32x8xbf16> to vector<32x8xbf16>
    %cst_433 = arith.constant dense<0.000000e+00> : vector<24x8xf32>
    %683 = tpu.matmul %627, %682, %cst_433 {dimension_numbers = #tpu.dot_dimension_numbers<[1], [0], [0], [1], [0, 0, 1, 1], [], []>} : vector<24x32xbf16>, vector<32x8xbf16>, vector<24x8xf32> -> vector<24x8xf32>
    %c1_434 = arith.constant 1 : index
    %c0_435 = arith.constant 0 : index
    %c0_436 = arith.constant 0 : index
    %684 = vector.load %arg28[%c1_434, %c0_435, %c0_436] : memref<4x1x8xf32, #tpu.memory_space<vmem>>, vector<1x1x8xf32>
    %685 = vector.shape_cast %684 : vector<1x1x8xf32> to vector<1x8xf32>
    %686 = vector.broadcast %685 : vector<1x8xf32> to vector<24x8xf32>
    %687 = arith.addf %683, %686 : vector<24x8xf32>
    %c1_437 = arith.constant 1 : index
    %c0_438 = arith.constant 0 : index
    %c0_439 = arith.constant 0 : index
    %688 = vector.load %arg35[%c1_437, %c0_438, %c0_439] : memref<4x32x8xbf16, #tpu.memory_space<vmem>>, vector<1x32x8xbf16>
    %689 = vector.shape_cast %688 : vector<1x32x8xbf16> to vector<32x8xbf16>
    %cst_440 = arith.constant dense<0.000000e+00> : vector<24x8xf32>
    %690 = tpu.matmul %627, %689, %cst_440 {dimension_numbers = #tpu.dot_dimension_numbers<[1], [0], [0], [1], [0, 0, 1, 1], [], []>} : vector<24x32xbf16>, vector<32x8xbf16>, vector<24x8xf32> -> vector<24x8xf32>
    %c1_441 = arith.constant 1 : index
    %c0_442 = arith.constant 0 : index
    %c0_443 = arith.constant 0 : index
    %691 = vector.load %arg31[%c1_441, %c0_442, %c0_443] : memref<4x1x8xf32, #tpu.memory_space<vmem>>, vector<1x1x8xf32>
    %692 = vector.shape_cast %691 : vector<1x1x8xf32> to vector<1x8xf32>
    %693 = vector.broadcast %692 : vector<1x8xf32> to vector<24x8xf32>
    %694 = arith.addf %690, %693 : vector<24x8xf32>
    %cst_444 = arith.constant 0.353553385 : f32
    %695 = vector.broadcast %cst_444 : f32 to vector<24x8xf32>
    %696 = arith.mulf %680, %695 : vector<24x8xf32>
    %697 = arith.truncf %696 : vector<24x8xf32> to vector<24x8xbf16>
    %698 = arith.truncf %687 : vector<24x8xf32> to vector<24x8xbf16>
    %cst_445 = arith.constant dense<0.000000e+00> : vector<24x24xf32>
    %699 = tpu.matmul %697, %698, %cst_445 {dimension_numbers = #tpu.dot_dimension_numbers<[1], [1], [0], [0], [0, 0, 1, 0], [], []>} : vector<24x8xbf16>, vector<24x8xbf16>, vector<24x24xf32> -> vector<24x24xf32>
    %700 = arith.addf %699, %596 : vector<24x24xf32>
    %cst_446 = arith.constant dense<0xFF800000> : vector<24xf32>
    %701 = vector.multi_reduction <maximumf>, %700, %cst_446 [1] : vector<24x24xf32> to vector<24xf32>
    %702 = vector.shape_cast %701 : vector<24xf32> to vector<24x1xf32>
    %703 = vector.broadcast %702 : vector<24x1xf32> to vector<24x24xf32>
    %704 = arith.subf %700, %703 : vector<24x24xf32>
    %705 = math.exp %704 : vector<24x24xf32>
    %cst_447 = arith.constant dense<0.000000e+00> : vector<24xf32>
    %706 = vector.multi_reduction <add>, %705, %cst_447 [1] : vector<24x24xf32> to vector<24xf32>
    %707 = vector.shape_cast %706 : vector<24xf32> to vector<24x1xf32>
    %708 = tpu.reciprocal %707 {approx = true} : vector<24x1xf32> -> vector<24x1xf32>
    %709 = vector.broadcast %708 : vector<24x1xf32> to vector<24x24xf32>
    %710 = arith.mulf %705, %709 : vector<24x24xf32>
    %711 = arith.truncf %710 : vector<24x24xf32> to vector<24x24xbf16>
    %712 = arith.truncf %694 : vector<24x8xf32> to vector<24x8xbf16>
    %cst_448 = arith.constant dense<0.000000e+00> : vector<24x8xf32>
    %713 = tpu.matmul %711, %712, %cst_448 {dimension_numbers = #tpu.dot_dimension_numbers<[1], [0], [0], [1], [0, 0, 1, 1], [], []>} : vector<24x24xbf16>, vector<24x8xbf16>, vector<24x8xf32> -> vector<24x8xf32>
    %714 = arith.truncf %713 : vector<24x8xf32> to vector<24x8xbf16>
    %c1_449 = arith.constant 1 : index
    %c0_450 = arith.constant 0 : index
    %c0_451 = arith.constant 0 : index
    %715 = vector.load %arg33[%c1_449, %c0_450, %c0_451] : memref<4x8x32xbf16, #tpu.memory_space<vmem>>, vector<1x8x32xbf16>
    %716 = vector.shape_cast %715 : vector<1x8x32xbf16> to vector<8x32xbf16>
    %cst_452 = arith.constant dense<0.000000e+00> : vector<24x32xf32>
    %717 = tpu.matmul %714, %716, %cst_452 {dimension_numbers = #tpu.dot_dimension_numbers<[1], [0], [0], [1], [0, 0, 1, 1], [], []>} : vector<24x8xbf16>, vector<8x32xbf16>, vector<24x32xf32> -> vector<24x32xf32>
    %718 = arith.addf %673, %717 : vector<24x32xf32>
    %c2_453 = arith.constant 2 : index
    %c0_454 = arith.constant 0 : index
    %c0_455 = arith.constant 0 : index
    %719 = vector.load %arg34[%c2_453, %c0_454, %c0_455] : memref<4x32x8xbf16, #tpu.memory_space<vmem>>, vector<1x32x8xbf16>
    %720 = vector.shape_cast %719 : vector<1x32x8xbf16> to vector<32x8xbf16>
    %cst_456 = arith.constant dense<0.000000e+00> : vector<24x8xf32>
    %721 = tpu.matmul %626, %720, %cst_456 {dimension_numbers = #tpu.dot_dimension_numbers<[1], [0], [0], [1], [0, 0, 1, 1], [], []>} : vector<24x32xbf16>, vector<32x8xbf16>, vector<24x8xf32> -> vector<24x8xf32>
    %c2_457 = arith.constant 2 : index
    %c0_458 = arith.constant 0 : index
    %c0_459 = arith.constant 0 : index
    %722 = vector.load %arg30[%c2_457, %c0_458, %c0_459] : memref<4x1x8xf32, #tpu.memory_space<vmem>>, vector<1x1x8xf32>
    %723 = vector.shape_cast %722 : vector<1x1x8xf32> to vector<1x8xf32>
    %724 = vector.broadcast %723 : vector<1x8xf32> to vector<24x8xf32>
    %725 = arith.addf %721, %724 : vector<24x8xf32>
    %c2_460 = arith.constant 2 : index
    %c0_461 = arith.constant 0 : index
    %c0_462 = arith.constant 0 : index
    %726 = vector.load %arg32[%c2_460, %c0_461, %c0_462] : memref<4x32x8xbf16, #tpu.memory_space<vmem>>, vector<1x32x8xbf16>
    %727 = vector.shape_cast %726 : vector<1x32x8xbf16> to vector<32x8xbf16>
    %cst_463 = arith.constant dense<0.000000e+00> : vector<24x8xf32>
    %728 = tpu.matmul %627, %727, %cst_463 {dimension_numbers = #tpu.dot_dimension_numbers<[1], [0], [0], [1], [0, 0, 1, 1], [], []>} : vector<24x32xbf16>, vector<32x8xbf16>, vector<24x8xf32> -> vector<24x8xf32>
    %c2_464 = arith.constant 2 : index
    %c0_465 = arith.constant 0 : index
    %c0_466 = arith.constant 0 : index
    %729 = vector.load %arg28[%c2_464, %c0_465, %c0_466] : memref<4x1x8xf32, #tpu.memory_space<vmem>>, vector<1x1x8xf32>
    %730 = vector.shape_cast %729 : vector<1x1x8xf32> to vector<1x8xf32>
    %731 = vector.broadcast %730 : vector<1x8xf32> to vector<24x8xf32>
    %732 = arith.addf %728, %731 : vector<24x8xf32>
    %c2_467 = arith.constant 2 : index
    %c0_468 = arith.constant 0 : index
    %c0_469 = arith.constant 0 : index
    %733 = vector.load %arg35[%c2_467, %c0_468, %c0_469] : memref<4x32x8xbf16, #tpu.memory_space<vmem>>, vector<1x32x8xbf16>
    %734 = vector.shape_cast %733 : vector<1x32x8xbf16> to vector<32x8xbf16>
    %cst_470 = arith.constant dense<0.000000e+00> : vector<24x8xf32>
    %735 = tpu.matmul %627, %734, %cst_470 {dimension_numbers = #tpu.dot_dimension_numbers<[1], [0], [0], [1], [0, 0, 1, 1], [], []>} : vector<24x32xbf16>, vector<32x8xbf16>, vector<24x8xf32> -> vector<24x8xf32>
    %c2_471 = arith.constant 2 : index
    %c0_472 = arith.constant 0 : index
    %c0_473 = arith.constant 0 : index
    %736 = vector.load %arg31[%c2_471, %c0_472, %c0_473] : memref<4x1x8xf32, #tpu.memory_space<vmem>>, vector<1x1x8xf32>
    %737 = vector.shape_cast %736 : vector<1x1x8xf32> to vector<1x8xf32>
    %738 = vector.broadcast %737 : vector<1x8xf32> to vector<24x8xf32>
    %739 = arith.addf %735, %738 : vector<24x8xf32>
    %cst_474 = arith.constant 0.353553385 : f32
    %740 = vector.broadcast %cst_474 : f32 to vector<24x8xf32>
    %741 = arith.mulf %725, %740 : vector<24x8xf32>
    %742 = arith.truncf %741 : vector<24x8xf32> to vector<24x8xbf16>
    %743 = arith.truncf %732 : vector<24x8xf32> to vector<24x8xbf16>
    %cst_475 = arith.constant dense<0.000000e+00> : vector<24x24xf32>
    %744 = tpu.matmul %742, %743, %cst_475 {dimension_numbers = #tpu.dot_dimension_numbers<[1], [1], [0], [0], [0, 0, 1, 0], [], []>} : vector<24x8xbf16>, vector<24x8xbf16>, vector<24x24xf32> -> vector<24x24xf32>
    %745 = arith.addf %744, %596 : vector<24x24xf32>
    %cst_476 = arith.constant dense<0xFF800000> : vector<24xf32>
    %746 = vector.multi_reduction <maximumf>, %745, %cst_476 [1] : vector<24x24xf32> to vector<24xf32>
    %747 = vector.shape_cast %746 : vector<24xf32> to vector<24x1xf32>
    %748 = vector.broadcast %747 : vector<24x1xf32> to vector<24x24xf32>
    %749 = arith.subf %745, %748 : vector<24x24xf32>
    %750 = math.exp %749 : vector<24x24xf32>
    %cst_477 = arith.constant dense<0.000000e+00> : vector<24xf32>
    %751 = vector.multi_reduction <add>, %750, %cst_477 [1] : vector<24x24xf32> to vector<24xf32>
    %752 = vector.shape_cast %751 : vector<24xf32> to vector<24x1xf32>
    %753 = tpu.reciprocal %752 {approx = true} : vector<24x1xf32> -> vector<24x1xf32>
    %754 = vector.broadcast %753 : vector<24x1xf32> to vector<24x24xf32>
    %755 = arith.mulf %750, %754 : vector<24x24xf32>
    %756 = arith.truncf %755 : vector<24x24xf32> to vector<24x24xbf16>
    %757 = arith.truncf %739 : vector<24x8xf32> to vector<24x8xbf16>
    %cst_478 = arith.constant dense<0.000000e+00> : vector<24x8xf32>
    %758 = tpu.matmul %756, %757, %cst_478 {dimension_numbers = #tpu.dot_dimension_numbers<[1], [0], [0], [1], [0, 0, 1, 1], [], []>} : vector<24x24xbf16>, vector<24x8xbf16>, vector<24x8xf32> -> vector<24x8xf32>
    %759 = arith.truncf %758 : vector<24x8xf32> to vector<24x8xbf16>
    %c2_479 = arith.constant 2 : index
    %c0_480 = arith.constant 0 : index
    %c0_481 = arith.constant 0 : index
    %760 = vector.load %arg33[%c2_479, %c0_480, %c0_481] : memref<4x8x32xbf16, #tpu.memory_space<vmem>>, vector<1x8x32xbf16>
    %761 = vector.shape_cast %760 : vector<1x8x32xbf16> to vector<8x32xbf16>
    %cst_482 = arith.constant dense<0.000000e+00> : vector<24x32xf32>
    %762 = tpu.matmul %759, %761, %cst_482 {dimension_numbers = #tpu.dot_dimension_numbers<[1], [0], [0], [1], [0, 0, 1, 1], [], []>} : vector<24x8xbf16>, vector<8x32xbf16>, vector<24x32xf32> -> vector<24x32xf32>
    %763 = arith.addf %718, %762 : vector<24x32xf32>
    %c3_483 = arith.constant 3 : index
    %c0_484 = arith.constant 0 : index
    %c0_485 = arith.constant 0 : index
    %764 = vector.load %arg34[%c3_483, %c0_484, %c0_485] : memref<4x32x8xbf16, #tpu.memory_space<vmem>>, vector<1x32x8xbf16>
    %765 = vector.shape_cast %764 : vector<1x32x8xbf16> to vector<32x8xbf16>
    %cst_486 = arith.constant dense<0.000000e+00> : vector<24x8xf32>
    %766 = tpu.matmul %626, %765, %cst_486 {dimension_numbers = #tpu.dot_dimension_numbers<[1], [0], [0], [1], [0, 0, 1, 1], [], []>} : vector<24x32xbf16>, vector<32x8xbf16>, vector<24x8xf32> -> vector<24x8xf32>
    %c3_487 = arith.constant 3 : index
    %c0_488 = arith.constant 0 : index
    %c0_489 = arith.constant 0 : index
    %767 = vector.load %arg30[%c3_487, %c0_488, %c0_489] : memref<4x1x8xf32, #tpu.memory_space<vmem>>, vector<1x1x8xf32>
    %768 = vector.shape_cast %767 : vector<1x1x8xf32> to vector<1x8xf32>
    %769 = vector.broadcast %768 : vector<1x8xf32> to vector<24x8xf32>
    %770 = arith.addf %766, %769 : vector<24x8xf32>
    %c3_490 = arith.constant 3 : index
    %c0_491 = arith.constant 0 : index
    %c0_492 = arith.constant 0 : index
    %771 = vector.load %arg32[%c3_490, %c0_491, %c0_492] : memref<4x32x8xbf16, #tpu.memory_space<vmem>>, vector<1x32x8xbf16>
    %772 = vector.shape_cast %771 : vector<1x32x8xbf16> to vector<32x8xbf16>
    %cst_493 = arith.constant dense<0.000000e+00> : vector<24x8xf32>
    %773 = tpu.matmul %627, %772, %cst_493 {dimension_numbers = #tpu.dot_dimension_numbers<[1], [0], [0], [1], [0, 0, 1, 1], [], []>} : vector<24x32xbf16>, vector<32x8xbf16>, vector<24x8xf32> -> vector<24x8xf32>
    %c3_494 = arith.constant 3 : index
    %c0_495 = arith.constant 0 : index
    %c0_496 = arith.constant 0 : index
    %774 = vector.load %arg28[%c3_494, %c0_495, %c0_496] : memref<4x1x8xf32, #tpu.memory_space<vmem>>, vector<1x1x8xf32>
    %775 = vector.shape_cast %774 : vector<1x1x8xf32> to vector<1x8xf32>
    %776 = vector.broadcast %775 : vector<1x8xf32> to vector<24x8xf32>
    %777 = arith.addf %773, %776 : vector<24x8xf32>
    %c3_497 = arith.constant 3 : index
    %c0_498 = arith.constant 0 : index
    %c0_499 = arith.constant 0 : index
    %778 = vector.load %arg35[%c3_497, %c0_498, %c0_499] : memref<4x32x8xbf16, #tpu.memory_space<vmem>>, vector<1x32x8xbf16>
    %779 = vector.shape_cast %778 : vector<1x32x8xbf16> to vector<32x8xbf16>
    %cst_500 = arith.constant dense<0.000000e+00> : vector<24x8xf32>
    %780 = tpu.matmul %627, %779, %cst_500 {dimension_numbers = #tpu.dot_dimension_numbers<[1], [0], [0], [1], [0, 0, 1, 1], [], []>} : vector<24x32xbf16>, vector<32x8xbf16>, vector<24x8xf32> -> vector<24x8xf32>
    %c3_501 = arith.constant 3 : index
    %c0_502 = arith.constant 0 : index
    %c0_503 = arith.constant 0 : index
    %781 = vector.load %arg31[%c3_501, %c0_502, %c0_503] : memref<4x1x8xf32, #tpu.memory_space<vmem>>, vector<1x1x8xf32>
    %782 = vector.shape_cast %781 : vector<1x1x8xf32> to vector<1x8xf32>
    %783 = vector.broadcast %782 : vector<1x8xf32> to vector<24x8xf32>
    %784 = arith.addf %780, %783 : vector<24x8xf32>
    %cst_504 = arith.constant 0.353553385 : f32
    %785 = vector.broadcast %cst_504 : f32 to vector<24x8xf32>
    %786 = arith.mulf %770, %785 : vector<24x8xf32>
    %787 = arith.truncf %786 : vector<24x8xf32> to vector<24x8xbf16>
    %788 = arith.truncf %777 : vector<24x8xf32> to vector<24x8xbf16>
    %cst_505 = arith.constant dense<0.000000e+00> : vector<24x24xf32>
    %789 = tpu.matmul %787, %788, %cst_505 {dimension_numbers = #tpu.dot_dimension_numbers<[1], [1], [0], [0], [0, 0, 1, 0], [], []>} : vector<24x8xbf16>, vector<24x8xbf16>, vector<24x24xf32> -> vector<24x24xf32>
    %790 = arith.addf %789, %596 : vector<24x24xf32>
    %cst_506 = arith.constant dense<0xFF800000> : vector<24xf32>
    %791 = vector.multi_reduction <maximumf>, %790, %cst_506 [1] : vector<24x24xf32> to vector<24xf32>
    %792 = vector.shape_cast %791 : vector<24xf32> to vector<24x1xf32>
    %793 = vector.broadcast %792 : vector<24x1xf32> to vector<24x24xf32>
    %794 = arith.subf %790, %793 : vector<24x24xf32>
    %795 = math.exp %794 : vector<24x24xf32>
    %cst_507 = arith.constant dense<0.000000e+00> : vector<24xf32>
    %796 = vector.multi_reduction <add>, %795, %cst_507 [1] : vector<24x24xf32> to vector<24xf32>
    %797 = vector.shape_cast %796 : vector<24xf32> to vector<24x1xf32>
    %798 = tpu.reciprocal %797 {approx = true} : vector<24x1xf32> -> vector<24x1xf32>
    %799 = vector.broadcast %798 : vector<24x1xf32> to vector<24x24xf32>
    %800 = arith.mulf %795, %799 : vector<24x24xf32>
    %801 = arith.truncf %800 : vector<24x24xf32> to vector<24x24xbf16>
    %802 = arith.truncf %784 : vector<24x8xf32> to vector<24x8xbf16>
    %cst_508 = arith.constant dense<0.000000e+00> : vector<24x8xf32>
    %803 = tpu.matmul %801, %802, %cst_508 {dimension_numbers = #tpu.dot_dimension_numbers<[1], [0], [0], [1], [0, 0, 1, 1], [], []>} : vector<24x24xbf16>, vector<24x8xbf16>, vector<24x8xf32> -> vector<24x8xf32>
    %804 = arith.truncf %803 : vector<24x8xf32> to vector<24x8xbf16>
    %c3_509 = arith.constant 3 : index
    %c0_510 = arith.constant 0 : index
    %c0_511 = arith.constant 0 : index
    %805 = vector.load %arg33[%c3_509, %c0_510, %c0_511] : memref<4x8x32xbf16, #tpu.memory_space<vmem>>, vector<1x8x32xbf16>
    %806 = vector.shape_cast %805 : vector<1x8x32xbf16> to vector<8x32xbf16>
    %cst_512 = arith.constant dense<0.000000e+00> : vector<24x32xf32>
    %807 = tpu.matmul %804, %806, %cst_512 {dimension_numbers = #tpu.dot_dimension_numbers<[1], [0], [0], [1], [0, 0, 1, 1], [], []>} : vector<24x8xbf16>, vector<8x32xbf16>, vector<24x32xf32> -> vector<24x32xf32>
    %808 = arith.addf %763, %807 : vector<24x32xf32>
    %c0_513 = arith.constant 0 : index
    %c0_514 = arith.constant 0 : index
    %809 = vector.load %arg29[%c0_513, %c0_514] : memref<1x32xf32, #tpu.memory_space<vmem>>, vector<1x32xf32>
    %810 = vector.broadcast %809 : vector<1x32xf32> to vector<24x32xf32>
    %811 = arith.addf %808, %810 : vector<24x32xf32>
    %812 = arith.addf %625, %811 : vector<24x32xf32>
    %cst_515 = arith.constant dense<0.000000e+00> : vector<24xf32>
    %813 = vector.multi_reduction <add>, %812, %cst_515 [1] : vector<24x32xf32> to vector<24xf32>
    %814 = vector.shape_cast %813 : vector<24xf32> to vector<24x1xf32>
    %cst_516 = arith.constant 3.200000e+01 : f32
    %815 = vector.broadcast %cst_516 : f32 to vector<24x1xf32>
    %816 = arith.divf %814, %815 : vector<24x1xf32>
    %817 = vector.broadcast %816 : vector<24x1xf32> to vector<24x32xf32>
    %818 = arith.subf %812, %817 : vector<24x32xf32>
    %819 = arith.mulf %818, %818 : vector<24x32xf32>
    %cst_517 = arith.constant dense<0.000000e+00> : vector<24xf32>
    %820 = vector.multi_reduction <add>, %819, %cst_517 [1] : vector<24x32xf32> to vector<24xf32>
    %821 = vector.shape_cast %820 : vector<24xf32> to vector<24x1xf32>
    %cst_518 = arith.constant 3.200000e+01 : f32
    %822 = vector.broadcast %cst_518 : f32 to vector<24x1xf32>
    %823 = arith.divf %821, %822 : vector<24x1xf32>
    %cst_519 = arith.constant 9.99999974E-6 : f32
    %824 = vector.broadcast %cst_519 : f32 to vector<24x1xf32>
    %825 = arith.addf %823, %824 : vector<24x1xf32>
    %826 = math.rsqrt %825 : vector<24x1xf32>
    %827 = vector.broadcast %826 : vector<24x1xf32> to vector<24x32xf32>
    %828 = arith.mulf %818, %827 : vector<24x32xf32>
    %c0_520 = arith.constant 0 : index
    %c0_521 = arith.constant 0 : index
    %829 = vector.load %arg23[%c0_520, %c0_521] : memref<1x32xf32, #tpu.memory_space<vmem>>, vector<1x32xf32>
    %830 = vector.broadcast %829 : vector<1x32xf32> to vector<24x32xf32>
    %831 = arith.mulf %828, %830 : vector<24x32xf32>
    %c0_522 = arith.constant 0 : index
    %c0_523 = arith.constant 0 : index
    %832 = vector.load %arg22[%c0_522, %c0_523] : memref<1x32xf32, #tpu.memory_space<vmem>>, vector<1x32xf32>
    %833 = vector.broadcast %832 : vector<1x32xf32> to vector<24x32xf32>
    %834 = arith.addf %831, %833 : vector<24x32xf32>
    %835 = arith.truncf %834 : vector<24x32xf32> to vector<24x32xbf16>
    %836 = arith.truncf %595 : vector<8x32xf32> to vector<8x32xbf16>
    %cst_524 = arith.constant 0.000000e+00 : f32
    %837 = vector.broadcast %cst_524 : f32 to vector<24x32xf32>
    %c0_525 = arith.constant 0 : index
    %c0_526 = arith.constant 0 : index
    %c0_527 = arith.constant 0 : index
    %838 = vector.load %arg16[%c0_525, %c0_526, %c0_527] : memref<4x32x8xbf16, #tpu.memory_space<vmem>>, vector<1x32x8xbf16>
    %839 = vector.shape_cast %838 : vector<1x32x8xbf16> to vector<32x8xbf16>
    %cst_528 = arith.constant dense<0.000000e+00> : vector<24x8xf32>
    %840 = tpu.matmul %835, %839, %cst_528 {dimension_numbers = #tpu.dot_dimension_numbers<[1], [0], [0], [1], [0, 0, 1, 1], [], []>} : vector<24x32xbf16>, vector<32x8xbf16>, vector<24x8xf32> -> vector<24x8xf32>
    %c0_529 = arith.constant 0 : index
    %c0_530 = arith.constant 0 : index
    %c0_531 = arith.constant 0 : index
    %841 = vector.load %arg12[%c0_529, %c0_530, %c0_531] : memref<4x1x8xf32, #tpu.memory_space<vmem>>, vector<1x1x8xf32>
    %842 = vector.shape_cast %841 : vector<1x1x8xf32> to vector<1x8xf32>
    %843 = vector.broadcast %842 : vector<1x8xf32> to vector<24x8xf32>
    %844 = arith.addf %840, %843 : vector<24x8xf32>
    %c0_532 = arith.constant 0 : index
    %c0_533 = arith.constant 0 : index
    %c0_534 = arith.constant 0 : index
    %845 = vector.load %arg14[%c0_532, %c0_533, %c0_534] : memref<4x32x8xbf16, #tpu.memory_space<vmem>>, vector<1x32x8xbf16>
    %846 = vector.shape_cast %845 : vector<1x32x8xbf16> to vector<32x8xbf16>
    %cst_535 = arith.constant dense<0.000000e+00> : vector<8x8xf32>
    %847 = tpu.matmul %836, %846, %cst_535 {dimension_numbers = #tpu.dot_dimension_numbers<[1], [0], [0], [1], [0, 0, 1, 1], [], []>} : vector<8x32xbf16>, vector<32x8xbf16>, vector<8x8xf32> -> vector<8x8xf32>
    %c0_536 = arith.constant 0 : index
    %c0_537 = arith.constant 0 : index
    %c0_538 = arith.constant 0 : index
    %848 = vector.load %arg10[%c0_536, %c0_537, %c0_538] : memref<4x1x8xf32, #tpu.memory_space<vmem>>, vector<1x1x8xf32>
    %849 = vector.shape_cast %848 : vector<1x1x8xf32> to vector<1x8xf32>
    %850 = vector.broadcast %849 : vector<1x8xf32> to vector<8x8xf32>
    %851 = arith.addf %847, %850 : vector<8x8xf32>
    %c0_539 = arith.constant 0 : index
    %c0_540 = arith.constant 0 : index
    %c0_541 = arith.constant 0 : index
    %852 = vector.load %arg17[%c0_539, %c0_540, %c0_541] : memref<4x32x8xbf16, #tpu.memory_space<vmem>>, vector<1x32x8xbf16>
    %853 = vector.shape_cast %852 : vector<1x32x8xbf16> to vector<32x8xbf16>
    %cst_542 = arith.constant dense<0.000000e+00> : vector<8x8xf32>
    %854 = tpu.matmul %836, %853, %cst_542 {dimension_numbers = #tpu.dot_dimension_numbers<[1], [0], [0], [1], [0, 0, 1, 1], [], []>} : vector<8x32xbf16>, vector<32x8xbf16>, vector<8x8xf32> -> vector<8x8xf32>
    %c0_543 = arith.constant 0 : index
    %c0_544 = arith.constant 0 : index
    %c0_545 = arith.constant 0 : index
    %855 = vector.load %arg13[%c0_543, %c0_544, %c0_545] : memref<4x1x8xf32, #tpu.memory_space<vmem>>, vector<1x1x8xf32>
    %856 = vector.shape_cast %855 : vector<1x1x8xf32> to vector<1x8xf32>
    %857 = vector.broadcast %856 : vector<1x8xf32> to vector<8x8xf32>
    %858 = arith.addf %854, %857 : vector<8x8xf32>
    %cst_546 = arith.constant 0.353553385 : f32
    %859 = vector.broadcast %cst_546 : f32 to vector<24x8xf32>
    %860 = arith.mulf %844, %859 : vector<24x8xf32>
    %861 = arith.truncf %860 : vector<24x8xf32> to vector<24x8xbf16>
    %862 = arith.truncf %851 : vector<8x8xf32> to vector<8x8xbf16>
    %cst_547 = arith.constant dense<0.000000e+00> : vector<24x8xf32>
    %863 = tpu.matmul %861, %862, %cst_547 {dimension_numbers = #tpu.dot_dimension_numbers<[1], [1], [0], [0], [0, 0, 1, 0], [], []>} : vector<24x8xbf16>, vector<8x8xbf16>, vector<24x8xf32> -> vector<24x8xf32>
    %cst_548 = arith.constant dense<0xFF800000> : vector<24xf32>
    %864 = vector.multi_reduction <maximumf>, %863, %cst_548 [1] : vector<24x8xf32> to vector<24xf32>
    %865 = vector.shape_cast %864 : vector<24xf32> to vector<24x1xf32>
    %866 = vector.broadcast %865 : vector<24x1xf32> to vector<24x8xf32>
    %867 = arith.subf %863, %866 : vector<24x8xf32>
    %868 = math.exp %867 : vector<24x8xf32>
    %cst_549 = arith.constant dense<0.000000e+00> : vector<24xf32>
    %869 = vector.multi_reduction <add>, %868, %cst_549 [1] : vector<24x8xf32> to vector<24xf32>
    %870 = vector.shape_cast %869 : vector<24xf32> to vector<24x1xf32>
    %871 = tpu.reciprocal %870 {approx = true} : vector<24x1xf32> -> vector<24x1xf32>
    %872 = vector.broadcast %871 : vector<24x1xf32> to vector<24x8xf32>
    %873 = arith.mulf %868, %872 : vector<24x8xf32>
    %874 = arith.truncf %873 : vector<24x8xf32> to vector<24x8xbf16>
    %875 = arith.truncf %858 : vector<8x8xf32> to vector<8x8xbf16>
    %cst_550 = arith.constant dense<0.000000e+00> : vector<24x8xf32>
    %876 = tpu.matmul %874, %875, %cst_550 {dimension_numbers = #tpu.dot_dimension_numbers<[1], [0], [0], [1], [0, 0, 1, 1], [], []>} : vector<24x8xbf16>, vector<8x8xbf16>, vector<24x8xf32> -> vector<24x8xf32>
    %877 = arith.truncf %876 : vector<24x8xf32> to vector<24x8xbf16>
    %c0_551 = arith.constant 0 : index
    %c0_552 = arith.constant 0 : index
    %c0_553 = arith.constant 0 : index
    %878 = vector.load %arg15[%c0_551, %c0_552, %c0_553] : memref<4x8x32xbf16, #tpu.memory_space<vmem>>, vector<1x8x32xbf16>
    %879 = vector.shape_cast %878 : vector<1x8x32xbf16> to vector<8x32xbf16>
    %cst_554 = arith.constant dense<0.000000e+00> : vector<24x32xf32>
    %880 = tpu.matmul %877, %879, %cst_554 {dimension_numbers = #tpu.dot_dimension_numbers<[1], [0], [0], [1], [0, 0, 1, 1], [], []>} : vector<24x8xbf16>, vector<8x32xbf16>, vector<24x32xf32> -> vector<24x32xf32>
    %881 = arith.addf %837, %880 : vector<24x32xf32>
    %c1_555 = arith.constant 1 : index
    %c0_556 = arith.constant 0 : index
    %c0_557 = arith.constant 0 : index
    %882 = vector.load %arg16[%c1_555, %c0_556, %c0_557] : memref<4x32x8xbf16, #tpu.memory_space<vmem>>, vector<1x32x8xbf16>
    %883 = vector.shape_cast %882 : vector<1x32x8xbf16> to vector<32x8xbf16>
    %cst_558 = arith.constant dense<0.000000e+00> : vector<24x8xf32>
    %884 = tpu.matmul %835, %883, %cst_558 {dimension_numbers = #tpu.dot_dimension_numbers<[1], [0], [0], [1], [0, 0, 1, 1], [], []>} : vector<24x32xbf16>, vector<32x8xbf16>, vector<24x8xf32> -> vector<24x8xf32>
    %c1_559 = arith.constant 1 : index
    %c0_560 = arith.constant 0 : index
    %c0_561 = arith.constant 0 : index
    %885 = vector.load %arg12[%c1_559, %c0_560, %c0_561] : memref<4x1x8xf32, #tpu.memory_space<vmem>>, vector<1x1x8xf32>
    %886 = vector.shape_cast %885 : vector<1x1x8xf32> to vector<1x8xf32>
    %887 = vector.broadcast %886 : vector<1x8xf32> to vector<24x8xf32>
    %888 = arith.addf %884, %887 : vector<24x8xf32>
    %c1_562 = arith.constant 1 : index
    %c0_563 = arith.constant 0 : index
    %c0_564 = arith.constant 0 : index
    %889 = vector.load %arg14[%c1_562, %c0_563, %c0_564] : memref<4x32x8xbf16, #tpu.memory_space<vmem>>, vector<1x32x8xbf16>
    %890 = vector.shape_cast %889 : vector<1x32x8xbf16> to vector<32x8xbf16>
    %cst_565 = arith.constant dense<0.000000e+00> : vector<8x8xf32>
    %891 = tpu.matmul %836, %890, %cst_565 {dimension_numbers = #tpu.dot_dimension_numbers<[1], [0], [0], [1], [0, 0, 1, 1], [], []>} : vector<8x32xbf16>, vector<32x8xbf16>, vector<8x8xf32> -> vector<8x8xf32>
    %c1_566 = arith.constant 1 : index
    %c0_567 = arith.constant 0 : index
    %c0_568 = arith.constant 0 : index
    %892 = vector.load %arg10[%c1_566, %c0_567, %c0_568] : memref<4x1x8xf32, #tpu.memory_space<vmem>>, vector<1x1x8xf32>
    %893 = vector.shape_cast %892 : vector<1x1x8xf32> to vector<1x8xf32>
    %894 = vector.broadcast %893 : vector<1x8xf32> to vector<8x8xf32>
    %895 = arith.addf %891, %894 : vector<8x8xf32>
    %c1_569 = arith.constant 1 : index
    %c0_570 = arith.constant 0 : index
    %c0_571 = arith.constant 0 : index
    %896 = vector.load %arg17[%c1_569, %c0_570, %c0_571] : memref<4x32x8xbf16, #tpu.memory_space<vmem>>, vector<1x32x8xbf16>
    %897 = vector.shape_cast %896 : vector<1x32x8xbf16> to vector<32x8xbf16>
    %cst_572 = arith.constant dense<0.000000e+00> : vector<8x8xf32>
    %898 = tpu.matmul %836, %897, %cst_572 {dimension_numbers = #tpu.dot_dimension_numbers<[1], [0], [0], [1], [0, 0, 1, 1], [], []>} : vector<8x32xbf16>, vector<32x8xbf16>, vector<8x8xf32> -> vector<8x8xf32>
    %c1_573 = arith.constant 1 : index
    %c0_574 = arith.constant 0 : index
    %c0_575 = arith.constant 0 : index
    %899 = vector.load %arg13[%c1_573, %c0_574, %c0_575] : memref<4x1x8xf32, #tpu.memory_space<vmem>>, vector<1x1x8xf32>
    %900 = vector.shape_cast %899 : vector<1x1x8xf32> to vector<1x8xf32>
    %901 = vector.broadcast %900 : vector<1x8xf32> to vector<8x8xf32>
    %902 = arith.addf %898, %901 : vector<8x8xf32>
    %cst_576 = arith.constant 0.353553385 : f32
    %903 = vector.broadcast %cst_576 : f32 to vector<24x8xf32>
    %904 = arith.mulf %888, %903 : vector<24x8xf32>
    %905 = arith.truncf %904 : vector<24x8xf32> to vector<24x8xbf16>
    %906 = arith.truncf %895 : vector<8x8xf32> to vector<8x8xbf16>
    %cst_577 = arith.constant dense<0.000000e+00> : vector<24x8xf32>
    %907 = tpu.matmul %905, %906, %cst_577 {dimension_numbers = #tpu.dot_dimension_numbers<[1], [1], [0], [0], [0, 0, 1, 0], [], []>} : vector<24x8xbf16>, vector<8x8xbf16>, vector<24x8xf32> -> vector<24x8xf32>
    %cst_578 = arith.constant dense<0xFF800000> : vector<24xf32>
    %908 = vector.multi_reduction <maximumf>, %907, %cst_578 [1] : vector<24x8xf32> to vector<24xf32>
    %909 = vector.shape_cast %908 : vector<24xf32> to vector<24x1xf32>
    %910 = vector.broadcast %909 : vector<24x1xf32> to vector<24x8xf32>
    %911 = arith.subf %907, %910 : vector<24x8xf32>
    %912 = math.exp %911 : vector<24x8xf32>
    %cst_579 = arith.constant dense<0.000000e+00> : vector<24xf32>
    %913 = vector.multi_reduction <add>, %912, %cst_579 [1] : vector<24x8xf32> to vector<24xf32>
    %914 = vector.shape_cast %913 : vector<24xf32> to vector<24x1xf32>
    %915 = tpu.reciprocal %914 {approx = true} : vector<24x1xf32> -> vector<24x1xf32>
    %916 = vector.broadcast %915 : vector<24x1xf32> to vector<24x8xf32>
    %917 = arith.mulf %912, %916 : vector<24x8xf32>
    %918 = arith.truncf %917 : vector<24x8xf32> to vector<24x8xbf16>
    %919 = arith.truncf %902 : vector<8x8xf32> to vector<8x8xbf16>
    %cst_580 = arith.constant dense<0.000000e+00> : vector<24x8xf32>
    %920 = tpu.matmul %918, %919, %cst_580 {dimension_numbers = #tpu.dot_dimension_numbers<[1], [0], [0], [1], [0, 0, 1, 1], [], []>} : vector<24x8xbf16>, vector<8x8xbf16>, vector<24x8xf32> -> vector<24x8xf32>
    %921 = arith.truncf %920 : vector<24x8xf32> to vector<24x8xbf16>
    %c1_581 = arith.constant 1 : index
    %c0_582 = arith.constant 0 : index
    %c0_583 = arith.constant 0 : index
    %922 = vector.load %arg15[%c1_581, %c0_582, %c0_583] : memref<4x8x32xbf16, #tpu.memory_space<vmem>>, vector<1x8x32xbf16>
    %923 = vector.shape_cast %922 : vector<1x8x32xbf16> to vector<8x32xbf16>
    %cst_584 = arith.constant dense<0.000000e+00> : vector<24x32xf32>
    %924 = tpu.matmul %921, %923, %cst_584 {dimension_numbers = #tpu.dot_dimension_numbers<[1], [0], [0], [1], [0, 0, 1, 1], [], []>} : vector<24x8xbf16>, vector<8x32xbf16>, vector<24x32xf32> -> vector<24x32xf32>
    %925 = arith.addf %881, %924 : vector<24x32xf32>
    %c2_585 = arith.constant 2 : index
    %c0_586 = arith.constant 0 : index
    %c0_587 = arith.constant 0 : index
    %926 = vector.load %arg16[%c2_585, %c0_586, %c0_587] : memref<4x32x8xbf16, #tpu.memory_space<vmem>>, vector<1x32x8xbf16>
    %927 = vector.shape_cast %926 : vector<1x32x8xbf16> to vector<32x8xbf16>
    %cst_588 = arith.constant dense<0.000000e+00> : vector<24x8xf32>
    %928 = tpu.matmul %835, %927, %cst_588 {dimension_numbers = #tpu.dot_dimension_numbers<[1], [0], [0], [1], [0, 0, 1, 1], [], []>} : vector<24x32xbf16>, vector<32x8xbf16>, vector<24x8xf32> -> vector<24x8xf32>
    %c2_589 = arith.constant 2 : index
    %c0_590 = arith.constant 0 : index
    %c0_591 = arith.constant 0 : index
    %929 = vector.load %arg12[%c2_589, %c0_590, %c0_591] : memref<4x1x8xf32, #tpu.memory_space<vmem>>, vector<1x1x8xf32>
    %930 = vector.shape_cast %929 : vector<1x1x8xf32> to vector<1x8xf32>
    %931 = vector.broadcast %930 : vector<1x8xf32> to vector<24x8xf32>
    %932 = arith.addf %928, %931 : vector<24x8xf32>
    %c2_592 = arith.constant 2 : index
    %c0_593 = arith.constant 0 : index
    %c0_594 = arith.constant 0 : index
    %933 = vector.load %arg14[%c2_592, %c0_593, %c0_594] : memref<4x32x8xbf16, #tpu.memory_space<vmem>>, vector<1x32x8xbf16>
    %934 = vector.shape_cast %933 : vector<1x32x8xbf16> to vector<32x8xbf16>
    %cst_595 = arith.constant dense<0.000000e+00> : vector<8x8xf32>
    %935 = tpu.matmul %836, %934, %cst_595 {dimension_numbers = #tpu.dot_dimension_numbers<[1], [0], [0], [1], [0, 0, 1, 1], [], []>} : vector<8x32xbf16>, vector<32x8xbf16>, vector<8x8xf32> -> vector<8x8xf32>
    %c2_596 = arith.constant 2 : index
    %c0_597 = arith.constant 0 : index
    %c0_598 = arith.constant 0 : index
    %936 = vector.load %arg10[%c2_596, %c0_597, %c0_598] : memref<4x1x8xf32, #tpu.memory_space<vmem>>, vector<1x1x8xf32>
    %937 = vector.shape_cast %936 : vector<1x1x8xf32> to vector<1x8xf32>
    %938 = vector.broadcast %937 : vector<1x8xf32> to vector<8x8xf32>
    %939 = arith.addf %935, %938 : vector<8x8xf32>
    %c2_599 = arith.constant 2 : index
    %c0_600 = arith.constant 0 : index
    %c0_601 = arith.constant 0 : index
    %940 = vector.load %arg17[%c2_599, %c0_600, %c0_601] : memref<4x32x8xbf16, #tpu.memory_space<vmem>>, vector<1x32x8xbf16>
    %941 = vector.shape_cast %940 : vector<1x32x8xbf16> to vector<32x8xbf16>
    %cst_602 = arith.constant dense<0.000000e+00> : vector<8x8xf32>
    %942 = tpu.matmul %836, %941, %cst_602 {dimension_numbers = #tpu.dot_dimension_numbers<[1], [0], [0], [1], [0, 0, 1, 1], [], []>} : vector<8x32xbf16>, vector<32x8xbf16>, vector<8x8xf32> -> vector<8x8xf32>
    %c2_603 = arith.constant 2 : index
    %c0_604 = arith.constant 0 : index
    %c0_605 = arith.constant 0 : index
    %943 = vector.load %arg13[%c2_603, %c0_604, %c0_605] : memref<4x1x8xf32, #tpu.memory_space<vmem>>, vector<1x1x8xf32>
    %944 = vector.shape_cast %943 : vector<1x1x8xf32> to vector<1x8xf32>
    %945 = vector.broadcast %944 : vector<1x8xf32> to vector<8x8xf32>
    %946 = arith.addf %942, %945 : vector<8x8xf32>
    %cst_606 = arith.constant 0.353553385 : f32
    %947 = vector.broadcast %cst_606 : f32 to vector<24x8xf32>
    %948 = arith.mulf %932, %947 : vector<24x8xf32>
    %949 = arith.truncf %948 : vector<24x8xf32> to vector<24x8xbf16>
    %950 = arith.truncf %939 : vector<8x8xf32> to vector<8x8xbf16>
    %cst_607 = arith.constant dense<0.000000e+00> : vector<24x8xf32>
    %951 = tpu.matmul %949, %950, %cst_607 {dimension_numbers = #tpu.dot_dimension_numbers<[1], [1], [0], [0], [0, 0, 1, 0], [], []>} : vector<24x8xbf16>, vector<8x8xbf16>, vector<24x8xf32> -> vector<24x8xf32>
    %cst_608 = arith.constant dense<0xFF800000> : vector<24xf32>
    %952 = vector.multi_reduction <maximumf>, %951, %cst_608 [1] : vector<24x8xf32> to vector<24xf32>
    %953 = vector.shape_cast %952 : vector<24xf32> to vector<24x1xf32>
    %954 = vector.broadcast %953 : vector<24x1xf32> to vector<24x8xf32>
    %955 = arith.subf %951, %954 : vector<24x8xf32>
    %956 = math.exp %955 : vector<24x8xf32>
    %cst_609 = arith.constant dense<0.000000e+00> : vector<24xf32>
    %957 = vector.multi_reduction <add>, %956, %cst_609 [1] : vector<24x8xf32> to vector<24xf32>
    %958 = vector.shape_cast %957 : vector<24xf32> to vector<24x1xf32>
    %959 = tpu.reciprocal %958 {approx = true} : vector<24x1xf32> -> vector<24x1xf32>
    %960 = vector.broadcast %959 : vector<24x1xf32> to vector<24x8xf32>
    %961 = arith.mulf %956, %960 : vector<24x8xf32>
    %962 = arith.truncf %961 : vector<24x8xf32> to vector<24x8xbf16>
    %963 = arith.truncf %946 : vector<8x8xf32> to vector<8x8xbf16>
    %cst_610 = arith.constant dense<0.000000e+00> : vector<24x8xf32>
    %964 = tpu.matmul %962, %963, %cst_610 {dimension_numbers = #tpu.dot_dimension_numbers<[1], [0], [0], [1], [0, 0, 1, 1], [], []>} : vector<24x8xbf16>, vector<8x8xbf16>, vector<24x8xf32> -> vector<24x8xf32>
    %965 = arith.truncf %964 : vector<24x8xf32> to vector<24x8xbf16>
    %c2_611 = arith.constant 2 : index
    %c0_612 = arith.constant 0 : index
    %c0_613 = arith.constant 0 : index
    %966 = vector.load %arg15[%c2_611, %c0_612, %c0_613] : memref<4x8x32xbf16, #tpu.memory_space<vmem>>, vector<1x8x32xbf16>
    %967 = vector.shape_cast %966 : vector<1x8x32xbf16> to vector<8x32xbf16>
    %cst_614 = arith.constant dense<0.000000e+00> : vector<24x32xf32>
    %968 = tpu.matmul %965, %967, %cst_614 {dimension_numbers = #tpu.dot_dimension_numbers<[1], [0], [0], [1], [0, 0, 1, 1], [], []>} : vector<24x8xbf16>, vector<8x32xbf16>, vector<24x32xf32> -> vector<24x32xf32>
    %969 = arith.addf %925, %968 : vector<24x32xf32>
    %c3_615 = arith.constant 3 : index
    %c0_616 = arith.constant 0 : index
    %c0_617 = arith.constant 0 : index
    %970 = vector.load %arg16[%c3_615, %c0_616, %c0_617] : memref<4x32x8xbf16, #tpu.memory_space<vmem>>, vector<1x32x8xbf16>
    %971 = vector.shape_cast %970 : vector<1x32x8xbf16> to vector<32x8xbf16>
    %cst_618 = arith.constant dense<0.000000e+00> : vector<24x8xf32>
    %972 = tpu.matmul %835, %971, %cst_618 {dimension_numbers = #tpu.dot_dimension_numbers<[1], [0], [0], [1], [0, 0, 1, 1], [], []>} : vector<24x32xbf16>, vector<32x8xbf16>, vector<24x8xf32> -> vector<24x8xf32>
    %c3_619 = arith.constant 3 : index
    %c0_620 = arith.constant 0 : index
    %c0_621 = arith.constant 0 : index
    %973 = vector.load %arg12[%c3_619, %c0_620, %c0_621] : memref<4x1x8xf32, #tpu.memory_space<vmem>>, vector<1x1x8xf32>
    %974 = vector.shape_cast %973 : vector<1x1x8xf32> to vector<1x8xf32>
    %975 = vector.broadcast %974 : vector<1x8xf32> to vector<24x8xf32>
    %976 = arith.addf %972, %975 : vector<24x8xf32>
    %c3_622 = arith.constant 3 : index
    %c0_623 = arith.constant 0 : index
    %c0_624 = arith.constant 0 : index
    %977 = vector.load %arg14[%c3_622, %c0_623, %c0_624] : memref<4x32x8xbf16, #tpu.memory_space<vmem>>, vector<1x32x8xbf16>
    %978 = vector.shape_cast %977 : vector<1x32x8xbf16> to vector<32x8xbf16>
    %cst_625 = arith.constant dense<0.000000e+00> : vector<8x8xf32>
    %979 = tpu.matmul %836, %978, %cst_625 {dimension_numbers = #tpu.dot_dimension_numbers<[1], [0], [0], [1], [0, 0, 1, 1], [], []>} : vector<8x32xbf16>, vector<32x8xbf16>, vector<8x8xf32> -> vector<8x8xf32>
    %c3_626 = arith.constant 3 : index
    %c0_627 = arith.constant 0 : index
    %c0_628 = arith.constant 0 : index
    %980 = vector.load %arg10[%c3_626, %c0_627, %c0_628] : memref<4x1x8xf32, #tpu.memory_space<vmem>>, vector<1x1x8xf32>
    %981 = vector.shape_cast %980 : vector<1x1x8xf32> to vector<1x8xf32>
    %982 = vector.broadcast %981 : vector<1x8xf32> to vector<8x8xf32>
    %983 = arith.addf %979, %982 : vector<8x8xf32>
    %c3_629 = arith.constant 3 : index
    %c0_630 = arith.constant 0 : index
    %c0_631 = arith.constant 0 : index
    %984 = vector.load %arg17[%c3_629, %c0_630, %c0_631] : memref<4x32x8xbf16, #tpu.memory_space<vmem>>, vector<1x32x8xbf16>
    %985 = vector.shape_cast %984 : vector<1x32x8xbf16> to vector<32x8xbf16>
    %cst_632 = arith.constant dense<0.000000e+00> : vector<8x8xf32>
    %986 = tpu.matmul %836, %985, %cst_632 {dimension_numbers = #tpu.dot_dimension_numbers<[1], [0], [0], [1], [0, 0, 1, 1], [], []>} : vector<8x32xbf16>, vector<32x8xbf16>, vector<8x8xf32> -> vector<8x8xf32>
    %c3_633 = arith.constant 3 : index
    %c0_634 = arith.constant 0 : index
    %c0_635 = arith.constant 0 : index
    %987 = vector.load %arg13[%c3_633, %c0_634, %c0_635] : memref<4x1x8xf32, #tpu.memory_space<vmem>>, vector<1x1x8xf32>
    %988 = vector.shape_cast %987 : vector<1x1x8xf32> to vector<1x8xf32>
    %989 = vector.broadcast %988 : vector<1x8xf32> to vector<8x8xf32>
    %990 = arith.addf %986, %989 : vector<8x8xf32>
    %cst_636 = arith.constant 0.353553385 : f32
    %991 = vector.broadcast %cst_636 : f32 to vector<24x8xf32>
    %992 = arith.mulf %976, %991 : vector<24x8xf32>
    %993 = arith.truncf %992 : vector<24x8xf32> to vector<24x8xbf16>
    %994 = arith.truncf %983 : vector<8x8xf32> to vector<8x8xbf16>
    %cst_637 = arith.constant dense<0.000000e+00> : vector<24x8xf32>
    %995 = tpu.matmul %993, %994, %cst_637 {dimension_numbers = #tpu.dot_dimension_numbers<[1], [1], [0], [0], [0, 0, 1, 0], [], []>} : vector<24x8xbf16>, vector<8x8xbf16>, vector<24x8xf32> -> vector<24x8xf32>
    %cst_638 = arith.constant dense<0xFF800000> : vector<24xf32>
    %996 = vector.multi_reduction <maximumf>, %995, %cst_638 [1] : vector<24x8xf32> to vector<24xf32>
    %997 = vector.shape_cast %996 : vector<24xf32> to vector<24x1xf32>
    %998 = vector.broadcast %997 : vector<24x1xf32> to vector<24x8xf32>
    %999 = arith.subf %995, %998 : vector<24x8xf32>
    %1000 = math.exp %999 : vector<24x8xf32>
    %cst_639 = arith.constant dense<0.000000e+00> : vector<24xf32>
    %1001 = vector.multi_reduction <add>, %1000, %cst_639 [1] : vector<24x8xf32> to vector<24xf32>
    %1002 = vector.shape_cast %1001 : vector<24xf32> to vector<24x1xf32>
    %1003 = tpu.reciprocal %1002 {approx = true} : vector<24x1xf32> -> vector<24x1xf32>
    %1004 = vector.broadcast %1003 : vector<24x1xf32> to vector<24x8xf32>
    %1005 = arith.mulf %1000, %1004 : vector<24x8xf32>
    %1006 = arith.truncf %1005 : vector<24x8xf32> to vector<24x8xbf16>
    %1007 = arith.truncf %990 : vector<8x8xf32> to vector<8x8xbf16>
    %cst_640 = arith.constant dense<0.000000e+00> : vector<24x8xf32>
    %1008 = tpu.matmul %1006, %1007, %cst_640 {dimension_numbers = #tpu.dot_dimension_numbers<[1], [0], [0], [1], [0, 0, 1, 1], [], []>} : vector<24x8xbf16>, vector<8x8xbf16>, vector<24x8xf32> -> vector<24x8xf32>
    %1009 = arith.truncf %1008 : vector<24x8xf32> to vector<24x8xbf16>
    %c3_641 = arith.constant 3 : index
    %c0_642 = arith.constant 0 : index
    %c0_643 = arith.constant 0 : index
    %1010 = vector.load %arg15[%c3_641, %c0_642, %c0_643] : memref<4x8x32xbf16, #tpu.memory_space<vmem>>, vector<1x8x32xbf16>
    %1011 = vector.shape_cast %1010 : vector<1x8x32xbf16> to vector<8x32xbf16>
    %cst_644 = arith.constant dense<0.000000e+00> : vector<24x32xf32>
    %1012 = tpu.matmul %1009, %1011, %cst_644 {dimension_numbers = #tpu.dot_dimension_numbers<[1], [0], [0], [1], [0, 0, 1, 1], [], []>} : vector<24x8xbf16>, vector<8x32xbf16>, vector<24x32xf32> -> vector<24x32xf32>
    %1013 = arith.addf %969, %1012 : vector<24x32xf32>
    %c0_645 = arith.constant 0 : index
    %c0_646 = arith.constant 0 : index
    %1014 = vector.load %arg11[%c0_645, %c0_646] : memref<1x32xf32, #tpu.memory_space<vmem>>, vector<1x32xf32>
    %1015 = vector.broadcast %1014 : vector<1x32xf32> to vector<24x32xf32>
    %1016 = arith.addf %1013, %1015 : vector<24x32xf32>
    %1017 = arith.addf %834, %1016 : vector<24x32xf32>
    %cst_647 = arith.constant dense<0.000000e+00> : vector<24xf32>
    %1018 = vector.multi_reduction <add>, %1017, %cst_647 [1] : vector<24x32xf32> to vector<24xf32>
    %1019 = vector.shape_cast %1018 : vector<24xf32> to vector<24x1xf32>
    %cst_648 = arith.constant 3.200000e+01 : f32
    %1020 = vector.broadcast %cst_648 : f32 to vector<24x1xf32>
    %1021 = arith.divf %1019, %1020 : vector<24x1xf32>
    %1022 = vector.broadcast %1021 : vector<24x1xf32> to vector<24x32xf32>
    %1023 = arith.subf %1017, %1022 : vector<24x32xf32>
    %1024 = arith.mulf %1023, %1023 : vector<24x32xf32>
    %cst_649 = arith.constant dense<0.000000e+00> : vector<24xf32>
    %1025 = vector.multi_reduction <add>, %1024, %cst_649 [1] : vector<24x32xf32> to vector<24xf32>
    %1026 = vector.shape_cast %1025 : vector<24xf32> to vector<24x1xf32>
    %cst_650 = arith.constant 3.200000e+01 : f32
    %1027 = vector.broadcast %cst_650 : f32 to vector<24x1xf32>
    %1028 = arith.divf %1026, %1027 : vector<24x1xf32>
    %cst_651 = arith.constant 9.99999974E-6 : f32
    %1029 = vector.broadcast %cst_651 : f32 to vector<24x1xf32>
    %1030 = arith.addf %1028, %1029 : vector<24x1xf32>
    %1031 = math.rsqrt %1030 : vector<24x1xf32>
    %1032 = vector.broadcast %1031 : vector<24x1xf32> to vector<24x32xf32>
    %1033 = arith.mulf %1023, %1032 : vector<24x32xf32>
    %c0_652 = arith.constant 0 : index
    %c0_653 = arith.constant 0 : index
    %1034 = vector.load %arg25[%c0_652, %c0_653] : memref<1x32xf32, #tpu.memory_space<vmem>>, vector<1x32xf32>
    %1035 = vector.broadcast %1034 : vector<1x32xf32> to vector<24x32xf32>
    %1036 = arith.mulf %1033, %1035 : vector<24x32xf32>
    %c0_654 = arith.constant 0 : index
    %c0_655 = arith.constant 0 : index
    %1037 = vector.load %arg24[%c0_654, %c0_655] : memref<1x32xf32, #tpu.memory_space<vmem>>, vector<1x32xf32>
    %1038 = vector.broadcast %1037 : vector<1x32xf32> to vector<24x32xf32>
    %1039 = arith.addf %1036, %1038 : vector<24x32xf32>
    %1040 = arith.truncf %1039 : vector<24x32xf32> to vector<24x32xbf16>
    %c0_656 = arith.constant 0 : index
    %c0_657 = arith.constant 0 : index
    %1041 = vector.load %arg19[%c0_656, %c0_657] : memref<32x64xbf16, #tpu.memory_space<vmem>>, vector<32x64xbf16>
    %cst_658 = arith.constant dense<0.000000e+00> : vector<24x64xf32>
    %1042 = tpu.matmul %1040, %1041, %cst_658 {dimension_numbers = #tpu.dot_dimension_numbers<[1], [0], [0], [1], [0, 0, 1, 1], [], []>} : vector<24x32xbf16>, vector<32x64xbf16>, vector<24x64xf32> -> vector<24x64xf32>
    %c0_659 = arith.constant 0 : index
    %c0_660 = arith.constant 0 : index
    %1043 = vector.load %arg18[%c0_659, %c0_660] : memref<1x64xf32, #tpu.memory_space<vmem>>, vector<1x64xf32>
    %1044 = vector.broadcast %1043 : vector<1x64xf32> to vector<24x64xf32>
    %1045 = arith.addf %1042, %1044 : vector<24x64xf32>
    %cst_661 = arith.constant 5.000000e-01 : f32
    %1046 = vector.broadcast %cst_661 : f32 to vector<24x64xf32>
    %1047 = arith.mulf %1046, %1045 : vector<24x64xf32>
    %cst_662 = arith.constant 4.471500e-02 : f32
    %1048 = vector.broadcast %cst_662 : f32 to vector<24x64xf32>
    %1049 = arith.mulf %1048, %1045 : vector<24x64xf32>
    %1050 = arith.mulf %1049, %1045 : vector<24x64xf32>
    %1051 = arith.mulf %1050, %1045 : vector<24x64xf32>
    %1052 = arith.addf %1045, %1051 : vector<24x64xf32>
    %cst_663 = arith.constant 0.797884583 : f32
    %1053 = vector.broadcast %cst_663 : f32 to vector<24x64xf32>
    %1054 = arith.mulf %1053, %1052 : vector<24x64xf32>
    %1055 = math.tanh %1054 : vector<24x64xf32>
    %cst_664 = arith.constant 1.000000e+00 : f32
    %1056 = vector.broadcast %cst_664 : f32 to vector<24x64xf32>
    %1057 = arith.addf %1056, %1055 : vector<24x64xf32>
    %1058 = arith.mulf %1047, %1057 : vector<24x64xf32>
    %1059 = arith.truncf %1058 : vector<24x64xf32> to vector<24x64xbf16>
    %c0_665 = arith.constant 0 : index
    %c0_666 = arith.constant 0 : index
    %1060 = vector.load %arg21[%c0_665, %c0_666] : memref<64x32xbf16, #tpu.memory_space<vmem>>, vector<64x32xbf16>
    %cst_667 = arith.constant dense<0.000000e+00> : vector<24x32xf32>
    %1061 = tpu.matmul %1059, %1060, %cst_667 {dimension_numbers = #tpu.dot_dimension_numbers<[1], [0], [0], [1], [0, 0, 1, 1], [], []>} : vector<24x64xbf16>, vector<64x32xbf16>, vector<24x32xf32> -> vector<24x32xf32>
    %1062 = arith.addf %1039, %1061 : vector<24x32xf32>
    %c0_668 = arith.constant 0 : index
    %c0_669 = arith.constant 0 : index
    %1063 = vector.load %arg20[%c0_668, %c0_669] : memref<1x32xf32, #tpu.memory_space<vmem>>, vector<1x32xf32>
    %1064 = vector.broadcast %1063 : vector<1x32xf32> to vector<24x32xf32>
    %1065 = arith.addf %1062, %1064 : vector<24x32xf32>
    %cst_670 = arith.constant dense<0.000000e+00> : vector<24xf32>
    %1066 = vector.multi_reduction <add>, %1065, %cst_670 [1] : vector<24x32xf32> to vector<24xf32>
    %1067 = vector.shape_cast %1066 : vector<24xf32> to vector<24x1xf32>
    %cst_671 = arith.constant 3.200000e+01 : f32
    %1068 = vector.broadcast %cst_671 : f32 to vector<24x1xf32>
    %1069 = arith.divf %1067, %1068 : vector<24x1xf32>
    %1070 = vector.broadcast %1069 : vector<24x1xf32> to vector<24x32xf32>
    %1071 = arith.subf %1065, %1070 : vector<24x32xf32>
    %1072 = arith.mulf %1071, %1071 : vector<24x32xf32>
    %cst_672 = arith.constant dense<0.000000e+00> : vector<24xf32>
    %1073 = vector.multi_reduction <add>, %1072, %cst_672 [1] : vector<24x32xf32> to vector<24xf32>
    %1074 = vector.shape_cast %1073 : vector<24xf32> to vector<24x1xf32>
    %cst_673 = arith.constant 3.200000e+01 : f32
    %1075 = vector.broadcast %cst_673 : f32 to vector<24x1xf32>
    %1076 = arith.divf %1074, %1075 : vector<24x1xf32>
    %cst_674 = arith.constant 9.99999974E-6 : f32
    %1077 = vector.broadcast %cst_674 : f32 to vector<24x1xf32>
    %1078 = arith.addf %1076, %1077 : vector<24x1xf32>
    %1079 = math.rsqrt %1078 : vector<24x1xf32>
    %1080 = vector.broadcast %1079 : vector<24x1xf32> to vector<24x32xf32>
    %1081 = arith.mulf %1071, %1080 : vector<24x32xf32>
    %c0_675 = arith.constant 0 : index
    %c0_676 = arith.constant 0 : index
    %1082 = vector.load %arg27[%c0_675, %c0_676] : memref<1x32xf32, #tpu.memory_space<vmem>>, vector<1x32xf32>
    %1083 = vector.broadcast %1082 : vector<1x32xf32> to vector<24x32xf32>
    %1084 = arith.mulf %1081, %1083 : vector<24x32xf32>
    %c0_677 = arith.constant 0 : index
    %c0_678 = arith.constant 0 : index
    %1085 = vector.load %arg26[%c0_677, %c0_678] : memref<1x32xf32, #tpu.memory_space<vmem>>, vector<1x32xf32>
    %1086 = vector.broadcast %1085 : vector<1x32xf32> to vector<24x32xf32>
    %1087 = arith.addf %1084, %1086 : vector<24x32xf32>
    %cst_679 = arith.constant dense<0.000000e+00> : vector<24xf32>
    %1088 = vector.multi_reduction <add>, %1087, %cst_679 [1] : vector<24x32xf32> to vector<24xf32>
    %1089 = vector.shape_cast %1088 : vector<24xf32> to vector<24x1xf32>
    %cst_680 = arith.constant 3.200000e+01 : f32
    %1090 = vector.broadcast %cst_680 : f32 to vector<24x1xf32>
    %1091 = arith.divf %1089, %1090 : vector<24x1xf32>
    %1092 = vector.broadcast %1091 : vector<24x1xf32> to vector<24x32xf32>
    %1093 = arith.subf %1087, %1092 : vector<24x32xf32>
    %1094 = arith.mulf %1093, %1093 : vector<24x32xf32>
    %cst_681 = arith.constant dense<0.000000e+00> : vector<24xf32>
    %1095 = vector.multi_reduction <add>, %1094, %cst_681 [1] : vector<24x32xf32> to vector<24xf32>
    %1096 = vector.shape_cast %1095 : vector<24xf32> to vector<24x1xf32>
    %cst_682 = arith.constant 3.200000e+01 : f32
    %1097 = vector.broadcast %cst_682 : f32 to vector<24x1xf32>
    %1098 = arith.divf %1096, %1097 : vector<24x1xf32>
    %cst_683 = arith.constant 9.99999974E-6 : f32
    %1099 = vector.broadcast %cst_683 : f32 to vector<24x1xf32>
    %1100 = arith.addf %1098, %1099 : vector<24x1xf32>
    %1101 = math.rsqrt %1100 : vector<24x1xf32>
    %1102 = vector.broadcast %1101 : vector<24x1xf32> to vector<24x32xf32>
    %1103 = arith.mulf %1093, %1102 : vector<24x32xf32>
    %c0_684 = arith.constant 0 : index
    %c0_685 = arith.constant 0 : index
    %1104 = vector.load %arg37[%c0_684, %c0_685] : memref<1x32xf32, #tpu.memory_space<vmem>>, vector<1x32xf32>
    %1105 = vector.broadcast %1104 : vector<1x32xf32> to vector<24x32xf32>
    %1106 = arith.mulf %1103, %1105 : vector<24x32xf32>
    %c0_686 = arith.constant 0 : index
    %c0_687 = arith.constant 0 : index
    %1107 = vector.load %arg36[%c0_686, %c0_687] : memref<1x32xf32, #tpu.memory_space<vmem>>, vector<1x32xf32>
    %1108 = vector.broadcast %1107 : vector<1x32xf32> to vector<24x32xf32>
    %1109 = arith.addf %1106, %1108 : vector<24x32xf32>
    %1110 = arith.truncf %1109 : vector<24x32xf32> to vector<24x32xbf16>
    %c0_688 = arith.constant 0 : index
    %c0_689 = arith.constant 0 : index
    %1111 = vector.load %arg81[%c0_688, %c0_689] : memref<32x128xbf16, #tpu.memory_space<vmem>>, vector<32x128xbf16>
    %cst_690 = arith.constant dense<0.000000e+00> : vector<24x128xf32>
    %1112 = tpu.matmul %1110, %1111, %cst_690 {dimension_numbers = #tpu.dot_dimension_numbers<[1], [0], [0], [1], [0, 0, 1, 1], [], []>} : vector<24x32xbf16>, vector<32x128xbf16>, vector<24x128xf32> -> vector<24x128xf32>
    %c0_691 = arith.constant 0 : index
    %c0_692 = arith.constant 0 : index
    %1113 = vector.load %arg80[%c0_691, %c0_692] : memref<1x128xf32, #tpu.memory_space<vmem>>, vector<1x128xf32>
    %1114 = vector.broadcast %1113 : vector<1x128xf32> to vector<24x128xf32>
    %1115 = arith.addf %1112, %1114 : vector<24x128xf32>
    %c0_693 = arith.constant 0 : index
    %c0_694 = arith.constant 0 : index
    %c0_695 = arith.constant 0 : index
    %1116 = vector.load %arg82[%c0_693, %c0_694, %c0_695] : memref<1x24x128xf32, #tpu.memory_space<vmem>>, vector<1x24x128xf32>
    %1117 = vector.shape_cast %1116 : vector<1x24x128xf32> to vector<24x128xf32>
    %1118 = vector.shape_cast %1115 : vector<24x128xf32> to vector<1x24x128xf32>
    tpu.vector_store %arg82[%c0_693, %c0_694, %c0_695], %1118 {strides = array<i32>} : memref<1x24x128xf32, #tpu.memory_space<vmem>>, vector<1x24x128xf32>,
    return
  }
  func.func @transform_0(%arg0: i32) -> (i32, i32, i32) {
    %c0_i32 = arith.constant 0 : i32
    %c0_i32_0 = arith.constant 0 : i32
    %c0_i32_1 = arith.constant 0 : i32
    return %arg0, %c0_i32, %c0_i32_0 : i32, i32, i32
  }
  func.func @transform_1(%arg0: i32) -> (i32, i32, i32) {
    %c0_i32 = arith.constant 0 : i32
    %c0_i32_0 = arith.constant 0 : i32
    %c0_i32_1 = arith.constant 0 : i32
    return %arg0, %c0_i32, %c0_i32_0 : i32, i32, i32
  }
  func.func @transform_2(%arg0: i32) -> (i32, i32, i32) {
    %c0_i32 = arith.constant 0 : i32
    %c0_i32_0 = arith.constant 0 : i32
    %c0_i32_1 = arith.constant 0 : i32
    return %arg0, %c0_i32, %c0_i32_0 : i32, i32, i32
  }
  func.func @transform_3(%arg0: i32) -> (i32, i32, i32) {
    %c0_i32 = arith.constant 0 : i32
    %c0_i32_0 = arith.constant 0 : i32
    %c0_i32_1 = arith.constant 0 : i32
    return %arg0, %c0_i32, %c0_i32_0 : i32, i32, i32
  }
  func.func @transform_4(%arg0: i32) -> (i32, i32) {
    %c0_i32 = arith.constant 0 : i32
    %c0_i32_0 = arith.constant 0 : i32
    %c0_i32_1 = arith.constant 0 : i32
    return %c0_i32, %c0_i32_0 : i32, i32
  }
  func.func @transform_5(%arg0: i32) -> (i32, i32) {
    %c0_i32 = arith.constant 0 : i32
    %c0_i32_0 = arith.constant 0 : i32
    %c0_i32_1 = arith.constant 0 : i32
    return %c0_i32, %c0_i32_0 : i32, i32
  }
  func.func @transform_6(%arg0: i32) -> (i32, i32) {
    %c0_i32 = arith.constant 0 : i32
    %c0_i32_0 = arith.constant 0 : i32
    %c0_i32_1 = arith.constant 0 : i32
    return %c0_i32, %c0_i32_0 : i32, i32
  }
  func.func @transform_7(%arg0: i32) -> (i32, i32, i32) {
    %c0_i32 = arith.constant 0 : i32
    %c0_i32_0 = arith.constant 0 : i32
    %c0_i32_1 = arith.constant 0 : i32
    %c0_i32_2 = arith.constant 0 : i32
    return %c0_i32, %c0_i32_0, %c0_i32_1 : i32, i32, i32
  }
  func.func @transform_8(%arg0: i32) -> (i32, i32) {
    %c0_i32 = arith.constant 0 : i32
    %c0_i32_0 = arith.constant 0 : i32
    %c0_i32_1 = arith.constant 0 : i32
    return %c0_i32, %c0_i32_0 : i32, i32
  }
  func.func @transform_9(%arg0: i32) -> (i32, i32, i32) {
    %c0_i32 = arith.constant 0 : i32
    %c0_i32_0 = arith.constant 0 : i32
    %c0_i32_1 = arith.constant 0 : i32
    %c0_i32_2 = arith.constant 0 : i32
    return %c0_i32, %c0_i32_0, %c0_i32_1 : i32, i32, i32
  }
  func.func @transform_10(%arg0: i32) -> (i32, i32) {
    %c0_i32 = arith.constant 0 : i32
    %c0_i32_0 = arith.constant 0 : i32
    %c0_i32_1 = arith.constant 0 : i32
    return %c0_i32, %c0_i32_0 : i32, i32
  }
  func.func @transform_11(%arg0: i32) -> (i32, i32, i32) {
    %c0_i32 = arith.constant 0 : i32
    %c0_i32_0 = arith.constant 0 : i32
    %c0_i32_1 = arith.constant 0 : i32
    %c0_i32_2 = arith.constant 0 : i32
    return %c0_i32, %c0_i32_0, %c0_i32_1 : i32, i32, i32
  }
  func.func @transform_12(%arg0: i32) -> (i32, i32, i32) {
    %c0_i32 = arith.constant 0 : i32
    %c0_i32_0 = arith.constant 0 : i32
    %c0_i32_1 = arith.constant 0 : i32
    %c0_i32_2 = arith.constant 0 : i32
    return %c0_i32, %c0_i32_0, %c0_i32_1 : i32, i32, i32
  }
  func.func @transform_13(%arg0: i32) -> (i32, i32, i32) {
    %c0_i32 = arith.constant 0 : i32
    %c0_i32_0 = arith.constant 0 : i32
    %c0_i32_1 = arith.constant 0 : i32
    %c0_i32_2 = arith.constant 0 : i32
    return %c0_i32, %c0_i32_0, %c0_i32_1 : i32, i32, i32
  }
  func.func @transform_14(%arg0: i32) -> (i32, i32, i32) {
    %c0_i32 = arith.constant 0 : i32
    %c0_i32_0 = arith.constant 0 : i32
    %c0_i32_1 = arith.constant 0 : i32
    %c0_i32_2 = arith.constant 0 : i32
    return %c0_i32, %c0_i32_0, %c0_i32_1 : i32, i32, i32
  }
  func.func @transform_15(%arg0: i32) -> (i32, i32, i32) {
    %c0_i32 = arith.constant 0 : i32
    %c0_i32_0 = arith.constant 0 : i32
    %c0_i32_1 = arith.constant 0 : i32
    %c0_i32_2 = arith.constant 0 : i32
    return %c0_i32, %c0_i32_0, %c0_i32_1 : i32, i32, i32
  }
  func.func @transform_16(%arg0: i32) -> (i32, i32, i32) {
    %c0_i32 = arith.constant 0 : i32
    %c0_i32_0 = arith.constant 0 : i32
    %c0_i32_1 = arith.constant 0 : i32
    %c0_i32_2 = arith.constant 0 : i32
    return %c0_i32, %c0_i32_0, %c0_i32_1 : i32, i32, i32
  }
  func.func @transform_17(%arg0: i32) -> (i32, i32) {
    %c0_i32 = arith.constant 0 : i32
    %c0_i32_0 = arith.constant 0 : i32
    %c0_i32_1 = arith.constant 0 : i32
    return %c0_i32, %c0_i32_0 : i32, i32
  }
  func.func @transform_18(%arg0: i32) -> (i32, i32) {
    %c0_i32 = arith.constant 0 : i32
    %c0_i32_0 = arith.constant 0 : i32
    %c0_i32_1 = arith.constant 0 : i32
    return %c0_i32, %c0_i32_0 : i32, i32
  }
  func.func @transform_19(%arg0: i32) -> (i32, i32) {
    %c0_i32 = arith.constant 0 : i32
    %c0_i32_0 = arith.constant 0 : i32
    %c0_i32_1 = arith.constant 0 : i32
    return %c0_i32, %c0_i32_0 : i32, i32
  }
  func.func @transform_20(%arg0: i32) -> (i32, i32) {
    %c0_i32 = arith.constant 0 : i32
    %c0_i32_0 = arith.constant 0 : i32
    %c0_i32_1 = arith.constant 0 : i32
    return %c0_i32, %c0_i32_0 : i32, i32
  }
  func.func @transform_21(%arg0: i32) -> (i32, i32) {
    %c0_i32 = arith.constant 0 : i32
    %c0_i32_0 = arith.constant 0 : i32
    %c0_i32_1 = arith.constant 0 : i32
    return %c0_i32, %c0_i32_0 : i32, i32
  }
  func.func @transform_22(%arg0: i32) -> (i32, i32) {
    %c0_i32 = arith.constant 0 : i32
    %c0_i32_0 = arith.constant 0 : i32
    %c0_i32_1 = arith.constant 0 : i32
    return %c0_i32, %c0_i32_0 : i32, i32
  }
  func.func @transform_23(%arg0: i32) -> (i32, i32) {
    %c0_i32 = arith.constant 0 : i32
    %c0_i32_0 = arith.constant 0 : i32
    %c0_i32_1 = arith.constant 0 : i32
    return %c0_i32, %c0_i32_0 : i32, i32
  }
  func.func @transform_24(%arg0: i32) -> (i32, i32) {
    %c0_i32 = arith.constant 0 : i32
    %c0_i32_0 = arith.constant 0 : i32
    %c0_i32_1 = arith.constant 0 : i32
    return %c0_i32, %c0_i32_0 : i32, i32
  }
  func.func @transform_25(%arg0: i32) -> (i32, i32) {
    %c0_i32 = arith.constant 0 : i32
    %c0_i32_0 = arith.constant 0 : i32
    %c0_i32_1 = arith.constant 0 : i32
    return %c0_i32, %c0_i32_0 : i32, i32
  }
  func.func @transform_26(%arg0: i32) -> (i32, i32) {
    %c0_i32 = arith.constant 0 : i32
    %c0_i32_0 = arith.constant 0 : i32
    %c0_i32_1 = arith.constant 0 : i32
    return %c0_i32, %c0_i32_0 : i32, i32
  }
  func.func @transform_27(%arg0: i32) -> (i32, i32, i32) {
    %c0_i32 = arith.constant 0 : i32
    %c0_i32_0 = arith.constant 0 : i32
    %c0_i32_1 = arith.constant 0 : i32
    %c0_i32_2 = arith.constant 0 : i32
    return %c0_i32, %c0_i32_0, %c0_i32_1 : i32, i32, i32
  }
  func.func @transform_28(%arg0: i32) -> (i32, i32) {
    %c0_i32 = arith.constant 0 : i32
    %c0_i32_0 = arith.constant 0 : i32
    %c0_i32_1 = arith.constant 0 : i32
    return %c0_i32, %c0_i32_0 : i32, i32
  }
  func.func @transform_29(%arg0: i32) -> (i32, i32, i32) {
    %c0_i32 = arith.constant 0 : i32
    %c0_i32_0 = arith.constant 0 : i32
    %c0_i32_1 = arith.constant 0 : i32
    %c0_i32_2 = arith.constant 0 : i32
    return %c0_i32, %c0_i32_0, %c0_i32_1 : i32, i32, i32
  }
  func.func @transform_30(%arg0: i32) -> (i32, i32, i32) {
    %c0_i32 = arith.constant 0 : i32
    %c0_i32_0 = arith.constant 0 : i32
    %c0_i32_1 = arith.constant 0 : i32
    %c0_i32_2 = arith.constant 0 : i32
    return %c0_i32, %c0_i32_0, %c0_i32_1 : i32, i32, i32
  }
  func.func @transform_31(%arg0: i32) -> (i32, i32, i32) {
    %c0_i32 = arith.constant 0 : i32
    %c0_i32_0 = arith.constant 0 : i32
    %c0_i32_1 = arith.constant 0 : i32
    %c0_i32_2 = arith.constant 0 : i32
    return %c0_i32, %c0_i32_0, %c0_i32_1 : i32, i32, i32
  }
  func.func @transform_32(%arg0: i32) -> (i32, i32, i32) {
    %c0_i32 = arith.constant 0 : i32
    %c0_i32_0 = arith.constant 0 : i32
    %c0_i32_1 = arith.constant 0 : i32
    %c0_i32_2 = arith.constant 0 : i32
    return %c0_i32, %c0_i32_0, %c0_i32_1 : i32, i32, i32
  }
  func.func @transform_33(%arg0: i32) -> (i32, i32, i32) {
    %c0_i32 = arith.constant 0 : i32
    %c0_i32_0 = arith.constant 0 : i32
    %c0_i32_1 = arith.constant 0 : i32
    %c0_i32_2 = arith.constant 0 : i32
    return %c0_i32, %c0_i32_0, %c0_i32_1 : i32, i32, i32
  }
  func.func @transform_34(%arg0: i32) -> (i32, i32, i32) {
    %c0_i32 = arith.constant 0 : i32
    %c0_i32_0 = arith.constant 0 : i32
    %c0_i32_1 = arith.constant 0 : i32
    %c0_i32_2 = arith.constant 0 : i32
    return %c0_i32, %c0_i32_0, %c0_i32_1 : i32, i32, i32
  }
  func.func @transform_35(%arg0: i32) -> (i32, i32) {
    %c0_i32 = arith.constant 0 : i32
    %c0_i32_0 = arith.constant 0 : i32
    %c0_i32_1 = arith.constant 0 : i32
    return %c0_i32, %c0_i32_0 : i32, i32
  }
  func.func @transform_36(%arg0: i32) -> (i32, i32) {
    %c0_i32 = arith.constant 0 : i32
    %c0_i32_0 = arith.constant 0 : i32
    %c0_i32_1 = arith.constant 0 : i32
    return %c0_i32, %c0_i32_0 : i32, i32
  }
  func.func @transform_37(%arg0: i32) -> (i32, i32) {
    %c0_i32 = arith.constant 0 : i32
    %c0_i32_0 = arith.constant 0 : i32
    %c0_i32_1 = arith.constant 0 : i32
    return %c0_i32, %c0_i32_0 : i32, i32
  }
  func.func @transform_38(%arg0: i32) -> (i32, i32) {
    %c0_i32 = arith.constant 0 : i32
    %c0_i32_0 = arith.constant 0 : i32
    %c0_i32_1 = arith.constant 0 : i32
    return %c0_i32, %c0_i32_0 : i32, i32
  }
  func.func @transform_39(%arg0: i32) -> (i32, i32) {
    %c0_i32 = arith.constant 0 : i32
    %c0_i32_0 = arith.constant 0 : i32
    %c0_i32_1 = arith.constant 0 : i32
    return %c0_i32, %c0_i32_0 : i32, i32
  }
  func.func @transform_40(%arg0: i32) -> (i32, i32, i32) {
    %c0_i32 = arith.constant 0 : i32
    %c0_i32_0 = arith.constant 0 : i32
    %c0_i32_1 = arith.constant 0 : i32
    %c0_i32_2 = arith.constant 0 : i32
    return %c0_i32, %c0_i32_0, %c0_i32_1 : i32, i32, i32
  }
  func.func @transform_41(%arg0: i32) -> (i32, i32) {
    %c0_i32 = arith.constant 0 : i32
    %c0_i32_0 = arith.constant 0 : i32
    %c0_i32_1 = arith.constant 0 : i32
    return %c0_i32, %c0_i32_0 : i32, i32
  }
  func.func @transform_42(%arg0: i32) -> (i32, i32) {
    %c0_i32 = arith.constant 0 : i32
    %c0_i32_0 = arith.constant 0 : i32
    %c0_i32_1 = arith.constant 0 : i32
    return %c0_i32, %c0_i32_0 : i32, i32
  }
  func.func @transform_43(%arg0: i32) -> (i32, i32, i32) {
    %c0_i32 = arith.constant 0 : i32
    %c0_i32_0 = arith.constant 0 : i32
    %c0_i32_1 = arith.constant 0 : i32
    %c0_i32_2 = arith.constant 0 : i32
    return %c0_i32, %c0_i32_0, %c0_i32_1 : i32, i32, i32
  }
  func.func @transform_44(%arg0: i32) -> (i32, i32) {
    %c0_i32 = arith.constant 0 : i32
    %c0_i32_0 = arith.constant 0 : i32
    %c0_i32_1 = arith.constant 0 : i32
    return %c0_i32, %c0_i32_0 : i32, i32
  }
  func.func @transform_45(%arg0: i32) -> (i32, i32, i32) {
    %c0_i32 = arith.constant 0 : i32
    %c0_i32_0 = arith.constant 0 : i32
    %c0_i32_1 = arith.constant 0 : i32
    %c0_i32_2 = arith.constant 0 : i32
    return %c0_i32, %c0_i32_0, %c0_i32_1 : i32, i32, i32
  }
  func.func @transform_46(%arg0: i32) -> (i32, i32) {
    %c0_i32 = arith.constant 0 : i32
    %c0_i32_0 = arith.constant 0 : i32
    %c0_i32_1 = arith.constant 0 : i32
    return %c0_i32, %c0_i32_0 : i32, i32
  }
  func.func @transform_47(%arg0: i32) -> (i32, i32, i32) {
    %c0_i32 = arith.constant 0 : i32
    %c0_i32_0 = arith.constant 0 : i32
    %c0_i32_1 = arith.constant 0 : i32
    %c0_i32_2 = arith.constant 0 : i32
    return %c0_i32, %c0_i32_0, %c0_i32_1 : i32, i32, i32
  }
  func.func @transform_48(%arg0: i32) -> (i32, i32, i32) {
    %c0_i32 = arith.constant 0 : i32
    %c0_i32_0 = arith.constant 0 : i32
    %c0_i32_1 = arith.constant 0 : i32
    %c0_i32_2 = arith.constant 0 : i32
    return %c0_i32, %c0_i32_0, %c0_i32_1 : i32, i32, i32
  }
  func.func @transform_49(%arg0: i32) -> (i32, i32, i32) {
    %c0_i32 = arith.constant 0 : i32
    %c0_i32_0 = arith.constant 0 : i32
    %c0_i32_1 = arith.constant 0 : i32
    %c0_i32_2 = arith.constant 0 : i32
    return %c0_i32, %c0_i32_0, %c0_i32_1 : i32, i32, i32
  }
  func.func @transform_50(%arg0: i32) -> (i32, i32, i32) {
    %c0_i32 = arith.constant 0 : i32
    %c0_i32_0 = arith.constant 0 : i32
    %c0_i32_1 = arith.constant 0 : i32
    %c0_i32_2 = arith.constant 0 : i32
    return %c0_i32, %c0_i32_0, %c0_i32_1 : i32, i32, i32
  }
  func.func @transform_51(%arg0: i32) -> (i32, i32, i32) {
    %c0_i32 = arith.constant 0 : i32
    %c0_i32_0 = arith.constant 0 : i32
    %c0_i32_1 = arith.constant 0 : i32
    %c0_i32_2 = arith.constant 0 : i32
    return %c0_i32, %c0_i32_0, %c0_i32_1 : i32, i32, i32
  }
  func.func @transform_52(%arg0: i32) -> (i32, i32, i32) {
    %c0_i32 = arith.constant 0 : i32
    %c0_i32_0 = arith.constant 0 : i32
    %c0_i32_1 = arith.constant 0 : i32
    %c0_i32_2 = arith.constant 0 : i32
    return %c0_i32, %c0_i32_0, %c0_i32_1 : i32, i32, i32
  }
  func.func @transform_53(%arg0: i32) -> (i32, i32) {
    %c0_i32 = arith.constant 0 : i32
    %c0_i32_0 = arith.constant 0 : i32
    %c0_i32_1 = arith.constant 0 : i32
    return %c0_i32, %c0_i32_0 : i32, i32
  }
  func.func @transform_54(%arg0: i32) -> (i32, i32) {
    %c0_i32 = arith.constant 0 : i32
    %c0_i32_0 = arith.constant 0 : i32
    %c0_i32_1 = arith.constant 0 : i32
    return %c0_i32, %c0_i32_0 : i32, i32
  }
  func.func @transform_55(%arg0: i32) -> (i32, i32) {
    %c0_i32 = arith.constant 0 : i32
    %c0_i32_0 = arith.constant 0 : i32
    %c0_i32_1 = arith.constant 0 : i32
    return %c0_i32, %c0_i32_0 : i32, i32
  }
  func.func @transform_56(%arg0: i32) -> (i32, i32) {
    %c0_i32 = arith.constant 0 : i32
    %c0_i32_0 = arith.constant 0 : i32
    %c0_i32_1 = arith.constant 0 : i32
    return %c0_i32, %c0_i32_0 : i32, i32
  }
  func.func @transform_57(%arg0: i32) -> (i32, i32) {
    %c0_i32 = arith.constant 0 : i32
    %c0_i32_0 = arith.constant 0 : i32
    %c0_i32_1 = arith.constant 0 : i32
    return %c0_i32, %c0_i32_0 : i32, i32
  }
  func.func @transform_58(%arg0: i32) -> (i32, i32) {
    %c0_i32 = arith.constant 0 : i32
    %c0_i32_0 = arith.constant 0 : i32
    %c0_i32_1 = arith.constant 0 : i32
    return %c0_i32, %c0_i32_0 : i32, i32
  }
  func.func @transform_59(%arg0: i32) -> (i32, i32) {
    %c0_i32 = arith.constant 0 : i32
    %c0_i32_0 = arith.constant 0 : i32
    %c0_i32_1 = arith.constant 0 : i32
    return %c0_i32, %c0_i32_0 : i32, i32
  }
  func.func @transform_60(%arg0: i32) -> (i32, i32) {
    %c0_i32 = arith.constant 0 : i32
    %c0_i32_0 = arith.constant 0 : i32
    %c0_i32_1 = arith.constant 0 : i32
    return %c0_i32, %c0_i32_0 : i32, i32
  }
  func.func @transform_61(%arg0: i32) -> (i32, i32, i32) {
    %c0_i32 = arith.constant 0 : i32
    %c0_i32_0 = arith.constant 0 : i32
    %c0_i32_1 = arith.constant 0 : i32
    %c0_i32_2 = arith.constant 0 : i32
    return %c0_i32, %c0_i32_0, %c0_i32_1 : i32, i32, i32
  }
  func.func @transform_62(%arg0: i32) -> (i32, i32) {
    %c0_i32 = arith.constant 0 : i32
    %c0_i32_0 = arith.constant 0 : i32
    %c0_i32_1 = arith.constant 0 : i32
    return %c0_i32, %c0_i32_0 : i32, i32
  }
  func.func @transform_63(%arg0: i32) -> (i32, i32, i32) {
    %c0_i32 = arith.constant 0 : i32
    %c0_i32_0 = arith.constant 0 : i32
    %c0_i32_1 = arith.constant 0 : i32
    %c0_i32_2 = arith.constant 0 : i32
    return %c0_i32, %c0_i32_0, %c0_i32_1 : i32, i32, i32
  }
  func.func @transform_64(%arg0: i32) -> (i32, i32, i32) {
    %c0_i32 = arith.constant 0 : i32
    %c0_i32_0 = arith.constant 0 : i32
    %c0_i32_1 = arith.constant 0 : i32
    %c0_i32_2 = arith.constant 0 : i32
    return %c0_i32, %c0_i32_0, %c0_i32_1 : i32, i32, i32
  }
  func.func @transform_65(%arg0: i32) -> (i32, i32, i32) {
    %c0_i32 = arith.constant 0 : i32
    %c0_i32_0 = arith.constant 0 : i32
    %c0_i32_1 = arith.constant 0 : i32
    %c0_i32_2 = arith.constant 0 : i32
    return %c0_i32, %c0_i32_0, %c0_i32_1 : i32, i32, i32
  }
  func.func @transform_66(%arg0: i32) -> (i32, i32, i32) {
    %c0_i32 = arith.constant 0 : i32
    %c0_i32_0 = arith.constant 0 : i32
    %c0_i32_1 = arith.constant 0 : i32
    %c0_i32_2 = arith.constant 0 : i32
    return %c0_i32, %c0_i32_0, %c0_i32_1 : i32, i32, i32
  }
  func.func @transform_67(%arg0: i32) -> (i32, i32, i32) {
    %c0_i32 = arith.constant 0 : i32
    %c0_i32_0 = arith.constant 0 : i32
    %c0_i32_1 = arith.constant 0 : i32
    %c0_i32_2 = arith.constant 0 : i32
    return %c0_i32, %c0_i32_0, %c0_i32_1 : i32, i32, i32
  }
  func.func @transform_68(%arg0: i32) -> (i32, i32, i32) {
    %c0_i32 = arith.constant 0 : i32
    %c0_i32_0 = arith.constant 0 : i32
    %c0_i32_1 = arith.constant 0 : i32
    %c0_i32_2 = arith.constant 0 : i32
    return %c0_i32, %c0_i32_0, %c0_i32_1 : i32, i32, i32
  }
  func.func @transform_69(%arg0: i32) -> (i32, i32) {
    %c0_i32 = arith.constant 0 : i32
    %c0_i32_0 = arith.constant 0 : i32
    %c0_i32_1 = arith.constant 0 : i32
    return %c0_i32, %c0_i32_0 : i32, i32
  }
  func.func @transform_70(%arg0: i32) -> (i32, i32) {
    %c0_i32 = arith.constant 0 : i32
    %c0_i32_0 = arith.constant 0 : i32
    %c0_i32_1 = arith.constant 0 : i32
    return %c0_i32, %c0_i32_0 : i32, i32
  }
  func.func @transform_71(%arg0: i32) -> (i32, i32) {
    %c0_i32 = arith.constant 0 : i32
    %c0_i32_0 = arith.constant 0 : i32
    %c0_i32_1 = arith.constant 0 : i32
    return %c0_i32, %c0_i32_0 : i32, i32
  }
  func.func @transform_72(%arg0: i32) -> (i32, i32) {
    %c0_i32 = arith.constant 0 : i32
    %c0_i32_0 = arith.constant 0 : i32
    %c0_i32_1 = arith.constant 0 : i32
    return %c0_i32, %c0_i32_0 : i32, i32
  }
  func.func @transform_73(%arg0: i32) -> (i32, i32) {
    %c0_i32 = arith.constant 0 : i32
    %c0_i32_0 = arith.constant 0 : i32
    %c0_i32_1 = arith.constant 0 : i32
    return %c0_i32, %c0_i32_0 : i32, i32
  }
  func.func @transform_74(%arg0: i32) -> (i32, i32) {
    %c0_i32 = arith.constant 0 : i32
    %c0_i32_0 = arith.constant 0 : i32
    %c0_i32_1 = arith.constant 0 : i32
    return %c0_i32, %c0_i32_0 : i32, i32
  }
  func.func @transform_75(%arg0: i32) -> (i32, i32) {
    %c0_i32 = arith.constant 0 : i32
    %c0_i32_0 = arith.constant 0 : i32
    %c0_i32_1 = arith.constant 0 : i32
    return %c0_i32, %c0_i32_0 : i32, i32
  }
  func.func @transform_76(%arg0: i32) -> (i32, i32) {
    %c0_i32 = arith.constant 0 : i32
    %c0_i32_0 = arith.constant 0 : i32
    %c0_i32_1 = arith.constant 0 : i32
    return %c0_i32, %c0_i32_0 : i32, i32
  }
  func.func @transform_77(%arg0: i32) -> (i32, i32) {
    %c0_i32 = arith.constant 0 : i32
    %c0_i32_0 = arith.constant 0 : i32
    %c0_i32_1 = arith.constant 0 : i32
    return %c0_i32, %c0_i32_0 : i32, i32
  }
  func.func @transform_78(%arg0: i32) -> (i32, i32) {
    %c0_i32 = arith.constant 0 : i32
    %c0_i32_0 = arith.constant 0 : i32
    %c0_i32_1 = arith.constant 0 : i32
    return %c0_i32, %c0_i32_0 : i32, i32
  }
  func.func @transform_79(%arg0: i32) -> (i32, i32) {
    %c0_i32 = arith.constant 0 : i32
    %c0_i32_0 = arith.constant 0 : i32
    %c0_i32_1 = arith.constant 0 : i32
    return %c0_i32, %c0_i32_0 : i32, i32
  }
  func.func @transform_80(%arg0: i32) -> (i32, i32) {
    %c0_i32 = arith.constant 0 : i32
    %c0_i32_0 = arith.constant 0 : i32
    %c0_i32_1 = arith.constant 0 : i32
    return %c0_i32, %c0_i32_0 : i32, i32
  }
  func.func @transform_81(%arg0: i32) -> (i32, i32, i32) {
    %c0_i32 = arith.constant 0 : i32
    %c0_i32_0 = arith.constant 0 : i32
    %c0_i32_1 = arith.constant 0 : i32
    return %arg0, %c0_i32, %c0_i32_0 : i32, i32, i32
  }
}

</mosaic_0001>

<bundles_post_ra>
// kernel: informer_forward.1
= control target key start
LH: loop header
LB: loop body
LE: loop exit
PB: predicated region body
PF: predicated region fallthrough
CT: control target
= control target key end

     0   :  { %s14837_s6 = smov 1   ;;  %s14838_s10 = smov 2   ;;  %s16749_s0 = inlined_call_operand.smem [shape: u32[82], index: -1, kind: input, shape index: {}] }
   0x1   :  { %s14956_s5 = sld [smem:[%s16749_s0]]   ;;  %s14839_s14 = smov 3  }
   0x2   :  { %s14961_s9 = sld [smem:[%s16749_s0 + %s14837_s6]]   ;;  %s14840_s18 = smov 4  }
   0x3   :  { %s14966_s13 = sld [smem:[%s16749_s0 + %s14838_s10]]   ;;  %s14841_s22 = smov 5  }
   0x4   :  { %s14971_s17 = sld [smem:[%s16749_s0 + %s14839_s14]]   ;;  %s14842_s26 = smov 6  }
   0x5   :  { %s14976_s21 = sld [smem:[%s16749_s0 + %s14840_s18]]   ;;  %s14843_s30 = smov 7  }
   0x6   :  { %s14981_s25 = sld [smem:[%s16749_s0 + %s14841_s22]]   ;;  %s14844_s4 = smov 8  }
   0x7   :  { %16817 = sst [smem:[#allocation60_spill]] %s14956_s5  ;;  %s14845_s10 = smov 9  }
   0x8   :  { %16818 = sst [smem:[#allocation61_spill]] %s14961_s9  ;;  %s14846_s15 = smov 10  }
   0x9   :  { %16819 = sst [smem:[#allocation62_spill]] %s14966_s13  ;;  %s14847_s20 = smov 11  }
   0xa   :  { %16820 = sst [smem:[#allocation63_spill]] %s14971_s17  ;;  %s14849_s1 = smov 13  }
   0xb   :  { %16821 = sst [smem:[#allocation64_spill]] %s14976_s21  ;;  %s14850_s7 = smov 14  }
   0xc   :  { %16822 = sst [smem:[#allocation65_spill]] %s14981_s25  ;;  %s14852_s22 = smov 16  }
   0xd   :  { %s14986_s29 = sld [smem:[%s16749_s0 + %s14842_s26]]   ;;  %s14848_s26 = smov 12  }
   0xe   :  { %s14991_s3 = sld [smem:[%s16749_s0 + %s14843_s30]]   ;;  %s14853_s28 = smov 17  }
   0xf   :  { %s14996_s8 = sld [smem:[%s16749_s0 + %s14844_s4]]  }
  0x10   :  { %s15001_s14 = sld [smem:[%s16749_s0 + %s14845_s10]]  }
  0x11   :  { %s15006_s19 = sld [smem:[%s16749_s0 + %s14846_s15]]   ;;  %s14851_s15 = smov 15  }
  0x12   :  { %s15011_s24 = sld [smem:[%s16749_s0 + %s14847_s20]]  }
  0x13   :  { %16823 = sst [smem:[#allocation66_spill]] %s14986_s29 }
  0x14   :  { %16824 = sst [smem:[#allocation67_spill]] %s14991_s3 }
  0x15   :  { %16825 = sst [smem:[#allocation68_spill]] %s14996_s8 }
  0x16   :  { %16826 = sst [smem:[#allocation69_spill]] %s15001_s14 }
  0x17   :  { %16827 = sst [smem:[#allocation70_spill]] %s15006_s19 }
  0x18   :  { %16828 = sst [smem:[#allocation71_spill]] %s15011_s24 }
  0x19   :  { %s15016_s30 = sld [smem:[%s16749_s0 + %s14848_s26]]  }
  0x1a   :  { %s15021_s6 = sld [smem:[%s16749_s0 + %s14849_s1]]  }
  0x1b   :  { %s15026_s12 = sld [smem:[%s16749_s0 + %s14850_s7]]   ;;  %s14854_s7 = smov 18  }
  0x1c   :  { %s15031_s20 = sld [smem:[%s16749_s0 + %s14851_s15]]   ;;  %s14855_s15 = smov 19  }
  0x1d   :  { %s15036_s27 = sld [smem:[%s16749_s0 + %s14852_s22]]   ;;  %s14856_s22 = smov 20  }
  0x1e   :  { %s15041_s4 = sld [smem:[%s16749_s0 + %s14853_s28]]   ;;  %s14857_s28 = smov 21  }
  0x1f   :  { %16829 = sst [smem:[#allocation72_spill]] %s15016_s30 }
  0x20   :  { %16830 = sst [smem:[#allocation73_spill]] %s15021_s6 }
  0x21   :  { %16831 = sst [smem:[#allocation74_spill]] %s15026_s12 }
  0x22   :  { %16832 = sst [smem:[#allocation75_spill]] %s15031_s20 }
  0x23   :  { %16833 = sst [smem:[#allocation76_spill]] %s15036_s27 }
  0x24   :  { %16834 = sst [smem:[#allocation77_spill]] %s15041_s4 }
  0x25   :  { %s15046_s19 = sld [smem:[%s16749_s0 + %s14854_s7]]   ;;  %s14858_s7 = smov 22  }
  0x26   :  { %s15051_s12 = sld [smem:[%s16749_s0 + %s14855_s15]]   ;;  %s14859_s15 = smov 23  }
  0x27   :  { %s15056_s30 = sld [smem:[%s16749_s0 + %s14856_s22]]   ;;  %s14860_s22 = smov 24  }
  0x28   :  { %s15061_s4 = sld [smem:[%s16749_s0 + %s14857_s28]]   ;;  %s14861_s28 = smov 25  }
  0x29   :  { %s15081_s24 = sld [smem:[%s16749_s0 + %s14861_s28]]   ;;  %s14865_s28 = smov 29  }
  0x2a   :  { %s15101_s6 = sld [smem:[%s16749_s0 + %s14865_s28]]   ;;  %s14869_s28 = smov 33  }
  0x2b   :  { %16835 = sst [smem:[#allocation78_spill]] %s15046_s19 }
  0x2c   :  { %16836 = sst [smem:[#allocation79_spill]] %s15051_s12 }
  0x2d   :  { %16837 = sst [smem:[#allocation80_spill]] %s15056_s30 }
  0x2e   :  { %16838 = sst [smem:[#allocation81_spill]] %s15061_s4 }
  0x2f   :  { %s15066_s19 = sld [smem:[%s16749_s0 + %s14858_s7]]   ;;  %s14862_s7 = smov 26  }
  0x30   :  { %s15071_s12 = sld [smem:[%s16749_s0 + %s14859_s15]]   ;;  %s14863_s15 = smov 27  }
  0x31   :  { %s15076_s30 = sld [smem:[%s16749_s0 + %s14860_s22]]   ;;  %s14864_s22 = smov 28  }
  0x32   :  { %s15086_s14 = sld [smem:[%s16749_s0 + %s14862_s7]]   ;;  %s14866_s7 = smov 30  }
  0x33   :  { %s15091_s27 = sld [smem:[%s16749_s0 + %s14863_s15]]   ;;  %s14867_s15 = smov 31  }
  0x34   :  { %s15096_s4 = sld [smem:[%s16749_s0 + %s14864_s22]]   ;;  %s14868_s22 = smov 32  }
  0x35   :  { %16843 = sst [smem:[#allocation86_spill]] %s15101_s6 }
  0x36   :  { %s15106_s20 = sld [smem:[%s16749_s0 + %s14866_s7]]   ;;  %s14870_s7 = smov 34  }
  0x37   :  { %16839 = sst [smem:[#allocation82_spill]] %s15076_s30 }
  0x38   :  { %16840 = sst [smem:[#allocation83_spill]] %s15086_s14 }
  0x39   :  { %16841 = sst [smem:[#allocation84_spill]] %s15091_s27 }
  0x3a   :  { %16842 = sst [smem:[#allocation85_spill]] %s15096_s4 }
  0x3b   :  { %s15111_s21 = sld [smem:[%s16749_s0 + %s14867_s15]]   ;;  %s14871_s15 = smov 35  }
  0x3c   :  { %16844 = sst [smem:[#allocation87_spill]] %s15106_s20 }
  0x3d   :  { %s15116_s27 = sld [smem:[%s16749_s0 + %s14868_s22]]   ;;  %s14872_s22 = smov 36  }
  0x3e   :  { %s15121_s6 = sld [smem:[%s16749_s0 + %s14869_s28]]   ;;  %s14873_s28 = smov 37  }
  0x3f   :  { %s15126_s20 = sld [smem:[%s16749_s0 + %s14870_s7]]   ;;  %s14874_s7 = smov 38  }
  0x40   :  { %s15131_s29 = sld [smem:[%s16749_s0 + %s14871_s15]]   ;;  %s14875_s15 = smov 39  }
  0x41   :  { %16845 = sst [smem:[#allocation88_spill]] %s15111_s21 }
  0x42   :  { %s15141_s25 = sld [smem:[%s16749_s0 + %s14873_s28]]   ;;  %s14877_s28 = smov 41  }
  0x43   :  { %16846 = sst [smem:[#allocation89_spill]] %s15116_s27 }
  0x44   :  { %16847 = sst [smem:[#allocation90_spill]] %s15121_s6 }
  0x45   :  { %16848 = sst [smem:[#allocation91_spill]] %s15126_s20 }
  0x46   :  { %16849 = sst [smem:[#allocation92_spill]] %s15131_s29 }
  0x47   :  { %s15136_s27 = sld [smem:[%s16749_s0 + %s14872_s22]]   ;;  %s14876_s22 = smov 40  }
  0x48   :  { %16850 = sst [smem:[#allocation93_spill]] %s15141_s25 }
  0x49   :  { %s15146_s20 = sld [smem:[%s16749_s0 + %s14874_s7]]   ;;  %s14878_s7 = smov 42  }
  0x4a   :  { %s15151_s21 = sld [smem:[%s16749_s0 + %s14875_s15]]   ;;  %s14879_s15 = smov 43  }
  0x4b   :  { %s15156_s6 = sld [smem:[%s16749_s0 + %s14876_s22]]   ;;  %s14880_s22 = smov 44  }
  0x4c   :  { %s15161_s17 = sld [smem:[%s16749_s0 + %s14877_s28]]   ;;  %s14881_s28 = smov 45  }
  0x4d   :  { %s15166_s8 = sld [smem:[%s16749_s0 + %s14878_s7]]   ;;  %s14882_s7 = smov 46  }
  0x4e   :  { %s15171_s13 = sld [smem:[%s16749_s0 + %s14879_s15]]   ;;  %s14883_s15 = smov 47  }
  0x4f   :  { %16851 = sst [smem:[#allocation94_spill]] %s15146_s20 }
  0x50   :  { %s15176_s3 = sld [smem:[%s16749_s0 + %s14880_s22]]   ;;  %s14884_s22 = smov 48  }
  0x51   :  { %16852 = sst [smem:[#allocation95_spill]] %s15156_s6 }
  0x52   :  { %16853 = sst [smem:[#allocation96_spill]] %s15161_s17 }
  0x53   :  { %16854 = sst [smem:[#allocation97_spill]] %s15166_s8 }
  0x54   :  { %16855 = sst [smem:[#allocation98_spill]] %s15171_s13 }
  0x55   :  { %s15181_s20 = sld [smem:[%s16749_s0 + %s14881_s28]]   ;;  %s14885_s28 = smov 49  }
  0x56   :  { %16856 = sst [smem:[#allocation99_spill]] %s15176_s3 }
  0x57   :  { %s15186_s6 = sld [smem:[%s16749_s0 + %s14882_s7]]   ;;  %s14886_s7 = smov 50  }
  0x58   :  { %s15191_s8 = sld [smem:[%s16749_s0 + %s14883_s15]]   ;;  %s14887_s15 = smov 51  }
  0x59   :  { %s15196_s9 = sld [smem:[%s16749_s0 + %s14884_s22]]   ;;  %s14888_s22 = smov 52  }
  0x5a   :  { %s15206_s3 = sld [smem:[%s16749_s0 + %s14886_s7]]   ;;  %s14890_s7 = smov 54  }
  0x5b   :  { %16857 = sst [smem:[#allocation100_spill]] %s15181_s20 }
  0x5c   :  { %s15201_s20 = sld [smem:[%s16749_s0 + %s14885_s28]]   ;;  %s14889_s28 = smov 53  }
  0x5d   :  { %16858 = sst [smem:[#allocation101_spill]] %s15186_s6 }
  0x5e   :  { %16859 = sst [smem:[#allocation102_spill]] %s15191_s8 }
  0x5f   :  { %16860 = sst [smem:[#allocation103_spill]] %s15196_s9 }
  0x60   :  { %16862 = sst [smem:[#allocation105_spill]] %s15206_s3 }
  0x61   :  { %s15211_s8 = sld [smem:[%s16749_s0 + %s14887_s15]]   ;;  %s14891_s15 = smov 55  }
  0x62   :  { %16861 = sst [smem:[#allocation104_spill]] %s15201_s20 }
  0x63   :  { %s15216_s9 = sld [smem:[%s16749_s0 + %s14888_s22]]   ;;  %s14892_s22 = smov 56  }
  0x64   :  { %s15221_s20 = sld [smem:[%s16749_s0 + %s14889_s28]]   ;;  %s14893_s28 = smov 57  }
  0x65   :  { %s15226_s3 = sld [smem:[%s16749_s0 + %s14890_s7]]   ;;  %s14894_s7 = smov 58  }
  0x66   :  { %s15241_s13 = sld [smem:[%s16749_s0 + %s14893_s28]]   ;;  %s14897_s28 = smov 61  }
  0x67   :  { %16863 = sst [smem:[#allocation106_spill]] %s15211_s8 }
  0x68   :  { %s15231_s8 = sld [smem:[%s16749_s0 + %s14891_s15]]   ;;  %s14895_s15 = smov 59  }
  0x69   :  { %16864 = sst [smem:[#allocation107_spill]] %s15216_s9 }
  0x6a   :  { %16865 = sst [smem:[#allocation108_spill]] %s15221_s20 }
  0x6b   :  { %16866 = sst [smem:[#allocation109_spill]] %s15226_s3 }
  0x6c   :  { %s15236_s9 = sld [smem:[%s16749_s0 + %s14892_s22]]   ;;  %s14896_s22 = smov 60  }
  0x6d   :  { %16869 = sst [smem:[#allocation112_spill]] %s15241_s13 }
  0x6e   :  { %16867 = sst [smem:[#allocation110_spill]] %s15231_s8 }
  0x6f   :  { %s15246_s3 = sld [smem:[%s16749_s0 + %s14894_s7]]   ;;  %s14898_s7 = smov 62  }
  0x70   :  { %s15251_s5 = sld [smem:[%s16749_s0 + %s14895_s15]]   ;;  %s14899_s15 = smov 63  }
  0x71   :  { %s15261_s13 = sld [smem:[%s16749_s0 + %s14897_s28]]   ;;  %s14901_s28 = smov 65  }
  0x72   :  { %16868 = sst [smem:[#allocation111_spill]] %s15236_s9 }
  0x73   :  { %s15256_s9 = sld [smem:[%s16749_s0 + %s14896_s22]]   ;;  %s14900_s22 = smov 64  }
  0x74   :  { %s15266_s20 = sld [smem:[%s16749_s0 + %s14898_s7]]   ;;  %s14902_s7 = smov 66  }
  0x75   :  { %16870 = sst [smem:[#allocation113_spill]] %s15246_s3 }
  0x76   :  { %16871 = sst [smem:[#allocation114_spill]] %s15251_s5 }
  0x77   :  { %16872 = sst [smem:[#allocation115_spill]] %s15261_s13 }
  0x78   :  { %s15271_s5 = sld [smem:[%s16749_s0 + %s14899_s15]]   ;;  %s14903_s15 = smov 67  }
  0x79   :  { %s15276_s17 = sld [smem:[%s16749_s0 + %s14900_s22]]   ;;  %s14904_s22 = smov 68  }
  0x7a   :  { %16873 = sst [smem:[#allocation116_spill]] %s15266_s20 }
  0x7b   :  { %s15281_s13 = sld [smem:[%s16749_s0 + %s14901_s28]]   ;;  %s14905_s28 = smov 69  }
  0x7c   :  { %s15286_s20 = sld [smem:[%s16749_s0 + %s14902_s7]]   ;;  %s14906_s7 = smov 70  }
  0x7e   :  { %16874 = sst [smem:[#allocation117_spill]] %s15271_s5 }
  0x7f   :  { %16875 = sst [smem:[#allocation118_spill]] %s15276_s17 }
  0x80   :  { %s15291_s5 = sld [smem:[%s16749_s0 + %s14903_s15]]   ;;  %s14907_s15 = smov 71  }
  0x81   :  { %16876 = sst [smem:[#allocation119_spill]] %s15281_s13 }
  0x82   :  { %16877 = sst [smem:[#allocation120_spill]] %s15286_s20 }
  0x83   :  { %s15296_s17 = sld [smem:[%s16749_s0 + %s14904_s22]]   ;;  %s14908_s22 = smov 72  }
  0x84   :  { %s15301_s13 = sld [smem:[%s16749_s0 + %s14905_s28]]   ;;  %s14909_s28 = smov 73  }
  0x85   :  { %s15306_s20 = sld [smem:[%s16749_s0 + %s14906_s7]]   ;;  %s14910_s7 = smov 74  }
  0x86   :  { %16878 = sst [smem:[#allocation121_spill]] %s15291_s5 }
  0x87   :  { %s15311_s5 = sld [smem:[%s16749_s0 + %s14907_s15]]   ;;  %s14911_s15 = smov 75  }
  0x88   :  { %s15321_s25 = sld [smem:[%s16749_s0 + %s14909_s28]]   ;;  %s14913_s28 = smov 77  }
  0x89   :  { %16879 = sst [smem:[#allocation122_spill]] %s15296_s17 }
  0x8a   :  { %s15316_s17 = sld [smem:[%s16749_s0 + %s14908_s22]]   ;;  %s14912_s22 = smov 76  }
  0x8b   :  { %16880 = sst [smem:[#allocation123_spill]] %s15306_s20 }
  0x8c   :  { %s15326_s20 = sld [smem:[%s16749_s0 + %s14910_s7]]   ;;  %s14914_s7 = smov 78  }
  0x8d   :  { %16881 = sst [smem:[#allocation124_spill]] %s15311_s5 }
  0x8e   :  { %s15331_s5 = sld [smem:[%s16749_s0 + %s14911_s15]]   ;;  %s14915_s15 = smov 79  }
  0x8f   :  { %s15341_s29 = sld [smem:[%s16749_s0 + %s14913_s28]]   ;;  %s14917_s28 = smov 81  }
  0x90   :  { %16882 = sst [smem:[#allocation125_spill]] %s15316_s17 }
  0x91   :  { %s15336_s17 = sld [smem:[%s16749_s0 + %s14912_s22]]   ;;  %s14916_s22 = smov 80  }
  0x92   :  { %16883 = sst [smem:[#allocation126_spill]] %s15326_s20 }
  0x93   :  { %s15346_s20 = sld [smem:[%s16749_s0 + %s14914_s7]]  }
  0x94   :  { %16884 = sst [smem:[#allocation127_spill]] %s15331_s5 }
  0x95   :  { %s15351_s14 = sld [smem:[%s16749_s0 + %s14915_s15]]  }
  0x96   :  { %s15361_s30 = sld [smem:[%s16749_s0 + %s14917_s28]]  }
  0x97   :  { %16885 = sst [smem:[#allocation128_spill]] %s15336_s17 }
  0x98   :  { %s15356_s17 = sld [smem:[%s16749_s0 + %s14916_s22]]  }
  0x99   :  { %168 = vsyncpa [#allocation3], 0 }
  0x9a   :  { %169 = vsyncpa [#allocation5], 0 }
  0x9b   :  { %170 = vsyncpa [#allocation8], 0 }
  0x9c   :  { %171 = vsyncpa [#allocation11], 0 }
  0x9d   :  { %172 = vsyncpa [#allocation14], 0 }
  0x9e   :  { %173 = vsyncpa [#allocation17], 0 }
  0x9f   :  { %174 = vsyncpa [#allocation20], 0 }
  0xa0   :  { %175 = vsyncpa [#allocation23], 0 }
  0xa1   :  { %176 = vsyncpa [#allocation26], 0 }
  0xa2   :  { %177 = vsyncpa [#allocation29], 0 }
  0xa3   :  { %178 = vsyncpa [#allocation32], 0 }
  0xa4   :  { %179 = vsyncpa [#allocation35], 0 }
  0xa5   :  { %180 = vsyncpa [#allocation38], 0 }
  0xa6   :  { %181 = vsyncpa [#allocation41], 0 }
  0xa7   :  { %182 = vsyncpa [#allocation44], 0  ;;  %s15363_s7 = smov 0  }
  0xa8 LB: > { %s14918_s0 = smov [#allocation4]   ;;  %s15369_s11 = sadd.s32 4294967295, %s14835_s7   ;;  %s14835_s7 = sphi %s15363_s7, %s188_s7  }
  0xa9   : > { %s2018_s10 = sshll.u32 %s14918_s0, 4  ;;  %p11489_p0 = scmp.ge.s32.totalorder %s14835_s7, 1  ;;  %s2019_s10 = int_to_ptr.vmem [resolvable:$true] %s2018_s10 }
  0xaa   : > { %p1940_p1 = scmp.lt.s32.totalorder %s14835_s7, 3  ;;  %p16790_p2 = scmp.eq.s32.totalorder %s15369_s11, 0 }
  0xab   : > { %s14919_s16 = smov [#allocation7]   ;;  %s14920_s22 = smov [#allocation10]  }
  0xac   : > { %p15374_p3 = pnand %p11489_p0, %p1940_p1  ;;  %s2040_s18 = sshll.u32 %s14919_s16, 4  ;;  %s15380_s18 = int_to_ptr.vmem [resolvable:$true] %s2040_s18 }
  0xad   : > { %s2065_s23 = sshll.u32 %s14920_s22, 4  ;;  %s14921_s28 = smov [#allocation13]   ;;  %s15388_s23 = int_to_ptr.vmem [resolvable:$true] %s2065_s23 }
  0xae   : > { %s16886_s15 = scalar_select %p15374_p3, 1, 0 }
  0xaf   : > { %p13461_p4 = pneg %p15374_p3  ;;  %s2105_s1 = sshll.u32 %s14921_s28, 4  ;;  %s15390_s1 = int_to_ptr.vmem [resolvable:$true] %s2105_s1 }
  0xb0   : > { %s14052_s0 = scalar_lea.vmem %s2019_s10, 16  ;;  %s14059_s16 = scalar_lea.vmem %s2019_s10, 32 }
  0xb1   : > { %p15384_p5 = pnand %p16790_p2, %p13461_p4  ;;  %p14053_p7 = scmp.ne.s32.totalorder %s2019_s10, %s14052_s0 }
  0xb2   : > { %p14060_p10 = scmp.lt.s32.totalorder %s2019_s10, %s2019_s10  ;;  %p14061_p11 = scmp.lt.s32.totalorder %s14059_s16, %s14052_s0 }
  0xb3   : > { %p15394_p6 = pneg %p15384_p5 }
  0xb4   : > { %p14062_p12 = por %p14061_p11, %p14060_p10 }
  0xb5   : > { %p14055_p8 = pnand %p14053_p7, %p15394_p6 }
  0xb7   : > { %p14056_p9 = pneg %p14055_p8 }
  0xb9   : > { %p14063_p13 = pnand %p14062_p12, %p14056_p9 }
  0xbb   : > { %14066 = shalt.err (!%p14063_p13)
}
  0xbc   : > { %13467 = dma.hbm_to_vmem [thread:$0]  (!%p15384_p5), %s15071_s12, 16, %s2019_s10, [#allocation5]  }
  0xbd   : > { %s14078_s22 = scalar_lea.vmem %s15380_s18, 16  ;;  %s14085_s28 = scalar_lea.vmem %s15380_s18, 32 }
  0xbe   : > { %p14079_p0 = scmp.ne.s32.totalorder %s15380_s18, %s14078_s22  ;;  %p14086_p7 = scmp.lt.s32.totalorder %s15380_s18, %s15380_s18 }
  0xbf   : > { %p14087_p8 = scmp.lt.s32.totalorder %s14085_s28, %s14078_s22 }
  0xc0   : > { %p14081_p1 = pnand %p14079_p0, %p15394_p6 }
  0xc1   : > { %p14088_p9 = por %p14087_p8, %p14086_p7 }
  0xc2   : > { %p14082_p4 = pneg %p14081_p1 }
  0xc4   : > { %p14089_p10 = pnand %p14088_p9, %p14082_p4 }
  0xc6   : > { %14092 = shalt.err (!%p14089_p10)
}
  0xc7   : > { %13473 = dma.hbm_to_vmem [thread:$0]  (!%p15384_p5), %s15081_s24, 16, %s15380_s18, [#allocation8]  }
  0xc8   : > { %s14104_s10 = scalar_lea.vmem %s15388_s23, 16  ;;  %s14111_s0 = scalar_lea.vmem %s15388_s23, 32 }
  0xc9   : > { %p14105_p11 = scmp.ne.s32.totalorder %s15388_s23, %s14104_s10  ;;  %p14112_p0 = scmp.lt.s32.totalorder %s15388_s23, %s15388_s23 }
  0xca   : > { %p14113_p1 = scmp.lt.s32.totalorder %s14111_s0, %s14104_s10 }
  0xcb   : > { %p14107_p12 = pnand %p14105_p11, %p15394_p6 }
  0xcc   : > { %p14114_p4 = por %p14113_p1, %p14112_p0 }
  0xcd   : > { %p14108_p13 = pneg %p14107_p12 }
  0xcf   : > { %p14115_p7 = pnand %p14114_p4, %p14108_p13 }
  0xd1   : > { %14118 = shalt.err (!%p14115_p7)
}
  0xd2   : > { %s16889_s4 = sld [smem:[#allocation85_spill]]  ;;  %s14130_s18 = scalar_lea.vmem %s15390_s1, 16 }
  0xd3   : > { %p14131_p8 = scmp.ne.s32.totalorder %s15390_s1, %s14130_s18  ;;  %s14137_s16 = scalar_lea.vmem %s15390_s1, 32 }
  0xd4   : > { %p14138_p11 = scmp.lt.s32.totalorder %s15390_s1, %s15390_s1  ;;  %p14139_p12 = scmp.lt.s32.totalorder %s14137_s16, %s14130_s18 }
  0xd5   : > { %p14133_p9 = pnand %p14131_p8, %p15394_p6 }
  0xd6   : > { %p14140_p13 = por %p14139_p12, %p14138_p11 }
  0xd7   : > { %p14134_p10 = pneg %p14133_p9 }
  0xd8   : > { %13479 = dma.hbm_to_vmem [thread:$0]  (!%p15384_p5), %s16889_s4, 16, %s15388_s23, [#allocation11]  }
  0xd9   : > { %p14141_p0 = pnand %p14140_p13, %p14134_p10 }
  0xdb   : > { %14144 = shalt.err (!%p14141_p0)
}
  0xdc   : > { %13485 = dma.hbm_to_vmem [thread:$0]  (!%p15384_p5), %s15136_s27, 16, %s15390_s1, [#allocation14]  }
  0xdd   : > { %s14922_s22 = smov [#allocation16]   ;;  %s14923_s28 = smov [#allocation19]  }
  0xde   : > { %s2130_s23 = sshll.u32 %s14922_s22, 4  ;;  %s2167_s10 = sshll.u32 %s14923_s28, 4  ;;  %s2131_s23 = int_to_ptr.vmem [resolvable:$true] %s2130_s23  ;;  %s2168_s10 = int_to_ptr.vmem [resolvable:$true] %s2167_s10 }
  0xdf   : > { %s14156_s0 = scalar_lea.vmem %s2131_s23, 16  ;;  %s14163_s18 = scalar_lea.vmem %s2131_s23, 32 }
  0xe0   : > { %p14157_p1 = scmp.ne.s32.totalorder %s2131_s23, %s14156_s0  ;;  %p14164_p8 = scmp.lt.s32.totalorder %s2131_s23, %s2131_s23 }
  0xe1   : > { %p14165_p9 = scmp.lt.s32.totalorder %s14163_s18, %s14156_s0 }
  0xe2   : > { %p14159_p4 = pnand %p14157_p1, %p15394_p6 }
  0xe3   : > { %p14166_p10 = por %p14165_p9, %p14164_p8 }
  0xe4   : > { %p14160_p7 = pneg %p14159_p4 }
  0xe6   : > { %p14167_p11 = pnand %p14166_p10, %p14160_p7 }
  0xe8   : > { %14170 = shalt.err (!%p14167_p11)
}
  0xe9   : > { %13491 = dma.hbm_to_vmem [thread:$0]  (!%p15384_p5), %s15151_s21, 16, %s2131_s23, [#allocation17]  }
  0xea   : > { %s14182_s1 = scalar_lea.vmem %s2168_s10, 16  ;;  %s14189_s16 = scalar_lea.vmem %s2168_s10, 32 }
  0xeb   : > { %p14183_p12 = scmp.ne.s32.totalorder %s2168_s10, %s14182_s1  ;;  %p14190_p1 = scmp.lt.s32.totalorder %s2168_s10, %s2168_s10 }
  0xec   : > { %p14191_p4 = scmp.lt.s32.totalorder %s14189_s16, %s14182_s1 }
  0xed   : > { %p14185_p13 = pnand %p14183_p12, %p15394_p6 }
  0xee   : > { %p14192_p2 = por %p14191_p4, %p14190_p1 }
  0xef   : > { %p14186_p0 = pneg %p14185_p13 }
  0xf1   : > { %p14193_p3 = pnand %p14192_p2, %p14186_p0 }
  0xf3   : > { %14196 = shalt.err (!%p14193_p3)
}
  0xf4   : > { %s16890_s6 = sld [smem:[#allocation101_spill]]  ;;  %s14924_s22 = smov [#allocation22]  }
  0xf5   : > { %s2210_s28 = sshll.u32 %s14924_s22, 4  ;;  %s14925_s23 = smov [#allocation25]   ;;  %s2211_s28 = int_to_ptr.vmem [resolvable:$true] %s2210_s28 }
  0xf6   : > { %s2235_s0 = sshll.u32 %s14925_s23, 4  ;;  %s14208_s18 = scalar_lea.vmem %s2211_s28, 16  ;;  %s2236_s0 = int_to_ptr.vmem [resolvable:$true] %s2235_s0 }
  0xf7   : > { %p14209_p7 = scmp.ne.s32.totalorder %s2211_s28, %s14208_s18  ;;  %s14215_s4 = scalar_lea.vmem %s2211_s28, 32 }
  0xf8   : > { %p14216_p10 = scmp.lt.s32.totalorder %s2211_s28, %s2211_s28  ;;  %p14217_p11 = scmp.lt.s32.totalorder %s14215_s4, %s14208_s18 }
  0xf9   : > { %p14211_p8 = pnand %p14209_p7, %p15394_p6 }
  0xfa   : > { %13497 = dma.hbm_to_vmem [thread:$0]  (!%p15384_p5), %s16890_s6, 16, %s2168_s10, [#allocation20]  }
  0xfb   : > { %p14212_p9 = pneg %p14211_p8  ;;  %p14218_p2 = por %p14217_p11, %p14216_p10 }
  0xfd   : > { %p14219_p3 = pnand %p14218_p2, %p14212_p9 }
  0xff   : > { %14222 = shalt.err (!%p14219_p3)
}
 0x100   : > { %s16891_s8 = sld [smem:[#allocation110_spill]]  ;;  %s14234_s10 = scalar_lea.vmem %s2236_s0, 16 }
 0x101   : > { %p14235_p12 = scmp.ne.s32.totalorder %s2236_s0, %s14234_s10  ;;  %s14241_s1 = scalar_lea.vmem %s2236_s0, 32 }
 0x102   : > { %p14242_p1 = scmp.lt.s32.totalorder %s2236_s0, %s2236_s0  ;;  %p14243_p4 = scmp.lt.s32.totalorder %s14241_s1, %s14234_s10 }
 0x103   : > { %p14237_p13 = pnand %p14235_p12, %p15394_p6 }
 0x104   : > { %p14244_p7 = por %p14243_p4, %p14242_p1 }
 0x105   : > { %p14238_p0 = pneg %p14237_p13 }
 0x106   : > { %13503 = dma.hbm_to_vmem [thread:$0]  (!%p15384_p5), %s16891_s8, 16, %s2211_s28, [#allocation23]  }
 0x107   : > { %p14245_p8 = pnand %p14244_p7, %p14238_p0 }
 0x109   : > { %14248 = shalt.err (!%p14245_p8)
}
 0x10a   : > { %s16892_s3 = sld [smem:[#allocation113_spill]]  ;;  %s14926_s4 = smov [#allocation28]  }
 0x10b   : > { %s2257_s16 = sshll.u32 %s14926_s4, 4  ;;  %s14927_s22 = smov [#allocation31]   ;;  %s2258_s16 = int_to_ptr.vmem [resolvable:$true] %s2257_s16 }
 0x10c   : > { %s2300_s28 = sshll.u32 %s14927_s22, 4  ;;  %s14260_s23 = scalar_lea.vmem %s2258_s16, 16  ;;  %s2301_s28 = int_to_ptr.vmem [resolvable:$true] %s2300_s28 }
 0x10d   : > { %p14261_p9 = scmp.ne.s32.totalorder %s2258_s16, %s14260_s23  ;;  %s14267_s18 = scalar_lea.vmem %s2258_s16, 32 }
 0x10e   : > { %p14268_p2 = scmp.lt.s32.totalorder %s2258_s16, %s2258_s16  ;;  %p14269_p3 = scmp.lt.s32.totalorder %s14267_s18, %s14260_s23 }
 0x10f   : > { %p14263_p10 = pnand %p14261_p9, %p15394_p6 }
 0x110   : > { %13509 = dma.hbm_to_vmem [thread:$0]  (!%p15384_p5), %s16892_s3, 16, %s2236_s0, [#allocation26]  }
 0x111   : > { %p14264_p11 = pneg %p14263_p10  ;;  %p14270_p12 = por %p14269_p3, %p14268_p2 }
 0x113   : > { %p14271_p13 = pnand %p14270_p12, %p14264_p11 }
 0x115   : > { %14274 = shalt.err (!%p14271_p13)
}
 0x116   : > { %13515 = dma.hbm_to_vmem [thread:$0]  (!%p15384_p5), %s15256_s9, 16, %s2258_s16, [#allocation29]  }
 0x117   : > { %s14286_s0 = scalar_lea.vmem %s2301_s28, 16  ;;  %s14293_s10 = scalar_lea.vmem %s2301_s28, 32 }
 0x118   : > { %p14287_p0 = scmp.ne.s32.totalorder %s2301_s28, %s14286_s0  ;;  %p14294_p7 = scmp.lt.s32.totalorder %s2301_s28, %s2301_s28 }
 0x119   : > { %p14295_p8 = scmp.lt.s32.totalorder %s14293_s10, %s14286_s0 }
 0x11a   : > { %p14289_p1 = pnand %p14287_p0, %p15394_p6 }
 0x11b   : > { %p14296_p9 = por %p14295_p8, %p14294_p7 }
 0x11c   : > { %p14290_p4 = pneg %p14289_p1 }
 0x11e   : > { %p14297_p10 = pnand %p14296_p9, %p14290_p4 }
 0x120   : > { %14300 = shalt.err (!%p14297_p10)
}
 0x121   : > { %13521 = dma.hbm_to_vmem [thread:$0]  (!%p15384_p5), %s15301_s13, 16, %s2301_s28, [#allocation32]  }
 0x122   : > { %s14928_s1 = smov [#allocation34]   ;;  %s14929_s16 = smov [#allocation37]  }
 0x123   : > { %s2328_s4 = sshll.u32 %s14928_s1, 4  ;;  %s2350_s22 = sshll.u32 %s14929_s16, 4  ;;  %s2329_s4 = int_to_ptr.vmem [resolvable:$true] %s2328_s4  ;;  %s2351_s22 = int_to_ptr.vmem [resolvable:$true] %s2350_s22 }
 0x124   : > { %s14312_s23 = scalar_lea.vmem %s2329_s4, 16  ;;  %s14319_s18 = scalar_lea.vmem %s2329_s4, 32 }
 0x125   : > { %p14313_p11 = scmp.ne.s32.totalorder %s2329_s4, %s14312_s23  ;;  %p14320_p12 = scmp.lt.s32.totalorder %s2329_s4, %s2329_s4 }
 0x126   : > { %p14321_p13 = scmp.lt.s32.totalorder %s14319_s18, %s14312_s23 }
 0x127   : > { %p14315_p2 = pnand %p14313_p11, %p15394_p6 }
 0x128   : > { %p14322_p0 = por %p14321_p13, %p14320_p12 }
 0x129   : > { %p14316_p3 = pneg %p14315_p2 }
 0x12b   : > { %p14323_p1 = pnand %p14322_p0, %p14316_p3 }
 0x12d   : > { %14326 = shalt.err (!%p14323_p1)
}
 0x12e   : > { %13527 = dma.hbm_to_vmem [thread:$0]  (!%p15384_p5), %s15321_s25, 16, %s2329_s4, [#allocation35]  }
 0x12f   : > { %s14338_s28 = scalar_lea.vmem %s2351_s22, 16  ;;  %s14345_s0 = scalar_lea.vmem %s2351_s22, 32 }
 0x130   : > { %p14339_p4 = scmp.ne.s32.totalorder %s2351_s22, %s14338_s28  ;;  %p14346_p9 = scmp.lt.s32.totalorder %s2351_s22, %s2351_s22 }
 0x131   : > { %p14347_p10 = scmp.lt.s32.totalorder %s14345_s0, %s14338_s28 }
 0x132   : > { %p14341_p7 = pnand %p14339_p4, %p15394_p6 }
 0x133   : > { %p14348_p11 = por %p14347_p10, %p14346_p9 }
 0x134   : > { %p14342_p8 = pneg %p14341_p7 }
 0x136   : > { %p14349_p2 = pnand %p14348_p11, %p14342_p8 }
 0x138   : > { %14352 = shalt.err (!%p14349_p2)
}
 0x139   : > { %s16893_s5 = sld [smem:[#allocation127_spill]]  ;;  %s14930_s10 = smov [#allocation40]  }
 0x13a   : > { %s2372_s1 = sshll.u32 %s14930_s10, 4  ;;  %s14931_s4 = smov [#allocation2]   ;;  %s2373_s1 = int_to_ptr.vmem [resolvable:$true] %s2372_s1 }
 0x13b   : > { %s2007_s16 = sshll.u32 %s14931_s4, 4  ;;  %s14364_s23 = scalar_lea.vmem %s2373_s1, 16  ;;  %s2008_s16 = int_to_ptr.vmem [resolvable:$true] %s2007_s16 }
 0x13c   : > { %p14365_p3 = scmp.ne.s32.totalorder %s2373_s1, %s14364_s23  ;;  %s14371_s18 = scalar_lea.vmem %s2373_s1, 32 }
 0x13d   : > { %p14372_p0 = scmp.lt.s32.totalorder %s2373_s1, %s2373_s1  ;;  %p14373_p1 = scmp.lt.s32.totalorder %s14371_s18, %s14364_s23 }
 0x13e   : > { %p14367_p12 = pnand %p14365_p3, %p15394_p6 }
 0x13f   : > { %13533 = dma.hbm_to_vmem [thread:$0]  (!%p15384_p5), %s16893_s5, 16, %s2351_s22, [#allocation38]  }
 0x140   : > { %p14368_p13 = pneg %p14367_p12  ;;  %p14374_p4 = por %p14373_p1, %p14372_p0 }
 0x142   : > { %p14375_p7 = pnand %p14374_p4, %p14368_p13 }
 0x144   : > { %14378 = shalt.err (!%p14375_p7)
}
 0x145   : > { %13539 = dma.hbm_to_vmem [thread:$0]  (!%p15384_p5), %s15341_s29, 16, %s2373_s1, [#allocation41]  }
 0x146   : > { %s14390_s22 = scalar_lea.vmem %s2008_s16, 16  ;;  %s14397_s28 = scalar_lea.vmem %s2008_s16, 32 }
 0x147   : > { %p14391_p8 = scmp.ne.s32.totalorder %s2008_s16, %s14390_s22  ;;  %p14398_p11 = scmp.lt.s32.totalorder %s2008_s16, %s2008_s16 }
 0x148   : > { %p14399_p2 = scmp.lt.s32.totalorder %s14397_s28, %s14390_s22 }
 0x149   : > { %p14393_p9 = pnand %p14391_p8, %p15394_p6 }
 0x14a   : > { %p14400_p3 = por %p14399_p2, %p14398_p11 }
 0x14b   : > { %p14394_p10 = pneg %p14393_p9 }
 0x14d   : > { %p14401_p12 = pnand %p14400_p3, %p14394_p10 }
 0x14f   : > { %14404 = shalt.err (!%p14401_p12)
}
 0x150   : > { %13464 = dma.hbm_to_vmem [thread:$0]  (!%p15384_p5), %s15066_s19, 16, %s2008_s16, [#allocation3]  }
 0x151   : > { %s14932_s0 = smov [#allocation6]   ;;  %s14933_s1 = smov [#allocation9]  }
 0x152   : > { %s2029_s10 = sshll.u32 %s14932_s0, 4  ;;  %s2051_s4 = sshll.u32 %s14933_s1, 4  ;;  %s2030_s10 = int_to_ptr.vmem [resolvable:$true] %s2029_s10  ;;  %s2052_s4 = int_to_ptr.vmem [resolvable:$true] %s2051_s4 }
 0x153   : > { %s14416_s23 = scalar_lea.vmem %s2030_s10, 16  ;;  %s14423_s18 = scalar_lea.vmem %s2030_s10, 32 }
 0x154   : > { %p14417_p13 = scmp.ne.s32.totalorder %s2030_s10, %s14416_s23  ;;  %p14424_p4 = scmp.lt.s32.totalorder %s2030_s10, %s2030_s10 }
 0x155   : > { %p14425_p7 = scmp.lt.s32.totalorder %s14423_s18, %s14416_s23 }
 0x156   : > { %p14419_p0 = pnand %p14417_p13, %p15394_p6 }
 0x157   : > { %p14426_p8 = por %p14425_p7, %p14424_p4 }
 0x158   : > { %p14420_p1 = pneg %p14419_p0 }
 0x15a   : > { %p14427_p9 = pnand %p14426_p8, %p14420_p1 }
 0x15c   : > { %14430 = shalt.err (!%p14427_p9)
}
 0x15d   : > { %s16894_s22 = sld [smem:[#allocation82_spill]]  ;;  %s14442_s16 = scalar_lea.vmem %s2052_s4, 16 }
 0x15e   : > { %p14443_p10 = scmp.ne.s32.totalorder %s2052_s4, %s14442_s16  ;;  %s14449_s28 = scalar_lea.vmem %s2052_s4, 32 }
 0x15f   : > { %p14450_p3 = scmp.lt.s32.totalorder %s2052_s4, %s2052_s4  ;;  %p14451_p12 = scmp.lt.s32.totalorder %s14449_s28, %s14442_s16 }
 0x160   : > { %p14445_p11 = pnand %p14443_p10, %p15394_p6 }
 0x161   : > { %p14452_p13 = por %p14451_p12, %p14450_p3 }
 0x162   : > { %p14446_p2 = pneg %p14445_p11 }
 0x163   : > { %13470 = dma.hbm_to_vmem [thread:$0]  (!%p15384_p5), %s16894_s22, 16, %s2030_s10, [#allocation5]  }
 0x164   : > { %p14453_p0 = pnand %p14452_p13, %p14446_p2 }
 0x166   : > { %14456 = shalt.err (!%p14453_p0)
}
 0x167   : > { %s16895_s0 = sld [smem:[#allocation83_spill]]  ;;  %s14934_s1 = smov [#allocation12]  }
 0x168   : > { %s2094_s23 = sshll.u32 %s14934_s1, 4  ;;  %s14935_s10 = smov [#allocation15]   ;;  %s2095_s23 = int_to_ptr.vmem [resolvable:$true] %s2094_s23 }
 0x169   : > { %s2116_s18 = sshll.u32 %s14935_s10, 4  ;;  %s14468_s22 = scalar_lea.vmem %s2095_s23, 16  ;;  %s2117_s18 = int_to_ptr.vmem [resolvable:$true] %s2116_s18 }
 0x16a   : > { %p14469_p1 = scmp.ne.s32.totalorder %s2095_s23, %s14468_s22  ;;  %s14475_s3 = scalar_lea.vmem %s2095_s23, 32 }
 0x16b   : > { %p14476_p8 = scmp.lt.s32.totalorder %s2095_s23, %s2095_s23  ;;  %p14477_p9 = scmp.lt.s32.totalorder %s14475_s3, %s14468_s22 }
 0x16c   : > { %p14471_p4 = pnand %p14469_p1, %p15394_p6 }
 0x16d   : > { %13476 = dma.hbm_to_vmem [thread:$0]  (!%p15384_p5), %s16895_s0, 16, %s2052_s4, [#allocation8]  }
 0x16e   : > { %p14472_p7 = pneg %p14471_p4  ;;  %p14478_p10 = por %p14477_p9, %p14476_p8 }
 0x170   : > { %p14479_p11 = pnand %p14478_p10, %p14472_p7 }
 0x172   : > { %14482 = shalt.err (!%p14479_p11)
}
 0x173   : > { %s16896_s16 = sld [smem:[#allocation92_spill]]  ;;  %s14494_s4 = scalar_lea.vmem %s2117_s18, 16 }
 0x174   : > { %p14495_p2 = scmp.ne.s32.totalorder %s2117_s18, %s14494_s4  ;;  %s14501_s28 = scalar_lea.vmem %s2117_s18, 32 }
 0x175   : > { %p14502_p13 = scmp.lt.s32.totalorder %s2117_s18, %s2117_s18  ;;  %p14503_p0 = scmp.lt.s32.totalorder %s14501_s28, %s14494_s4 }
 0x176   : > { %p14497_p3 = pnand %p14495_p2, %p15394_p6 }
 0x177   : > { %p14504_p1 = por %p14503_p0, %p14502_p13 }
 0x178   : > { %p14498_p12 = pneg %p14497_p3 }
 0x179   : > { %13482 = dma.hbm_to_vmem [thread:$0]  (!%p15384_p5), %s16896_s16, 16, %s2095_s23, [#allocation11]  }
 0x17a   : > { %p14505_p4 = pnand %p14504_p1, %p14498_p12 }
 0x17c   : > { %14508 = shalt.err (!%p14505_p4)
}
 0x17d   : > { %s16897_s3 = sld [smem:[#allocation93_spill]]  ;;  %s14936_s0 = smov [#allocation18]  }
 0x17e   : > { %s2144_s1 = sshll.u32 %s14936_s0, 4  ;;  %s14937_s23 = smov [#allocation21]   ;;  %s2145_s1 = int_to_ptr.vmem [resolvable:$true] %s2144_s1 }
 0x17f   : > { %s2196_s10 = sshll.u32 %s14937_s23, 4  ;;  %s14520_s22 = scalar_lea.vmem %s2145_s1, 16  ;;  %s2197_s10 = int_to_ptr.vmem [resolvable:$true] %s2196_s10 }
 0x180   : > { %p14521_p7 = scmp.ne.s32.totalorder %s2145_s1, %s14520_s22  ;;  %s14527_s16 = scalar_lea.vmem %s2145_s1, 32 }
 0x181   : > { %p14528_p10 = scmp.lt.s32.totalorder %s2145_s1, %s2145_s1  ;;  %p14529_p11 = scmp.lt.s32.totalorder %s14527_s16, %s14520_s22 }
 0x182   : > { %p14523_p8 = pnand %p14521_p7, %p15394_p6 }
 0x183   : > { %13488 = dma.hbm_to_vmem [thread:$0]  (!%p15384_p5), %s16897_s3, 16, %s2117_s18, [#allocation14]  }
 0x184   : > { %p14524_p9 = pneg %p14523_p8  ;;  %p14530_p2 = por %p14529_p11, %p14528_p10 }
 0x186   : > { %p14531_p3 = pnand %p14530_p2, %p14524_p9 }
 0x188   : > { %14534 = shalt.err (!%p14531_p3)
}
 0x189   : > { %s16898_s4 = sld [smem:[#allocation96_spill]]  ;;  %s14546_s18 = scalar_lea.vmem %s2197_s10, 16 }
 0x18a   : > { %p14547_p12 = scmp.ne.s32.totalorder %s2197_s10, %s14546_s18  ;;  %s14553_s28 = scalar_lea.vmem %s2197_s10, 32 }
 0x18b   : > { %p14554_p1 = scmp.lt.s32.totalorder %s2197_s10, %s2197_s10  ;;  %p14555_p4 = scmp.lt.s32.totalorder %s14553_s28, %s14546_s18 }
 0x18c   : > { %p14549_p13 = pnand %p14547_p12, %p15394_p6 }
 0x18d   : > { %p14556_p7 = por %p14555_p4, %p14554_p1 }
 0x18e   : > { %p14550_p0 = pneg %p14549_p13 }
 0x18f   : > { %13494 = dma.hbm_to_vmem [thread:$0]  (!%p15384_p5), %s16898_s4, 16, %s2145_s1, [#allocation17]  }
 0x190   : > { %p14557_p8 = pnand %p14556_p7, %p14550_p0 }
 0x192   : > { %14560 = shalt.err (!%p14557_p8)
}
 0x193   : > { %s16899_s3 = sld [smem:[#allocation108_spill]]  ;;  %s14938_s0 = smov [#allocation24]  }
 0x194   : > { %s2224_s23 = sshll.u32 %s14938_s0, 4  ;;  %s14939_s1 = smov [#allocation27]   ;;  %s2225_s23 = int_to_ptr.vmem [resolvable:$true] %s2224_s23 }
 0x195   : > { %s2246_s22 = sshll.u32 %s14939_s1, 4  ;;  %s14572_s16 = scalar_lea.vmem %s2225_s23, 16  ;;  %s2247_s22 = int_to_ptr.vmem [resolvable:$true] %s2246_s22 }
 0x196   : > { %p14573_p9 = scmp.ne.s32.totalorder %s2225_s23, %s14572_s16  ;;  %s14579_s4 = scalar_lea.vmem %s2225_s23, 32 }
 0x197   : > { %p14580_p2 = scmp.lt.s32.totalorder %s2225_s23, %s2225_s23  ;;  %p14581_p3 = scmp.lt.s32.totalorder %s14579_s4, %s14572_s16 }
 0x198   : > { %p14575_p10 = pnand %p14573_p9, %p15394_p6 }
 0x199   : > { %13500 = dma.hbm_to_vmem [thread:$0]  (!%p15384_p5), %s16899_s3, 16, %s2197_s10, [#allocation20]  }
 0x19a   : > { %p14576_p11 = pneg %p14575_p10  ;;  %p14582_p12 = por %p14581_p3, %p14580_p2 }
 0x19c   : > { %p14583_p13 = pnand %p14582_p12, %p14576_p11 }
 0x19e   : > { %14586 = shalt.err (!%p14583_p13)
}
 0x19f   : > { %s16900_s18 = sld [smem:[#allocation112_spill]]  ;;  %s14598_s10 = scalar_lea.vmem %s2247_s22, 16 }
 0x1a0   : > { %p14599_p0 = scmp.ne.s32.totalorder %s2247_s22, %s14598_s10  ;;  %s14605_s28 = scalar_lea.vmem %s2247_s22, 32 }
 0x1a1   : > { %p14606_p7 = scmp.lt.s32.totalorder %s2247_s22, %s2247_s22  ;;  %p14607_p8 = scmp.lt.s32.totalorder %s14605_s28, %s14598_s10 }
 0x1a2   : > { %p14601_p1 = pnand %p14599_p0, %p15394_p6 }
 0x1a3   : > { %p14608_p9 = por %p14607_p8, %p14606_p7 }
 0x1a4   : > { %p14602_p4 = pneg %p14601_p1 }
 0x1a5   : > { %13506 = dma.hbm_to_vmem [thread:$0]  (!%p15384_p5), %s16900_s18, 16, %s2225_s23, [#allocation23]  }
 0x1a6   : > { %p14609_p10 = pnand %p14608_p9, %p14602_p4 }
 0x1a8   : > { %14612 = shalt.err (!%p14609_p10)
}
 0x1a9   : > { %s16901_s3 = sld [smem:[#allocation114_spill]]  ;;  %s14940_s0 = smov [#allocation30]  }
 0x1aa   : > { %s2271_s1 = sshll.u32 %s14940_s0, 4  ;;  %s14941_s23 = smov [#allocation33]   ;;  %s2272_s1 = int_to_ptr.vmem [resolvable:$true] %s2271_s1 }
 0x1ab   : > { %s2314_s16 = sshll.u32 %s14941_s23, 4  ;;  %s14624_s4 = scalar_lea.vmem %s2272_s1, 16  ;;  %s2315_s16 = int_to_ptr.vmem [resolvable:$true] %s2314_s16 }
 0x1ac   : > { %p14625_p11 = scmp.ne.s32.totalorder %s2272_s1, %s14624_s4  ;;  %s14631_s18 = scalar_lea.vmem %s2272_s1, 32 }
 0x1ad   : > { %p14632_p12 = scmp.lt.s32.totalorder %s2272_s1, %s2272_s1  ;;  %p14633_p13 = scmp.lt.s32.totalorder %s14631_s18, %s14624_s4 }
 0x1ae   : > { %p14627_p2 = pnand %p14625_p11, %p15394_p6 }
 0x1af   : > { %13512 = dma.hbm_to_vmem [thread:$0]  (!%p15384_p5), %s16901_s3, 16, %s2247_s22, [#allocation26]  }
 0x1b0   : > { %p14628_p3 = pneg %p14627_p2  ;;  %p14634_p0 = por %p14633_p13, %p14632_p12 }
 0x1b2   : > { %p14635_p1 = pnand %p14634_p0, %p14628_p3 }
 0x1b4   : > { %14638 = shalt.err (!%p14635_p1)
}
 0x1b5   : > { %s16902_s10 = sld [smem:[#allocation116_spill]]  ;;  %s14650_s22 = scalar_lea.vmem %s2315_s16, 16 }
 0x1b6   : > { %p14651_p4 = scmp.ne.s32.totalorder %s2315_s16, %s14650_s22  ;;  %s14657_s28 = scalar_lea.vmem %s2315_s16, 32 }
 0x1b7   : > { %p14658_p9 = scmp.lt.s32.totalorder %s2315_s16, %s2315_s16  ;;  %p14659_p10 = scmp.lt.s32.totalorder %s14657_s28, %s14650_s22 }
 0x1b8   : > { %p14653_p7 = pnand %p14651_p4, %p15394_p6 }
 0x1b9   : > { %p14660_p11 = por %p14659_p10, %p14658_p9 }
 0x1ba   : > { %p14654_p8 = pneg %p14653_p7 }
 0x1bb   : > { %13518 = dma.hbm_to_vmem [thread:$0]  (!%p15384_p5), %s16902_s10, 16, %s2272_s1, [#allocation29]  }
 0x1bc   : > { %p14661_p2 = pnand %p14660_p11, %p14654_p8 }
 0x1be   : > { %14664 = shalt.err (!%p14661_p2)
}
 0x1bf   : > { %s16903_s3 = sld [smem:[#allocation124_spill]]  ;;  %s14942_s0 = smov [#allocation36]  }
 0x1c0   : > { %s2339_s23 = sshll.u32 %s14942_s0, 4  ;;  %s14943_s1 = smov [#allocation39]   ;;  %s2340_s23 = int_to_ptr.vmem [resolvable:$true] %s2339_s23 }
 0x1c1   : > { %s2361_s4 = sshll.u32 %s14943_s1, 4  ;;  %s14676_s18 = scalar_lea.vmem %s2340_s23, 16  ;;  %s2362_s4 = int_to_ptr.vmem [resolvable:$true] %s2361_s4 }
 0x1c2   : > { %p14677_p3 = scmp.ne.s32.totalorder %s2340_s23, %s14676_s18  ;;  %s14683_s10 = scalar_lea.vmem %s2340_s23, 32 }
 0x1c3   : > { %p14684_p0 = scmp.lt.s32.totalorder %s2340_s23, %s2340_s23  ;;  %p14685_p1 = scmp.lt.s32.totalorder %s14683_s10, %s14676_s18 }
 0x1c4   : > { %p14679_p12 = pnand %p14677_p3, %p15394_p6 }
 0x1c5   : > { %13524 = dma.hbm_to_vmem [thread:$0]  (!%p15384_p5), %s16903_s3, 16, %s2315_s16, [#allocation32]  }
 0x1c6   : > { %p14680_p13 = pneg %p14679_p12  ;;  %p14686_p4 = por %p14685_p1, %p14684_p0 }
 0x1c8   : > { %p14687_p7 = pnand %p14686_p4, %p14680_p13 }
 0x1ca   : > { %14690 = shalt.err (!%p14687_p7)
}
 0x1cb   : > { %s16904_s22 = sld [smem:[#allocation126_spill]]  ;;  %s14702_s16 = scalar_lea.vmem %s2362_s4, 16 }
 0x1cc   : > { %p14703_p8 = scmp.ne.s32.totalorder %s2362_s4, %s14702_s16  ;;  %s14709_s28 = scalar_lea.vmem %s2362_s4, 32 }
 0x1cd   : > { %p14710_p11 = scmp.lt.s32.totalorder %s2362_s4, %s2362_s4  ;;  %p14711_p2 = scmp.lt.s32.totalorder %s14709_s28, %s14702_s16 }
 0x1ce   : > { %p14705_p9 = pnand %p14703_p8, %p15394_p6 }
 0x1cf   : > { %p14712_p3 = por %p14711_p2, %p14710_p11 }
 0x1d0   : > { %p14706_p10 = pneg %p14705_p9 }
 0x1d1   : > { %13530 = dma.hbm_to_vmem [thread:$0]  (!%p15384_p5), %s16904_s22, 16, %s2340_s23, [#allocation35]  }
 0x1d2   : > { %p14713_p12 = pnand %p14712_p3, %p14706_p10 }
 0x1d4   : > { %14716 = shalt.err (!%p14713_p12)
}
 0x1d5   : > { %s16905_s3 = sld [smem:[#allocation128_spill]]  ;;  %s14944_s0 = smov [#allocation42]  }
 0x1d6   : > { %s2383_s1 = sshll.u32 %s14944_s0, 4  ;;  %s14945_s23 = smov [#allocation43]   ;;  %s2384_s1 = int_to_ptr.vmem [resolvable:$true] %s2383_s1 }
 0x1d7   : > { %s2394_s18 = sshll.u32 %s14945_s23, 4  ;;  %s14728_s10 = scalar_lea.vmem %s2384_s1, 16  ;;  %s2395_s18 = int_to_ptr.vmem [resolvable:$true] %s2394_s18 }
 0x1d8   : > { %p14729_p13 = scmp.ne.s32.totalorder %s2384_s1, %s14728_s10  ;;  %s14735_s22 = scalar_lea.vmem %s2384_s1, 32 }
 0x1d9   : > { %p14736_p4 = scmp.lt.s32.totalorder %s2384_s1, %s2384_s1  ;;  %p14737_p7 = scmp.lt.s32.totalorder %s14735_s22, %s14728_s10 }
 0x1da   : > { %p14731_p0 = pnand %p14729_p13, %p15394_p6 }
 0x1db   : > { %13536 = dma.hbm_to_vmem [thread:$0]  (!%p15384_p5), %s16905_s3, 16, %s2362_s4, [#allocation38]  }
 0x1dc   : > { %p14732_p1 = pneg %p14731_p0  ;;  %p14738_p8 = por %p14737_p7, %p14736_p4 }
 0x1de   : > { %p14739_p9 = pnand %p14738_p8, %p14732_p1 }
 0x1e0   : > { %14742 = shalt.err (!%p14739_p9)
}
 0x1e1   : > { %13542 = dma.hbm_to_vmem [thread:$0]  (!%p15384_p5), %s15346_s20, 16, %s2384_s1, [#allocation41]  }
 0x1e2   : > { %s14754_s4 = scalar_lea.vmem %s2395_s18, 16  ;;  %s14761_s16 = scalar_lea.vmem %s2395_s18, 32 }
 0x1e3   : > { %p14755_p10 = scmp.ne.s32.totalorder %s2395_s18, %s14754_s4  ;;  %p14762_p3 = scmp.lt.s32.totalorder %s2395_s18, %s2395_s18 }
 0x1e4   : > { %p14763_p12 = scmp.lt.s32.totalorder %s14761_s16, %s14754_s4 }
 0x1e5   : > { %p14757_p11 = pnand %p14755_p10, %p15394_p6 }
 0x1e6   : > { %p14764_p13 = por %p14763_p12, %p14762_p3 }
 0x1e7   : > { %p14758_p2 = pneg %p14757_p11 }
 0x1e9   : > { %p14765_p0 = pnand %p14764_p13, %p14758_p2 }
 0x1eb   : > { %14768 = shalt.err (!%p14765_p0)
}
 0x1ec   : > { %13545 = dma.hbm_to_vmem [thread:$0]  (!%p15384_p5), %s15351_s14, 16, %s2395_s18, [#allocation44]  }
 0x1ed   : > { %p16906_p1 = scmp.ne.s32.totalorder %s16886_s15, 0 }
 0x1ee   : > { %p16907_p4 = scmp.eq.s32.totalorder (!%p16906_p1), %s15369_s11, 0 }
 0x1ef   : > { %2442 = sbr.rel (%p16906_p1) target bundleno = 19697 (0x4cf1), region = 344 }
 0x1f4   : > { %14774 = dma.done.wait (%p16907_p4), [#allocation3], 16   ;;  %p16908_p7 = pmov %p16907_p4 }
 0x1f5   : > { %p16909_p6 = pmov %p16907_p4 }
 0x1f6   : > { %14776 = vsyncadd (%p16908_p7), [#allocation3], 4294967280 }
 0x1f7   : > { %14778 = dma.done.wait (%p16909_p6), [#allocation5], 32   ;;  %p16910_p8 = pmov %p16907_p4 }
 0x1f8   : > { %p16911_p9 = pmov %p16907_p4 }
 0x1f9   : > { %14780 = vsyncadd (%p16910_p8), [#allocation5], 4294967264 }
 0x1fa   : > { %14782 = dma.done.wait (%p16911_p9), [#allocation8], 32   ;;  %p16912_p5 = pmov %p16907_p4 }
 0x1fb   : > { %p16913_p10 = pmov %p16907_p4 }
 0x1fc   : > { %14784 = vsyncadd (%p16912_p5), [#allocation8], 4294967264 }
 0x1fd   : > { %14786 = dma.done.wait (%p16913_p10), [#allocation11], 32   ;;  %p16914_p11 = pmov %p16907_p4 }
 0x1fe   : > { %p16915_p2 = pmov %p16907_p4 }
 0x1ff   : > { %14788 = vsyncadd (%p16914_p11), [#allocation11], 4294967264 }
 0x200   : > { %14790 = dma.done.wait (%p16915_p2), [#allocation14], 32   ;;  %p16916_p3 = pmov %p16915_p2 }
 0x201   : > { %p16917_p12 = pmov %p16915_p2 }
 0x202   : > { %14792 = vsyncadd (%p16916_p3), [#allocation14], 4294967264 }
 0x203   : > { %14794 = dma.done.wait (%p16917_p12), [#allocation17], 32   ;;  %p16918_p13 = pmov %p16915_p2 }
 0x204   : > { %p16919_p0 = pmov %p16915_p2 }
 0x205   : > { %14796 = vsyncadd (%p16918_p13), [#allocation17], 4294967264 }
 0x206   : > { %14798 = dma.done.wait (%p16919_p0), [#allocation20], 32   ;;  %p16920_p1 = pmov %p16919_p0 }
 0x207   : > { %p16921_p4 = pmov %p16919_p0 }
 0x208   : > { %14800 = vsyncadd (%p16920_p1), [#allocation20], 4294967264 }
 0x209   : > { %14802 = dma.done.wait (%p16921_p4), [#allocation23], 32   ;;  %p16922_p7 = pmov %p16919_p0 }
 0x20a   : > { %p16923_p6 = pmov %p16919_p0 }
 0x20b   : > { %14804 = vsyncadd (%p16922_p7), [#allocation23], 4294967264 }
 0x20c   : > { %14806 = dma.done.wait (%p16923_p6), [#allocation26], 32   ;;  %p16924_p8 = pmov %p16919_p0 }
 0x20d   : > { %p16925_p9 = pmov %p16919_p0 }
 0x20e   : > { %14808 = vsyncadd (%p16924_p8), [#allocation26], 4294967264 }
 0x20f   : > { %14810 = dma.done.wait (%p16925_p9), [#allocation29], 32   ;;  %p16926_p5 = pmov %p16919_p0 }
 0x210   : > { %p16927_p10 = pmov %p16919_p0 }
 0x211   : > { %14812 = vsyncadd (%p16926_p5), [#allocation29], 4294967264 }
 0x212   : > { %14814 = dma.done.wait (%p16927_p10), [#allocation32], 32   ;;  %p16928_p11 = pmov %p16919_p0 }
 0x213   : > { %p16929_p2 = pmov %p16919_p0 }
 0x214   : > { %14816 = vsyncadd (%p16928_p11), [#allocation32], 4294967264 }
 0x215   : > { %14818 = dma.done.wait (%p16929_p2), [#allocation35], 32   ;;  %p16930_p3 = pmov %p16919_p0 }
 0x216   : > { %p16931_p12 = pmov %p16919_p0 }
 0x217   : > { %14820 = vsyncadd (%p16930_p3), [#allocation35], 4294967264 }
 0x218   : > { %14822 = dma.done.wait (%p16931_p12), [#allocation38], 32   ;;  %p16932_p13 = pmov %p16919_p0 }
 0x21a   : > { %14824 = vsyncadd (%p16932_p13), [#allocation38], 4294967264 }
 0x21b   : > { %14826 = dma.done.wait (%p16919_p0), [#allocation41], 32   ;;  %p16933_p1 = pmov %p16919_p0 }
 0x21c   : > { %p16934_p4 = pmov %p16919_p0 }
 0x21d   : > { %14828 = vsyncadd (%p16933_p1), [#allocation41], 4294967264 }
 0x21e   : > { %14830 = dma.done.wait (%p16934_p4), [#allocation44], 16   ;;  %p16935_p7 = pmov %p16919_p0 }
 0x21f   : > { %s16936_s15 = sld [smem:[#allocation60_spill]]  ;;  %p2745_p6 = scmp.lt.s32.totalorder %s15369_s11, 1  ;;  %v2777_v0 = vlaneseq  ;;  %v14946_v1 = vmov 0.0   ;;  %vm14947_vm0 = vmmov 0   ;;  %vm2797_vm1 = vcmask 1041408  }
 0x220   : > { %14832 = vsyncadd (%p16935_p7), [#allocation44], 4294967280  ;;  %s16937_s26 = sld [smem:[#allocation98_spill]]  ;;  %12481 = vmatprep.subr.bf16.mxu0 %v14946_v1  ;;  %12487 = vmatprep.subr.bf16.mxu1 %v14946_v1  ;;  %vm2793_vm2 = vcmask 31744   ;;  %v11561_v46 = vld [vmem:[#allocation18] ss:$0 sm:$0xff] }
 0x221   : > { %12483 = vmatprep.mubr.msk.bf16.mxu0 %vm14947_vm0, %v14946_v1  ;;  %s16989_s11 = smov (!%p2745_p6, %s15369_s11), 1  ;;  %12489 = vmatprep.mubr.msk.bf16.mxu1 %vm14947_vm0, %v14946_v1  ;;  %v15628_v2 = vshrl.u32 %v2777_v0, 7  ;;  %s16938_s3 = sld [smem:[#allocation99_spill]]  ;;  %vm3028_vm5 = vcmask 261120   ;;  %vm3205_vm6 = vcmask 64512   ;;  %vm3253_vm7 = vcmask 130048  }
 0x222   : > { %s12129_s2 = sshll.u32 %s16989_s11, 4  ;;  %s16939_s0 = sld [smem:[#allocation61_spill]]  ;;  %vm3647_vm8 = vcmask 1043456   ;;  %vm4652_vm9 = vcmask 523264   ;;  %vm4980_vm11 = vcmask 1040384   ;;  %vm4988_vm13 = vcmask 1046528  }
 0x223   : > { %vm2779_vm3 = vcmp.lt.s32.totalorder %v15628_v2, 1  ;;  %vm2785_vm4 = vcmp.lt.s32.totalorder %v15628_v2, 7  ;;  %s16940_s23 = sld [smem:[#allocation106_spill]]  ;;  %vm4996_vm14 = vcmask 1045504   ;;  %vm5006_vm15 = vcmask 121856  }
 0x224   : > { %s16941_s18 = sld [smem:[#allocation104_spill]] }
 0x225   : > { %s2749_s28 = scalar_lea.vmem %s16936_s15, %s12129_s2  ;;  %s16942_s10 = sld [smem:[#allocation97_spill]] }
 0x226   : > { %v11555_v3 = vld [vmem:[%s16937_s26 + $0x2] sm:$0x3]  ;;  %v2790_v4 = vld [vmem:[%s16937_s26] sm:$0x3]  ;;  %v2772_v8 = vld [vmem:[%s2749_s28 + $0x8] sm:$0xff]  ;;  %s16943_s22 = sld [smem:[#allocation107_spill]] }
 0x227   : > { %v2771_v5 = vld [vmem:[%s2749_s28] sm:$0xff]  ;;  %v2799_v6 = vsel %vm2797_vm1, %v11555_v3, 0  ;;  %v2846_v7 = vsel %vm2797_vm1, %v2790_v4, 0  ;;  %v2776_v11 = vrot.slane %v2772_v8, 7  ;;  %v2784_v12 = vrot.slane %v2772_v8, 1  ;;  %s16944_s4 = sld [smem:[#allocation100_spill]] }
 0x228   : > { %v2775_v9 = vrot.slane %v2771_v5, 7  ;;  %v2783_v10 = vrot.slane %v2771_v5, 1  ;;  %12482 = vmatpush3.bf16.msra.mxu0 %v2799_v6  ;;  %12488 = vmatpush3.bf16.msra.mxu1 %v2846_v7  ;;  %v2789_v13 = vpack.c.bf16 %v2772_v8, %v2771_v5  ;;  %v11558_v14 = vld [vmem:[%s16937_s26 + $0x4] sm:$0x3]  ;;  %v2941_v15 = vld [vmem:[%s16938_s3] sm:$0x3]  ;;  %s2754_s1 = scalar_lea.vmem %s16939_s0, %s12129_s2 }
 0x229   : > { %12493 = vmatprep.subr.bf16.mxu0 %v14946_v1  ;;  %v2895_v16 = vsel %vm2797_vm1, %v11558_v14, 0  ;;  %12499 = vmatprep.subr.bf16.mxu1 %v14946_v1  ;;  %v2946_v17 = vsel %vm2797_vm1, %v2941_v15, 0  ;;  %v2773_v23 = vld [vmem:[%s2754_s1] sm:$0xff]  ;;  %v2774_v24 = vld [vmem:[%s2754_s1 + $0x8] sm:$0xff]  ;;  %s16945_s16 = sld [smem:[#allocation102_spill]] }
 0x22a   : > { %v2780_v18 = vsel %vm2779_vm3, %v2775_v9, %v2776_v11  ;;  %v2781_v19 = vsel %vm2779_vm3, %v2776_v11, %v2775_v9  ;;  %v2786_v21 = vsel %vm2785_vm4, %v2783_v10, %v2784_v12  ;;  %v2787_v22 = vsel %vm2785_vm4, %v2784_v12, %v2783_v10  ;;  %v13721_v27 = vld [vmem:[%s16940_s23 + $0x8] sm:$0xff]   ;;  %v13723_v29 = vld [vmem:[%s16940_s23] sm:$0xff]   ;;  %s16946_s15 = sld [smem:[#allocation103_spill]] }
 0x22b   : > { %12484 = vmatmul.mubr.msk.bf16.vlgmr.msra.gmra.mxu0 %vm2793_vm2, %v2789_v13  ;;  %v2782_v20 = vpack.c.bf16 %v2780_v18, %v2781_v19  ;;  %v2788_v25 = vpack.c.bf16 %v2787_v22, %v2786_v21  ;;  %v2940_v26 = vpack.c.bf16 %v2774_v24, %v2773_v23  ;;  %v13722_v28 = vld [vmem:[%s16941_s18 + $0x8] sm:$0xff]   ;;  %v13724_v30 = vld [vmem:[%s16941_s18] sm:$0xff]   ;;  %s16947_s2 = sld [smem:[#allocation105_spill]] }
 0x22c   : > { %12494 = vmatpush3.bf16.msra.mxu0 %v2895_v16  ;;  %12495 = vmatprep.mubr.msk.bf16.mxu0 %vm14947_vm0, %v14946_v1  ;;  %v3000_v54 = vld [vmem:[%s16942_s10] sm:$0xff]  ;;  %v3001_v55 = vld [vmem:[%s16942_s10 + $0x8] sm:$0xff]  ;;  %s16948_s28 = sld [smem:[#allocation109_spill]] }
 0x22d   : > { %12490 = vmatmul.mubr.msk.bf16.vlgmr.msra.gmra.mxu1 %vm2793_vm2, %v2782_v20  ;;  %12505 = vmatprep.subr.bf16.mxu0 %v14946_v1  ;;  %v13725_v60 = vld [vmem:[%s16943_s22 + $0x8] sm:$0xff]   ;;  %v13726_v62 = vld [vmem:[%s16943_s22] sm:$0xff]   ;;  %s16949_s3 = sld [smem:[#allocation111_spill]] }
 0x22e   : > { %12500 = vmatpush3.bf16.msra.mxu1 %v2946_v17  ;;  %12501 = vmatprep.mubr.msk.bf16.mxu1 %vm14947_vm0, %v14946_v1  ;;  %v11566_v3 = vld [vmem:[%s16944_s4] ss:$0 sm:$0xff]  ;;  %s16950_s0 = sld [smem:[#allocation95_spill]] }
 0x22f   : > { %12513 = vmatprep.subr.bf16.mxu1 %v14946_v1  ;;  %v11562_v10 = vld [vmem:[%s16945_s16] ss:$0 sm:$0xff]  ;;  %s16951_s1 = sld [smem:[#allocation121_spill]] }
 0x230   : > { %v11570_v18 = vld [vmem:[%s16946_s15] ss:$0 sm:$0xff]  ;;  %s16957_s5 = sld [smem:[#allocation118_spill]] }
 0x231   : > { %s16958_s6 = sld [smem:[#allocation120_spill]] }
 0x232   : > { %s16982_s8 = sld [smem:[#allocation74_spill]] }
 0x233   : > { %12496 = vmatmul.mubr.msk.bf16.vlgmr.msra.gmra.mxu0 %vm2793_vm2, %v2788_v25 }
 0x234   : > { %12509 = vmatprep.mubr.msk.bf16.mxu0 %vm14947_vm0, %v14946_v1  ;;  %12506 = vmatpush3.bf16.msra.mxu0 %v13721_v27 }
 0x235   : > { %12502 = vmatmul.mubr.msk.bf16.vlgmr.msra.gmra.mxu1 %vm2793_vm2, %v2940_v26  ;;  %12507 = vmatprep.subr.bf16.mxu0 %v14946_v1  ;;  %v13727_v26 = vld [vmem:[%s16940_s23 + $0x18] sm:$0xff]  }
 0x236   : > { %12517 = vmatprep.mubr.msk.bf16.mxu1 %vm14947_vm0, %v14946_v1  ;;  %12514 = vmatpush3.bf16.msra.mxu1 %v13722_v28 }
 0x237   : > { %12515 = vmatprep.subr.bf16.mxu1 %v14946_v1 }
 0x238   : > { %12508 = vmatpush3.bf16.msra.mxu0 %v13723_v29  ;;  %v13728_v29 = vld [vmem:[%s16940_s23 + $0x10] sm:$0xff]  }
 0x239   : > { %12521 = vmatprep.subr.bf16.mxu0 %v14946_v1 }
 0x23a   : > { %12516 = vmatpush3.bf16.msra.mxu1 %v13724_v30  ;;  %v13729_v30 = vld [vmem:[%s16943_s22 + $0x18] sm:$0xff]  }
 0x23b   : > { %12529 = vmatprep.subr.bf16.mxu1 %v14946_v1 }
 0x2eb   : > { %v2835_v31 = vpop.f32.mrf.mxu0 }
 0x2ed   : > { %v2882_v32 = vpop.f32.mrf.mxu1  ;;  %v12485_v33 = vpop.f32.mrf.mxu0 }
 0x2ee   : > { %v2883_v38 = vadd.f32 %v2882_v32, %v2835_v31  ;;  %v13730_v31 = vld [vmem:[%s16943_s22 + $0x10] sm:$0xff]  }
 0x2ef   : > { %v12491_v34 = vpop.f32.mrf.mxu1  ;;  %v2838_v35 = vpop.f32.mrf.mxu0 }
 0x2f1   : > { %v2885_v36 = vpop.f32.mrf.mxu1  ;;  %v12486_v37 = vpop.f32.mrf.mxu0 }
 0x2f2   : > { %v2886_v44 = vadd.f32 %v2885_v36, %v2838_v35 }
 0x2f3   : > { %v12492_v39 = vpop.f32.mrf.mxu1  ;;  %v2931_v40 = vpop.f32.mrf.mxu0 }
 0x2f4   : > { %v2938_v41 = vadd.f32 %v2931_v40, %v2883_v38  ;;  %v11581_v38 = vld [vmem:[%s16945_s16 + $0x1] ss:$0 sm:$0xff] }
 0x2f5   : > { %v2982_v42 = vpop.f32.mrf.mxu1  ;;  %v12497_v43 = vpop.f32.mrf.mxu0 }
 0x2f6   : > { %v2989_v45 = vadd.f32 %v2982_v42, %v2938_v41 }
 0x2f7   : > { %v12503_v47 = vpop.f32.mrf.mxu1  ;;  %v2934_v48 = vpop.f32.mrf.mxu0 }
 0x2f8   : > { %v2939_v49 = vadd.f32 %v2934_v48, %v2886_v44  ;;  %v2998_v52 = vadd.f32 %v11561_v46, %v2989_v45 }
 0x2f9   : > { %v2985_v50 = vpop.f32.mrf.mxu1  ;;  %v12498_v51 = vpop.f32.mrf.mxu0 }
 0x2fa   : > { %v2990_v53 = vadd.f32 %v2985_v50, %v2939_v49  ;;  %v15677_v58 = vadd.f32 %v3000_v54, %v2998_v52  ;;  %v11599_v49 = vld [vmem:[%s16946_s15 + $0x1] ss:$0 sm:$0xff] }
 0x2fb   : > { %v12504_v56 = vpop.f32.mrf.mxu1 }
 0x2fc   : > { %v2999_v57 = vadd.f32 %v11561_v46, %v2990_v53 }
 0x2fe   : > { %v15679_v59 = vadd.f32 %v3001_v55, %v2999_v57 }
 0x300   : > { %v15684_v61 = vpack.c.bf16 %v15679_v59, %v15677_v58 }
 0x302   : > { %12510 = vmatmul.mubr.msk.bf16.vlgmr.msra.gmra.mxu0 %vm3028_vm5, %v15684_v61  ;;  %12518 = vmatmul.mubr.msk.bf16.vlgmr.msra.gmra.mxu1 %vm3028_vm5, %v15684_v61 }
 0x303   : > { %12522 = vmatpush3.bf16.msra.mxu0 %v13725_v60  ;;  %12525 = vmatprep.mubr.msk.bf16.mxu0 %vm14947_vm0, %v14946_v1 }
 0x304   : > { %12523 = vmatprep.subr.bf16.mxu0 %v14946_v1  ;;  %12531 = vmatprep.mubr.msk.bf16.mxu1 %vm14947_vm0, %v14946_v1 }
 0x307   : > { %12524 = vmatpush3.bf16.msra.mxu0 %v13726_v62 }
 0x308   : > { %12535 = vmatprep.subr.bf16.mxu0 %v14946_v1 }
 0x30a   : > { %12526 = vmatmul.mubr.msk.bf16.vlgmr.msra.gmra.mxu0 %vm3028_vm5, %v15684_v61 }
 0x30b   : > { %12537 = vmatprep.mubr.msk.bf16.mxu0 %vm14947_vm0, %v14946_v1 }
 0x3c2   : > { %v3066_v63 = vpop.f32.mrf.mxu0  ;;  %v3130_v0 = vpop.f32.mrf.mxu1 }
 0x3c3   : > { %v3131_v8 = vadd.f32 %v11566_v3, %v3130_v0  ;;  %v3067_v16 = vadd.f32 %v11562_v10, %v3066_v63 }
 0x3c4   : > { %v12511_v4 = vpop.f32.mrf.mxu0  ;;  %v12519_v5 = vpop.f32.mrf.mxu1 }
 0x3c5   : > { %v3201_v22 = vmul.f32 0.35355338, %v3067_v16 }
 0x3c6   : > { %v3069_v6 = vpop.f32.mrf.mxu0  ;;  %v3133_v7 = vpop.f32.mrf.mxu1 }
 0x3c7   : > { %v3134_v9 = vadd.f32 %v11566_v3, %v3133_v7  ;;  %v3070_v13 = vadd.f32 %v11562_v10, %v3069_v6 }
 0x3c8   : > { %v12512_v11 = vpop.f32.mrf.mxu0  ;;  %v12520_v12 = vpop.f32.mrf.mxu1 }
 0x3c9   : > { %v3204_v14 = vpack.c.bf16 %v3134_v9, %v3131_v8  ;;  %v3202_v20 = vmul.f32 0.35355338, %v3070_v13  ;;  %v13731_v13 = vld [vmem:[%s16941_s18 + $0x18] sm:$0xff]  }
 0x3ca   : > { %v3194_v15 = vpop.f32.mrf.mxu0 }
 0x3cb   : > { %v3210_v17 = vsel %vm3205_vm6, %v3204_v14, 0  ;;  %v3195_v23 = vadd.f32 %v11570_v18, %v3194_v15  ;;  %v3203_v27 = vpack.c.bf16 %v3202_v20, %v3201_v22  ;;  %v13732_v15 = vld [vmem:[%s16941_s18 + $0x10] sm:$0xff]   ;;  %v11590_v22 = vld [vmem:[%s16944_s4 + $0x1] ss:$0 sm:$0xff] }
 0x3cc   : > { %v12527_v19 = vpop.f32.mrf.mxu0  ;;  %12530 = vmatpush3.bf16.xpose.msra.mxu1 %v3210_v17 }
 0x3cd   : > { %12541 = vmatprep.subr.bf16.mxu1 %v14946_v1 }
 0x3ce   : > { %v3197_v21 = vpop.f32.mrf.mxu0 }
 0x3cf   : > { %v3198_v24 = vadd.f32 %v11570_v18, %v3197_v21 }
 0x3d0   : > { %v12528_v25 = vpop.f32.mrf.mxu0 }
 0x3d1   : > { %v3277_v28 = vpack.c.bf16 %v3198_v24, %v3195_v23 }
 0x3d3   : > { %12532 = vmatmul.mubr.msk.bf16.vlgmr.msra.gmra.mxu1 %vm3205_vm6, %v3203_v27  ;;  %12536 = vmatpush3.bf16.msra.mxu0 %v3277_v28 }
 0x3d4   : > { %12542 = vmatpush3.bf16.msra.mxu1 %v13727_v26  ;;  %12545 = vmatprep.mubr.msk.bf16.mxu1 %vm14947_vm0, %v14946_v1 }
 0x3d5   : > { %12543 = vmatprep.subr.bf16.mxu1 %v14946_v1  ;;  %12549 = vmatprep.subr.bf16.mxu0 %v14946_v1 }
 0x3d8   : > { %12544 = vmatpush3.bf16.msra.mxu1 %v13728_v29 }
 0x3d9   : > { %12557 = vmatprep.subr.bf16.mxu1 %v14946_v1 }
 0x3db   : > { %12546 = vmatmul.mubr.msk.bf16.vlgmr.msra.gmra.mxu1 %vm3028_vm5, %v15684_v61 }
 0x3dc   : > { %12558 = vmatpush3.bf16.msra.mxu1 %v13729_v30  ;;  %12561 = vmatprep.mubr.msk.bf16.mxu1 %vm14947_vm0, %v14946_v1 }
 0x3dd   : > { %12559 = vmatprep.subr.bf16.mxu1 %v14946_v1 }
 0x3e0   : > { %12560 = vmatpush3.bf16.msra.mxu1 %v13730_v31 }
 0x3e1   : > { %12571 = vmatprep.subr.bf16.mxu1 %v14946_v1 }
 0x3e3   : > { %12562 = vmatmul.mubr.msk.bf16.vlgmr.msra.gmra.mxu1 %vm3028_vm5, %v15684_v61 }
 0x3e4   : > { %12573 = vmatprep.mubr.msk.bf16.mxu1 %vm14947_vm0, %v14946_v1 }
 0x493   : > { %v3246_v32 = vpop.f32.mrf.mxu1 }
 0x494   : > { %v3254_v33 = vsel %vm3253_vm7, %v3246_v32, -inf }
 0x495   : > { %3255 = vmax.xlane.f32.xlu0 %v3254_v33  ;;  %v12533_v34 = vpop.f32.mrf.mxu1 }
 0x497   : > { %v3249_v35 = vpop.f32.mrf.mxu1 }
 0x498   : > { %v3257_v36 = vsel %vm3253_vm7, %v3249_v35, -inf }
 0x499   : > { %3258 = vmax.xlane.f32.xlu0 %v3257_v36  ;;  %v12534_v37 = vpop.f32.mrf.mxu1 }
 0x49b   : > { %v3383_v39 = vpop.f32.mrf.mxu1 }
 0x49c   : > { %v3384_v41 = vadd.f32 %v11581_v38, %v3383_v39 }
 0x49d   : > { %v12547_v40 = vpop.f32.mrf.mxu1 }
 0x49e   : > { %v15729_v45 = vmul.f32 0.35355338, %v3384_v41 }
 0x49f   : > { %v3386_v42 = vpop.f32.mrf.mxu1 }
 0x4a0   : > { %v3387_v43 = vadd.f32 %v11581_v38, %v3386_v42 }
 0x4a1   : > { %v12548_v44 = vpop.f32.mrf.mxu1 }
 0x4a2   : > { %v3523_v46 = vmul.f32 0.35355338, %v3387_v43 }
 0x4a3   : > { %v3515_v47 = vpop.f32.mrf.mxu1 }
 0x4a4   : > { %v3524_v48 = vpack.c.bf16 %v3523_v46, %v15729_v45  ;;  %v3516_v52 = vadd.f32 %v11599_v49, %v3515_v47 }
 0x4a5   : > { %v12563_v50 = vpop.f32.mrf.mxu1 }
 0x4a6   : > { %v3323_v50 = vld [vmem:[%s16947_s2] sm:$0xf] }
 0x4a7   : > { %v3518_v51 = vpop.f32.mrf.mxu1 }
 0x4a8   : > { %v3519_v53 = vadd.f32 %v11599_v49, %v3518_v51 }
 0x4a9   : > { %v12564_v54 = vpop.f32.mrf.mxu1 }
 0x4aa   : > { %v3596_v55 = vpack.c.bf16 %v3519_v53, %v3516_v52  ;;  %v3696_v54 = vsel %vm3647_vm8, %v3323_v50, 0 }
 0x4ac   : > { %12572 = vmatpush3.bf16.msra.mxu1 %v3596_v55  ;;  %v13733_v55 = vld [vmem:[%s16941_s18 + $0x28] sm:$0xff]  }
 0x4ad   : > { %12583 = vmatprep.subr.bf16.mxu1 %v14946_v1 }
 0x51e   : > { %v3256_v56 = vpop.xlane.xlu0 %3255 }
 0x51f   : > { %v3260_v57 = vsub.f32 %v3246_v32, %v3256_v56  ;;  %v13734_v56 = vld [vmem:[%s16941_s18 + $0x20] sm:$0xff]  }
 0x521   : > { %v3262_v60 = vmul.f32 1.442695, %v3260_v57  ;;  %v11605_v57 = vld [vmem:[%s16947_s2 + $0x4] sm:$0xf] }
 0x522   : > { %v3259_v62 = vpop.xlane.xlu0 %3258 }
 0x523   : > { %13843 = vpow2.f32 %v3262_v60  ;;  %v3261_v63 = vsub.f32 %v3249_v35, %v3259_v62  ;;  %v3649_v60 = vsel %vm3647_vm8, %v11605_v57, 0 }
 0x525   : > { %v3264_v0 = vmul.f32 1.442695, %v3261_v63 }
 0x527   : > { %13845 = vpow2.f32 %v3264_v0 }
 0x530   : > { %v13844_v3 = vpop.eup %13843 }
 0x531   : > { %v3266_v4 = vsel %vm3253_vm7, %v13844_v3, 0.0 }
 0x532   : > { %3267 = vadd.xlane.f32.xlu1 %v3266_v4 }
 0x534   : > { %v13846_v5 = vpop.eup %13845 }
 0x535   : > { %v3269_v6 = vsel %vm3253_vm7, %v13846_v5, 0.0 }
 0x536   : > { %3270 = vadd.xlane.f32.xlu1 %v3269_v6 }
 0x5bb   : > { %v3268_v7 = vpop.xlane.xlu1 %3267 }
 0x5bc   : > { %13847 = vrcp.f32 %v3268_v7  ;;  %v13736_v7 = vld [vmem:[%s16940_s23 + $0x20] sm:$0xff]  }
 0x5bf   : > { %v3271_v8 = vpop.xlane.xlu1 %3270 }
 0x5c0   : > { %13849 = vrcp.f32 %v3271_v8 }
 0x5c9   : > { %v13848_v9 = vpop.eup %13847 }
 0x5ca   : > { %v3274_v11 = vmul.f32 %v13848_v9, %v13844_v3  ;;  %v13735_v3 = vld [vmem:[%s16940_s23 + $0x28] sm:$0xff]  }
 0x5cd   : > { %v13850_v10 = vpop.eup %13849 }
 0x5ce   : > { %v3275_v12 = vmul.f32 %v13850_v10, %v13846_v5  ;;  %v13737_v10 = vld [vmem:[%s16943_s22 + $0x28] sm:$0xff]  }
 0x5d0   : > { %v3276_v14 = vpack.c.bf16 %v3275_v12, %v3274_v11 }
 0x5d2   : > { %12538 = vmatmul.mubr.msk.bf16.vlgmr.msra.gmra.mxu0 %vm3253_vm7, %v3276_v14  ;;  %v11622_v14 = vld [vmem:[%s16944_s4 + $0x2] ss:$0 sm:$0xff] }
 0x5d3   : > { %12550 = vmatpush3.bf16.msra.mxu0 %v13731_v13  ;;  %12553 = vmatprep.mubr.msk.bf16.mxu0 %vm14947_vm0, %v14946_v1  ;;  %v13738_v13 = vld [vmem:[%s16943_s22 + $0x20] sm:$0xff]  }
 0x5d4   : > { %12551 = vmatprep.subr.bf16.mxu0 %v14946_v1 }
 0x5d7   : > { %12552 = vmatpush3.bf16.msra.mxu0 %v13732_v15 }
 0x5d8   : > { %12565 = vmatprep.subr.bf16.mxu0 %v14946_v1 }
 0x5da   : > { %12554 = vmatmul.mubr.msk.bf16.vlgmr.msra.gmra.mxu0 %vm3028_vm5, %v15684_v61 }
 0x5db   : > { %12567 = vmatprep.mubr.msk.bf16.mxu0 %vm14947_vm0, %v14946_v1 }
 0x692   : > { %v3315_v16 = vpop.f32.mrf.mxu0 }
 0x694   : > { %v12539_v17 = vpop.f32.mrf.mxu0 }
 0x696   : > { %v3318_v18 = vpop.f32.mrf.mxu0 }
 0x697   : > { %v3322_v19 = vpack.c.bf16 %v3318_v18, %v3315_v16 }
 0x698   : > { %v12540_v20 = vpop.f32.mrf.mxu0 }
 0x69a   : > { %v3449_v21 = vpop.f32.mrf.mxu0 }
 0x69b   : > { %v3450_v25 = vadd.f32 %v11590_v22, %v3449_v21 }
 0x69c   : > { %v12555_v23 = vpop.f32.mrf.mxu0 }
 0x69e   : > { %v3452_v24 = vpop.f32.mrf.mxu0 }
 0x69f   : > { %v3453_v26 = vadd.f32 %v11590_v22, %v3452_v24 }
 0x6a0   : > { %v12556_v27 = vpop.f32.mrf.mxu0 }
 0x6a1   : > { %v3525_v28 = vpack.c.bf16 %v3453_v26, %v3450_v25  ;;  %v11613_v26 = vld [vmem:[%s16945_s16 + $0x2] ss:$0 sm:$0xff] }
 0x6a3   : > { %v3530_v29 = vsel %vm3205_vm6, %v3525_v28, 0 }
 0x6a4   : > { %12566 = vmatpush3.bf16.xpose.msra.mxu0 %v3530_v29 }
 0x6a5   : > { %12577 = vmatprep.subr.bf16.mxu0 %v14946_v1 }
 0x6ab   : > { %12568 = vmatmul.mubr.msk.bf16.vlgmr.msra.gmra.mxu0 %vm3205_vm6, %v3524_v48 }
 0x6ac   : > { %12579 = vmatprep.mubr.msk.bf16.mxu0 %vm14947_vm0, %v14946_v1  ;;  %12578 = vmatpush3.bf16.msra.mxu0 %v3649_v60 }
 0x6ad   : > { %12589 = vmatprep.subr.bf16.mxu0 %v14946_v1 }
 0x76b   : > { %v3566_v30 = vpop.f32.mrf.mxu0 }
 0x76c   : > { %v3573_v31 = vsel %vm3253_vm7, %v3566_v30, -inf }
 0x76d   : > { %3574 = vmax.xlane.f32.xlu0 %v3573_v31  ;;  %v12569_v32 = vpop.f32.mrf.mxu0 }
 0x76f   : > { %v3569_v33 = vpop.f32.mrf.mxu0 }
 0x770   : > { %v3576_v34 = vsel %vm3253_vm7, %v3569_v33, -inf }
 0x771   : > { %3577 = vmax.xlane.f32.xlu1 %v3576_v34  ;;  %v12570_v35 = vpop.f32.mrf.mxu0 }
 0x7f6   : > { %v3575_v36 = vpop.xlane.xlu0 %3574 }
 0x7f7   : > { %v3579_v37 = vsub.f32 %v3566_v30, %v3575_v36 }
 0x7f9   : > { %v3581_v38 = vmul.f32 1.442695, %v3579_v37  ;;  %v11631_v37 = vld [vmem:[%s16946_s15 + $0x2] ss:$0 sm:$0xff] }
 0x7fa   : > { %v3578_v39 = vpop.xlane.xlu1 %3577 }
 0x7fb   : > { %13851 = vpow2.f32 %v3581_v38  ;;  %v3580_v40 = vsub.f32 %v3569_v33, %v3578_v39 }
 0x7fd   : > { %v3583_v41 = vmul.f32 1.442695, %v3580_v40 }
 0x7ff   : > { %13853 = vpow2.f32 %v3583_v41 }
 0x808   : > { %v13852_v42 = vpop.eup %13851 }
 0x809   : > { %v3585_v43 = vsel %vm3253_vm7, %v13852_v42, 0.0 }
 0x80a   : > { %3586 = vadd.xlane.f32.xlu0 %v3585_v43 }
 0x80c   : > { %v13854_v44 = vpop.eup %13853 }
 0x80d   : > { %v3588_v45 = vsel %vm3253_vm7, %v13854_v44, 0.0 }
 0x80e   : > { %3589 = vadd.xlane.f32.xlu1 %v3588_v45 }
 0x893   : > { %v3587_v46 = vpop.xlane.xlu0 %3586 }
 0x894   : > { %13855 = vrcp.f32 %v3587_v46 }
 0x897   : > { %v3590_v47 = vpop.xlane.xlu1 %3589 }
 0x898   : > { %13857 = vrcp.f32 %v3590_v47 }
 0x8a1   : > { %v13856_v48 = vpop.eup %13855 }
 0x8a2   : > { %v3593_v51 = vmul.f32 %v13856_v48, %v13852_v42 }
 0x8a5   : > { %v13858_v49 = vpop.eup %13857 }
 0x8a6   : > { %v3594_v52 = vmul.f32 %v13858_v49, %v13854_v44 }
 0x8a8   : > { %v3595_v53 = vpack.c.bf16 %v3594_v52, %v3593_v51 }
 0x8aa   : > { %12574 = vmatmul.mubr.msk.bf16.vlgmr.msra.gmra.mxu1 %vm3253_vm7, %v3595_v53 }
 0x8ab   : > { %12584 = vmatpush3.bf16.msra.mxu1 %v3696_v54  ;;  %12585 = vmatprep.mubr.msk.bf16.mxu1 %vm14947_vm0, %v14946_v1 }
 0x8ac   : > { %12597 = vmatprep.subr.bf16.mxu1 %v14946_v1 }
 0x8b2   : > { %12586 = vmatmul.mubr.msk.bf16.vlgmr.msra.gmra.mxu1 %vm3205_vm6, %v3322_v19 }
 0x8b3   : > { %12598 = vmatpush3.bf16.msra.mxu1 %v13733_v55  ;;  %12601 = vmatprep.mubr.msk.bf16.mxu1 %vm14947_vm0, %v14946_v1 }
 0x8b4   : > { %12599 = vmatprep.subr.bf16.mxu1 %v14946_v1 }
 0x8b7   : > { %12600 = vmatpush3.bf16.msra.mxu1 %v13734_v56 }
 0x8b8   : > { %12613 = vmatprep.subr.bf16.mxu1 %v14946_v1 }
 0x8ba   : > { %12602 = vmatmul.mubr.msk.bf16.vlgmr.msra.gmra.mxu1 %vm3028_vm5, %v15684_v61 }
 0x8bb   : > { %12615 = vmatprep.mubr.msk.bf16.mxu1 %vm14947_vm0, %v14946_v1 }
 0x96a   : > { %v3634_v62 = vpop.f32.mrf.mxu1 }
 0x96c   : > { %v12575_v63 = vpop.f32.mrf.mxu1 }
 0x96e   : > { %v3637_v0 = vpop.f32.mrf.mxu1 }
 0x96f   : > { %v3641_v4 = vpack.c.bf16 %v3637_v0, %v3634_v62 }
 0x970   : > { %v12576_v5 = vpop.f32.mrf.mxu1 }
 0x971   : > { %12580 = vmatmul.mubr.msk.bf16.vlgmr.msra.gmra.mxu0 %vm3205_vm6, %v3641_v4 }
 0x972   : > { %v15779_v6 = vpop.f32.mrf.mxu1  ;;  %12590 = vmatpush3.bf16.msra.mxu0 %v13735_v3  ;;  %12593 = vmatprep.mubr.msk.bf16.mxu0 %vm14947_vm0, %v14946_v1 }
 0x973   : > { %12591 = vmatprep.subr.bf16.mxu0 %v14946_v1 }
 0x974   : > { %v12587_v8 = vpop.f32.mrf.mxu1 }
 0x975   : > { %v13739_v8 = vld [vmem:[%s16940_s23 + $0x38] sm:$0xff]  }
 0x976   : > { %v15785_v9 = vpop.f32.mrf.mxu1  ;;  %12592 = vmatpush3.bf16.msra.mxu0 %v13736_v7 }
 0x977   : > { %12605 = vmatprep.subr.bf16.mxu0 %v14946_v1 }
 0x978   : > { %v12588_v11 = vpop.f32.mrf.mxu1 }
 0x979   : > { %12594 = vmatmul.mubr.msk.bf16.vlgmr.msra.gmra.mxu0 %vm3028_vm5, %v15684_v61  ;;  %v13740_v11 = vld [vmem:[%s16940_s23 + $0x30] sm:$0xff]  }
 0x97a   : > { %v3864_v12 = vpop.f32.mrf.mxu1  ;;  %12606 = vmatpush3.bf16.msra.mxu0 %v13737_v10  ;;  %12609 = vmatprep.mubr.msk.bf16.mxu0 %vm14947_vm0, %v14946_v1 }
 0x97b   : > { %12607 = vmatprep.subr.bf16.mxu0 %v14946_v1  ;;  %v3865_v17 = vadd.f32 %v11622_v14, %v3864_v12  ;;  %v13741_v12 = vld [vmem:[%s16943_s22 + $0x38] sm:$0xff]  }
 0x97c   : > { %v12603_v15 = vpop.f32.mrf.mxu1 }
 0x97e   : > { %v3867_v16 = vpop.f32.mrf.mxu1  ;;  %12608 = vmatpush3.bf16.msra.mxu0 %v13738_v13  ;;  %v13742_v13 = vld [vmem:[%s16943_s22 + $0x30] sm:$0xff]  }
 0x97f   : > { %v3868_v18 = vadd.f32 %v11622_v14, %v3867_v16  ;;  %12619 = vmatprep.subr.bf16.mxu0 %v14946_v1  ;;  %v11637_v14 = vld [vmem:[%s16947_s2 + $0x8] sm:$0xf] }
 0x980   : > { %v12604_v19 = vpop.f32.mrf.mxu1  ;;  %v4063_v15 = vsel %vm3647_vm8, %v11637_v14, 0 }
 0x981   : > { %v3940_v20 = vpack.c.bf16 %v3868_v18, %v3865_v17  ;;  %12610 = vmatmul.mubr.msk.bf16.vlgmr.msra.gmra.mxu0 %vm3028_vm5, %v15684_v61  ;;  %v13743_v19 = vld [vmem:[%s16941_s18 + $0x38] sm:$0xff]  }
 0x982   : > { %12621 = vmatprep.mubr.msk.bf16.mxu0 %vm14947_vm0, %v14946_v1 }
 0x983   : > { %v3945_v21 = vsel %vm3205_vm6, %v3940_v20, 0 }
 0x984   : > { %12614 = vmatpush3.bf16.xpose.msra.mxu1 %v3945_v21 }
 0x985   : > { %12625 = vmatprep.subr.bf16.mxu1 %v14946_v1 }
 0xa31   : > { %v15803_v22 = vpop.f32.mrf.mxu0 }
 0xa33   : > { %v12581_v23 = vpop.f32.mrf.mxu0 }
 0xa34   : > { %v11644_v23 = vld [vmem:[%s16945_s16 + $0x3] ss:$0 sm:$0xff] }
 0xa35   : > { %v15805_v24 = vpop.f32.mrf.mxu0 }
 0xa37   : > { %v12582_v25 = vpop.f32.mrf.mxu0 }
 0xa39   : > { %v3798_v27 = vpop.f32.mrf.mxu0 }
 0xa3a   : > { %v3799_v29 = vadd.f32 %v11613_v26, %v3798_v27 }
 0xa3b   : > { %v12595_v28 = vpop.f32.mrf.mxu0 }
 0xa3c   : > { %v3937_v33 = vmul.f32 0.35355338, %v3799_v29 }
 0xa3d   : > { %v3801_v30 = vpop.f32.mrf.mxu0 }
 0xa3e   : > { %v3802_v31 = vadd.f32 %v11613_v26, %v3801_v30  ;;  %v13744_v26 = vld [vmem:[%s16941_s18 + $0x30] sm:$0xff]  }
 0xa3f   : > { %v12596_v32 = vpop.f32.mrf.mxu0 }
 0xa40   : > { %v3938_v34 = vmul.f32 0.35355338, %v3802_v31 }
 0xa41   : > { %v3930_v35 = vpop.f32.mrf.mxu0 }
 0xa42   : > { %v3939_v36 = vpack.c.bf16 %v3938_v34, %v3937_v33  ;;  %v3931_v40 = vadd.f32 %v11631_v37, %v3930_v35 }
 0xa43   : > { %v12611_v38 = vpop.f32.mrf.mxu0 }
 0xa44   : > { %12616 = vmatmul.mubr.msk.bf16.vlgmr.msra.gmra.mxu1 %vm3205_vm6, %v3939_v36  ;;  %v11662_v36 = vld [vmem:[%s16946_s15 + $0x3] ss:$0 sm:$0xff] }
 0xa45   : > { %v3933_v39 = vpop.f32.mrf.mxu0  ;;  %12627 = vmatprep.mubr.msk.bf16.mxu1 %vm14947_vm0, %v14946_v1  ;;  %12626 = vmatpush3.bf16.msra.mxu1 %v4063_v15 }
 0xa46   : > { %v3934_v41 = vadd.f32 %v11631_v37, %v3933_v39  ;;  %12639 = vmatprep.subr.bf16.mxu1 %v14946_v1 }
 0xa47   : > { %v12612_v42 = vpop.f32.mrf.mxu0 }
 0xa48   : > { %v4011_v43 = vpack.c.bf16 %v3934_v41, %v3931_v40 }
 0xa4a   : > { %12620 = vmatpush3.bf16.msra.mxu0 %v4011_v43  ;;  %v3733_v43 = vadd.f32 %v15779_v6, %v15803_v22 }
 0xa4b   : > { %12631 = vmatprep.subr.bf16.mxu0 %v14946_v1 }
 0xb04   : > { %v3981_v44 = vpop.f32.mrf.mxu1 }
 0xb05   : > { %v3988_v45 = vsel %vm3253_vm7, %v3981_v44, -inf }
 0xb06   : > { %3989 = vmax.xlane.f32.xlu0 %v3988_v45  ;;  %v12617_v46 = vpop.f32.mrf.mxu1 }
 0xb07   : > { %v3736_v46 = vadd.f32 %v15785_v9, %v15805_v24 }
 0xb08   : > { %v3984_v47 = vpop.f32.mrf.mxu1 }
 0xb09   : > { %v3991_v48 = vsel %vm3253_vm7, %v3984_v47, -inf }
 0xb0a   : > { %3992 = vmax.xlane.f32.xlu1 %v3991_v48  ;;  %v12618_v49 = vpop.f32.mrf.mxu1 }
 0xb8f   : > { %v3990_v50 = vpop.xlane.xlu0 %3989 }
 0xb90   : > { %v3994_v51 = vsub.f32 %v3981_v44, %v3990_v50 }
 0xb92   : > { %v3996_v52 = vmul.f32 1.442695, %v3994_v51  ;;  %v11653_v51 = vld [vmem:[%s16944_s4 + $0x3] ss:$0 sm:$0xff]  ;;  %s16956_s4 = sld [smem:[#allocation117_spill]] }
 0xb93   : > { %v3993_v53 = vpop.xlane.xlu1 %3992 }
 0xb94   : > { %13859 = vpow2.f32 %v3996_v52  ;;  %v3995_v54 = vsub.f32 %v3984_v47, %v3993_v53 }
 0xb96   : > { %v3998_v55 = vmul.f32 1.442695, %v3995_v54 }
 0xb98   : > { %13861 = vpow2.f32 %v3998_v55 }
 0xba1   : > { %v13860_v56 = vpop.eup %13859 }
 0xba2   : > { %v4000_v57 = vsel %vm3253_vm7, %v13860_v56, 0.0 }
 0xba3   : > { %4001 = vadd.xlane.f32.xlu0 %v4000_v57 }
 0xba5   : > { %v13862_v60 = vpop.eup %13861 }
 0xba6   : > { %v4003_v62 = vsel %vm3253_vm7, %v13862_v60, 0.0 }
 0xba7   : > { %4004 = vadd.xlane.f32.xlu1 %v4003_v62 }
 0xc2c   : > { %v4002_v63 = vpop.xlane.xlu0 %4001 }
 0xc2d   : > { %13863 = vrcp.f32 %v4002_v63 }
 0xc30   : > { %v4005_v0 = vpop.xlane.xlu1 %4004 }
 0xc31   : > { %13865 = vrcp.f32 %v4005_v0 }
 0xc3a   : > { %v13864_v3 = vpop.eup %13863 }
 0xc3b   : > { %v4008_v5 = vmul.f32 %v13864_v3, %v13860_v56 }
 0xc3e   : > { %v13866_v4 = vpop.eup %13865 }
 0xc3f   : > { %v4009_v7 = vmul.f32 %v13866_v4, %v13862_v60 }
 0xc41   : > { %v4010_v10 = vpack.c.bf16 %v4009_v7, %v4008_v5 }
 0xc43   : > { %12622 = vmatmul.mubr.msk.bf16.vlgmr.msra.gmra.mxu0 %vm3253_vm7, %v4010_v10 }
 0xc44   : > { %12632 = vmatpush3.bf16.msra.mxu0 %v13739_v8  ;;  %12635 = vmatprep.mubr.msk.bf16.mxu0 %vm14947_vm0, %v14946_v1 }
 0xc45   : > { %12633 = vmatprep.subr.bf16.mxu0 %v14946_v1 }
 0xc48   : > { %12634 = vmatpush3.bf16.msra.mxu0 %v13740_v11 }
 0xc49   : > { %12647 = vmatprep.subr.bf16.mxu0 %v14946_v1 }
 0xc4b   : > { %12636 = vmatmul.mubr.msk.bf16.vlgmr.msra.gmra.mxu0 %vm3028_vm5, %v15684_v61 }
 0xc4c   : > { %12648 = vmatpush3.bf16.msra.mxu0 %v13741_v12  ;;  %12651 = vmatprep.mubr.msk.bf16.mxu0 %vm14947_vm0, %v14946_v1 }
 0xc4d   : > { %12649 = vmatprep.subr.bf16.mxu0 %v14946_v1 }
 0xc50   : > { %12650 = vmatpush3.bf16.msra.mxu0 %v13742_v13 }
 0xc51   : > { %12661 = vmatprep.subr.bf16.mxu0 %v14946_v1 }
 0xc53   : > { %12652 = vmatmul.mubr.msk.bf16.vlgmr.msra.gmra.mxu0 %vm3028_vm5, %v15684_v61 }
 0xc54   : > { %12663 = vmatprep.mubr.msk.bf16.mxu0 %vm14947_vm0, %v14946_v1 }
 0xd03   : > { %v4049_v16 = vpop.f32.mrf.mxu0 }
 0xd05   : > { %v12623_v17 = vpop.f32.mrf.mxu0 }
 0xd07   : > { %v4052_v18 = vpop.f32.mrf.mxu0 }
 0xd08   : > { %v4056_v20 = vpack.c.bf16 %v4052_v18, %v4049_v16 }
 0xd09   : > { %v12624_v21 = vpop.f32.mrf.mxu0 }
 0xd0a   : > { %12628 = vmatmul.mubr.msk.bf16.vlgmr.msra.gmra.mxu1 %vm3205_vm6, %v4056_v20  ;;  %v11668_v21 = vld [vmem:[%s16947_s2 + $0xc] sm:$0xf]  ;;  %s16953_s2 = sld [smem:[#allocation119_spill]] }
 0xd0b   : > { %v4167_v25 = vpop.f32.mrf.mxu0  ;;  %12640 = vmatpush3.bf16.msra.mxu1 %v13743_v19  ;;  %12643 = vmatprep.mubr.msk.bf16.mxu1 %vm14947_vm0, %v14946_v1 }
 0xd0c   : > { %12641 = vmatprep.subr.bf16.mxu1 %v14946_v1  ;;  %v4168_v28 = vadd.f32 %v11644_v23, %v4167_v25 }
 0xd0d   : > { %v12637_v27 = vpop.f32.mrf.mxu0 }
 0xd0e   : > { %v4306_v32 = vmul.f32 0.35355338, %v4168_v28 }
 0xd0f   : > { %v4170_v29 = vpop.f32.mrf.mxu0  ;;  %12642 = vmatpush3.bf16.msra.mxu1 %v13744_v26 }
 0xd10   : > { %v4171_v30 = vadd.f32 %v11644_v23, %v4170_v29  ;;  %12655 = vmatprep.subr.bf16.mxu1 %v14946_v1  ;;  %v4432_v23 = vsel %vm3647_vm8, %v11668_v21, 0 }
 0xd11   : > { %v12638_v31 = vpop.f32.mrf.mxu0 }
 0xd12   : > { %v4307_v33 = vmul.f32 0.35355338, %v4171_v30  ;;  %12644 = vmatmul.mubr.msk.bf16.vlgmr.msra.gmra.mxu1 %vm3028_vm5, %v15684_v61  ;;  %v11670_v31 = vld [vmem:[#allocation19] ss:$0 sm:$0xff] }
 0xd13   : > { %v4299_v34 = vpop.f32.mrf.mxu0  ;;  %12657 = vmatprep.mubr.msk.bf16.mxu1 %vm14947_vm0, %v14946_v1 }
 0xd14   : > { %v4308_v35 = vpack.c.bf16 %v4307_v33, %v4306_v32  ;;  %v4300_v39 = vadd.f32 %v11662_v36, %v4299_v34 }
 0xd15   : > { %v12653_v37 = vpop.f32.mrf.mxu0 }
 0xd17   : > { %v4302_v38 = vpop.f32.mrf.mxu0 }
 0xd18   : > { %v4303_v40 = vadd.f32 %v11662_v36, %v4302_v38 }
 0xd19   : > { %v12654_v41 = vpop.f32.mrf.mxu0 }
 0xd1a   : > { %v4380_v42 = vpack.c.bf16 %v4303_v40, %v4300_v39 }
 0xd1c   : > { %12662 = vmatpush3.bf16.msra.mxu0 %v4380_v42 }
 0xd1d   : > { %12673 = vmatprep.subr.bf16.mxu0 %v14946_v1 }
 0xdca   : > { %v4099_v61 = vpop.f32.mrf.mxu1 }
 0xdcb   : > { %v15855_v44 = vadd.f32 %v4099_v61, %v3733_v43 }
 0xdcc   : > { %v12629_v45 = vpop.f32.mrf.mxu1 }
 0xdce   : > { %v4102_v47 = vpop.f32.mrf.mxu1 }
 0xdcf   : > { %v15859_v48 = vadd.f32 %v4102_v47, %v3736_v46 }
 0xdd0   : > { %v12630_v49 = vpop.f32.mrf.mxu1 }
 0xdd2   : > { %v4233_v50 = vpop.f32.mrf.mxu1 }
 0xdd3   : > { %v4234_v54 = vadd.f32 %v11653_v51, %v4233_v50 }
 0xdd4   : > { %v12645_v52 = vpop.f32.mrf.mxu1 }
 0xdd6   : > { %v4236_v53 = vpop.f32.mrf.mxu1 }
 0xdd7   : > { %v4237_v55 = vadd.f32 %v11653_v51, %v4236_v53  ;;  %v13745_v51 = vld [vmem:[%s16948_s28 + $0x8] sm:$0xff]  }
 0xdd8   : > { %v12646_v56 = vpop.f32.mrf.mxu1 }
 0xdd9   : > { %v4309_v57 = vpack.c.bf16 %v4237_v55, %v4234_v54 }
 0xddb   : > { %v4314_v6 = vsel %vm3205_vm6, %v4309_v57, 0 }
 0xddc   : > { %12656 = vmatpush3.bf16.xpose.msra.mxu1 %v4314_v6 }
 0xddd   : > { %12667 = vmatprep.subr.bf16.mxu1 %v14946_v1 }
 0xde3   : > { %12658 = vmatmul.mubr.msk.bf16.vlgmr.msra.gmra.mxu1 %vm3205_vm6, %v4308_v35 }
 0xde4   : > { %12669 = vmatprep.mubr.msk.bf16.mxu1 %vm14947_vm0, %v14946_v1  ;;  %12668 = vmatpush3.bf16.msra.mxu1 %v4432_v23 }
 0xde5   : > { %12681 = vmatprep.subr.bf16.mxu1 %v14946_v1 }
 0xea3   : > { %v4350_v9 = vpop.f32.mrf.mxu1 }
 0xea4   : > { %v4357_v22 = vsel %vm3253_vm7, %v4350_v9, -inf }
 0xea5   : > { %4358 = vmax.xlane.f32.xlu0 %v4357_v22  ;;  %v12659_v24 = vpop.f32.mrf.mxu1  ;;  %v11671_v22 = vld [vmem:[#allocation25] ss:$0 sm:$0xff] }
 0xea7   : > { %v4353_v60 = vpop.f32.mrf.mxu1 }
 0xea8   : > { %v4360_v62 = vsel %vm3253_vm7, %v4353_v60, -inf }
 0xea9   : > { %4361 = vmax.xlane.f32.xlu1 %v4360_v62  ;;  %v12660_v63 = vpop.f32.mrf.mxu1 }
 0xeaa   : > { %v11672_v63 = vld [vmem:[#allocation24] ss:$0 sm:$0xff] }
 0xf2e   : > { %v4359_v0 = vpop.xlane.xlu0 %4358 }
 0xf2f   : > { %v4363_v3 = vsub.f32 %v4350_v9, %v4359_v0 }
 0xf31   : > { %v4365_v4 = vmul.f32 1.442695, %v4363_v3 }
 0xf32   : > { %v4362_v5 = vpop.xlane.xlu1 %4361 }
 0xf33   : > { %13867 = vpow2.f32 %v4365_v4  ;;  %v4364_v7 = vsub.f32 %v4353_v60, %v4362_v5 }
 0xf35   : > { %v4367_v8 = vmul.f32 1.442695, %v4364_v7  ;;  %v13747_v7 = vld [vmem:[%s16949_s3 + $0x18] sm:$0xff]  }
 0xf37   : > { %13869 = vpow2.f32 %v4367_v8  ;;  %v13748_v8 = vld [vmem:[%s16949_s3 + $0x10] sm:$0xff]  }
 0xf40   : > { %v13868_v10 = vpop.eup %13867 }
 0xf41   : > { %v4369_v11 = vsel %vm3253_vm7, %v13868_v10, 0.0 }
 0xf42   : > { %4370 = vadd.xlane.f32.xlu0 %v4369_v11  ;;  %v13750_v11 = vld [vmem:[%s16949_s3] sm:$0xff]  }
 0xf44   : > { %v13870_v12 = vpop.eup %13869 }
 0xf45   : > { %v4372_v13 = vsel %vm3253_vm7, %v13870_v12, 0.0 }
 0xf46   : > { %4373 = vadd.xlane.f32.xlu1 %v4372_v13 }
 0xfcb   : > { %v4371_v14 = vpop.xlane.xlu0 %4370 }
 0xfcc   : > { %13871 = vrcp.f32 %v4371_v14 }
 0xfcf   : > { %v4374_v15 = vpop.xlane.xlu1 %4373 }
 0xfd0   : > { %13873 = vrcp.f32 %v4374_v15 }
 0xfd9   : > { %v13872_v16 = vpop.eup %13871 }
 0xfda   : > { %v4377_v18 = vmul.f32 %v13872_v16, %v13868_v10  ;;  %v13749_v10 = vld [vmem:[%s16949_s3 + $0x8] sm:$0xff]   ;;  %s16954_s3 = sld [smem:[#allocation122_spill]] }
 0xfdd   : > { %v13874_v17 = vpop.eup %13873 }
 0xfde   : > { %v4378_v19 = vmul.f32 %v13874_v17, %v13870_v12  ;;  %v11673_v12 = vld [vmem:[#allocation21] ss:$0 sm:$0xff] }
 0xfe0   : > { %v4379_v20 = vpack.c.bf16 %v4378_v19, %v4377_v18 }
 0xfe2   : > { %12664 = vmatmul.mubr.msk.bf16.vlgmr.msra.gmra.mxu0 %vm3253_vm7, %v4379_v20 }
 0xfe3   : > { %12677 = vmatprep.mubr.msk.bf16.mxu0 %vm14947_vm0, %v14946_v1  ;;  %12674 = vmatpush3.bf16.msra.mxu0 %v13745_v51 }
 0xfe4   : > { %12675 = vmatprep.subr.bf16.mxu0 %v14946_v1 }
0x10a2   : > { %v4418_v25 = vpop.f32.mrf.mxu0 }
0x10a4   : > { %v12665_v26 = vpop.f32.mrf.mxu0 }
0x10a6   : > { %v4421_v27 = vpop.f32.mrf.mxu0 }
0x10a7   : > { %v4425_v28 = vpack.c.bf16 %v4421_v27, %v4418_v25 }
0x10a8   : > { %v12666_v29 = vpop.f32.mrf.mxu0 }
0x10a9   : > { %12670 = vmatmul.mubr.msk.bf16.vlgmr.msra.gmra.mxu1 %vm3205_vm6, %v4425_v28 }
0x10aa   : > { %12689 = vmatprep.mubr.msk.bf16.mxu1 %vm14947_vm0, %v14946_v1  ;;  %12682 = vmatpush3.bf16.msra.mxu1 %v13747_v7  ;;  %v11683_v7 = vld [vmem:[#allocation28] ss:$0 sm:$0xff] }
0x10ab   : > { %12683 = vmatprep.subr.bf16.mxu1 %v14946_v1 }
0x10ae   : > { %12684 = vmatpush3.bf16.msra.mxu1 %v13748_v8 }
0x10af   : > { %12685 = vmatprep.subr.bf16.mxu1 %v14946_v1 }
0x10b2   : > { %12686 = vmatpush3.bf16.msra.mxu1 %v13749_v10 }
0x10b3   : > { %12687 = vmatprep.subr.bf16.mxu1 %v14946_v1 }
0x10b6   : > { %12688 = vmatpush3.bf16.msra.mxu1 %v13750_v11 }
0x10b7   : > { %12709 = vmatprep.subr.bf16.mxu1 %v14946_v1 }
0x1169   : > { %v4468_v30 = vpop.f32.mrf.mxu1 }
0x116a   : > { %v4475_v32 = vadd.f32 %v4468_v30, %v15855_v44 }
0x116b   : > { %v12671_v33 = vpop.f32.mrf.mxu1 }
0x116c   : > { %v4484_v34 = vadd.f32 %v11670_v31, %v4475_v32 }
0x116d   : > { %v4471_v35 = vpop.f32.mrf.mxu1 }
0x116e   : > { %v4476_v36 = vadd.f32 %v4471_v35, %v15859_v48  ;;  %v4486_v37 = vadd.f32 %v4484_v34, %v15677_v58 }
0x116f   : > { %v12672_v38 = vpop.f32.mrf.mxu1 }
0x1170   : > { %v4485_v39 = vadd.f32 %v11670_v31, %v4476_v36  ;;  %v4488_v40 = vsel %vm3028_vm5, %v4486_v37, 0.0 }
0x1171   : > { %4489 = vadd.xlane.f32.xlu0 %v4488_v40 }
0x1172   : > { %v4487_v41 = vadd.f32 %v4485_v39, %v15679_v59  ;;  %v13746_v59 = vld [vmem:[%s16948_s28] sm:$0xff]  }
0x1173   : > { %12676 = vmatpush3.bf16.msra.mxu0 %v13746_v59 }
0x1174   : > { %v4491_v42 = vsel %vm3028_vm5, %v4487_v41, 0.0  ;;  %12693 = vmatprep.subr.bf16.mxu0 %v14946_v1 }
0x1175   : > { %4492 = vadd.xlane.f32.xlu1 %v4491_v42 }
0x11fa   : > { %v4490_v43 = vpop.xlane.xlu0 %4489 }
0x11fb   : > { %v4495_v61 = vmul.f32 0.03125, %v4490_v43 }
0x11fd   : > { %v4497_v44 = vsub.f32 %v4486_v37, %v4495_v61 }
0x11fe   : > { %v4493_v45 = vpop.xlane.xlu1 %4492 }
0x11ff   : > { %v4496_v46 = vmul.f32 0.03125, %v4493_v45  ;;  %v4499_v47 = vmul.f32 %v4497_v44, %v4497_v44 }
0x1201   : > { %v4498_v48 = vsub.f32 %v4487_v41, %v4496_v46  ;;  %v4501_v58 = vsel %vm3028_vm5, %v4499_v47, 0.0  ;;  %v11682_v41 = vld [vmem:[#allocation22] ss:$0 sm:$0xff] }
0x1202   : > { %4502 = vadd.xlane.f32.xlu0 %v4501_v58 }
0x1203   : > { %v4500_v49 = vmul.f32 %v4498_v48, %v4498_v48 }
0x1205   : > { %v4504_v50 = vsel %vm3028_vm5, %v4500_v49, 0.0 }
0x1206   : > { %4505 = vadd.xlane.f32.xlu1 %v4504_v50 }
0x128b   : > { %v4503_v52 = vpop.xlane.xlu0 %4502 }
0x128c   : > { %v4507_v53 = vmul.f32 0.03125, %v4503_v52 }
0x128e   : > { %v4509_v54 = vadd.f32 1e-05, %v4507_v53 }
0x128f   : > { %v4506_v55 = vpop.xlane.xlu1 %4505 }
0x1290   : > { %13875 = vrsqrt.f32 %v4509_v54  ;;  %v4508_v56 = vmul.f32 0.03125, %v4506_v55 }
0x1292   : > { %v4510_v57 = vadd.f32 1e-05, %v4508_v56 }
0x1294   : > { %13877 = vrsqrt.f32 %v4510_v57 }
0x129d   : > { %v13876_v6 = vpop.eup %13875 }
0x129e   : > { %v4513_v9 = vmul.f32 %v13876_v6, %v4497_v44  ;;  %v13751_v6 = vld [vmem:[%s16950_s0 + $0x18] sm:$0xff]  }
0x12a0   : > { %v4522_v62 = vmul.f32 %v11671_v22, %v4513_v9  ;;  %v13752_v9 = vld [vmem:[%s16950_s0 + $0x28] sm:$0xff]  }
0x12a1   : > { %v13878_v24 = vpop.eup %13877 }
0x12a2   : > { %v4514_v60 = vmul.f32 %v13878_v24, %v4498_v48  ;;  %v4531_v3 = vadd.f32 %v11672_v63, %v4522_v62  ;;  %v13754_v24 = vld [vmem:[%s16950_s0 + $0x20] sm:$0xff]  }
0x12a4   : > { %v4523_v0 = vmul.f32 %v11671_v22, %v4514_v60  ;;  %v13753_v22 = vld [vmem:[%s16950_s0 + $0x10] sm:$0xff]  }
0x12a6   : > { %v4532_v4 = vadd.f32 %v11672_v63, %v4523_v0 }
0x12a8   : > { %v4533_v5 = vpack.c.bf16 %v4532_v4, %v4531_v3 }
0x12aa   : > { %12678 = vmatmul.mubr.msk.bf16.vlgmr.msra.gmra.mxu0 %vm3028_vm5, %v4533_v5 }
0x12ab   : > { %12697 = vmatprep.mubr.msk.bf16.mxu0 %vm14947_vm0, %v14946_v1  ;;  %12694 = vmatpush3.bf16.msra.mxu0 %v13751_v6 }
0x12ac   : > { %12695 = vmatprep.subr.bf16.mxu0 %v14946_v1 }
0x12af   : > { %12696 = vmatpush3.bf16.msra.mxu0 %v13753_v22 }
0x12b0   : > { %12701 = vmatprep.subr.bf16.mxu0 %v14946_v1 }
0x136a   : > { %v4594_v13 = vpop.f32.mrf.mxu0 }
0x136b   : > { %v4595_v14 = vadd.f32 %v11673_v12, %v4594_v13 }
0x136c   : > { %v12679_v15 = vpop.f32.mrf.mxu0 }
0x136d   : > { %v4603_v16 = vmul.f32 0.044715, %v4595_v14  ;;  %v4601_v34 = vmul.f32 0.5, %v4595_v14 }
0x136e   : > { %v4597_v17 = vpop.f32.mrf.mxu0 }
0x136f   : > { %v4605_v18 = vmul.f32 %v4603_v16, %v4595_v14  ;;  %v4598_v19 = vadd.f32 %v11673_v12, %v4597_v17  ;;  %v11684_v12 = vld [vmem:[#allocation27] ss:$0 sm:$0xff]  ;;  %v13755_v17 = vld [vmem:[%s16950_s0 + $0x8] sm:$0xff]  }
0x1370   : > { %v12680_v20 = vpop.f32.mrf.mxu0 }
0x1371   : > { %v4607_v21 = vmul.f32 %v4605_v18, %v4595_v14  ;;  %v4604_v23 = vmul.f32 0.044715, %v4598_v19  ;;  %v4602_v35 = vmul.f32 0.5, %v4598_v19 }
0x1373   : > { %v4609_v25 = vadd.f32 %v4607_v21, %v4595_v14  ;;  %v4606_v26 = vmul.f32 %v4604_v23, %v4598_v19 }
0x1375   : > { %v4611_v27 = vmul.f32 0.7978846, %v4609_v25  ;;  %v4608_v28 = vmul.f32 %v4606_v26, %v4598_v19 }
0x1377   : > { %13879 = vtanh.f32 %v4611_v27  ;;  %v4610_v29 = vadd.f32 %v4608_v28, %v4598_v19  ;;  %v13756_v27 = vld [vmem:[%s16950_s0] sm:$0xff]   ;;  %s16952_s0 = sld [smem:[#allocation94_spill]] }
0x1379   : > { %v4612_v30 = vmul.f32 0.7978846, %v4610_v29 }
0x137b   : > { %13881 = vtanh.f32 %v4612_v30 }
0x1384   : > { %v13880_v31 = vpop.eup %13879 }
0x1385   : > { %v4615_v32 = vadd.f32 1.0, %v13880_v31 }
0x1387   : > { %v4617_v37 = vmul.f32 %v4615_v32, %v4601_v34  ;;  %v13757_v32 = vld [vmem:[%s16951_s1 + $0x8] sm:$0xff]  }
0x1388   : > { %v13882_v33 = vpop.eup %13881 }
0x1389   : > { %v4616_v36 = vadd.f32 1.0, %v13882_v33 }
0x138b   : > { %v4618_v38 = vmul.f32 %v4616_v36, %v4602_v35 }
0x138d   : > { %v4619_v39 = vpack.c.bf16 %v4618_v38, %v4617_v37 }
0x138f   : > { %12690 = vmatmul.mubr.msk.bf16.vlgmr.msra.gmra.mxu1 %vm4652_vm9, %v4619_v39 }
0x1390   : > { %12713 = vmatprep.mubr.msk.bf16.mxu1 %vm14947_vm0, %v14946_v1  ;;  %12710 = vmatpush3.bf16.msra.mxu1 %v13752_v9 }
0x1391   : > { %12711 = vmatprep.subr.bf16.mxu1 %v14946_v1 }
0x1394   : > { %12712 = vmatpush3.bf16.msra.mxu1 %v13754_v24 }
0x1395   : > { %12724 = vmatprep.subr.bf16.mxu1 %v14946_v1 }
0x144f   : > { %v4690_v40 = vpop.f32.mrf.mxu1 }
0x1450   : > { %v4697_v42 = vadd.f32 %v4690_v40, %v4531_v3 }
0x1451   : > { %v12691_v43 = vpop.f32.mrf.mxu1 }
0x1452   : > { %v4706_v61 = vadd.f32 %v11682_v41, %v4697_v42  ;;  %v11702_v43 = vld [vmem:[#allocation15] ss:$0 sm:$0xff] }
0x1453   : > { %v4693_v44 = vpop.f32.mrf.mxu1 }
0x1454   : > { %v4698_v45 = vadd.f32 %v4693_v44, %v4532_v4  ;;  %v4708_v46 = vsel %vm3028_vm5, %v4706_v61, 0.0 }
0x1455   : > { %4709 = vadd.xlane.f32.xlu0 %v4708_v46  ;;  %v12692_v47 = vpop.f32.mrf.mxu1 }
0x1456   : > { %v4707_v48 = vadd.f32 %v11682_v41, %v4698_v45  ;;  %v11703_v45 = vld [vmem:[#allocation16] ss:$0 sm:$0xff] }
0x1458   : > { %v4711_v58 = vsel %vm3028_vm5, %v4707_v48, 0.0 }
0x1459   : > { %4712 = vadd.xlane.f32.xlu1 %v4711_v58 }
0x14de   : > { %v4710_v49 = vpop.xlane.xlu0 %4709 }
0x14df   : > { %v4714_v50 = vmul.f32 0.03125, %v4710_v49 }
0x14e1   : > { %v4716_v51 = vsub.f32 %v4706_v61, %v4714_v50 }
0x14e2   : > { %v4713_v59 = vpop.xlane.xlu1 %4712 }
0x14e3   : > { %v4715_v52 = vmul.f32 0.03125, %v4713_v59  ;;  %v4718_v53 = vmul.f32 %v4716_v51, %v4716_v51 }
0x14e5   : > { %v4717_v54 = vsub.f32 %v4707_v48, %v4715_v52  ;;  %v4720_v55 = vsel %vm3028_vm5, %v4718_v53, 0.0 }
0x14e6   : > { %4721 = vadd.xlane.f32.xlu0 %v4720_v55 }
0x14e7   : > { %v4719_v56 = vmul.f32 %v4717_v54, %v4717_v54 }
0x14e9   : > { %v4723_v57 = vsel %vm3028_vm5, %v4719_v56, 0.0 }
0x14ea   : > { %4724 = vadd.xlane.f32.xlu1 %v4723_v57 }
0x156f   : > { %v4722_v60 = vpop.xlane.xlu0 %4721 }
0x1570   : > { %v4726_v62 = vmul.f32 0.03125, %v4722_v60 }
0x1572   : > { %v4728_v63 = vadd.f32 1e-05, %v4726_v62 }
0x1573   : > { %v4725_v0 = vpop.xlane.xlu1 %4724 }
0x1574   : > { %13883 = vrsqrt.f32 %v4728_v63  ;;  %v4727_v3 = vmul.f32 0.03125, %v4725_v0 }
0x1576   : > { %v4729_v4 = vadd.f32 1e-05, %v4727_v3 }
0x1578   : > { %13885 = vrsqrt.f32 %v4729_v4 }
0x1581   : > { %v13884_v5 = vpop.eup %13883 }
0x1582   : > { %v4732_v8 = vmul.f32 %v13884_v5, %v4716_v51 }
0x1584   : > { %v4741_v10 = vmul.f32 %v11683_v7, %v4732_v8 }
0x1585   : > { %v13886_v11 = vpop.eup %13885 }
0x1586   : > { %v4733_v13 = vmul.f32 %v13886_v11, %v4717_v54  ;;  %v4750_v15 = vadd.f32 %v11684_v12, %v4741_v10 }
0x1588   : > { %v4742_v14 = vmul.f32 %v11683_v7, %v4733_v13  ;;  %v4757_v19 = vrot.slane %v4750_v15, 1  ;;  %v4752_v28 = vrot.slane %v4750_v15, 7 }
0x158a   : > { %v4751_v16 = vadd.f32 %v11684_v12, %v4742_v14 }
0x158c   : > { %v4762_v18 = vpack.c.bf16 %v4751_v16, %v4750_v15  ;;  %v4758_v20 = vrot.slane %v4751_v16, 1  ;;  %v4753_v21 = vrot.slane %v4751_v16, 7 }
0x158e   : > { %12698 = vmatmul.mubr.msk.bf16.vlgmr.msra.gmra.mxu0 %vm3028_vm5, %v4762_v18  ;;  %v4759_v23 = vsel %vm2785_vm4, %v4757_v19, %v4758_v20  ;;  %v4760_v25 = vsel %vm2785_vm4, %v4758_v20, %v4757_v19  ;;  %v4754_v29 = vsel %vm2779_vm3, %v4752_v28, %v4753_v21  ;;  %v4755_v30 = vsel %vm2779_vm3, %v4753_v21, %v4752_v28  ;;  %v13758_v18 = vld [vmem:[%s16953_s2 + $0x8] sm:$0xff]   ;;  %v13759_v19 = vld [vmem:[%s16951_s1] sm:$0xff]  }
0x158f   : > { %12702 = vmatpush3.bf16.msra.mxu0 %v13755_v17  ;;  %v4761_v26 = vpack.c.bf16 %v4760_v25, %v4759_v23  ;;  %12705 = vmatprep.mubr.msk.bf16.mxu0 %vm14947_vm0, %v14946_v1  ;;  %v4756_v31 = vpack.c.bf16 %v4754_v29, %v4755_v30  ;;  %v4977_v17 = vld [vmem:[%s16952_s0] sm:$0xff]  ;;  %s16955_s0 = sld [smem:[#allocation115_spill]]  ;;  %v13761_v23 = vld [vmem:[%s16954_s3 + $0x8] sm:$0xff]  }
0x1590   : > { %12703 = vmatprep.subr.bf16.mxu0 %v14946_v1  ;;  %v13760_v20 = vld [vmem:[%s16953_s2] sm:$0xff]  }
0x1591   : > { %12714 = vmatmul.mubr.msk.bf16.vlgmr.msra.gmra.mxu1 %vm3028_vm5, %v4761_v26  ;;  %v11708_v29 = vld [vmem:[%s16956_s4] ss:$0 sm:$0xff] }
0x1592   : > { %12728 = vmatprep.mubr.msk.bf16.mxu1 %vm14947_vm0, %v14946_v1  ;;  %12725 = vmatpush3.bf16.msra.mxu1 %v13757_v32 }
0x1593   : > { %12704 = vmatpush3.bf16.msra.mxu0 %v13756_v27  ;;  %12726 = vmatprep.subr.bf16.mxu1 %v14946_v1  ;;  %v13762_v27 = vld [vmem:[%s16954_s3] sm:$0xff]  }
0x1594   : > { %12717 = vmatprep.subr.mxu0 %v14946_v1 }
0x1595   : > { %v11712_v28 = vld [vmem:[%s16955_s0] ss:$0 sm:$0xff] }
0x1596   : > { %12706 = vmatmul.mubr.msk.bf16.vlgmr.msra.gmra.mxu0 %vm3028_vm5, %v4756_v31  ;;  %12727 = vmatpush3.bf16.msra.mxu1 %v13759_v19  ;;  %v13768_v19 = vld [vmem:[%s16953_s2 + $0x10] sm:$0xff]  }
0x1597   : > { %12721 = vmatprep.mubr.msk.f32.mxu0 %vm14947_vm0, %v14946_v1  ;;  %12740 = vmatprep.subr.bf16.mxu1 %v14946_v1 }
0x164e   : > { %v4821_v33 = vpop.f32.mrf.mxu0 }
0x1650   : > { %v12699_v34 = vpop.f32.mrf.mxu0 }
0x1651   : > { %v4938_v35 = vpop.f32.mrf.mxu1 }
0x1652   : > { %v4824_v36 = vpop.f32.mrf.mxu0 }
0x1653   : > { %v12715_v37 = vpop.f32.mrf.mxu1 }
0x1654   : > { %v12700_v38 = vpop.f32.mrf.mxu0 }
0x1655   : > { %v4941_v39 = vpop.f32.mrf.mxu1 }
0x1656   : > { %v4877_v40 = vpop.f32.mrf.mxu0 }
0x1657   : > { %v4878_v41 = vadd.f32 %v4877_v40, %v4821_v33  ;;  %v12716_v42 = vpop.f32.mrf.mxu1 }
0x1658   : > { %v12707_v61 = vpop.f32.mrf.mxu0  ;;  %v11716_v42 = vld [vmem:[%s16957_s5] ss:$0 sm:$0xff] }
0x1659   : > { %v4945_v44 = vadd.f32 %v4938_v35, %v4878_v41 }
0x165a   : > { %v4880_v46 = vpop.f32.mrf.mxu0 }
0x165b   : > { %v4954_v47 = vmul.f32 %v11702_v43, %v4945_v44  ;;  %v4881_v48 = vadd.f32 %v4880_v46, %v4824_v36  ;;  %v13763_v46 = vld [vmem:[%s16951_s1 + $0x18] sm:$0xff]  }
0x165c   : > { %v12708_v58 = vpop.f32.mrf.mxu0 }
0x165d   : > { %v4963_v49 = vadd.f32 %v11703_v45, %v4954_v47  ;;  %v4946_v50 = vadd.f32 %v4941_v39, %v4881_v48 }
0x165f   : > { %v4967_v51 = vmin.f32 %v4963_v49, 0.0  ;;  %v4955_v59 = vmul.f32 %v11702_v43, %v4946_v50  ;;  %vm4965_vm10 = vcmp.gt.f32.partialorder %v4963_v49, 0.0 }
0x1661   : > { %v4969_v52 = vmul.f32 1.442695, %v4967_v51  ;;  %v4964_v53 = vadd.f32 %v11703_v45, %v4955_v59  ;;  %v13764_v51 = vld [vmem:[%s16951_s1 + $0x10] sm:$0xff]   ;;  %v13765_v59 = vld [vmem:[%s16954_s3 + $0x18] sm:$0xff]  }
0x1663   : > { %13887 = vpow2.f32 %v4969_v52  ;;  %v4968_v54 = vmin.f32 %v4964_v53, 0.0  ;;  %vm4966_vm12 = vcmp.gt.f32.partialorder %v4964_v53, 0.0  ;;  %v13766_v52 = vld [vmem:[%s16954_s3 + $0x10] sm:$0xff]  }
0x1665   : > { %v4971_v55 = vmul.f32 1.442695, %v4968_v54 }
0x1667   : > { %13889 = vpow2.f32 %v4971_v55 }
0x1670   : > { %v13888_v56 = vpop.eup %13887 }
0x1671   : > { %v11704_v57 = vadd.f32 -1.0, %v13888_v56 }
0x1673   : > { %v4975_v6 = vsel %vm4965_vm10, %v4963_v49, %v11704_v57 }
0x1674   : > { %v13890_v9 = vpop.eup %13889  ;;  %v4981_v22 = vrot.slane %v4975_v6, 7 }
0x1675   : > { %v11705_v24 = vadd.f32 -1.0, %v13890_v9 }
0x1676   : > { %v4986_v63 = vsel %vm4980_vm11, -1e+30, %v4981_v22 }
0x1677   : > { %v4976_v60 = vsel %vm4966_vm12, %v4964_v53, %v11705_v24  ;;  %v4989_v4 = vrot.slane %v4986_v63, 1  ;;  %v4997_v12 = vrot.slane %v4986_v63, 2 }
0x1678   : > { %v4982_v62 = vrot.slane %v4976_v60, 7  ;;  %v11745_v60 = vld [vmem:[%s16957_s5 + $0x1] ss:$0 sm:$0xff] }
0x167a   : > { %v5000_v0 = vrot.slane %v4982_v62, 2  ;;  %v4983_v3 = vsel %vm4980_vm11, %v4981_v22, %v4982_v62 }
0x167b   : > { %v4990_v5 = vrot.slane %v4983_v3, 1  ;;  %v4998_v7 = vrot.slane %v4983_v3, 2 }
0x167d   : > { %v4991_v8 = vsel %vm4988_vm13, %v4989_v4, %v4990_v5  ;;  %v4995_v10 = vmax.f32 %v4983_v3, %v4990_v5  ;;  %v5001_v11 = vsel %vm4996_vm14, %v4998_v7, %v5000_v0  ;;  %v4999_v15 = vsel %vm4996_vm14, %v4997_v12, %v4998_v7 }
0x167e   : > { %v4994_v13 = vmax.f32 %v4986_v63, %v4991_v8 }
0x167f   : > { %v5005_v14 = vmax.f32 %v4995_v10, %v5001_v11 }
0x1680   : > { %v5004_v16 = vmax.f32 %v4994_v13, %v4999_v15 }
0x1681   : > { %12718 = vmatpush3.msk.msra.mxu0 %vm4988_vm13, %v5005_v14 }
0x1682   : > { %12719 = vmatprep.subr.mxu0 %v14946_v1 }
0x1683   : > { %12720 = vmatpush3.msra.mxu0 %v5004_v16 }
0x1684   : > { %12722 = vmatmul.mubr.msk.f32.vlgmr.msra.gmra.mxu0 %vm5006_vm15, %v4977_v17  ;;  %12732 = vmatprep.subr.bf16.mxu0 %v14946_v1  ;;  %v13767_v17 = vld [vmem:[%s16953_s2 + $0x18] sm:$0xff]  }
0x1685   : > { %12733 = vmatpush3.bf16.msra.mxu0 %v13758_v18  ;;  %12736 = vmatprep.mubr.msk.bf16.mxu0 %vm14947_vm0, %v14946_v1 }
0x1686   : > { %12734 = vmatprep.subr.bf16.mxu0 %v14946_v1 }
0x1689   : > { %12735 = vmatpush3.bf16.msra.mxu0 %v13760_v20 }
0x168a   : > { %12748 = vmatprep.subr.bf16.mxu0 %v14946_v1 }
0x1744   : > { %v15952_v21 = vpop.f32.mrf.mxu0 }
0x1745   : > { %v15957_v25 = vpack.c.bf16 %v15952_v21, %v15952_v21 }
0x1746   : > { %v12723_v26 = vpop.f32.mrf.mxu0 }
0x1747   : > { %12729 = vmatmul.mubr.msk.bf16.vlgmr.msra.gmra.mxu1 %vm3028_vm5, %v15957_v25  ;;  %12737 = vmatmul.mubr.msk.bf16.vlgmr.msra.gmra.mxu0 %vm3028_vm5, %v15957_v25 }
0x1748   : > { %12741 = vmatpush3.bf16.msra.mxu1 %v13761_v23  ;;  %12744 = vmatprep.mubr.msk.bf16.mxu1 %vm14947_vm0, %v14946_v1 }
0x1749   : > { %12742 = vmatprep.subr.bf16.mxu1 %v14946_v1  ;;  %12750 = vmatprep.mubr.msk.bf16.mxu0 %vm14947_vm0, %v14946_v1 }
0x174c   : > { %12743 = vmatpush3.bf16.msra.mxu1 %v13762_v27 }
0x174d   : > { %12754 = vmatprep.subr.bf16.mxu1 %v14946_v1 }
0x174f   : > { %12745 = vmatmul.mubr.msk.bf16.vlgmr.msra.gmra.mxu1 %vm3028_vm5, %v15957_v25 }
0x1750   : > { %12756 = vmatprep.mubr.msk.bf16.mxu1 %vm14947_vm0, %v14946_v1 }
0x1807   : > { %v5144_v30 = vpop.f32.mrf.mxu1  ;;  %v5207_v31 = vpop.f32.mrf.mxu0 }
0x1808   : > { %v5208_v32 = vadd.f32 %v11712_v28, %v5207_v31  ;;  %v5145_v35 = vadd.f32 %v11708_v29, %v5144_v30  ;;  %v11736_v28 = vld [vmem:[%s16955_s0 + $0x1] ss:$0 sm:$0xff] }
0x1809   : > { %v12730_v33 = vpop.f32.mrf.mxu1  ;;  %v12738_v34 = vpop.f32.mrf.mxu0  ;;  %v11727_v29 = vld [vmem:[%s16956_s4 + $0x1] ss:$0 sm:$0xff] }
0x180a   : > { %v5278_v36 = vpack.c.bf16 %v5208_v32, %v5208_v32  ;;  %v5276_v43 = vmul.f32 0.35355338, %v5145_v35 }
0x180b   : > { %v5147_v37 = vpop.f32.mrf.mxu1  ;;  %v5210_v38 = vpop.f32.mrf.mxu0 }
0x180c   : > { %v5283_v39 = vsel %vm3205_vm6, %v5278_v36, 0  ;;  %v5277_v47 = vpack.c.bf16 %v5276_v43, %v5276_v43 }
0x180d   : > { %v12731_v40 = vpop.f32.mrf.mxu1  ;;  %v12739_v41 = vpop.f32.mrf.mxu0  ;;  %12749 = vmatpush3.bf16.xpose.msra.mxu0 %v5283_v39 }
0x180e   : > { %12760 = vmatprep.subr.bf16.mxu0 %v14946_v1 }
0x180f   : > { %v5270_v61 = vpop.f32.mrf.mxu1 }
0x1810   : > { %v5271_v44 = vadd.f32 %v11716_v42, %v5270_v61 }
0x1811   : > { %v12746_v45 = vpop.f32.mrf.mxu1 }
0x1812   : > { %v5337_v48 = vpack.c.bf16 %v5271_v44, %v5271_v44 }
0x1813   : > { %v5273_v58 = vpop.f32.mrf.mxu1 }
0x1814   : > { %v5342_v49 = vsel %vm3647_vm8, %v5337_v48, 0  ;;  %12751 = vmatmul.mubr.msk.bf16.vlgmr.msra.gmra.mxu0 %vm3205_vm6, %v5277_v47 }
0x1815   : > { %v12747_v50 = vpop.f32.mrf.mxu1  ;;  %12755 = vmatpush3.bf16.msra.mxu1 %v5342_v49  ;;  %12761 = vmatpush3.bf16.msra.mxu0 %v13763_v46 }
0x1816   : > { %12762 = vmatprep.subr.bf16.mxu0 %v14946_v1  ;;  %12764 = vmatprep.mubr.msk.bf16.mxu0 %vm14947_vm0, %v14946_v1  ;;  %v5385_v50 = vld [vmem:[%s16958_s6] sm:$0xf] }
0x1817   : > { %12768 = vmatprep.subr.bf16.mxu1 %v14946_v1 }
0x1819   : > { %12763 = vmatpush3.bf16.msra.mxu0 %v13764_v51 }
0x181a   : > { %12776 = vmatprep.subr.bf16.mxu0 %v14946_v1 }
0x181c   : > { %12765 = vmatmul.mubr.msk.bf16.vlgmr.msra.gmra.mxu0 %vm3028_vm5, %v15957_v25 }
0x181d   : > { %12777 = vmatpush3.bf16.msra.mxu0 %v13765_v59  ;;  %12780 = vmatprep.mubr.msk.bf16.mxu0 %vm14947_vm0, %v14946_v1 }
0x181e   : > { %12778 = vmatprep.subr.bf16.mxu0 %v14946_v1 }
0x1821   : > { %12779 = vmatpush3.bf16.msra.mxu0 %v13766_v52  ;;  %v5742_v52 = vsel %vm3647_vm8, %v5385_v50, 0 }
0x1822   : > { %12790 = vmatprep.subr.bf16.mxu0 %v14946_v1 }
0x1824   : > { %12781 = vmatmul.mubr.msk.bf16.vlgmr.msra.gmra.mxu0 %vm3028_vm5, %v15957_v25 }
0x1825   : > { %12792 = vmatprep.mubr.msk.bf16.mxu0 %vm14947_vm0, %v14946_v1 }
0x18d4   : > { %v5319_v53 = vpop.f32.mrf.mxu0 }
0x18d5   : > { %v5325_v54 = vsel %vm3205_vm6, %v5319_v53, -inf }
0x18d6   : > { %5326 = vmax.xlane.f32.xlu0 %v5325_v54  ;;  %v12752_v55 = vpop.f32.mrf.mxu0 }
0x18d7   : > { %v13770_v55 = vld [vmem:[%s16953_s2 + $0x20] sm:$0xff]  }
0x18d8   : > { %v5322_v56 = vpop.f32.mrf.mxu0 }
0x18d9   : > { %v11751_v56 = vld [vmem:[%s16958_s6 + $0x4] sm:$0xf] }
0x18da   : > { %v12753_v57 = vpop.f32.mrf.mxu0 }
0x18db   : > { %v5696_v57 = vsel %vm3647_vm8, %v11751_v56, 0  ;;  %v13778_v56 = vld [vmem:[%s16954_s3 + $0x30] sm:$0xff]  }
0x18dc   : > { %v5445_v6 = vpop.f32.mrf.mxu0 }
0x18dd   : > { %v5446_v33 = vadd.f32 %v11727_v29, %v5445_v6 }
0x18de   : > { %v12766_v9 = vpop.f32.mrf.mxu0 }
0x18df   : > { %v5581_v38 = vmul.f32 0.35355338, %v5446_v33  ;;  %v13771_v9 = vld [vmem:[%s16951_s1 + $0x28] sm:$0xff]  }
0x18e0   : > { %v5448_v22 = vpop.f32.mrf.mxu0 }
0x18e1   : > { %v5582_v39 = vpack.c.bf16 %v5581_v38, %v5581_v38 }
0x18e2   : > { %v12767_v24 = vpop.f32.mrf.mxu0 }
0x18e4   : > { %v5575_v62 = vpop.f32.mrf.mxu0 }
0x18e5   : > { %v5576_v63 = vadd.f32 %v11745_v60, %v5575_v62  ;;  %v13772_v62 = vld [vmem:[%s16951_s1 + $0x20] sm:$0xff]  }
0x18e6   : > { %v12782_v0 = vpop.f32.mrf.mxu0 }
0x18e7   : > { %v5642_v3 = vpack.c.bf16 %v5576_v63, %v5576_v63 }
0x18e8   : > { %v5578_v4 = vpop.f32.mrf.mxu0 }
0x18e9   : > { %v5647_v5 = vsel %vm3647_vm8, %v5642_v3, 0  ;;  %v13773_v3 = vld [vmem:[%s16954_s3 + $0x28] sm:$0xff]  }
0x18ea   : > { %v12783_v7 = vpop.f32.mrf.mxu0  ;;  %12791 = vmatpush3.bf16.msra.mxu0 %v5647_v5 }
0x18eb   : > { %12802 = vmatprep.subr.bf16.mxu0 %v14946_v1  ;;  %v13774_v7 = vld [vmem:[%s16954_s3 + $0x20] sm:$0xff]  }
0x195f   : > { %v5327_v8 = vpop.xlane.xlu0 %5326 }
0x1960   : > { %v5328_v10 = vsub.f32 %v5319_v53, %v5327_v8  ;;  %v13769_v53 = vld [vmem:[%s16953_s2 + $0x28] sm:$0xff]  }
0x1962   : > { %v5329_v11 = vmul.f32 1.442695, %v5328_v10  ;;  %v11768_v10 = vld [vmem:[%s16955_s0 + $0x2] ss:$0 sm:$0xff] }
0x1964   : > { %13891 = vpow2.f32 %v5329_v11 }
0x1971   : > { %v13892_v12 = vpop.eup %13891 }
0x1972   : > { %v5331_v13 = vsel %vm3205_vm6, %v13892_v12, 0.0 }
0x1973   : > { %5332 = vadd.xlane.f32.xlu1 %v5331_v13 }
0x19fc   : > { %v5333_v14 = vpop.xlane.xlu1 %5332 }
0x19fd   : > { %13893 = vrcp.f32 %v5333_v14 }
0x1a0a   : > { %v13894_v15 = vpop.eup %13893 }
0x1a0b   : > { %v5335_v16 = vmul.f32 %v13894_v15, %v13892_v12 }
0x1a0d   : > { %v5336_v18 = vpack.c.bf16 %v5335_v16, %v5335_v16 }
0x1a0f   : > { %12757 = vmatmul.mubr.msk.bf16.vlgmr.msra.gmra.mxu1 %vm3205_vm6, %v5336_v18 }
0x1a10   : > { %12769 = vmatpush3.bf16.msra.mxu1 %v13767_v17  ;;  %12772 = vmatprep.mubr.msk.bf16.mxu1 %vm14947_vm0, %v14946_v1 }
0x1a11   : > { %12770 = vmatprep.subr.bf16.mxu1 %v14946_v1 }
0x1a14   : > { %12771 = vmatpush3.bf16.msra.mxu1 %v13768_v19 }
0x1a15   : > { %12784 = vmatprep.subr.bf16.mxu1 %v14946_v1 }
0x1a17   : > { %12773 = vmatmul.mubr.msk.bf16.vlgmr.msra.gmra.mxu1 %vm3028_vm5, %v15957_v25 }
0x1a18   : > { %12786 = vmatprep.mubr.msk.bf16.mxu1 %vm14947_vm0, %v14946_v1 }
0x1acf   : > { %v5378_v20 = vpop.f32.mrf.mxu1 }
0x1ad0   : > { %v5384_v54 = vpack.c.bf16 %v5378_v20, %v5378_v20 }
0x1ad1   : > { %v12758_v23 = vpop.f32.mrf.mxu1 }
0x1ad3   : > { %v5381_v26 = vpop.f32.mrf.mxu1 }
0x1ad4   : > { %v11759_v26 = vld [vmem:[%s16956_s4 + $0x2] ss:$0 sm:$0xff] }
0x1ad5   : > { %v12759_v27 = vpop.f32.mrf.mxu1 }
0x1ad7   : > { %v5510_v30 = vpop.f32.mrf.mxu1 }
0x1ad8   : > { %v5511_v31 = vadd.f32 %v11736_v28, %v5510_v30 }
0x1ad9   : > { %v12774_v32 = vpop.f32.mrf.mxu1 }
0x1ada   : > { %v5583_v34 = vpack.c.bf16 %v5511_v31, %v5511_v31 }
0x1adb   : > { %v5513_v35 = vpop.f32.mrf.mxu1 }
0x1adc   : > { %v5588_v36 = vsel %vm3205_vm6, %v5583_v34, 0  ;;  %v11777_v34 = vld [vmem:[%s16957_s5 + $0x2] ss:$0 sm:$0xff] }
0x1add   : > { %v12775_v37 = vpop.f32.mrf.mxu1  ;;  %12785 = vmatpush3.bf16.xpose.msra.mxu1 %v5588_v36 }
0x1ade   : > { %12796 = vmatprep.subr.bf16.mxu1 %v14946_v1 }
0x1ae4   : > { %12787 = vmatmul.mubr.msk.bf16.vlgmr.msra.gmra.mxu1 %vm3205_vm6, %v5582_v39 }
0x1ae5   : > { %12798 = vmatprep.mubr.msk.bf16.mxu1 %vm14947_vm0, %v14946_v1  ;;  %12797 = vmatpush3.bf16.msra.mxu1 %v5696_v57  ;;  %v11783_v57 = vld [vmem:[%s16958_s6 + $0x8] sm:$0xf] }
0x1ae6   : > { %12808 = vmatprep.subr.bf16.mxu1 %v14946_v1 }
0x1ba4   : > { %v5624_v40 = vpop.f32.mrf.mxu1 }
0x1ba5   : > { %v5630_v41 = vsel %vm3205_vm6, %v5624_v40, -inf }
0x1ba6   : > { %5631 = vmax.xlane.f32.xlu0 %v5630_v41  ;;  %v12788_v42 = vpop.f32.mrf.mxu1 }
0x1ba8   : > { %v5627_v43 = vpop.f32.mrf.mxu1 }
0x1baa   : > { %v12789_v61 = vpop.f32.mrf.mxu1 }
0x1c2f   : > { %v5632_v44 = vpop.xlane.xlu0 %5631 }
0x1c30   : > { %v5633_v45 = vsub.f32 %v5624_v40, %v5632_v44 }
0x1c32   : > { %v5634_v46 = vmul.f32 1.442695, %v5633_v45 }
0x1c34   : > { %13895 = vpow2.f32 %v5634_v46 }
0x1c41   : > { %v13896_v47 = vpop.eup %13895 }
0x1c42   : > { %v5636_v48 = vsel %vm3205_vm6, %v13896_v47, 0.0 }
0x1c43   : > { %5637 = vadd.xlane.f32.xlu1 %v5636_v48 }
0x1ccc   : > { %v5638_v58 = vpop.xlane.xlu1 %5637 }
0x1ccd   : > { %13897 = vrcp.f32 %v5638_v58 }
0x1cda   : > { %v13898_v49 = vpop.eup %13897 }
0x1cdb   : > { %v5640_v51 = vmul.f32 %v13898_v49, %v13896_v47 }
0x1cdd   : > { %v5641_v59 = vpack.c.bf16 %v5640_v51, %v5640_v51 }
0x1cdf   : > { %12793 = vmatmul.mubr.msk.bf16.vlgmr.msra.gmra.mxu0 %vm3205_vm6, %v5641_v59 }
0x1ce0   : > { %12803 = vmatpush3.bf16.msra.mxu0 %v5742_v52  ;;  %12804 = vmatprep.mubr.msk.bf16.mxu0 %vm14947_vm0, %v14946_v1  ;;  %v13775_v52 = vld [vmem:[%s16951_s1 + $0x38] sm:$0xff]  }
0x1ce1   : > { %12816 = vmatprep.subr.bf16.mxu0 %v14946_v1 }
0x1ce7   : > { %12805 = vmatmul.mubr.msk.bf16.vlgmr.msra.gmra.mxu0 %vm3205_vm6, %v5384_v54  ;;  %v13776_v54 = vld [vmem:[%s16951_s1 + $0x30] sm:$0xff]   ;;  %s16960_s1 = sld [smem:[#allocation67_spill]] }
0x1ce8   : > { %12817 = vmatpush3.bf16.msra.mxu0 %v13769_v53  ;;  %12820 = vmatprep.mubr.msk.bf16.mxu0 %vm14947_vm0, %v14946_v1 }
0x1ce9   : > { %12818 = vmatprep.subr.bf16.mxu0 %v14946_v1 }
0x1cec   : > { %12819 = vmatpush3.bf16.msra.mxu0 %v13770_v55  ;;  %v13777_v55 = vld [vmem:[%s16954_s3 + $0x38] sm:$0xff]   ;;  %s16962_s3 = sld [smem:[#allocation125_spill]] }
0x1ced   : > { %12832 = vmatprep.subr.bf16.mxu0 %v14946_v1 }
0x1cef   : > { %12821 = vmatmul.mubr.msk.bf16.vlgmr.msra.gmra.mxu0 %vm3028_vm5, %v15957_v25 }
0x1cf0   : > { %12834 = vmatprep.mubr.msk.bf16.mxu0 %vm14947_vm0, %v14946_v1 }
0x1d9f   : > { %v5683_v6 = vpop.f32.mrf.mxu0 }
0x1da0   : > { %v5689_v22 = vpack.c.bf16 %v5683_v6, %v5683_v6  ;;  %v6094_v6 = vsel %vm3647_vm8, %v11783_v57, 0  ;;  %v11816_v57 = vld [vmem:[#allocation30] ss:$0 sm:$0xff] }
0x1da1   : > { %v12794_v24 = vpop.f32.mrf.mxu0 }
0x1da2   : > { %12799 = vmatmul.mubr.msk.bf16.vlgmr.msra.gmra.mxu1 %vm3205_vm6, %v5689_v22  ;;  %v13779_v22 = vld [vmem:[%s16953_s2 + $0x38] sm:$0xff]  }
0x1da3   : > { %v5686_v60 = vpop.f32.mrf.mxu0  ;;  %12809 = vmatpush3.bf16.msra.mxu1 %v13771_v9  ;;  %12812 = vmatprep.mubr.msk.bf16.mxu1 %vm14947_vm0, %v14946_v1 }
0x1da4   : > { %12810 = vmatprep.subr.bf16.mxu1 %v14946_v1 }
0x1da5   : > { %v12795_v63 = vpop.f32.mrf.mxu0 }
0x1da6   : > { %v13780_v63 = vld [vmem:[%s16953_s2 + $0x30] sm:$0xff]   ;;  %s16961_s2 = sld [smem:[#allocation62_spill]] }
0x1da7   : > { %v16051_v0 = vpop.f32.mrf.mxu0  ;;  %12811 = vmatpush3.bf16.msra.mxu1 %v13772_v62 }
0x1da8   : > { %12824 = vmatprep.subr.bf16.mxu1 %v14946_v1 }
0x1da9   : > { %v12806_v4 = vpop.f32.mrf.mxu0 }
0x1daa   : > { %12813 = vmatmul.mubr.msk.bf16.vlgmr.msra.gmra.mxu1 %vm3028_vm5, %v15957_v25 }
0x1dab   : > { %v5781_v5 = vpop.f32.mrf.mxu0  ;;  %12825 = vmatpush3.bf16.msra.mxu1 %v13773_v3  ;;  %12828 = vmatprep.mubr.msk.bf16.mxu1 %vm14947_vm0, %v14946_v1 }
0x1dac   : > { %12826 = vmatprep.subr.bf16.mxu1 %v14946_v1 }
0x1dad   : > { %v12807_v8 = vpop.f32.mrf.mxu0 }
0x1daf   : > { %v5908_v11 = vpop.f32.mrf.mxu0  ;;  %12827 = vmatpush3.bf16.msra.mxu1 %v13774_v7 }
0x1db0   : > { %v5909_v12 = vadd.f32 %v11768_v10, %v5908_v11  ;;  %12838 = vmatprep.subr.bf16.mxu1 %v14946_v1  ;;  %v11808_v10 = vld [vmem:[%s16957_s5 + $0x3] ss:$0 sm:$0xff]  ;;  %s16970_s5 = sld [smem:[#allocation84_spill]] }
0x1db1   : > { %v12822_v13 = vpop.f32.mrf.mxu0 }
0x1db2   : > { %v5981_v14 = vpack.c.bf16 %v5909_v12, %v5909_v12  ;;  %12829 = vmatmul.mubr.msk.bf16.vlgmr.msra.gmra.mxu1 %vm3028_vm5, %v15957_v25 }
0x1db3   : > { %v5911_v15 = vpop.f32.mrf.mxu0  ;;  %12840 = vmatprep.mubr.msk.bf16.mxu1 %vm14947_vm0, %v14946_v1 }
0x1db4   : > { %v5986_v16 = vsel %vm3205_vm6, %v5981_v14, 0 }
0x1db5   : > { %v12823_v17 = vpop.f32.mrf.mxu0  ;;  %12833 = vmatpush3.bf16.xpose.msra.mxu0 %v5986_v16 }
0x1db6   : > { %12844 = vmatprep.subr.bf16.mxu0 %v14946_v1 }
0x1e62   : > { %v16069_v18 = vpop.f32.mrf.mxu1 }
0x1e64   : > { %v12800_v19 = vpop.f32.mrf.mxu1 }
0x1e66   : > { %v5735_v20 = vpop.f32.mrf.mxu1 }
0x1e68   : > { %v12801_v23 = vpop.f32.mrf.mxu1 }
0x1e6a   : > { %v5843_v27 = vpop.f32.mrf.mxu1 }
0x1e6b   : > { %v5844_v28 = vadd.f32 %v11759_v26, %v5843_v27 }
0x1e6c   : > { %v12814_v29 = vpop.f32.mrf.mxu1 }
0x1e6d   : > { %v5979_v30 = vmul.f32 0.35355338, %v5844_v28  ;;  %v11799_v28 = vld [vmem:[%s16955_s0 + $0x3] ss:$0 sm:$0xff]  ;;  %s16959_s0 = sld [smem:[#allocation123_spill]] }
0x1e6e   : > { %v5846_v31 = vpop.f32.mrf.mxu1  ;;  %v11790_v29 = vld [vmem:[%s16956_s4 + $0x3] ss:$0 sm:$0xff] }
0x1e6f   : > { %v5980_v32 = vpack.c.bf16 %v5979_v30, %v5979_v30 }
0x1e70   : > { %v12815_v33 = vpop.f32.mrf.mxu1 }
0x1e71   : > { %12835 = vmatmul.mubr.msk.bf16.vlgmr.msra.gmra.mxu0 %vm3205_vm6, %v5980_v32 }
0x1e72   : > { %v5973_v35 = vpop.f32.mrf.mxu1  ;;  %12846 = vmatprep.mubr.msk.bf16.mxu0 %vm14947_vm0, %v14946_v1  ;;  %12845 = vmatpush3.bf16.msra.mxu0 %v6094_v6 }
0x1e73   : > { %v5974_v36 = vadd.f32 %v11777_v34, %v5973_v35  ;;  %12858 = vmatprep.subr.bf16.mxu0 %v14946_v1 }
0x1e74   : > { %v12830_v37 = vpop.f32.mrf.mxu1 }
0x1e75   : > { %v6040_v38 = vpack.c.bf16 %v5974_v36, %v5974_v36 }
0x1e76   : > { %v5976_v39 = vpop.f32.mrf.mxu1 }
0x1e77   : > { %v6045_v40 = vsel %vm3647_vm8, %v6040_v38, 0 }
0x1e78   : > { %v12831_v41 = vpop.f32.mrf.mxu1  ;;  %12839 = vmatpush3.bf16.msra.mxu1 %v6045_v40 }
0x1e79   : > { %12850 = vmatprep.subr.bf16.mxu1 %v14946_v1 }
0x1f31   : > { %v6022_v42 = vpop.f32.mrf.mxu0 }
0x1f32   : > { %v6028_v43 = vsel %vm3205_vm6, %v6022_v42, -inf }
0x1f33   : > { %6029 = vmax.xlane.f32.xlu0 %v6028_v43  ;;  %v12836_v61 = vpop.f32.mrf.mxu0 }
0x1f35   : > { %v6025_v44 = vpop.f32.mrf.mxu0 }
0x1f37   : > { %v12837_v45 = vpop.f32.mrf.mxu0 }
0x1fbc   : > { %v6030_v46 = vpop.xlane.xlu0 %6029 }
0x1fbd   : > { %v6031_v47 = vsub.f32 %v6022_v42, %v6030_v46 }
0x1fbf   : > { %v6032_v48 = vmul.f32 1.442695, %v6031_v47 }
0x1fc1   : > { %13899 = vpow2.f32 %v6032_v48 }
0x1fce   : > { %v13900_v58 = vpop.eup %13899 }
0x1fcf   : > { %v6034_v49 = vsel %vm3205_vm6, %v13900_v58, 0.0 }
0x1fd0   : > { %6035 = vadd.xlane.f32.xlu1 %v6034_v49 }
0x2059   : > { %v6036_v50 = vpop.xlane.xlu1 %6035 }
0x205a   : > { %13901 = vrcp.f32 %v6036_v50  ;;  %v11814_v50 = vld [vmem:[%s16958_s6 + $0xc] sm:$0xf]  ;;  %s16973_s6 = sld [smem:[#allocation64_spill]] }
0x2067   : > { %v13902_v51 = vpop.eup %13901 }
0x2068   : > { %v6038_v59 = vmul.f32 %v13902_v51, %v13900_v58  ;;  %v6447_v51 = vsel %vm3647_vm8, %v11814_v50, 0 }
0x206a   : > { %v6039_v53 = vpack.c.bf16 %v6038_v59, %v6038_v59 }
0x206c   : > { %12841 = vmatmul.mubr.msk.bf16.vlgmr.msra.gmra.mxu1 %vm3205_vm6, %v6039_v53 }
0x206d   : > { %12851 = vmatpush3.bf16.msra.mxu1 %v13775_v52  ;;  %12854 = vmatprep.mubr.msk.bf16.mxu1 %vm14947_vm0, %v14946_v1 }
0x206e   : > { %12852 = vmatprep.subr.bf16.mxu1 %v14946_v1 }
0x2071   : > { %12853 = vmatpush3.bf16.msra.mxu1 %v13776_v54 }
0x2072   : > { %12866 = vmatprep.subr.bf16.mxu1 %v14946_v1 }
0x2074   : > { %12855 = vmatmul.mubr.msk.bf16.vlgmr.msra.gmra.mxu1 %vm3028_vm5, %v15957_v25 }
0x2075   : > { %12867 = vmatpush3.bf16.msra.mxu1 %v13777_v55  ;;  %12870 = vmatprep.mubr.msk.bf16.mxu1 %vm14947_vm0, %v14946_v1 }
0x2076   : > { %12868 = vmatprep.subr.bf16.mxu1 %v14946_v1 }
0x2079   : > { %12869 = vmatpush3.bf16.msra.mxu1 %v13778_v56 }
0x207a   : > { %12880 = vmatprep.subr.bf16.mxu1 %v14946_v1 }
0x207c   : > { %12871 = vmatmul.mubr.msk.bf16.vlgmr.msra.gmra.mxu1 %vm3028_vm5, %v15957_v25 }
0x207d   : > { %12882 = vmatprep.mubr.msk.bf16.mxu1 %vm14947_vm0, %v14946_v1 }
0x212c   : > { %v6081_v9 = vpop.f32.mrf.mxu1 }
0x212d   : > { %v6087_v24 = vpack.c.bf16 %v6081_v9, %v6081_v9 }
0x212e   : > { %v12842_v60 = vpop.f32.mrf.mxu1 }
0x212f   : > { %12847 = vmatmul.mubr.msk.bf16.vlgmr.msra.gmra.mxu0 %vm3205_vm6, %v6087_v24 }
0x2130   : > { %v6084_v62 = vpop.f32.mrf.mxu1  ;;  %12859 = vmatpush3.bf16.msra.mxu0 %v13779_v22  ;;  %12862 = vmatprep.mubr.msk.bf16.mxu0 %vm14947_vm0, %v14946_v1 }
0x2131   : > { %12860 = vmatprep.subr.bf16.mxu0 %v14946_v1 }
0x2132   : > { %v12843_v3 = vpop.f32.mrf.mxu1 }
0x2134   : > { %v6196_v4 = vpop.f32.mrf.mxu1  ;;  %12861 = vmatpush3.bf16.msra.mxu0 %v13780_v63 }
0x2135   : > { %12874 = vmatprep.subr.bf16.mxu0 %v14946_v1  ;;  %v6197_v33 = vadd.f32 %v11790_v29, %v6196_v4 }
0x2136   : > { %v12856_v5 = vpop.f32.mrf.mxu1 }
0x2137   : > { %12863 = vmatmul.mubr.msk.bf16.vlgmr.msra.gmra.mxu0 %vm3028_vm5, %v15957_v25  ;;  %v5779_v25 = vadd.f32 %v16051_v0, %v16069_v18  ;;  %v6332_v38 = vmul.f32 0.35355338, %v6197_v33 }
0x2138   : > { %v6199_v7 = vpop.f32.mrf.mxu1  ;;  %12876 = vmatprep.mubr.msk.bf16.mxu0 %vm14947_vm0, %v14946_v1 }
0x2139   : > { %v6333_v0 = vpack.c.bf16 %v6332_v38, %v6332_v38 }
0x213a   : > { %v12857_v8 = vpop.f32.mrf.mxu1 }
0x213c   : > { %v6326_v11 = vpop.f32.mrf.mxu1 }
0x213d   : > { %v6327_v12 = vadd.f32 %v11808_v10, %v6326_v11  ;;  %v13781_v10 = vld [vmem:[%s16959_s0 + $0x8] sm:$0xff]   ;;  %v13782_v11 = vld [vmem:[%s16959_s0] sm:$0xff]   ;;  %s16148_s0 = smul.u32 24, %s16989_s11  ;;  %s16963_s11 = sld [smem:[#allocation68_spill]] }
0x213e   : > { %v12872_v13 = vpop.f32.mrf.mxu1 }
0x213f   : > { %v6393_v14 = vpack.c.bf16 %v6327_v12, %v6327_v12  ;;  %s2759_s4 = scalar_lea.vmem %s16961_s2, %s16148_s0 }
0x2140   : > { %v6329_v15 = vpop.f32.mrf.mxu1  ;;  %v6752_v29 = vld [vmem:[%s2759_s4 + $0x10] sm:$0xff] }
0x2141   : > { %v6398_v16 = vsel %vm3647_vm8, %v6393_v14, 0  ;;  %v11817_v15 = vld [vmem:[#allocation36] ss:$0 sm:$0xff] }
0x2142   : > { %v12873_v17 = vpop.f32.mrf.mxu1  ;;  %12881 = vmatpush3.bf16.msra.mxu1 %v6398_v16 }
0x2143   : > { %12892 = vmatprep.subr.bf16.mxu1 %v14946_v1  ;;  %v11818_v17 = vld [vmem:[#allocation34] ss:$0 sm:$0xff] }
0x21ef   : > { %v6130_v19 = vpop.f32.mrf.mxu0 }
0x21f0   : > { %v6136_v20 = vadd.f32 %v6130_v19, %v5779_v25 }
0x21f1   : > { %v12848_v23 = vpop.f32.mrf.mxu0 }
0x21f2   : > { %v11833_v23 = vld [vmem:[%s16960_s1 + $0x2] sm:$0x3] }
0x21f3   : > { %v6133_v26 = vpop.f32.mrf.mxu0 }
0x21f4   : > { %v6784_v26 = vsel %vm2797_vm1, %v11833_v23, 0 }
0x21f5   : > { %v12849_v27 = vpop.f32.mrf.mxu0 }
0x21f6   : > { %v6750_v27 = vld [vmem:[%s2759_s4] sm:$0xff] }
0x21f7   : > { %v6261_v30 = vpop.f32.mrf.mxu0 }
0x21f8   : > { %v6262_v31 = vadd.f32 %v11799_v28, %v6261_v30  ;;  %v6751_v28 = vld [vmem:[%s2759_s4 + $0x8] sm:$0xff]  ;;  %s16964_s4 = sld [smem:[#allocation63_spill]] }
0x21f9   : > { %v12864_v32 = vpop.f32.mrf.mxu0  ;;  %v6772_v30 = vpack.c.bf16 %v6751_v28, %v6750_v27  ;;  %v6757_v33 = vrot.slane %v6751_v28, 7 }
0x21fa   : > { %v6334_v34 = vpack.c.bf16 %v6262_v31, %v6262_v31  ;;  %v6773_v31 = vpack.c.bf16 %v6752_v29, %v6752_v29  ;;  %v6756_v32 = vrot.slane %v6750_v27, 7 }
0x21fb   : > { %v6264_v35 = vpop.f32.mrf.mxu0 }
0x21fc   : > { %v6339_v36 = vsel %vm3205_vm6, %v6334_v34, 0  ;;  %v6758_v34 = vrot.slane %v6752_v29, 7  ;;  %v13783_v35 = vld [vmem:[%s16962_s3 + $0x18] sm:$0xff]   ;;  %v6760_v38 = vsel %vm2779_vm3, %v6756_v32, %v6757_v33 }
0x21fd   : > { %v12865_v37 = vpop.f32.mrf.mxu0  ;;  %12875 = vmatpush3.bf16.xpose.msra.mxu0 %v6339_v36  ;;  %v6774_v36 = vld [vmem:[%s16960_s1] sm:$0x3] }
0x21fe   : > { %12886 = vmatprep.subr.bf16.mxu0 %v14946_v1  ;;  %v6841_v37 = vsel %vm2797_vm1, %v6774_v36, 0  ;;  %s2764_s2 = scalar_lea.vmem %s16964_s4, %s16148_s0  ;;  %s16966_s4 = sld [smem:[#allocation88_spill]] }
0x21ff   : > { %v6754_v50 = vld [vmem:[%s2764_s2 + $0x8] sm:$0xff] }
0x2204   : > { %12877 = vmatmul.mubr.msk.bf16.vlgmr.msra.gmra.mxu0 %vm3205_vm6, %v6333_v0  ;;  %v6761_v0 = vsel %vm2779_vm3, %v6758_v34, %v6756_v32  ;;  %v13788_v32 = vld [vmem:[%s16966_s4 + $0x8] sm:$0xff]  }
0x2205   : > { %12888 = vmatprep.mubr.msk.bf16.mxu0 %vm14947_vm0, %v14946_v1  ;;  %12887 = vmatpush3.bf16.msra.mxu0 %v6447_v51  ;;  %v6755_v51 = vld [vmem:[%s2764_s2 + $0x10] sm:$0xff] }
0x2206   : > { %12900 = vmatprep.subr.bf16.mxu0 %v14946_v1 }
0x22c4   : > { %v6375_v18 = vpop.f32.mrf.mxu0 }
0x22c5   : > { %v6381_v39 = vsel %vm3205_vm6, %v6375_v18, -inf }
0x22c6   : > { %6382 = vmax.xlane.f32.xlu0 %v6381_v39  ;;  %v12878_v40 = vpop.f32.mrf.mxu0  ;;  %v6762_v39 = vpack.c.bf16 %v6760_v38, %v6761_v0 }
0x22c8   : > { %v6378_v41 = vpop.f32.mrf.mxu0 }
0x22c9   : > { %v13784_v41 = vld [vmem:[%s16962_s3 + $0x10] sm:$0xff]  }
0x22ca   : > { %v12879_v42 = vpop.f32.mrf.mxu0 }
0x22cb   : > { %v13785_v42 = vld [vmem:[%s16962_s3 + $0x8] sm:$0xff]  }
0x234f   : > { %v6383_v43 = vpop.xlane.xlu0 %6382 }
0x2350   : > { %v6384_v61 = vsub.f32 %v6375_v18, %v6383_v43  ;;  %v6759_v18 = vsel %vm2779_vm3, %v6757_v33, %v6758_v34  ;;  %v13786_v43 = vld [vmem:[%s16962_s3] sm:$0xff]   ;;  %s16969_s3 = sld [smem:[#allocation66_spill]] }
0x2351   : > { %v6763_v40 = vpack.c.bf16 %v6759_v18, %v6759_v18  ;;  %v13790_v34 = vld [vmem:[%s16966_s4] sm:$0xff]  }
0x2352   : > { %v6385_v44 = vmul.f32 1.442695, %v6384_v61  ;;  %v6764_v61 = vrot.slane %v6750_v27, 1 }
0x2354   : > { %13903 = vpow2.f32 %v6385_v44  ;;  %v6765_v44 = vrot.slane %v6751_v28, 1 }
0x2361   : > { %v13904_v45 = vpop.eup %13903 }
0x2362   : > { %v6387_v46 = vsel %vm3205_vm6, %v13904_v45, 0.0 }
0x2363   : > { %6388 = vadd.xlane.f32.xlu1 %v6387_v46  ;;  %v6955_v46 = vld [vmem:[%s16963_s11] sm:$0x3]  ;;  %s16965_s11 = sld [smem:[#allocation90_spill]] }
0x2369   : > { %v13789_v33 = vld [vmem:[%s16965_s11] sm:$0xff]  }
0x23ec   : > { %v6389_v47 = vpop.xlane.xlu1 %6388 }
0x23ed   : > { %13905 = vrcp.f32 %v6389_v47  ;;  %v6963_v47 = vsel %vm2797_vm1, %v6955_v46, 0 }
0x23fa   : > { %v13906_v48 = vpop.eup %13905 }
0x23fb   : > { %v6391_v58 = vmul.f32 %v13906_v48, %v13904_v45  ;;  %v11838_v45 = vld [vmem:[%s16960_s1 + $0x4] sm:$0x3]  ;;  %v6766_v48 = vrot.slane %v6752_v29, 1  ;;  %s16968_s1 = sld [smem:[#allocation65_spill]] }
0x23fd   : > { %v6392_v49 = vpack.c.bf16 %v6391_v58, %v6391_v58  ;;  %v6768_v58 = vsel %vm2785_vm4, %v6764_v61, %v6765_v44 }
0x23ff   : > { %12883 = vmatmul.mubr.msk.bf16.vlgmr.msra.gmra.mxu1 %vm3205_vm6, %v6392_v49  ;;  %v6753_v49 = vld [vmem:[%s2764_s2] sm:$0xff]  ;;  %s16967_s2 = sld [smem:[#allocation91_spill]] }
0x2400   : > { %12896 = vmatprep.mubr.msk.bf16.mxu1 %vm14947_vm0, %v14946_v1  ;;  %12893 = vmatpush3.bf16.msra.mxu1 %v13781_v10 }
0x2401   : > { %12894 = vmatprep.subr.bf16.mxu1 %v14946_v1 }
0x2404   : > { %12895 = vmatpush3.bf16.msra.mxu1 %v13782_v11  ;;  %v6900_v11 = vsel %vm2797_vm1, %v11838_v45, 0 }
0x2405   : > { %13316 = vmatprep.subr.msk.bf16.mxu1 %vm2797_vm1, %v11833_v23 }
0x24bf   : > { %v6434_v59 = vpop.f32.mrf.mxu1 }
0x24c0   : > { %v6440_v52 = vpack.c.bf16 %v6434_v59, %v6434_v59  ;;  %v6953_v59 = vpack.c.bf16 %v6754_v50, %v6753_v49 }
0x24c1   : > { %v12884_v53 = vpop.f32.mrf.mxu1 }
0x24c2   : > { %12889 = vmatmul.mubr.msk.bf16.vlgmr.msra.gmra.mxu0 %vm3205_vm6, %v6440_v52  ;;  %v6954_v52 = vpack.c.bf16 %v6755_v51, %v6755_v51  ;;  %v6767_v53 = vsel %vm2785_vm4, %v6765_v44, %v6766_v48  ;;  %v7026_v51 = vld [vmem:[%s16969_s3] sm:$0xff] }
0x24c3   : > { %v6437_v54 = vpop.f32.mrf.mxu1  ;;  %12908 = vmatprep.mubr.msk.bf16.mxu0 %vm14947_vm0, %v14946_v1  ;;  %12901 = vmatpush3.bf16.msra.mxu0 %v13783_v35  ;;  %v13791_v35 = vld [vmem:[%s16967_s2 + $0x8] sm:$0xff]  }
0x24c4   : > { %12902 = vmatprep.subr.bf16.mxu0 %v14946_v1  ;;  %v6769_v54 = vsel %vm2785_vm4, %v6766_v48, %v6764_v61  ;;  %v11843_v61 = vld [vmem:[%s16968_s1] ss:$0 sm:$0xff]  ;;  %s16971_s1 = sld [smem:[#allocation86_spill]] }
0x24c5   : > { %v12885_v55 = vpop.f32.mrf.mxu1 }
0x24c6   : > { %v6770_v55 = vpack.c.bf16 %v6767_v53, %v6768_v58  ;;  %v7028_v58 = vld [vmem:[%s16969_s3 + $0x10] sm:$0xff] }
0x24c7   : > { %12903 = vmatpush3.bf16.msra.mxu0 %v13784_v41 }
0x24c8   : > { %12904 = vmatprep.subr.bf16.mxu0 %v14946_v1 }
0x24cb   : > { %12905 = vmatpush3.bf16.msra.mxu0 %v13785_v42 }
0x24cc   : > { %12906 = vmatprep.subr.bf16.mxu0 %v14946_v1 }
0x24cf   : > { %12907 = vmatpush3.bf16.msra.mxu0 %v13786_v43 }
0x24d0   : > { %13318 = vmatprep.subr.msk.bf16.mxu0 %vm2797_vm1, %v11838_v45 }
0x2582   : > { %v6483_v56 = vpop.f32.mrf.mxu0 }
0x2583   : > { %v6489_v6 = vadd.f32 %v6483_v56, %v6136_v20  ;;  %v11819_v56 = vld [vmem:[#allocation31] ss:$0 sm:$0xff] }
0x2584   : > { %v12890_v9 = vpop.f32.mrf.mxu0 }
0x2585   : > { %v6497_v22 = vadd.f32 %v11816_v57, %v6489_v6 }
0x2586   : > { %v6486_v24 = vpop.f32.mrf.mxu0 }
0x2587   : > { %v6498_v60 = vadd.f32 %v6497_v22, %v15952_v21 }
0x2588   : > { %v12891_v62 = vpop.f32.mrf.mxu0 }
0x2589   : > { %v6499_v63 = vsel %vm3028_vm5, %v6498_v60, 0.0 }
0x258a   : > { %6500 = vadd.xlane.f32.xlu0 %v6499_v63 }
0x2613   : > { %v6501_v3 = vpop.xlane.xlu0 %6500 }
0x2614   : > { %v6502_v4 = vmul.f32 0.03125, %v6501_v3 }
0x2616   : > { %v6503_v5 = vsub.f32 %v6498_v60, %v6502_v4 }
0x2618   : > { %v6504_v7 = vmul.f32 %v6503_v5, %v6503_v5 }
0x261a   : > { %v6505_v8 = vsel %vm3028_vm5, %v6504_v7, 0.0 }
0x261b   : > { %6506 = vadd.xlane.f32.xlu1 %v6505_v8 }
0x26a4   : > { %v6507_v21 = vpop.xlane.xlu1 %6506 }
0x26a5   : > { %v6508_v12 = vmul.f32 0.03125, %v6507_v21  ;;  %v6771_v21 = vpack.c.bf16 %v6769_v54, %v6769_v54 }
0x26a7   : > { %v6509_v13 = vadd.f32 1e-05, %v6508_v12 }
0x26a9   : > { %13907 = vrsqrt.f32 %v6509_v13 }
0x26b6   : > { %v13908_v14 = vpop.eup %13907 }
0x26b7   : > { %v6511_v16 = vmul.f32 %v13908_v14, %v6503_v5 }
0x26b9   : > { %v6519_v25 = vmul.f32 %v11817_v15, %v6511_v16 }
0x26bb   : > { %v16142_v19 = vadd.f32 %v11818_v17, %v6519_v25 }
0x26bd   : > { %v6528_v20 = vpack.c.bf16 %v16142_v19, %v16142_v19 }
0x26bf   : > { %12897 = vmatmul.mubr.msk.bf16.vlgmr.msra.gmra.mxu1 %vm3028_vm5, %v6528_v20 }
0x26c0   : > { %12913 = vmatpush3.bf16.msra.mxu1 %v6784_v26  ;;  %12914 = vmatprep.mubr.msk.bf16.mxu1 %vm2793_vm2, %v6772_v30 }
0x26c1   : > { %13317 = vmatprep.subr.msk.bf16.mxu1 %vm2797_vm1, %v6774_v36 }
0x26c7   : > { %12915 = vmatmul.mubr.msk.bf16.vlgmr.msra.gmra.mxu1 %vm2793_vm2, %v6773_v31  ;;  %v13787_v31 = vld [vmem:[%s16965_s11 + $0x8] sm:$0xff]  }
0x26c8   : > { %12919 = vmatpush3.bf16.msra.mxu1 %v6841_v37  ;;  %12920 = vmatprep.mubr.msk.bf16.mxu1 %vm2793_vm2, %v6762_v39 }
0x26c9   : > { %13319 = vmatprep.subr.msk.bf16.mxu1 %vm2797_vm1, %v6955_v46  ;;  %vm7320_vm1 = vcmask 195584  }
0x26cf   : > { %12921 = vmatmul.mubr.msk.bf16.vlgmr.msra.gmra.mxu1 %vm2793_vm2, %v6763_v40 }
0x26d0   : > { %12931 = vmatpush3.bf16.msra.mxu1 %v6963_v47  ;;  %12932 = vmatprep.mubr.msk.bf16.mxu1 %vm2793_vm2, %v6953_v59  ;;  %v7027_v59 = vld [vmem:[%s16969_s3 + $0x8] sm:$0xff]  ;;  %s16972_s3 = sld [smem:[#allocation87_spill]] }
0x26d1   : > { %12944 = vmatprep.subr.bf16.mxu1 %v13788_v32 }
0x26d7   : > { %12933 = vmatmul.mubr.msk.bf16.vlgmr.msra.gmra.mxu1 %vm2793_vm2, %v6954_v52 }
0x26d8   : > { %12945 = vmatpush3.bf16.msra.mxu1 %v13788_v32 }
0x26d9   : > { %12946 = vmatprep.subr.bf16.mxu1 %v13790_v34 }
0x26dc   : > { %12947 = vmatpush3.bf16.msra.mxu1 %v13790_v34 }
0x277f   : > { %v6589_v57 = vpop.f32.mrf.mxu1 }
0x2780   : > { %v6590_v6 = vadd.f32 %v11819_v56, %v6589_v57 }
0x2781   : > { %v12898_v9 = vpop.f32.mrf.mxu1 }
0x2782   : > { %v6596_v22 = vmul.f32 0.044715, %v6590_v6  ;;  %v6595_v2 = vmul.f32 0.5, %v6590_v6  ;;  %v11849_v9 = vld [vmem:[%s16970_s5] ss:$0 sm:$0xff] }
0x2783   : > { %v6592_v24 = vpop.f32.mrf.mxu1 }
0x2784   : > { %v6597_v60 = vmul.f32 %v6596_v22, %v6590_v6 }
0x2785   : > { %v12899_v62 = vpop.f32.mrf.mxu1 }
0x2786   : > { %v6598_v63 = vmul.f32 %v6597_v60, %v6590_v6 }
0x2787   : > { %v12916_v12 = vpop.f32.mrf.mxu1 }
0x2788   : > { %v6599_v3 = vadd.f32 %v6598_v63, %v6590_v6  ;;  %v13792_v6 = vld [vmem:[%s16967_s2] sm:$0xff]  }
0x2789   : > { %v6820_v13 = vpop.f32.mrf.mxu1 }
0x278a   : > { %v6600_v4 = vmul.f32 0.7978846, %v6599_v3 }
0x278b   : > { %v12917_v14 = vpop.f32.mrf.mxu1 }
0x278c   : > { %13909 = vtanh.f32 %v6600_v4  ;;  %v11844_v4 = vld [vmem:[%s16971_s1] ss:$0 sm:$0xff] }
0x278d   : > { %v6823_v15 = vpop.f32.mrf.mxu1 }
0x278f   : > { %v12922_v16 = vpop.f32.mrf.mxu1 }
0x2790   : > { %v6886_v17 = vadd.f32 %v12922_v16, %v12916_v12 }
0x2791   : > { %v6877_v25 = vpop.f32.mrf.mxu1 }
0x2792   : > { %v6878_v20 = vadd.f32 %v6877_v25, %v6820_v13 }
0x2793   : > { %v12923_v23 = vpop.f32.mrf.mxu1 }
0x2795   : > { %v6880_v26 = vpop.f32.mrf.mxu1 }
0x2796   : > { %v6881_v27 = vadd.f32 %v6880_v26, %v6823_v15 }
0x2797   : > { %v12934_v28 = vpop.f32.mrf.mxu1 }
0x2799   : > { %v13910_v5 = vpop.eup %13909  ;;  %v6999_v29 = vpop.f32.mrf.mxu1 }
0x279a   : > { %v6602_v7 = vadd.f32 1.0, %v13910_v5 }
0x279b   : > { %v12935_v30 = vpop.f32.mrf.mxu1 }
0x279c   : > { %v6603_v8 = vmul.f32 %v6602_v7, %v6595_v2 }
0x279d   : > { %v7002_v48 = vpop.f32.mrf.mxu1 }
0x279e   : > { %v6604_v10 = vpack.c.bf16 %v6603_v8, %v6603_v8 }
0x27a0   : > { %12909 = vmatmul.mubr.msk.bf16.vlgmr.msra.gmra.mxu0 %vm4652_vm9, %v6604_v10 }
0x27a1   : > { %12925 = vmatpush3.bf16.msra.mxu0 %v6900_v11  ;;  %12926 = vmatprep.mubr.msk.bf16.mxu0 %vm2793_vm2, %v6770_v55 }
0x27a2   : > { %12936 = vmatprep.subr.bf16.mxu0 %v13787_v31 }
0x27a8   : > { %12927 = vmatmul.mubr.msk.bf16.vlgmr.msra.gmra.mxu0 %vm2793_vm2, %v6771_v21  ;;  %v11854_v21 = vld [vmem:[%s16972_s3] ss:$0 sm:$0xff] }
0x27a9   : > { %12937 = vmatpush3.bf16.msra.mxu0 %v13787_v31 }
0x27aa   : > { %12938 = vmatprep.subr.bf16.mxu0 %v13789_v33 }
0x27ad   : > { %12939 = vmatpush3.bf16.msra.mxu0 %v13789_v33 }
0x27ae   : > { %12952 = vmatprep.subr.bf16.mxu0 %v13791_v35 }
0x2860   : > { %v16199_v36 = vpop.f32.mrf.mxu0 }
0x2862   : > { %v12910_v37 = vpop.f32.mrf.mxu0 }
0x2864   : > { %v6677_v38 = vpop.f32.mrf.mxu0 }
0x2866   : > { %v12911_v0 = vpop.f32.mrf.mxu0 }
0x2868   : > { %v12928_v18 = vpop.f32.mrf.mxu0 }
0x2869   : > { %v6952_v39 = vadd.f32 %v12928_v18, %v6886_v17  ;;  %v13794_v18 = vld [vmem:[%s16966_s4 + $0x10] sm:$0xff]  }
0x286a   : > { %v6936_v40 = vpop.f32.mrf.mxu0 }
0x286b   : > { %v6950_v41 = vadd.f32 %v6936_v40, %v6878_v20  ;;  %v7015_v42 = vadd.f32 %v12934_v28, %v6952_v39  ;;  %v16250_v40 = vld [vmem:[%s16973_s6] sm:$0xff] }
0x286c   : > { %v12929_v43 = vpop.f32.mrf.mxu0 }
0x286d   : > { %v7013_v44 = vadd.f32 %v6999_v29, %v6950_v41  ;;  %v7025_v47 = vadd.f32 %v11843_v61, %v7015_v42  ;;  %v13793_v29 = vld [vmem:[%s16966_s4 + $0x18] sm:$0xff]   ;;  %v16253_v41 = vld [vmem:[%s16973_s6 + $0x10] sm:$0xff] }
0x286e   : > { %v6939_v45 = vpop.f32.mrf.mxu0 }
0x286f   : > { %v6951_v46 = vadd.f32 %v6939_v45, %v6881_v27  ;;  %v7023_v49 = vadd.f32 %v11843_v61, %v7013_v44  ;;  %v16205_v53 = vadd.f32 %v7028_v58, %v7025_v47  ;;  %v16257_v44 = vld [vmem:[%s16973_s6 + $0x8] sm:$0xff]  ;;  %s16974_s6 = sld [smem:[#allocation89_spill]] }
0x2871   : > { %v7014_v50 = vadd.f32 %v7002_v48, %v6951_v46  ;;  %v16207_v54 = vadd.f32 %v7026_v51, %v7023_v49  ;;  %v16217_v57 = vpack.c.bf16 %v16205_v53, %v16205_v53  ;;  %v11878_v48 = vld [vmem:[%s16970_s5 + $0x1] ss:$0 sm:$0xff] }
0x2873   : > { %v7024_v52 = vadd.f32 %v11843_v61, %v7014_v50 }
0x2875   : > { %v16209_v55 = vadd.f32 %v7027_v59, %v7024_v52 }
0x2877   : > { %v16213_v56 = vpack.c.bf16 %v16209_v55, %v16207_v54 }
0x2879   : > { %12940 = vmatprep.mubr.msk.bf16.mxu0 %vm3028_vm5, %v16213_v56  ;;  %12948 = vmatprep.mubr.msk.bf16.mxu1 %vm3028_vm5, %v16213_v56 }
0x287a   : > { %12941 = vmatmul.mubr.msk.bf16.vlgmr.msra.gmra.mxu0 %vm3028_vm5, %v16217_v57  ;;  %12949 = vmatmul.mubr.msk.bf16.vlgmr.msra.gmra.mxu1 %vm3028_vm5, %v16217_v57 }
0x287b   : > { %12953 = vmatpush3.bf16.msra.mxu0 %v13791_v35  ;;  %12956 = vmatprep.mubr.msk.bf16.mxu0 %vm3028_vm5, %v16213_v56 }
0x287c   : > { %12954 = vmatprep.subr.bf16.mxu0 %v13792_v6 }
0x287f   : > { %12955 = vmatpush3.bf16.msra.mxu0 %v13792_v6 }
0x2882   : > { %12957 = vmatmul.mubr.msk.bf16.vlgmr.msra.gmra.mxu0 %vm3028_vm5, %v16217_v57 }
0x293a   : > { %v12942_v22 = vpop.f32.mrf.mxu0  ;;  %v12950_v24 = vpop.f32.mrf.mxu1 }
0x293b   : > { %v7177_v60 = vadd.f32 %v12950_v24, %v11849_v9  ;;  %v7106_v26 = vadd.f32 %v12942_v22, %v11844_v4 }
0x293c   : > { %v7097_v62 = vpop.f32.mrf.mxu0  ;;  %v7168_v63 = vpop.f32.mrf.mxu1 }
0x293d   : > { %v7259_v3 = vpack.c.bf16 %v7177_v60, %v7177_v60  ;;  %v7098_v8 = vadd.f32 %v11844_v4, %v7097_v62  ;;  %v7169_v12 = vadd.f32 %v11849_v9, %v7168_v63  ;;  %v7255_v34 = vmul.f32 0.35355338, %v7106_v26 }
0x293e   : > { %v12943_v5 = vpop.f32.mrf.mxu0  ;;  %v12951_v2 = vpop.f32.mrf.mxu1 }
0x293f   : > { %v7270_v7 = vsel %vm3205_vm6, %v7259_v3, 0  ;;  %13320 = vmatprep.subr.msk.bf16.mxu1 %vm3205_vm6, %v7259_v3  ;;  %v7253_v16 = vmul.f32 0.35355338, %v7098_v8  ;;  %v7257_v0 = vpack.c.bf16 %v7255_v34, %v7255_v34 }
0x2940   : > { %v7100_v10 = vpop.f32.mrf.mxu0  ;;  %v7171_v11 = vpop.f32.mrf.mxu1  ;;  %12961 = vmatpush3.bf16.xpose.msra.mxu1 %v7270_v7 }
0x2941   : > { %v7101_v13 = vadd.f32 %v11844_v4, %v7100_v10  ;;  %v7172_v14 = vadd.f32 %v11849_v9, %v7171_v11 }
0x2942   : > { %v12958_v15 = vpop.f32.mrf.mxu0 }
0x2943   : > { %v7254_v17 = vmul.f32 0.35355338, %v7101_v13  ;;  %v7258_v25 = vpack.c.bf16 %v7172_v14, %v7169_v12  ;;  %v7248_v20 = vadd.f32 %v12958_v15, %v11854_v21 }
0x2944   : > { %v7239_v23 = vpop.f32.mrf.mxu0 }
0x2945   : > { %v7256_v27 = vpack.c.bf16 %v7254_v17, %v7253_v16  ;;  %v7357_v28 = vpack.c.bf16 %v7248_v20, %v7248_v20  ;;  %13321 = vmatprep.subr.msk.bf16.mxu1 %vm3205_vm6, %v7258_v25  ;;  %v7267_v32 = vsel %vm3205_vm6, %v7258_v25, 0  ;;  %v7240_v35 = vadd.f32 %v11854_v21, %v7239_v23  ;;  %v13795_v20 = vld [vmem:[%s16965_s11 + $0x18] sm:$0xff]  }
0x2946   : > { %v12959_v30 = vpop.f32.mrf.mxu0 }
0x2947   : > { %v7365_v31 = vsel %vm3647_vm8, %v7357_v28, 0  ;;  %12964 = vmatprep.mubr.msk.bf16.mxu1 %vm3205_vm6, %v7256_v27  ;;  %13322 = vmatprep.subr.msk.bf16.mxu0 %vm3647_vm8, %v7357_v28 }
0x2948   : > { %v7242_v33 = vpop.f32.mrf.mxu0  ;;  %12963 = vmatpush3.bf16.xpose.msra.mxu1 %v7267_v32  ;;  %12969 = vmatpush3.bf16.msra.mxu0 %v7365_v31 }
0x2949   : > { %v7243_v37 = vadd.f32 %v11854_v21, %v7242_v33  ;;  %12984 = vmatprep.subr.bf16.mxu1 %v13793_v29 }
0x294b   : > { %v7356_v38 = vpack.c.bf16 %v7243_v37, %v7240_v35  ;;  %v13796_v37 = vld [vmem:[%s16965_s11 + $0x10] sm:$0xff]  }
0x294d   : > { %12970 = vmatprep.subr.bf16.mxu0 %v7356_v38 }
0x294e   : > { %12971 = vmatpush3.bf16.msra.mxu0 %v7356_v38  ;;  %v13797_v38 = vld [vmem:[%s16967_s2 + $0x18] sm:$0xff]  }
0x294f   : > { %12965 = vmatmul.mubr.msk.bf16.vlgmr.msra.gmra.mxu1 %vm3205_vm6, %v7257_v0  ;;  %12976 = vmatprep.subr.bf16.mxu0 %v13795_v20  ;;  %v13798_v0 = vld [vmem:[%s16967_s2 + $0x10] sm:$0xff]  }
0x2950   : > { %12985 = vmatpush3.bf16.msra.mxu1 %v13793_v29  ;;  %12988 = vmatprep.mubr.msk.bf16.mxu1 %vm3028_vm5, %v16213_v56 }
0x2951   : > { %12986 = vmatprep.subr.bf16.mxu1 %v13794_v18 }
0x2954   : > { %12987 = vmatpush3.bf16.msra.mxu1 %v13794_v18  ;;  %v7417_v18 = vld [vmem:[%s16974_s6] sm:$0xf] }
0x2957   : > { %12989 = vmatmul.mubr.msk.bf16.vlgmr.msra.gmra.mxu1 %vm3028_vm5, %v16217_v57 }
0x2a0f   : > { %v12966_v39 = vpop.f32.mrf.mxu1 }
0x2a10   : > { %v7315_v45 = vadd.f32 %v12966_v39, %v16253_v41 }
0x2a11   : > { %v7306_v42 = vpop.f32.mrf.mxu1 }
0x2a12   : > { %v7307_v43 = vadd.f32 %v7306_v42, %v16250_v40  ;;  %v7327_v59 = vsel %vm7320_vm1, %v7315_v45, -inf }
0x2a13   : > { %v12967_v61 = vpop.f32.mrf.mxu1 }
0x2a14   : > { %v7321_v46 = vsel %vm7320_vm1, %v7307_v43, -inf }
0x2a15   : > { %v7309_v47 = vpop.f32.mrf.mxu1  ;;  %7322 = vmax.xlane.f32.xlu0 %v7321_v46  ;;  %v11868_v46 = vld [vmem:[%s16971_s1 + $0x1] ss:$0 sm:$0xff] }
0x2a16   : > { %v7310_v58 = vadd.f32 %v7309_v47, %v16257_v44 }
0x2a17   : > { %v12990_v49 = vpop.f32.mrf.mxu1 }
0x2a18   : > { %v7559_v50 = vadd.f32 %v12990_v49, %v11878_v48  ;;  %v7324_v51 = vsel %vm7320_vm1, %v7310_v58, -inf }
0x2a19   : > { %v7550_v52 = vpop.f32.mrf.mxu1  ;;  %7325 = vmax.xlane.f32.xlu1 %v7324_v51  ;;  %7328 = vmax.xlane.f32.xlu0 %v7327_v59  ;;  %v11888_v51 = vld [vmem:[%s16972_s3 + $0x1] ss:$0 sm:$0xff] }
0x2a1a   : > { %v7643_v6 = vpack.c.bf16 %v7559_v50, %v7559_v50  ;;  %v7551_v60 = vadd.f32 %v11878_v48, %v7550_v52 }
0x2a1b   : > { %v12991_v9 = vpop.f32.mrf.mxu1 }
0x2a1c   : > { %v7654_v22 = vsel %vm3205_vm6, %v7643_v6, 0  ;;  %13323 = vmatprep.subr.msk.bf16.mxu1 %vm3205_vm6, %v7643_v6 }
0x2a1d   : > { %v7553_v24 = vpop.f32.mrf.mxu1  ;;  %13001 = vmatpush3.bf16.xpose.msra.mxu1 %v7654_v22 }
0x2a1e   : > { %v7554_v62 = vadd.f32 %v11878_v48, %v7553_v24 }
0x2a20   : > { %v7642_v63 = vpack.c.bf16 %v7554_v62, %v7551_v60 }
0x2a22   : > { %13324 = vmatprep.subr.msk.bf16.mxu1 %vm3205_vm6, %v7642_v63  ;;  %v7651_v3 = vsel %vm3205_vm6, %v7642_v63, 0 }
0x2a25   : > { %13003 = vmatpush3.bf16.xpose.msra.mxu1 %v7651_v3 }
0x2a26   : > { %13327 = vmatprep.subr.msk.bf16.mxu1 %vm3647_vm8, %v7417_v18 }
0x2a9e   : > { %v7323_v4 = vpop.xlane.xlu0 %7322 }
0x2a9f   : > { %v7330_v5 = vsub.f32 %v7307_v43, %v7323_v4 }
0x2aa1   : > { %v7333_v2 = vmul.f32 1.442695, %v7330_v5  ;;  %v7866_v5 = vsel %vm3647_vm8, %v7417_v18, 0 }
0x2aa2   : > { %v7326_v7 = vpop.xlane.xlu1 %7325  ;;  %v7329_v8 = vpop.xlane.xlu0 %7328 }
0x2aa3   : > { %13911 = vpow2.f32 %v7333_v2  ;;  %v7331_v10 = vsub.f32 %v7310_v58, %v7326_v7  ;;  %v7332_v11 = vsub.f32 %v7315_v45, %v7329_v8  ;;  %v13799_v2 = vld [vmem:[%s16966_s4 + $0x28] sm:$0xff]  }
0x2aa5   : > { %v7335_v21 = vmul.f32 1.442695, %v7331_v10  ;;  %v7337_v12 = vmul.f32 1.442695, %v7332_v11 }
0x2aa7   : > { %13913 = vpow2.f32 %v7335_v21 }
0x2aa8   : > { %13915 = vpow2.f32 %v7337_v12 }
0x2ab0   : > { %v13912_v13 = vpop.eup %13911 }
0x2ab1   : > { %v7339_v14 = vsel %vm7320_vm1, %v13912_v13, 0.0 }
0x2ab2   : > { %7340 = vadd.xlane.f32.xlu1 %v7339_v14  ;;  %v13800_v14 = vld [vmem:[%s16966_s4 + $0x20] sm:$0xff]  }
0x2ab4   : > { %v13914_v15 = vpop.eup %13913 }
0x2ab5   : > { %v13916_v16 = vpop.eup %13915  ;;  %v7342_v17 = vsel %vm7320_vm1, %v13914_v15, 0.0 }
0x2ab6   : > { %7343 = vadd.xlane.f32.xlu0 %v7342_v17  ;;  %v7345_v25 = vsel %vm7320_vm1, %v13916_v16, 0.0 }
0x2ab7   : > { %7346 = vadd.xlane.f32.xlu1 %v7345_v25 }
0x2b3b   : > { %v7341_v23 = vpop.xlane.xlu1 %7340 }
0x2b3c   : > { %13917 = vrcp.f32 %v7341_v23 }
0x2b3f   : > { %v7344_v26 = vpop.xlane.xlu0 %7343 }
0x2b40   : > { %v7347_v27 = vpop.xlane.xlu1 %7346  ;;  %13919 = vrcp.f32 %v7344_v26 }
0x2b41   : > { %13921 = vrcp.f32 %v7347_v27 }
0x2b49   : > { %v13918_v28 = vpop.eup %13917 }
0x2b4a   : > { %v7351_v31 = vmul.f32 %v13918_v28, %v13912_v13 }
0x2b4d   : > { %v13920_v29 = vpop.eup %13919 }
0x2b4e   : > { %v13922_v30 = vpop.eup %13921  ;;  %v7352_v32 = vmul.f32 %v13920_v29, %v13914_v15 }
0x2b4f   : > { %v7353_v33 = vmul.f32 %v13922_v30, %v13916_v16 }
0x2b50   : > { %v7354_v34 = vpack.c.bf16 %v7352_v32, %v7351_v31 }
0x2b51   : > { %v7355_v35 = vpack.c.bf16 %v7353_v33, %v7353_v33 }
0x2b52   : > { %12972 = vmatprep.mubr.msk.bf16.mxu0 %vm7320_vm1, %v7354_v34  ;;  %v11917_v34 = vld [vmem:[%s16970_s5 + $0x2] ss:$0 sm:$0xff] }
0x2b53   : > { %12973 = vmatmul.mubr.msk.bf16.vlgmr.msra.gmra.mxu0 %vm7320_vm1, %v7355_v35 }
0x2b54   : > { %12977 = vmatpush3.bf16.msra.mxu0 %v13795_v20  ;;  %12980 = vmatprep.mubr.msk.bf16.mxu0 %vm3028_vm5, %v16213_v56 }
0x2b55   : > { %12978 = vmatprep.subr.bf16.mxu0 %v13796_v37 }
0x2b58   : > { %12979 = vmatpush3.bf16.msra.mxu0 %v13796_v37 }
0x2b59   : > { %12992 = vmatprep.subr.bf16.mxu0 %v13797_v38 }
0x2b5b   : > { %12981 = vmatmul.mubr.msk.bf16.vlgmr.msra.gmra.mxu0 %vm3028_vm5, %v16217_v57 }
0x2b5c   : > { %12993 = vmatpush3.bf16.msra.mxu0 %v13797_v38  ;;  %12996 = vmatprep.mubr.msk.bf16.mxu0 %vm3028_vm5, %v16213_v56 }
0x2b5d   : > { %12994 = vmatprep.subr.bf16.mxu0 %v13798_v0 }
0x2b60   : > { %12995 = vmatpush3.bf16.msra.mxu0 %v13798_v0 }
0x2b63   : > { %12997 = vmatmul.mubr.msk.bf16.vlgmr.msra.gmra.mxu0 %vm3028_vm5, %v16217_v57 }
0x2c13   : > { %v12974_v39 = vpop.f32.mrf.mxu0 }
0x2c14   : > { %v7416_v13 = vpack.c.bf16 %v12974_v39, %v12974_v39 }
0x2c15   : > { %v7401_v42 = vpop.f32.mrf.mxu0 }
0x2c17   : > { %v12975_v43 = vpop.f32.mrf.mxu0 }
0x2c19   : > { %v7404_v61 = vpop.f32.mrf.mxu0 }
0x2c1a   : > { %v7415_v7 = vpack.c.bf16 %v7404_v61, %v7401_v42 }
0x2c1b   : > { %v12982_v45 = vpop.f32.mrf.mxu0 }
0x2c1c   : > { %v7486_v48 = vadd.f32 %v12982_v45, %v11868_v46 }
0x2c1d   : > { %v7477_v47 = vpop.f32.mrf.mxu0 }
0x2c1e   : > { %v7478_v49 = vadd.f32 %v11868_v46, %v7477_v47  ;;  %v7639_v52 = vmul.f32 0.35355338, %v7486_v48 }
0x2c1f   : > { %v12983_v58 = vpop.f32.mrf.mxu0 }
0x2c20   : > { %v7637_v9 = vmul.f32 0.35355338, %v7478_v49  ;;  %v7641_v3 = vpack.c.bf16 %v7639_v52, %v7639_v52 }
0x2c21   : > { %v7480_v50 = vpop.f32.mrf.mxu0 }
0x2c22   : > { %v7481_v59 = vadd.f32 %v11868_v46, %v7480_v50 }
0x2c23   : > { %v12998_v6 = vpop.f32.mrf.mxu0 }
0x2c24   : > { %v7638_v22 = vmul.f32 0.35355338, %v7481_v59  ;;  %v7632_v24 = vadd.f32 %v12998_v6, %v11888_v51 }
0x2c25   : > { %v7623_v60 = vpop.f32.mrf.mxu0 }
0x2c26   : > { %v7640_v62 = vpack.c.bf16 %v7638_v22, %v7637_v9  ;;  %v7740_v63 = vpack.c.bf16 %v7632_v24, %v7632_v24  ;;  %v7624_v11 = vadd.f32 %v11888_v51, %v7623_v60 }
0x2c27   : > { %v12999_v4 = vpop.f32.mrf.mxu0 }
0x2c28   : > { %v7748_v8 = vsel %vm3647_vm8, %v7740_v63, 0  ;;  %13004 = vmatprep.mubr.msk.bf16.mxu1 %vm3205_vm6, %v7640_v62  ;;  %13325 = vmatprep.subr.msk.bf16.mxu0 %vm3647_vm8, %v7740_v63 }
0x2c29   : > { %v7626_v10 = vpop.f32.mrf.mxu0  ;;  %13005 = vmatmul.mubr.msk.bf16.vlgmr.msra.gmra.mxu1 %vm3205_vm6, %v7641_v3  ;;  %13009 = vmatpush3.bf16.msra.mxu0 %v7748_v8 }
0x2c2a   : > { %v7627_v21 = vadd.f32 %v11888_v51, %v7626_v10  ;;  %13024 = vmatprep.mubr.msk.bf16.mxu1 %vm3205_vm6, %v7415_v7  ;;  %13023 = vmatpush3.bf16.msra.mxu1 %v7866_v5 }
0x2c2b   : > { %13036 = vmatprep.subr.bf16.mxu1 %v13799_v2 }
0x2c2c   : > { %v7739_v12 = vpack.c.bf16 %v7627_v21, %v7624_v11 }
0x2c2e   : > { %13010 = vmatprep.subr.bf16.mxu0 %v7739_v12 }
0x2c2f   : > { %13011 = vmatpush3.bf16.msra.mxu0 %v7739_v12 }
0x2c31   : > { %13025 = vmatmul.mubr.msk.bf16.vlgmr.msra.gmra.mxu1 %vm3205_vm6, %v7416_v13 }
0x2c32   : > { %13037 = vmatpush3.bf16.msra.mxu1 %v13799_v2  ;;  %13040 = vmatprep.mubr.msk.bf16.mxu1 %vm3028_vm5, %v16213_v56 }
0x2c33   : > { %13038 = vmatprep.subr.bf16.mxu1 %v13800_v14 }
0x2c36   : > { %13039 = vmatpush3.bf16.msra.mxu1 %v13800_v14  ;;  %v11897_v14 = vld [vmem:[%s16974_s6 + $0x4] sm:$0xf] }
0x2c37   : > { %13326 = vmatprep.subr.msk.bf16.mxu0 %vm3647_vm8, %v11897_v14 }
0x2c39   : > { %13041 = vmatmul.mubr.msk.bf16.vlgmr.msra.gmra.mxu1 %vm3028_vm5, %v16217_v57 }
0x2ce9   : > { %v13006_v15 = vpop.f32.mrf.mxu1 }
0x2cea   : > { %v7699_v20 = vadd.f32 %v13006_v15, %v16253_v41  ;;  %v7809_v15 = vsel %vm3647_vm8, %v11897_v14, 0 }
0x2ceb   : > { %v7690_v16 = vpop.f32.mrf.mxu1 }
0x2cec   : > { %v7691_v17 = vadd.f32 %v7690_v16, %v16250_v40  ;;  %v7710_v30 = vsel %vm7320_vm1, %v7699_v20, -inf  ;;  %v13801_v16 = vld [vmem:[%s16965_s11 + $0x28] sm:$0xff]  }
0x2ced   : > { %v13007_v25 = vpop.f32.mrf.mxu1 }
0x2cee   : > { %v7704_v23 = vsel %vm7320_vm1, %v7691_v17, -inf }
0x2cef   : > { %v7693_v26 = vpop.f32.mrf.mxu1  ;;  %7705 = vmax.xlane.f32.xlu0 %v7704_v23 }
0x2cf0   : > { %v7694_v27 = vadd.f32 %v7693_v26, %v16257_v44 }
0x2cf1   : > { %v16307_v28 = vpop.f32.mrf.mxu1 }
0x2cf2   : > { %v7707_v29 = vsel %vm7320_vm1, %v7694_v27, -inf }
0x2cf3   : > { %7708 = vmax.xlane.f32.xlu1 %v7707_v29  ;;  %7711 = vmax.xlane.f32.xlu0 %v7710_v30  ;;  %v16311_v31 = vpop.f32.mrf.mxu1  ;;  %v13802_v29 = vld [vmem:[%s16965_s11 + $0x20] sm:$0xff]   ;;  %v13803_v30 = vld [vmem:[%s16967_s2 + $0x28] sm:$0xff]  }
0x2cf5   : > { %v13027_v32 = vpop.f32.mrf.mxu1 }
0x2cf6   : > { %v13804_v32 = vld [vmem:[%s16967_s2 + $0x20] sm:$0xff]  }
0x2cf7   : > { %v16313_v33 = vpop.f32.mrf.mxu1 }
0x2cf9   : > { %v13042_v35 = vpop.f32.mrf.mxu1 }
0x2cfa   : > { %v8057_v37 = vadd.f32 %v13042_v35, %v11917_v34 }
0x2cfb   : > { %v8048_v38 = vpop.f32.mrf.mxu1 }
0x2cfc   : > { %v8141_v0 = vpack.c.bf16 %v8057_v37, %v8057_v37  ;;  %v8049_v43 = vadd.f32 %v11917_v34, %v8048_v38 }
0x2cfd   : > { %v13043_v18 = vpop.f32.mrf.mxu1 }
0x2cfe   : > { %v8152_v39 = vsel %vm3205_vm6, %v8141_v0, 0  ;;  %13328 = vmatprep.subr.msk.bf16.mxu1 %vm3205_vm6, %v8141_v0 }
0x2cff   : > { %v8051_v42 = vpop.f32.mrf.mxu1  ;;  %13053 = vmatpush3.bf16.xpose.msra.mxu1 %v8152_v39  ;;  %v11907_v39 = vld [vmem:[%s16971_s1 + $0x2] ss:$0 sm:$0xff] }
0x2d00   : > { %v8052_v61 = vadd.f32 %v11917_v34, %v8051_v42  ;;  %v13805_v34 = vld [vmem:[%s16965_s11 + $0x38] sm:$0xff]  }
0x2d02   : > { %v8140_v45 = vpack.c.bf16 %v8052_v61, %v8049_v43 }
0x2d04   : > { %13329 = vmatprep.subr.msk.bf16.mxu1 %vm3205_vm6, %v8140_v45  ;;  %v8149_v46 = vsel %vm3205_vm6, %v8140_v45, 0 }
0x2d07   : > { %13055 = vmatpush3.bf16.xpose.msra.mxu1 %v8149_v46 }
0x2d08   : > { %13074 = vmatprep.subr.bf16.mxu1 %v13805_v34 }
0x2d78   : > { %v7706_v47 = vpop.xlane.xlu0 %7705 }
0x2d79   : > { %v7713_v48 = vsub.f32 %v7691_v17, %v7706_v47  ;;  %v11927_v47 = vld [vmem:[%s16972_s3 + $0x2] ss:$0 sm:$0xff] }
0x2d7b   : > { %v7716_v58 = vmul.f32 1.442695, %v7713_v48 }
0x2d7c   : > { %v7709_v49 = vpop.xlane.xlu1 %7708  ;;  %v7712_v50 = vpop.xlane.xlu0 %7711 }
0x2d7d   : > { %13923 = vpow2.f32 %v7716_v58  ;;  %v7714_v51 = vsub.f32 %v7694_v27, %v7709_v49  ;;  %v7715_v59 = vsub.f32 %v7699_v20, %v7712_v50 }
0x2d7f   : > { %v7718_v52 = vmul.f32 1.442695, %v7714_v51  ;;  %v7720_v6 = vmul.f32 1.442695, %v7715_v59 }
0x2d81   : > { %13925 = vpow2.f32 %v7718_v52 }
0x2d82   : > { %13927 = vpow2.f32 %v7720_v6 }
0x2d8a   : > { %v13924_v9 = vpop.eup %13923 }
0x2d8b   : > { %v7722_v22 = vsel %vm7320_vm1, %v13924_v9, 0.0 }
0x2d8c   : > { %7723 = vadd.xlane.f32.xlu1 %v7722_v22 }
0x2d8e   : > { %v13926_v24 = vpop.eup %13925 }
0x2d8f   : > { %v13928_v60 = vpop.eup %13927  ;;  %v7725_v62 = vsel %vm7320_vm1, %v13926_v24, 0.0 }
0x2d90   : > { %7726 = vadd.xlane.f32.xlu0 %v7725_v62  ;;  %v7728_v63 = vsel %vm7320_vm1, %v13928_v60, 0.0 }
0x2d91   : > { %7729 = vadd.xlane.f32.xlu1 %v7728_v63 }
0x2e15   : > { %v7724_v3 = vpop.xlane.xlu1 %7723 }
0x2e16   : > { %13929 = vrcp.f32 %v7724_v3 }
0x2e19   : > { %v7727_v4 = vpop.xlane.xlu0 %7726 }
0x2e1a   : > { %v7730_v5 = vpop.xlane.xlu1 %7729  ;;  %13931 = vrcp.f32 %v7727_v4 }
0x2e1b   : > { %13933 = vrcp.f32 %v7730_v5  ;;  %v13807_v5 = vld [vmem:[%s16967_s2 + $0x38] sm:$0xff]  }
0x2e23   : > { %v13930_v2 = vpop.eup %13929 }
0x2e24   : > { %v7734_v10 = vmul.f32 %v13930_v2, %v13924_v9 }
0x2e27   : > { %v13932_v7 = vpop.eup %13931 }
0x2e28   : > { %v13934_v8 = vpop.eup %13933  ;;  %v7735_v11 = vmul.f32 %v13932_v7, %v13926_v24  ;;  %v13808_v7 = vld [vmem:[%s16967_s2 + $0x30] sm:$0xff]   ;;  %s16976_s2 = sld [smem:[#allocation73_spill]] }
0x2e29   : > { %v7736_v21 = vmul.f32 %v13934_v8, %v13928_v60  ;;  %v13806_v60 = vld [vmem:[%s16965_s11 + $0x30] sm:$0xff]  }
0x2e2a   : > { %v7737_v12 = vpack.c.bf16 %v7735_v11, %v7734_v10 }
0x2e2b   : > { %v7738_v13 = vpack.c.bf16 %v7736_v21, %v7736_v21 }
0x2e2c   : > { %13012 = vmatprep.mubr.msk.bf16.mxu0 %vm7320_vm1, %v7737_v12 }
0x2e2d   : > { %13013 = vmatmul.mubr.msk.bf16.vlgmr.msra.gmra.mxu0 %vm7320_vm1, %v7738_v13 }
0x2e2e   : > { %13017 = vmatpush3.bf16.msra.mxu0 %v7809_v15  ;;  %v11944_v15 = vld [vmem:[%s16971_s1 + $0x3] ss:$0 sm:$0xff]  ;;  %s16975_s1 = sld [smem:[#allocation75_spill]] }
0x2e2f   : > { %13028 = vmatprep.subr.bf16.mxu0 %v13801_v16 }
0x2eed   : > { %v13014_v17 = vpop.f32.mrf.mxu0 }
0x2eee   : > { %v7799_v27 = vpack.c.bf16 %v13014_v17, %v13014_v17 }
0x2eef   : > { %v7784_v25 = vpop.f32.mrf.mxu0 }
0x2ef1   : > { %v13015_v20 = vpop.f32.mrf.mxu0 }
0x2ef3   : > { %v7787_v23 = vpop.f32.mrf.mxu0 }
0x2ef4   : > { %v7798_v26 = vpack.c.bf16 %v7787_v23, %v7784_v25 }
0x2ef6   : > { %13018 = vmatprep.mubr.msk.bf16.mxu0 %vm3205_vm6, %v7798_v26 }
0x2ef7   : > { %13019 = vmatmul.mubr.msk.bf16.vlgmr.msra.gmra.mxu0 %vm3205_vm6, %v7799_v27 }
0x2ef8   : > { %13029 = vmatpush3.bf16.msra.mxu0 %v13801_v16  ;;  %13032 = vmatprep.mubr.msk.bf16.mxu0 %vm3028_vm5, %v16213_v56 }
0x2ef9   : > { %13030 = vmatprep.subr.bf16.mxu0 %v13802_v29 }
0x2efc   : > { %13031 = vmatpush3.bf16.msra.mxu0 %v13802_v29 }
0x2efd   : > { %13044 = vmatprep.subr.bf16.mxu0 %v13803_v30 }
0x2eff   : > { %13033 = vmatmul.mubr.msk.bf16.vlgmr.msra.gmra.mxu0 %vm3028_vm5, %v16217_v57 }
0x2f00   : > { %13045 = vmatpush3.bf16.msra.mxu0 %v13803_v30  ;;  %13048 = vmatprep.mubr.msk.bf16.mxu0 %vm3028_vm5, %v16213_v56 }
0x2f01   : > { %13046 = vmatprep.subr.bf16.mxu0 %v13804_v32 }
0x2f04   : > { %13047 = vmatpush3.bf16.msra.mxu0 %v13804_v32  ;;  %v11964_v32 = vld [vmem:[%s16972_s3 + $0x3] ss:$0 sm:$0xff]  ;;  %s16977_s3 = sld [smem:[#allocation81_spill]] }
0x2f07   : > { %13049 = vmatmul.mubr.msk.bf16.vlgmr.msra.gmra.mxu0 %vm3028_vm5, %v16217_v57 }
0x2fb7   : > { %v16343_v35 = vpop.f32.mrf.mxu0 }
0x2fb9   : > { %v16345_v37 = vpop.f32.mrf.mxu0 }
0x2fbb   : > { %v13021_v38 = vpop.f32.mrf.mxu0 }
0x2fbd   : > { %v16347_v0 = vpop.f32.mrf.mxu0 }
0x2fbf   : > { %v13034_v18 = vpop.f32.mrf.mxu0 }
0x2fc0   : > { %v7984_v43 = vadd.f32 %v13034_v18, %v11907_v39 }
0x2fc1   : > { %v7975_v42 = vpop.f32.mrf.mxu0 }
0x2fc2   : > { %v7976_v45 = vadd.f32 %v11907_v39, %v7975_v42  ;;  %v8137_v58 = vmul.f32 0.35355338, %v7984_v43 }
0x2fc3   : > { %v13035_v61 = vpop.f32.mrf.mxu0 }
0x2fc4   : > { %v8135_v50 = vmul.f32 0.35355338, %v7976_v45  ;;  %v8139_v22 = vpack.c.bf16 %v8137_v58, %v8137_v58 }
0x2fc5   : > { %v7978_v46 = vpop.f32.mrf.mxu0 }
0x2fc6   : > { %v7979_v48 = vadd.f32 %v11907_v39, %v7978_v46 }
0x2fc7   : > { %v13050_v49 = vpop.f32.mrf.mxu0 }
0x2fc8   : > { %v8136_v51 = vmul.f32 0.35355338, %v7979_v48  ;;  %v8130_v59 = vadd.f32 %v13050_v49, %v11927_v47 }
0x2fc9   : > { %v8121_v52 = vpop.f32.mrf.mxu0 }
0x2fca   : > { %v8138_v6 = vpack.c.bf16 %v8136_v51, %v8135_v50  ;;  %v8238_v9 = vpack.c.bf16 %v8130_v59, %v8130_v59  ;;  %v8122_v3 = vadd.f32 %v11927_v47, %v8121_v52 }
0x2fcb   : > { %v13051_v24 = vpop.f32.mrf.mxu0 }
0x2fcc   : > { %v8246_v62 = vsel %vm3647_vm8, %v8238_v9, 0  ;;  %13056 = vmatprep.mubr.msk.bf16.mxu1 %vm3205_vm6, %v8138_v6  ;;  %13330 = vmatprep.subr.msk.bf16.mxu0 %vm3647_vm8, %v8238_v9 }
0x2fcd   : > { %v8124_v63 = vpop.f32.mrf.mxu0  ;;  %13057 = vmatmul.mubr.msk.bf16.vlgmr.msra.gmra.mxu1 %vm3205_vm6, %v8139_v22  ;;  %13061 = vmatpush3.bf16.msra.mxu0 %v8246_v62 }
0x2fce   : > { %v8125_v4 = vadd.f32 %v11927_v47, %v8124_v63  ;;  %13075 = vmatpush3.bf16.msra.mxu1 %v13805_v34  ;;  %13078 = vmatprep.mubr.msk.bf16.mxu1 %vm3028_vm5, %v16213_v56 }
0x2fcf   : > { %13076 = vmatprep.subr.bf16.mxu1 %v13806_v60 }
0x2fd0   : > { %v8237_v2 = vpack.c.bf16 %v8125_v4, %v8122_v3 }
0x2fd2   : > { %13062 = vmatprep.subr.bf16.mxu0 %v8237_v2  ;;  %13077 = vmatpush3.bf16.msra.mxu1 %v13806_v60 }
0x2fd3   : > { %13063 = vmatpush3.bf16.msra.mxu0 %v8237_v2  ;;  %13090 = vmatprep.subr.bf16.mxu1 %v13807_v5 }
0x2fd5   : > { %13079 = vmatmul.mubr.msk.bf16.vlgmr.msra.gmra.mxu1 %vm3028_vm5, %v16217_v57 }
0x2fd6   : > { %13091 = vmatpush3.bf16.msra.mxu1 %v13807_v5  ;;  %13094 = vmatprep.mubr.msk.bf16.mxu1 %vm3028_vm5, %v16213_v56 }
0x2fd7   : > { %13092 = vmatprep.subr.bf16.mxu1 %v13808_v7 }
0x2fda   : > { %13093 = vmatpush3.bf16.msra.mxu1 %v13808_v7 }
0x2fdd   : > { %13095 = vmatmul.mubr.msk.bf16.vlgmr.msra.gmra.mxu1 %vm3028_vm5, %v16217_v57 }
0x308d   : > { %v13058_v8 = vpop.f32.mrf.mxu1 }
0x308e   : > { %v8197_v12 = vadd.f32 %v13058_v8, %v16253_v41 }
0x308f   : > { %v8188_v10 = vpop.f32.mrf.mxu1 }
0x3090   : > { %v8189_v11 = vadd.f32 %v8188_v10, %v16250_v40  ;;  %v8208_v23 = vsel %vm7320_vm1, %v8197_v12, -inf }
0x3091   : > { %v13059_v21 = vpop.f32.mrf.mxu1 }
0x3092   : > { %v8202_v13 = vsel %vm7320_vm1, %v8189_v11, -inf }
0x3093   : > { %v8191_v14 = vpop.f32.mrf.mxu1  ;;  %8203 = vmax.xlane.f32.xlu0 %v8202_v13 }
0x3094   : > { %v8192_v16 = vadd.f32 %v8191_v14, %v16257_v44 }
0x3095   : > { %v13080_v17 = vpop.f32.mrf.mxu1 }
0x3096   : > { %v16371_v25 = vadd.f32 %v13080_v17, %v11944_v15  ;;  %v8205_v20 = vsel %vm7320_vm1, %v8192_v16, -inf }
0x3097   : > { %v8419_v26 = vpop.f32.mrf.mxu1  ;;  %8206 = vmax.xlane.f32.xlu1 %v8205_v20  ;;  %8209 = vmax.xlane.f32.xlu0 %v8208_v23  ;;  %v11936_v23 = vld [vmem:[%s16974_s6 + $0x8] sm:$0xf] }
0x3098   : > { %v8420_v29 = vadd.f32 %v11944_v15, %v8419_v26  ;;  %13331 = vmatprep.subr.msk.bf16.mxu0 %vm3647_vm8, %v11936_v23  ;;  %v8307_v26 = vsel %vm3647_vm8, %v11936_v23, 0 }
0x3099   : > { %v13081_v27 = vpop.f32.mrf.mxu1 }
0x309a   : > { %v16376_v18 = vmul.f32 0.35355338, %v8420_v29  ;;  %v13809_v27 = vld [vmem:[%s16966_s4 + $0x38] sm:$0xff]  }
0x309b   : > { %v8422_v30 = vpop.f32.mrf.mxu1 }
0x309c   : > { %v8423_v34 = vadd.f32 %v11944_v15, %v8422_v30 }
0x309d   : > { %v13096_v38 = vpop.f32.mrf.mxu1 }
0x309e   : > { %v16378_v39 = vmul.f32 0.35355338, %v8423_v34  ;;  %v8574_v42 = vadd.f32 %v13096_v38, %v11964_v32 }
0x309f   : > { %v8565_v43 = vpop.f32.mrf.mxu1 }
0x30a0   : > { %v8582_v61 = vpack.c.bf16 %v16378_v39, %v16376_v18  ;;  %v8682_v45 = vpack.c.bf16 %v8574_v42, %v8574_v42  ;;  %v8566_v58 = vadd.f32 %v11964_v32, %v8565_v43  ;;  %v13810_v43 = vld [vmem:[%s16966_s4 + $0x30] sm:$0xff]   ;;  %v11954_v18 = vld [vmem:[%s16970_s5 + $0x3] ss:$0 sm:$0xff]  ;;  %s16978_s4 = sld [smem:[#allocation76_spill]] }
0x30a1   : > { %v13097_v46 = vpop.f32.mrf.mxu1  ;;  %s16979_s5 = sld [smem:[#allocation69_spill]] }
0x30a2   : > { %v8690_v47 = vsel %vm3647_vm8, %v8682_v45, 0  ;;  %13334 = vmatprep.subr.msk.bf16.mxu1 %vm3647_vm8, %v8682_v45  ;;  %v7911_v45 = vadd.f32 %v16307_v28, %v16343_v35 }
0x30a3   : > { %v8568_v48 = vpop.f32.mrf.mxu1  ;;  %13107 = vmatpush3.bf16.msra.mxu1 %v8690_v47  ;;  %v7903_v47 = vadd.f32 %v16311_v31, %v16345_v37 }
0x30a4   : > { %v8569_v49 = vadd.f32 %v11964_v32, %v8568_v48 }
0x30a6   : > { %v8681_v50 = vpack.c.bf16 %v8569_v49, %v8566_v58 }
0x30a8   : > { %13108 = vmatprep.subr.bf16.mxu1 %v8681_v50 }
0x30a9   : > { %13109 = vmatpush3.bf16.msra.mxu1 %v8681_v50 }
0x311c   : > { %v8204_v51 = vpop.xlane.xlu0 %8203 }
0x311d   : > { %v8211_v59 = vsub.f32 %v8189_v11, %v8204_v51 }
0x311f   : > { %v8214_v52 = vmul.f32 1.442695, %v8211_v59 }
0x3120   : > { %v8207_v6 = vpop.xlane.xlu1 %8206  ;;  %v8210_v9 = vpop.xlane.xlu0 %8209 }
0x3121   : > { %13935 = vpow2.f32 %v8214_v52  ;;  %v8212_v22 = vsub.f32 %v8192_v16, %v8207_v6  ;;  %v8213_v24 = vsub.f32 %v8197_v12, %v8210_v9 }
0x3123   : > { %v8216_v60 = vmul.f32 1.442695, %v8212_v22  ;;  %v8218_v62 = vmul.f32 1.442695, %v8213_v24 }
0x3125   : > { %13937 = vpow2.f32 %v8216_v60 }
0x3126   : > { %13939 = vpow2.f32 %v8218_v62 }
0x312e   : > { %v13936_v63 = vpop.eup %13935 }
0x312f   : > { %v8220_v3 = vsel %vm7320_vm1, %v13936_v63, 0.0 }
0x3130   : > { %8221 = vadd.xlane.f32.xlu1 %v8220_v3 }
0x3132   : > { %v13938_v4 = vpop.eup %13937 }
0x3133   : > { %v13940_v5 = vpop.eup %13939  ;;  %v8223_v2 = vsel %vm7320_vm1, %v13938_v4, 0.0 }
0x3134   : > { %8224 = vadd.xlane.f32.xlu0 %v8223_v2  ;;  %v8226_v7 = vsel %vm7320_vm1, %v13940_v5, 0.0 }
0x3135   : > { %8227 = vadd.xlane.f32.xlu1 %v8226_v7 }
0x31b9   : > { %v8222_v8 = vpop.xlane.xlu1 %8221 }
0x31ba   : > { %13941 = vrcp.f32 %v8222_v8 }
0x31bd   : > { %v8225_v10 = vpop.xlane.xlu0 %8224 }
0x31be   : > { %v8228_v11 = vpop.xlane.xlu1 %8227  ;;  %13943 = vrcp.f32 %v8225_v10 }
0x31bf   : > { %13945 = vrcp.f32 %v8228_v11 }
0x31c7   : > { %v13942_v21 = vpop.eup %13941 }
0x31c8   : > { %v8232_v14 = vmul.f32 %v13942_v21, %v13936_v63 }
0x31cb   : > { %v13944_v12 = vpop.eup %13943 }
0x31cc   : > { %v13946_v13 = vpop.eup %13945  ;;  %v8233_v15 = vmul.f32 %v13944_v12, %v13938_v4 }
0x31cd   : > { %v8234_v16 = vmul.f32 %v13946_v13, %v13940_v5 }
0x31ce   : > { %v8235_v17 = vpack.c.bf16 %v8233_v15, %v8232_v14 }
0x31cf   : > { %v8236_v20 = vpack.c.bf16 %v8234_v16, %v8234_v16 }
0x31d0   : > { %13064 = vmatprep.mubr.msk.bf16.mxu0 %vm7320_vm1, %v8235_v17  ;;  %v11828_v17 = vld [vmem:[#allocation33] ss:$0 sm:$0xff] }
0x31d1   : > { %13065 = vmatmul.mubr.msk.bf16.vlgmr.msra.gmra.mxu0 %vm7320_vm1, %v8236_v20 }
0x31d2   : > { %13069 = vmatpush3.bf16.msra.mxu0 %v8307_v26 }
0x31d3   : > { %13082 = vmatprep.subr.bf16.mxu0 %v13809_v27 }
0x3291   : > { %v13066_v29 = vpop.f32.mrf.mxu0 }
0x3292   : > { %v8297_v42 = vpack.c.bf16 %v13066_v29, %v13066_v29 }
0x3293   : > { %v8282_v30 = vpop.f32.mrf.mxu0 }
0x3295   : > { %v13067_v32 = vpop.f32.mrf.mxu0 }
0x3297   : > { %v8285_v34 = vpop.f32.mrf.mxu0 }
0x3298   : > { %v8296_v38 = vpack.c.bf16 %v8285_v34, %v8282_v30 }
0x329a   : > { %13070 = vmatprep.mubr.msk.bf16.mxu0 %vm3205_vm6, %v8296_v38 }
0x329b   : > { %13071 = vmatmul.mubr.msk.bf16.vlgmr.msra.gmra.mxu0 %vm3205_vm6, %v8297_v42 }
0x329c   : > { %13083 = vmatpush3.bf16.msra.mxu0 %v13809_v27  ;;  %13086 = vmatprep.mubr.msk.bf16.mxu0 %vm3028_vm5, %v16213_v56 }
0x329d   : > { %13084 = vmatprep.subr.bf16.mxu0 %v13810_v43 }
0x32a0   : > { %13085 = vmatpush3.bf16.msra.mxu0 %v13810_v43 }
0x32a3   : > { %13087 = vmatmul.mubr.msk.bf16.vlgmr.msra.gmra.mxu0 %vm3028_vm5, %v16217_v57  ;;  %v7906_v57 = vadd.f32 %v16313_v33, %v16347_v0  ;;  %v8581_v0 = vmul.f32 0.35355338, %v16371_v25 }
0x32a4   : > { %13102 = vmatprep.mubr.msk.bf16.mxu0 %vm3205_vm6, %v8582_v61 }
0x32a5   : > { %v8583_v22 = vpack.c.bf16 %v8581_v0, %v8581_v0 }
0x335b   : > { %v13072_v46 = vpop.f32.mrf.mxu0 }
0x335c   : > { %v16408_v48 = vadd.f32 %v13072_v46, %v7911_v45 }
0x335d   : > { %v8343_v56 = vpop.f32.mrf.mxu0 }
0x335e   : > { %v16410_v58 = vadd.f32 %v8343_v56, %v7903_v47 }
0x335f   : > { %v13073_v49 = vpop.f32.mrf.mxu0 }
0x3361   : > { %v8346_v50 = vpop.f32.mrf.mxu0 }
0x3362   : > { %v16415_v39 = vadd.f32 %v8346_v50, %v7906_v57 }
0x3363   : > { %v13088_v61 = vpop.f32.mrf.mxu0 }
0x3364   : > { %v8501_v51 = vadd.f32 %v13088_v61, %v11954_v18 }
0x3365   : > { %v8492_v28 = vpop.f32.mrf.mxu0 }
0x3366   : > { %v8585_v35 = vpack.c.bf16 %v8501_v51, %v8501_v51  ;;  %v8493_v52 = vadd.f32 %v11954_v18, %v8492_v28  ;;  %v11973_v51 = vld [vmem:[%s16974_s6 + $0xc] sm:$0xf]  ;;  %s16981_s6 = sld [smem:[#allocation72_spill]] }
0x3367   : > { %v13089_v59 = vpop.f32.mrf.mxu0  ;;  %13335 = vmatprep.subr.msk.bf16.mxu1 %vm3647_vm8, %v11973_v51  ;;  %v8751_v28 = vsel %vm3647_vm8, %v11973_v51, 0 }
0x3368   : > { %v8596_v31 = vsel %vm3205_vm6, %v8585_v35, 0  ;;  %13332 = vmatprep.subr.msk.bf16.mxu0 %vm3205_vm6, %v8585_v35 }
0x3369   : > { %v8495_v37 = vpop.f32.mrf.mxu0  ;;  %13099 = vmatpush3.bf16.xpose.msra.mxu0 %v8596_v31 }
0x336a   : > { %v8496_v6 = vadd.f32 %v11954_v18, %v8495_v37 }
0x336c   : > { %v8584_v9 = vpack.c.bf16 %v8496_v6, %v8493_v52 }
0x336e   : > { %13333 = vmatprep.subr.msk.bf16.mxu0 %vm3205_vm6, %v8584_v9  ;;  %v8593_v33 = vsel %vm3205_vm6, %v8584_v9, 0 }
0x3371   : > { %13101 = vmatpush3.bf16.xpose.msra.mxu0 %v8593_v33 }
0x3378   : > { %13103 = vmatmul.mubr.msk.bf16.vlgmr.msra.gmra.mxu0 %vm3205_vm6, %v8583_v22 }
0x3438   : > { %v13104_v24 = vpop.f32.mrf.mxu0 }
0x3439   : > { %v8641_v3 = vadd.f32 %v13104_v24, %v16253_v41 }
0x343a   : > { %v8632_v60 = vpop.f32.mrf.mxu0 }
0x343b   : > { %v8633_v62 = vadd.f32 %v8632_v60, %v16250_v40  ;;  %v8652_v25 = vsel %vm7320_vm1, %v8641_v3, -inf }
0x343c   : > { %v13105_v63 = vpop.f32.mrf.mxu0 }
0x343d   : > { %v8646_v4 = vsel %vm7320_vm1, %v8633_v62, -inf }
0x343e   : > { %v8635_v5 = vpop.f32.mrf.mxu0  ;;  %8647 = vmax.xlane.f32.xlu0 %v8646_v4 }
0x343f   : > { %v8636_v2 = vadd.f32 %v8635_v5, %v16257_v44  ;;  %v6680_v44 = vadd.f32 %v16199_v36, %v16142_v19 }
0x3441   : > { %v8649_v7 = vsel %vm7320_vm1, %v8636_v2, -inf  ;;  %v6688_v27 = vadd.f32 %v11828_v17, %v6680_v44 }
0x3442   : > { %8650 = vmax.xlane.f32.xlu1 %v8649_v7  ;;  %8653 = vmax.xlane.f32.xlu0 %v8652_v25 }
0x3443   : > { %v6689_v30 = vsel %vm3028_vm5, %v6688_v27, 0.0 }
0x34c7   : > { %v8648_v8 = vpop.xlane.xlu0 %8647 }
0x34c8   : > { %v8655_v10 = vsub.f32 %v8633_v62, %v8648_v8  ;;  %v11976_v62 = vld [vmem:[#allocation10] ss:$0 sm:$0xff]  ;;  %v11829_v8 = vld [vmem:[#allocation39] ss:$0 sm:$0xff] }
0x34ca   : > { %v8658_v11 = vmul.f32 1.442695, %v8655_v10 }
0x34cb   : > { %v8651_v21 = vpop.xlane.xlu1 %8650  ;;  %v8654_v40 = vpop.xlane.xlu0 %8653 }
0x34cc   : > { %13947 = vpow2.f32 %v8658_v11  ;;  %v8656_v12 = vsub.f32 %v8636_v2, %v8651_v21  ;;  %v8657_v41 = vsub.f32 %v8641_v3, %v8654_v40 }
0x34ce   : > { %v8660_v13 = vmul.f32 1.442695, %v8656_v12  ;;  %v8662_v14 = vmul.f32 1.442695, %v8657_v41  ;;  %v11830_v41 = vld [vmem:[#allocation37] ss:$0 sm:$0xff] }
0x34d0   : > { %13949 = vpow2.f32 %v8660_v13 }
0x34d1   : > { %13951 = vpow2.f32 %v8662_v14 }
0x34d9   : > { %v13948_v15 = vpop.eup %13947 }
0x34da   : > { %v8664_v16 = vsel %vm7320_vm1, %v13948_v15, 0.0 }
0x34db   : > { %8665 = vadd.xlane.f32.xlu1 %v8664_v16 }
0x34dd   : > { %v13950_v20 = vpop.eup %13949 }
0x34de   : > { %v13952_v23 = vpop.eup %13951  ;;  %v8667_v26 = vsel %vm7320_vm1, %v13950_v20, 0.0 }
0x34df   : > { %8668 = vadd.xlane.f32.xlu0 %v8667_v26  ;;  %v8670_v29 = vsel %vm7320_vm1, %v13952_v23, 0.0 }
0x34e0   : > { %8671 = vadd.xlane.f32.xlu1 %v8670_v29 }
0x34e3   : > { %6690 = vadd.xlane.f32.xlu0 %v6689_v30 }
0x3564   : > { %v8666_v32 = vpop.xlane.xlu1 %8665 }
0x3565   : > { %13953 = vrcp.f32 %v8666_v32 }
0x3568   : > { %v8669_v34 = vpop.xlane.xlu0 %8668 }
0x3569   : > { %v8672_v19 = vpop.xlane.xlu1 %8671  ;;  %13955 = vrcp.f32 %v8669_v34 }
0x356a   : > { %13957 = vrcp.f32 %v8672_v19 }
0x356c   : > { %v6691_v36 = vpop.xlane.xlu0 %6690 }
0x356d   : > { %v6692_v38 = vmul.f32 0.03125, %v6691_v36 }
0x356f   : > { %v6693_v42 = vsub.f32 %v6688_v27, %v6692_v38 }
0x3571   : > { %v6694_v43 = vmul.f32 %v6693_v42, %v6693_v42 }
0x3572   : > { %v13954_v46 = vpop.eup %13953 }
0x3573   : > { %v6695_v45 = vsel %vm3028_vm5, %v6694_v43, 0.0  ;;  %v8676_v49 = vmul.f32 %v13954_v46, %v13948_v15  ;;  %v13811_v46 = vld [vmem:[%s16975_s1 + $0x8] sm:$0xff]  }
0x3574   : > { %6696 = vadd.xlane.f32.xlu1 %v6695_v45  ;;  %13120 = vmatprep.subr.bf16.mxu0 %v13811_v46 }
0x3575   : > { %13121 = vmatpush3.bf16.msra.mxu0 %v13811_v46 }
0x3576   : > { %v13956_v47 = vpop.eup %13955 }
0x3577   : > { %v13958_v56 = vpop.eup %13957  ;;  %v8677_v57 = vmul.f32 %v13956_v47, %v13950_v20  ;;  %v13812_v47 = vld [vmem:[%s16975_s1] sm:$0xff]  }
0x3578   : > { %v8678_v50 = vmul.f32 %v13958_v56, %v13952_v23  ;;  %v13813_v56 = vld [vmem:[%s16976_s2 + $0x8] sm:$0xff]   ;;  %13122 = vmatprep.subr.bf16.mxu0 %v13812_v47 }
0x3579   : > { %v8679_v18 = vpack.c.bf16 %v8677_v57, %v8676_v49  ;;  %13123 = vmatpush3.bf16.msra.mxu0 %v13812_v47  ;;  %v13814_v49 = vld [vmem:[%s16976_s2] sm:$0xff]  }
0x357a   : > { %v8680_v61 = vpack.c.bf16 %v8678_v50, %v8678_v50  ;;  %13136 = vmatprep.subr.bf16.mxu0 %v14946_v1 }
0x357b   : > { %13110 = vmatprep.mubr.msk.bf16.mxu1 %vm7320_vm1, %v8679_v18 }
0x357c   : > { %13111 = vmatmul.mubr.msk.bf16.vlgmr.msra.gmra.mxu1 %vm7320_vm1, %v8680_v61 }
0x357d   : > { %13115 = vmatpush3.bf16.msra.mxu1 %v8751_v28 }
0x357e   : > { %13128 = vmatprep.subr.bf16.mxu1 %v14946_v1 }
0x35fd   : > { %v6697_v9 = vpop.xlane.xlu1 %6696 }
0x35fe   : > { %v6698_v33 = vmul.f32 0.03125, %v6697_v9 }
0x3600   : > { %v6699_v0 = vadd.f32 1e-05, %v6698_v33 }
0x3602   : > { %13959 = vrsqrt.f32 %v6699_v0  ;;  %v11977_v0 = vld [vmem:[#allocation2] ss:$0 sm:$0xff] }
0x360f   : > { %v13960_v60 = vpop.eup %13959 }
0x3610   : > { %v6701_v7 = vmul.f32 %v13960_v60, %v6693_v42 }
0x3612   : > { %v6709_v12 = vmul.f32 %v11829_v8, %v6701_v7 }
0x3614   : > { %v6717_v15 = vadd.f32 %v11830_v41, %v6709_v12  ;;  %v13815_v12 = vld [vmem:[%s16978_s4 + $0x8] sm:$0xff]  }
0x363c   : > { %v13112_v35 = vpop.f32.mrf.mxu1 }
0x363d   : > { %v8741_v6 = vpack.c.bf16 %v13112_v35, %v13112_v35 }
0x363e   : > { %v8726_v59 = vpop.f32.mrf.mxu1 }
0x3640   : > { %v13113_v31 = vpop.f32.mrf.mxu1 }
0x3642   : > { %v8729_v37 = vpop.f32.mrf.mxu1 }
0x3643   : > { %v8740_v52 = vpack.c.bf16 %v8729_v37, %v8726_v59 }
0x3645   : > { %13116 = vmatprep.mubr.msk.bf16.mxu1 %vm3205_vm6, %v8740_v52 }
0x3646   : > { %13117 = vmatmul.mubr.msk.bf16.vlgmr.msra.gmra.mxu1 %vm3205_vm6, %v8741_v6 }
0x3647   : > { %13132 = vmatprep.mubr.msk.bf16.mxu1 %vm14947_vm0, %v14946_v1  ;;  %13129 = vmatpush3.bf16.msra.mxu1 %v13813_v56 }
0x3648   : > { %13130 = vmatprep.subr.bf16.mxu1 %v14946_v1 }
0x364b   : > { %13131 = vmatpush3.bf16.msra.mxu1 %v13814_v49 }
0x3706   : > { %v13118_v22 = vpop.f32.mrf.mxu1 }
0x3707   : > { %v8803_v24 = vadd.f32 %v13118_v22, %v16408_v48 }
0x3708   : > { %v8787_v63 = vpop.f32.mrf.mxu1 }
0x3709   : > { %v8801_v3 = vadd.f32 %v8787_v63, %v16410_v58  ;;  %v8813_v5 = vadd.f32 %v11976_v62, %v8803_v24 }
0x370a   : > { %v13119_v4 = vpop.f32.mrf.mxu1 }
0x370b   : > { %v8811_v2 = vadd.f32 %v11976_v62, %v8801_v3  ;;  %v8816_v48 = vadd.f32 %v8813_v5, %v16205_v53  ;;  %v11978_v3 = vld [vmem:[%s16977_s3] ss:$0 sm:$0xff]  ;;  %s16980_s3 = sld [smem:[#allocation71_spill]] }
0x370c   : > { %v8790_v25 = vpop.f32.mrf.mxu1 }
0x370d   : > { %v8802_v10 = vadd.f32 %v8790_v25, %v16415_v39  ;;  %v8814_v11 = vadd.f32 %v8811_v2, %v16207_v54  ;;  %v8823_v14 = vsel %vm3028_vm5, %v8816_v48, 0.0  ;;  %v6718_v39 = vsel %vm3028_vm5, %v6717_v15, 0.0  ;;  %v11831_v2 = vld [vmem:[#allocation42] ss:$0 sm:$0xff] }
0x370f   : > { %v8812_v21 = vadd.f32 %v11976_v62, %v8802_v10  ;;  %v8817_v40 = vsel %vm3028_vm5, %v8814_v11, 0.0 }
0x3710   : > { %8818 = vadd.xlane.f32.xlu0 %v8817_v40 }
0x3711   : > { %v8815_v58 = vadd.f32 %v8812_v21, %v16209_v55 }
0x3713   : > { %v8820_v13 = vsel %vm3028_vm5, %v8815_v58, 0.0 }
0x3714   : > { %8821 = vadd.xlane.f32.xlu1 %v8820_v13  ;;  %8824 = vadd.xlane.f32.xlu0 %v8823_v14  ;;  %v13816_v14 = vld [vmem:[%s16978_s4] sm:$0xff]  }
0x3718   : > { %6719 = vadd.xlane.f32.xlu1 %v6718_v39  ;;  %v11984_v39 = vld [vmem:[%s16979_s5] ss:$0 sm:$0xff] }
0x3799   : > { %v8819_v54 = vpop.xlane.xlu0 %8818 }
0x379a   : > { %v8826_v44 = vmul.f32 0.03125, %v8819_v54 }
0x379c   : > { %v8829_v16 = vsub.f32 %v8814_v11, %v8826_v44  ;;  %v11832_v11 = vld [vmem:[#allocation40] ss:$0 sm:$0xff]  ;;  %v11979_v44 = vld [vmem:[%s16980_s3] ss:$0 sm:$0xff] }
0x379d   : > { %v8822_v17 = vpop.xlane.xlu1 %8821  ;;  %v8825_v53 = vpop.xlane.xlu0 %8824 }
0x379e   : > { %v8827_v20 = vmul.f32 0.03125, %v8822_v17  ;;  %v8828_v23 = vmul.f32 0.03125, %v8825_v53  ;;  %v8832_v26 = vmul.f32 %v8829_v16, %v8829_v16 }
0x37a0   : > { %v8830_v27 = vsub.f32 %v8815_v58, %v8827_v20  ;;  %v8831_v55 = vsub.f32 %v8816_v48, %v8828_v23  ;;  %v8835_v29 = vsel %vm3028_vm5, %v8832_v26, 0.0 }
0x37a1   : > { %v6720_v30 = vpop.xlane.xlu1 %6719  ;;  %8836 = vadd.xlane.f32.xlu0 %v8835_v29  ;;  %v11988_v29 = vld [vmem:[%s16981_s6] ss:$0 sm:$0xff] }
0x37a2   : > { %v6721_v32 = vmul.f32 0.03125, %v6720_v30  ;;  %v8833_v34 = vmul.f32 %v8830_v27, %v8830_v27  ;;  %v8834_v19 = vmul.f32 %v8831_v55, %v8831_v55  ;;  %v13817_v30 = vld [vmem:[%s16975_s1 + $0x18] sm:$0xff]  }
0x37a4   : > { %v6722_v36 = vsub.f32 %v6717_v15, %v6721_v32  ;;  %v8838_v38 = vsel %vm3028_vm5, %v8833_v34, 0.0  ;;  %v8841_v42 = vsel %vm3028_vm5, %v8834_v19, 0.0 }
0x37a5   : > { %8839 = vadd.xlane.f32.xlu1 %v8838_v38  ;;  %8842 = vadd.xlane.f32.xlu0 %v8841_v42 }
0x37a6   : > { %v6723_v43 = vmul.f32 %v6722_v36, %v6722_v36 }
0x37a8   : > { %v6724_v45 = vsel %vm3028_vm5, %v6723_v43, 0.0 }
0x37a9   : > { %6725 = vadd.xlane.f32.xlu1 %v6724_v45 }
0x382a   : > { %v8837_v57 = vpop.xlane.xlu0 %8836 }
0x382b   : > { %v8844_v50 = vmul.f32 0.03125, %v8837_v57 }
0x382d   : > { %v8847_v18 = vadd.f32 1e-05, %v8844_v50 }
0x382e   : > { %v8840_v61 = vpop.xlane.xlu1 %8839  ;;  %v8843_v51 = vpop.xlane.xlu0 %8842 }
0x382f   : > { %13961 = vrsqrt.f32 %v8847_v18  ;;  %v8845_v28 = vmul.f32 0.03125, %v8840_v61  ;;  %v8846_v35 = vmul.f32 0.03125, %v8843_v51  ;;  %v13818_v51 = vld [vmem:[%s16975_s1 + $0x10] sm:$0xff]  }
0x3831   : > { %v8848_v59 = vadd.f32 1e-05, %v8845_v28  ;;  %v8849_v31 = vadd.f32 1e-05, %v8846_v35  ;;  %v13819_v28 = vld [vmem:[%s16978_s4 + $0x18] sm:$0xff]   ;;  %v13820_v35 = vld [vmem:[%s16978_s4 + $0x10] sm:$0xff]  }
0x3832   : > { %v6726_v37 = vpop.xlane.xlu1 %6725 }
0x3833   : > { %13963 = vrsqrt.f32 %v8848_v59  ;;  %v6727_v52 = vmul.f32 0.03125, %v6726_v37 }
0x3834   : > { %13965 = vrsqrt.f32 %v8849_v31 }
0x3835   : > { %v6728_v6 = vadd.f32 1e-05, %v6727_v52 }
0x3837   : > { %13967 = vrsqrt.f32 %v6728_v6 }
0x383c   : > { %v13962_v9 = vpop.eup %13961 }
0x383d   : > { %v8853_v33 = vmul.f32 %v13962_v9, %v8829_v16  ;;  %v12001_v9 = vld [vmem:[%s16980_s3 + $0x1] ss:$0 sm:$0xff] }
0x383f   : > { %v8863_v62 = vmul.f32 %v11977_v0, %v8853_v33 }
0x3840   : > { %v13964_v22 = vpop.eup %13963 }
0x3841   : > { %v13966_v24 = vpop.eup %13965  ;;  %v8854_v60 = vmul.f32 %v13964_v22, %v8830_v27  ;;  %v16467_v8 = vadd.f32 %v11978_v3, %v8863_v62 }
0x3842   : > { %v8855_v63 = vmul.f32 %v13966_v24, %v8831_v55 }
0x3843   : > { %v8864_v4 = vmul.f32 %v11977_v0, %v8854_v60 }
0x3844   : > { %v13968_v5 = vpop.eup %13967  ;;  %v8865_v7 = vmul.f32 %v11977_v0, %v8855_v63 }
0x3845   : > { %v6730_v25 = vmul.f32 %v13968_v5, %v6722_v36  ;;  %v16469_v10 = vadd.f32 %v11978_v3, %v8864_v4  ;;  %v12020_v4 = vld [vmem:[%s16981_s6 + $0x1] ss:$0 sm:$0xff] }
0x3846   : > { %v16471_v21 = vadd.f32 %v11978_v3, %v8865_v7 }
0x3847   : > { %v6738_v40 = vmul.f32 %v11831_v2, %v6730_v25  ;;  %v16475_v48 = vpack.c.bf16 %v16469_v10, %v16467_v8 }
0x3848   : > { %v16480_v41 = vpack.c.bf16 %v16471_v21, %v16471_v21 }
0x3849   : > { %v6746_v58 = vadd.f32 %v11832_v11, %v6738_v40  ;;  %13124 = vmatprep.mubr.msk.bf16.mxu0 %vm3028_vm5, %v16475_v48 }
0x384a   : > { %13125 = vmatmul.mubr.msk.bf16.vlgmr.msra.gmra.mxu0 %vm3028_vm5, %v16480_v41 }
0x384b   : > { %v16486_v13 = vpack.c.bf16 %v6746_v58, %v6746_v58  ;;  %13137 = vmatpush3.bf16.msra.mxu0 %v13815_v12  ;;  %13140 = vmatprep.mubr.msk.bf16.mxu0 %vm14947_vm0, %v14946_v1 }
0x384c   : > { %13138 = vmatprep.subr.bf16.mxu0 %v14946_v1 }
0x384d   : > { %13133 = vmatmul.mubr.msk.bf16.vlgmr.msra.gmra.mxu1 %vm3028_vm5, %v16486_v13 }
0x384f   : > { %13139 = vmatpush3.bf16.msra.mxu0 %v13816_v14 }
0x3852   : > { %13141 = vmatmul.mubr.msk.bf16.vlgmr.msra.gmra.mxu0 %vm3028_vm5, %v16486_v13 }
0x390a   : > { %v13126_v15 = vpop.f32.mrf.mxu0 }
0x390b   : > { %v8951_v26 = vadd.f32 %v13126_v15, %v11979_v44 }
0x390c   : > { %v8942_v54 = vpop.f32.mrf.mxu0 }
0x390d   : > { %v9016_v16 = vpop.f32.mrf.mxu1  ;;  %v8943_v20 = vadd.f32 %v11979_v44, %v8942_v54  ;;  %v9087_v46 = vmul.f32 0.35355338, %v8951_v26 }
0x390e   : > { %v9017_v17 = vadd.f32 %v11984_v39, %v9016_v16  ;;  %v13127_v53 = vpop.f32.mrf.mxu0 }
0x390f   : > { %v13134_v23 = vpop.f32.mrf.mxu1  ;;  %v9085_v38 = vmul.f32 0.35355338, %v8943_v20  ;;  %v9089_v18 = vpack.c.bf16 %v9087_v46, %v9087_v46 }
0x3910   : > { %v9090_v27 = vpack.c.bf16 %v9017_v17, %v9017_v17  ;;  %v8945_v55 = vpop.f32.mrf.mxu0 }
0x3911   : > { %v8946_v32 = vadd.f32 %v11979_v44, %v8945_v55  ;;  %v9019_v34 = vpop.f32.mrf.mxu1 }
0x3912   : > { %v9098_v19 = vsel %vm3205_vm6, %v9090_v27, 0  ;;  %v9079_v36 = vpop.f32.mrf.mxu0  ;;  %13336 = vmatprep.subr.msk.bf16.mxu1 %vm3205_vm6, %v9090_v27 }
0x3913   : > { %v9086_v42 = vmul.f32 0.35355338, %v8946_v32  ;;  %v9080_v43 = vadd.f32 %v11988_v29, %v9079_v36  ;;  %v13135_v45 = vpop.f32.mrf.mxu1  ;;  %13145 = vmatpush3.bf16.xpose.msra.mxu1 %v9098_v19 }
0x3914   : > { %v13142_v47 = vpop.f32.mrf.mxu0  ;;  %13156 = vmatprep.subr.bf16.mxu1 %v13817_v30 }
0x3915   : > { %v9088_v56 = vpack.c.bf16 %v9086_v42, %v9085_v38  ;;  %v9183_v49 = vpack.c.bf16 %v9080_v43, %v9080_v43 }
0x3916   : > { %v9082_v57 = vpop.f32.mrf.mxu0 }
0x3917   : > { %v9191_v50 = vsel %vm3647_vm8, %v9183_v49, 0  ;;  %13146 = vmatprep.mubr.msk.bf16.mxu1 %vm3205_vm6, %v9088_v56  ;;  %13337 = vmatprep.subr.msk.bf16.mxu0 %vm3647_vm8, %v9183_v49 }
0x3918   : > { %v13143_v61 = vpop.f32.mrf.mxu0  ;;  %13151 = vmatpush3.bf16.msra.mxu0 %v9191_v50 }
0x3919   : > { %13164 = vmatprep.subr.bf16.mxu0 %v14946_v1  ;;  %v13822_v61 = vld [vmem:[%s16976_s2 + $0x10] sm:$0xff]  }
0x391a   : > { %13147 = vmatmul.mubr.msk.bf16.vlgmr.msra.gmra.mxu1 %vm3205_vm6, %v9089_v18  ;;  %v13821_v18 = vld [vmem:[%s16976_s2 + $0x18] sm:$0xff]  }
0x391b   : > { %13157 = vmatpush3.bf16.msra.mxu1 %v13817_v30  ;;  %13160 = vmatprep.mubr.msk.bf16.mxu1 %vm3028_vm5, %v16475_v48 }
0x391c   : > { %13158 = vmatprep.subr.bf16.mxu1 %v13818_v51 }
0x391f   : > { %13159 = vmatpush3.bf16.msra.mxu1 %v13818_v51 }
0x3920   : > { %13172 = vmatprep.subr.bf16.mxu1 %v14946_v1 }
0x3922   : > { %13161 = vmatmul.mubr.msk.bf16.vlgmr.msra.gmra.mxu1 %vm3028_vm5, %v16480_v41 }
0x3923   : > { %13173 = vmatpush3.bf16.msra.mxu1 %v13819_v28  ;;  %13176 = vmatprep.mubr.msk.bf16.mxu1 %vm14947_vm0, %v14946_v1 }
0x3924   : > { %13174 = vmatprep.subr.bf16.mxu1 %v14946_v1 }
0x3927   : > { %13175 = vmatpush3.bf16.msra.mxu1 %v13820_v35 }
0x392a   : > { %13177 = vmatmul.mubr.msk.bf16.vlgmr.msra.gmra.mxu1 %vm3028_vm5, %v16486_v13 }
0x39da   : > { %v13148_v59 = vpop.f32.mrf.mxu1 }
0x39db   : > { %v9154_v33 = vsel %vm3205_vm6, %v13148_v59, -inf }
0x39dc   : > { %v9134_v31 = vpop.f32.mrf.mxu1 }
0x39dd   : > { %v9148_v37 = vsel %vm3205_vm6, %v9134_v31, -inf }
0x39de   : > { %9149 = vmax.xlane.f32.xlu0 %v9148_v37  ;;  %v13149_v52 = vpop.f32.mrf.mxu1 }
0x39e0   : > { %v9137_v6 = vpop.f32.mrf.mxu1 }
0x39e1   : > { %v9151_v0 = vsel %vm3205_vm6, %v9137_v6, -inf }
0x39e2   : > { %9155 = vmax.xlane.f32.xlu0 %v9154_v33  ;;  %v13162_v22 = vpop.f32.mrf.mxu1  ;;  %9152 = vmax.xlane.f32.xlu1 %v9151_v0 }
0x39e3   : > { %v16524_v24 = vadd.f32 %v13162_v22, %v12001_v9 }
0x39e4   : > { %v9303_v60 = vpop.f32.mrf.mxu1 }
0x39e5   : > { %v9304_v63 = vadd.f32 %v12001_v9, %v9303_v60 }
0x39e6   : > { %v13163_v62 = vpop.f32.mrf.mxu1 }
0x39e7   : > { %v9447_v7 = vmul.f32 0.35355338, %v9304_v63  ;;  %v9449_v62 = vmul.f32 0.35355338, %v16524_v24 }
0x39e8   : > { %v9306_v3 = vpop.f32.mrf.mxu1 }
0x39e9   : > { %v9307_v5 = vadd.f32 %v12001_v9, %v9306_v3  ;;  %v9451_v63 = vpack.c.bf16 %v9449_v62, %v9449_v62 }
0x39ea   : > { %v9441_v2 = vpop.f32.mrf.mxu1 }
0x39eb   : > { %v9448_v25 = vmul.f32 0.35355338, %v9307_v5  ;;  %v9442_v11 = vadd.f32 %v12020_v4, %v9441_v2 }
0x39ec   : > { %v13178_v40 = vpop.f32.mrf.mxu1 }
0x39ed   : > { %v9450_v12 = vpack.c.bf16 %v9448_v25, %v9447_v7  ;;  %v9545_v58 = vpack.c.bf16 %v9442_v11, %v9442_v11 }
0x39ee   : > { %v9444_v14 = vpop.f32.mrf.mxu1 }
0x39ef   : > { %v9553_v15 = vsel %vm3647_vm8, %v9545_v58, 0  ;;  %13339 = vmatprep.subr.msk.bf16.mxu1 %vm3647_vm8, %v9545_v58 }
0x39f0   : > { %v13179_v39 = vpop.f32.mrf.mxu1  ;;  %13187 = vmatpush3.bf16.msra.mxu1 %v9553_v15 }
0x3a67   : > { %v9150_v54 = vpop.xlane.xlu0 %9149 }
0x3a68   : > { %v9157_v44 = vsub.f32 %v9134_v31, %v9150_v54  ;;  %v12011_v31 = vld [vmem:[%s16979_s5 + $0x1] ss:$0 sm:$0xff] }
0x3a6a   : > { %v9160_v16 = vmul.f32 1.442695, %v9157_v44 }
0x3a6b   : > { %v9156_v17 = vpop.xlane.xlu0 %9155  ;;  %v9153_v53 = vpop.xlane.xlu1 %9152 }
0x3a6c   : > { %13969 = vpow2.f32 %v9160_v16  ;;  %v9159_v20 = vsub.f32 %v13148_v59, %v9156_v17  ;;  %v9158_v23 = vsub.f32 %v9137_v6, %v9153_v53 }
0x3a6e   : > { %v9164_v26 = vmul.f32 1.442695, %v9159_v20  ;;  %v9162_v27 = vmul.f32 1.442695, %v9158_v23 }
0x3a70   : > { %13971 = vpow2.f32 %v9164_v26 }
0x3a71   : > { %13973 = vpow2.f32 %v9162_v27  ;;  %v9243_v27 = vld [vmem:[%s16982_s8] sm:$0xf] }
0x3a72   : > { %13341 = vmatprep.subr.msk.bf16.mxu1 %vm3647_vm8, %v9243_v27 }
0x3a79   : > { %v13970_v55 = vpop.eup %13969 }
0x3a7a   : > { %v9166_v29 = vsel %vm3205_vm6, %v13970_v55, 0.0 }
0x3a7b   : > { %9167 = vadd.xlane.f32.xlu1 %v9166_v29 }
0x3a7d   : > { %v13972_v30 = vpop.eup %13971 }
0x3a7e   : > { %v13974_v32 = vpop.eup %13973  ;;  %v9172_v34 = vsel %vm3205_vm6, %v13972_v30, 0.0 }
0x3a7f   : > { %9173 = vadd.xlane.f32.xlu1 %v9172_v34  ;;  %v9169_v19 = vsel %vm3205_vm6, %v13974_v32, 0.0 }
0x3a80   : > { %9170 = vadd.xlane.f32.xlu0 %v9169_v19 }
0x3b04   : > { %v9168_v36 = vpop.xlane.xlu1 %9167 }
0x3b05   : > { %13975 = vrcp.f32 %v9168_v36 }
0x3b08   : > { %v9174_v38 = vpop.xlane.xlu1 %9173 }
0x3b09   : > { %v9171_v42 = vpop.xlane.xlu0 %9170  ;;  %13977 = vrcp.f32 %v9174_v38 }
0x3b0a   : > { %13979 = vrcp.f32 %v9171_v42 }
0x3b12   : > { %v13976_v43 = vpop.eup %13975 }
0x3b13   : > { %v9178_v56 = vmul.f32 %v13976_v43, %v13970_v55 }
0x3b16   : > { %v13978_v45 = vpop.eup %13977 }
0x3b17   : > { %v13980_v46 = vpop.eup %13979  ;;  %v9180_v47 = vmul.f32 %v13978_v45, %v13972_v30 }
0x3b18   : > { %v9179_v49 = vmul.f32 %v13980_v46, %v13974_v32  ;;  %v9671_v46 = vsel %vm3647_vm8, %v9243_v27, 0 }
0x3b19   : > { %v9182_v57 = vpack.c.bf16 %v9180_v47, %v9180_v47  ;;  %v13823_v47 = vld [vmem:[%s16976_s2 + $0x28] sm:$0xff]  }
0x3b1a   : > { %v9181_v50 = vpack.c.bf16 %v9179_v49, %v9178_v56  ;;  %v13824_v49 = vld [vmem:[%s16976_s2 + $0x20] sm:$0xff]  }
0x3b1c   : > { %13152 = vmatprep.mubr.msk.bf16.mxu0 %vm3205_vm6, %v9181_v50 }
0x3b1d   : > { %13153 = vmatmul.mubr.msk.bf16.vlgmr.msra.gmra.mxu0 %vm3205_vm6, %v9182_v57  ;;  %v12028_v57 = vld [vmem:[%s16982_s8 + $0x4] sm:$0xf] }
0x3b1e   : > { %13165 = vmatpush3.bf16.msra.mxu0 %v13821_v18  ;;  %13168 = vmatprep.mubr.msk.bf16.mxu0 %vm14947_vm0, %v14946_v1  ;;  %v9614_v50 = vsel %vm3647_vm8, %v12028_v57, 0  ;;  %v13825_v18 = vld [vmem:[%s16975_s1 + $0x28] sm:$0xff]  }
0x3b1f   : > { %13166 = vmatprep.subr.bf16.mxu0 %v14946_v1 }
0x3b22   : > { %13167 = vmatpush3.bf16.msra.mxu0 %v13822_v61 }
0x3b25   : > { %13169 = vmatmul.mubr.msk.bf16.vlgmr.msra.gmra.mxu0 %vm3028_vm5, %v16486_v13 }
0x3b26   : > { %13182 = vmatprep.mubr.msk.bf16.mxu0 %vm3205_vm6, %v9450_v12 }
0x3bdd   : > { %v16542_v51 = vpop.f32.mrf.mxu0 }
0x3bde   : > { %v9242_v56 = vpack.c.bf16 %v16542_v51, %v16542_v51 }
0x3bdf   : > { %v16544_v28 = vpop.f32.mrf.mxu0 }
0x3be1   : > { %v13155_v35 = vpop.f32.mrf.mxu0 }
0x3be3   : > { %v16546_v59 = vpop.f32.mrf.mxu0 }
0x3be4   : > { %v9241_v37 = vpack.c.bf16 %v16546_v59, %v16544_v28 }
0x3be5   : > { %v9376_v52 = vpop.f32.mrf.mxu0 }
0x3be6   : > { %v9377_v6 = vadd.f32 %v12011_v31, %v9376_v52  ;;  %v13826_v52 = vld [vmem:[%s16975_s1 + $0x20] sm:$0xff]  }
0x3be7   : > { %v13170_v9 = vpop.f32.mrf.mxu0 }
0x3be8   : > { %v9452_v33 = vpack.c.bf16 %v9377_v6, %v9377_v6 }
0x3be9   : > { %v9379_v0 = vpop.f32.mrf.mxu0 }
0x3bea   : > { %v9460_v22 = vsel %vm3205_vm6, %v9452_v33, 0  ;;  %13338 = vmatprep.subr.msk.bf16.mxu0 %vm3205_vm6, %v9452_v33  ;;  %v12048_v0 = vld [vmem:[%s16979_s5 + $0x2] ss:$0 sm:$0xff] }
0x3beb   : > { %v13171_v60 = vpop.f32.mrf.mxu0  ;;  %13181 = vmatpush3.bf16.xpose.msra.mxu0 %v9460_v22  ;;  %v13827_v22 = vld [vmem:[%s16978_s4 + $0x28] sm:$0xff]  }
0x3bec   : > { %13340 = vmatprep.subr.msk.bf16.mxu0 %vm3647_vm8, %v12028_v57 }
0x3bf2   : > { %13183 = vmatmul.mubr.msk.bf16.vlgmr.msra.gmra.mxu0 %vm3205_vm6, %v9451_v63 }
0x3bf3   : > { %13193 = vmatpush3.bf16.msra.mxu0 %v9614_v50 }
0x3bf4   : > { %13204 = vmatprep.subr.bf16.mxu0 %v13825_v18 }
0x3cb2   : > { %v13184_v3 = vpop.f32.mrf.mxu0 }
0x3cb3   : > { %v9516_v25 = vsel %vm3205_vm6, %v13184_v3, -inf }
0x3cb4   : > { %v9496_v4 = vpop.f32.mrf.mxu0 }
0x3cb5   : > { %v9510_v5 = vsel %vm3205_vm6, %v9496_v4, -inf }
0x3cb6   : > { %9511 = vmax.xlane.f32.xlu0 %v9510_v5  ;;  %v13185_v2 = vpop.f32.mrf.mxu0 }
0x3cb8   : > { %v9499_v7 = vpop.f32.mrf.mxu0 }
0x3cb9   : > { %v9513_v11 = vsel %vm3205_vm6, %v9499_v7, -inf }
0x3cba   : > { %9517 = vmax.xlane.f32.xlu0 %v9516_v25  ;;  %9514 = vmax.xlane.f32.xlu1 %v9513_v11 }
0x3d3f   : > { %v9512_v40 = vpop.xlane.xlu0 %9511 }
0x3d40   : > { %v9519_v12 = vsub.f32 %v9496_v4, %v9512_v40  ;;  %v13828_v4 = vld [vmem:[%s16978_s4 + $0x20] sm:$0xff]  }
0x3d42   : > { %v9522_v58 = vmul.f32 1.442695, %v9519_v12 }
0x3d43   : > { %v9518_v24 = vpop.xlane.xlu0 %9517  ;;  %v9515_v14 = vpop.xlane.xlu1 %9514 }
0x3d44   : > { %13981 = vpow2.f32 %v9522_v58  ;;  %v9521_v15 = vsub.f32 %v13184_v3, %v9518_v24  ;;  %v9520_v39 = vsub.f32 %v9499_v7, %v9515_v14  ;;  %v12038_v24 = vld [vmem:[%s16980_s3 + $0x2] ss:$0 sm:$0xff] }
0x3d46   : > { %v9526_v54 = vmul.f32 1.442695, %v9521_v15  ;;  %v9524_v44 = vmul.f32 1.442695, %v9520_v39 }
0x3d48   : > { %13983 = vpow2.f32 %v9526_v54 }
0x3d49   : > { %13985 = vpow2.f32 %v9524_v44 }
0x3d51   : > { %v13982_v16 = vpop.eup %13981 }
0x3d52   : > { %v9528_v17 = vsel %vm3205_vm6, %v13982_v16, 0.0 }
0x3d53   : > { %9529 = vadd.xlane.f32.xlu1 %v9528_v17 }
0x3d55   : > { %v13984_v53 = vpop.eup %13983 }
0x3d56   : > { %v13986_v20 = vpop.eup %13985  ;;  %v9534_v23 = vsel %vm3205_vm6, %v13984_v53, 0.0 }
0x3d57   : > { %9535 = vadd.xlane.f32.xlu1 %v9534_v23  ;;  %v9531_v26 = vsel %vm3205_vm6, %v13986_v20, 0.0 }
0x3d58   : > { %9532 = vadd.xlane.f32.xlu0 %v9531_v26 }
0x3ddc   : > { %v9530_v55 = vpop.xlane.xlu1 %9529 }
0x3ddd   : > { %13987 = vrcp.f32 %v9530_v55 }
0x3de0   : > { %v9536_v29 = vpop.xlane.xlu1 %9535 }
0x3de1   : > { %v9533_v30 = vpop.xlane.xlu0 %9532  ;;  %13989 = vrcp.f32 %v9536_v29 }
0x3de2   : > { %13991 = vrcp.f32 %v9533_v30 }
0x3dea   : > { %v13988_v32 = vpop.eup %13987 }
0x3deb   : > { %v9540_v38 = vmul.f32 %v13988_v32, %v13982_v16  ;;  %v12057_v16 = vld [vmem:[%s16981_s6 + $0x2] ss:$0 sm:$0xff] }
0x3dee   : > { %v13990_v34 = vpop.eup %13989 }
0x3def   : > { %v13992_v19 = vpop.eup %13991  ;;  %v9542_v36 = vmul.f32 %v13990_v34, %v13984_v53 }
0x3df0   : > { %v9541_v42 = vmul.f32 %v13992_v19, %v13986_v20 }
0x3df1   : > { %v9544_v43 = vpack.c.bf16 %v9542_v36, %v9542_v36 }
0x3df2   : > { %v9543_v45 = vpack.c.bf16 %v9541_v42, %v9540_v38 }
0x3df4   : > { %13188 = vmatprep.mubr.msk.bf16.mxu1 %vm3205_vm6, %v9543_v45 }
0x3df5   : > { %13189 = vmatmul.mubr.msk.bf16.vlgmr.msra.gmra.mxu1 %vm3205_vm6, %v9544_v43 }
0x3df6   : > { %13200 = vmatprep.mubr.msk.bf16.mxu1 %vm3205_vm6, %v9241_v37  ;;  %13199 = vmatpush3.bf16.msra.mxu1 %v9671_v46 }
0x3df7   : > { %13212 = vmatprep.subr.bf16.mxu1 %v14946_v1 }
0x3dfd   : > { %13201 = vmatmul.mubr.msk.bf16.vlgmr.msra.gmra.mxu1 %vm3205_vm6, %v9242_v56 }
0x3dfe   : > { %13213 = vmatpush3.bf16.msra.mxu1 %v13823_v47  ;;  %13216 = vmatprep.mubr.msk.bf16.mxu1 %vm14947_vm0, %v14946_v1 }
0x3dff   : > { %13214 = vmatprep.subr.bf16.mxu1 %v14946_v1 }
0x3e02   : > { %13215 = vmatpush3.bf16.msra.mxu1 %v13824_v49 }
0x3e05   : > { %13217 = vmatmul.mubr.msk.bf16.vlgmr.msra.gmra.mxu1 %vm3028_vm5, %v16486_v13 }
0x3eb5   : > { %v13190_v61 = vpop.f32.mrf.mxu1 }
0x3eb6   : > { %v9604_v31 = vpack.c.bf16 %v13190_v61, %v13190_v61 }
0x3eb7   : > { %v9589_v51 = vpop.f32.mrf.mxu1 }
0x3eb9   : > { %v13191_v28 = vpop.f32.mrf.mxu1 }
0x3ebb   : > { %v9592_v35 = vpop.f32.mrf.mxu1 }
0x3ebc   : > { %v9603_v59 = vpack.c.bf16 %v9592_v35, %v9589_v51 }
0x3ebd   : > { %v16585_v37 = vpop.f32.mrf.mxu1 }
0x3ebe   : > { %13194 = vmatprep.mubr.msk.bf16.mxu0 %vm3205_vm6, %v9603_v59 }
0x3ebf   : > { %13195 = vmatmul.mubr.msk.bf16.vlgmr.msra.gmra.mxu0 %vm3205_vm6, %v9604_v31  ;;  %v16590_v6 = vpop.f32.mrf.mxu1 }
0x3ec0   : > { %13205 = vmatpush3.bf16.msra.mxu0 %v13825_v18  ;;  %13208 = vmatprep.mubr.msk.bf16.mxu0 %vm3028_vm5, %v16475_v48 }
0x3ec1   : > { %v13203_v9 = vpop.f32.mrf.mxu1  ;;  %13206 = vmatprep.subr.bf16.mxu0 %v13826_v52 }
0x3ec3   : > { %v16594_v33 = vpop.f32.mrf.mxu1 }
0x3ec4   : > { %13207 = vmatpush3.bf16.msra.mxu0 %v13826_v52 }
0x3ec5   : > { %v9853_v60 = vpop.f32.mrf.mxu1  ;;  %13220 = vmatprep.subr.bf16.mxu0 %v14946_v1 }
0x3ec6   : > { %v9854_v62 = vadd.f32 %v12048_v0, %v9853_v60 }
0x3ec7   : > { %13209 = vmatmul.mubr.msk.bf16.vlgmr.msra.gmra.mxu0 %vm3028_vm5, %v16480_v41  ;;  %v13218_v63 = vpop.f32.mrf.mxu1 }
0x3ec8   : > { %v9929_v3 = vpack.c.bf16 %v9854_v62, %v9854_v62  ;;  %13221 = vmatpush3.bf16.msra.mxu0 %v13827_v22  ;;  %13224 = vmatprep.mubr.msk.bf16.mxu0 %vm14947_vm0, %v14946_v1  ;;  %v13829_v62 = vld [vmem:[%s16975_s1 + $0x38] sm:$0xff]  }
0x3ec9   : > { %v9856_v5 = vpop.f32.mrf.mxu1  ;;  %13222 = vmatprep.subr.bf16.mxu0 %v14946_v1 }
0x3eca   : > { %v9937_v2 = vsel %vm3205_vm6, %v9929_v3, 0  ;;  %13342 = vmatprep.subr.msk.bf16.mxu1 %vm3205_vm6, %v9929_v3 }
0x3ecb   : > { %v13219_v7 = vpop.f32.mrf.mxu1  ;;  %13229 = vmatpush3.bf16.xpose.msra.mxu1 %v9937_v2 }
0x3ecc   : > { %13223 = vmatpush3.bf16.msra.mxu0 %v13828_v4 }
0x3ecf   : > { %13225 = vmatmul.mubr.msk.bf16.vlgmr.msra.gmra.mxu0 %vm3028_vm5, %v16486_v13 }
0x3f7f   : > { %v16609_v25 = vpop.f32.mrf.mxu0 }
0x3f81   : > { %v16611_v11 = vpop.f32.mrf.mxu0 }
0x3f83   : > { %v13197_v40 = vpop.f32.mrf.mxu0 }
0x3f85   : > { %v16613_v12 = vpop.f32.mrf.mxu0 }
0x3f87   : > { %v13210_v58 = vpop.f32.mrf.mxu0 }
0x3f88   : > { %v9789_v15 = vadd.f32 %v13210_v58, %v12038_v24 }
0x3f89   : > { %v9780_v14 = vpop.f32.mrf.mxu0 }
0x3f8a   : > { %v9781_v54 = vadd.f32 %v12038_v24, %v9780_v14  ;;  %v9926_v53 = vmul.f32 0.35355338, %v9789_v15 }
0x3f8b   : > { %v13211_v39 = vpop.f32.mrf.mxu0 }
0x3f8c   : > { %v9924_v23 = vmul.f32 0.35355338, %v9781_v54  ;;  %v9928_v32 = vpack.c.bf16 %v9926_v53, %v9926_v53  ;;  %v13830_v39 = vld [vmem:[%s16975_s1 + $0x30] sm:$0xff]   ;;  %v13831_v54 = vld [vmem:[%s16978_s4 + $0x38] sm:$0xff]   ;;  %s16983_s1 = sld [smem:[#allocation70_spill]] }
0x3f8d   : > { %v9783_v44 = vpop.f32.mrf.mxu0 }
0x3f8e   : > { %v9784_v17 = vadd.f32 %v12038_v24, %v9783_v44  ;;  %v13832_v44 = vld [vmem:[%s16978_s4 + $0x30] sm:$0xff]  }
0x3f8f   : > { %v9918_v20 = vpop.f32.mrf.mxu0 }
0x3f90   : > { %v9925_v26 = vmul.f32 0.35355338, %v9784_v17  ;;  %v9919_v27 = vadd.f32 %v12057_v16, %v9918_v20 }
0x3f91   : > { %v13226_v55 = vpop.f32.mrf.mxu0 }
0x3f92   : > { %v9927_v29 = vpack.c.bf16 %v9925_v26, %v9924_v23  ;;  %v10022_v30 = vpack.c.bf16 %v9919_v27, %v9919_v27  ;;  %v12073_v23 = vld [vmem:[%s16980_s3 + $0x3] ss:$0 sm:$0xff]  ;;  %v13833_v27 = vld [vmem:[%s16976_s2 + $0x38] sm:$0xff]  }
0x3f93   : > { %v9921_v34 = vpop.f32.mrf.mxu0 }
0x3f94   : > { %v10030_v19 = vsel %vm3647_vm8, %v10022_v30, 0  ;;  %13230 = vmatprep.mubr.msk.bf16.mxu1 %vm3205_vm6, %v9927_v29  ;;  %13343 = vmatprep.subr.msk.bf16.mxu0 %vm3647_vm8, %v10022_v30  ;;  %v13834_v34 = vld [vmem:[%s16976_s2 + $0x30] sm:$0xff]   ;;  %s16986_s2 = sld [smem:[#allocation77_spill]] }
0x3f95   : > { %v13227_v36 = vpop.f32.mrf.mxu0  ;;  %13231 = vmatmul.mubr.msk.bf16.vlgmr.msra.gmra.mxu1 %vm3205_vm6, %v9928_v32  ;;  %13235 = vmatpush3.bf16.msra.mxu0 %v10030_v19 }
0x3f96   : > { %13246 = vmatprep.subr.bf16.mxu0 %v13829_v62 }
0x4055   : > { %v13232_v38 = vpop.f32.mrf.mxu1 }
0x4056   : > { %v9993_v47 = vsel %vm3205_vm6, %v13232_v38, -inf }
0x4057   : > { %v9973_v42 = vpop.f32.mrf.mxu1 }
0x4058   : > { %v9987_v43 = vsel %vm3205_vm6, %v9973_v42, -inf }
0x4059   : > { %9988 = vmax.xlane.f32.xlu0 %v9987_v43  ;;  %v13233_v45 = vpop.f32.mrf.mxu1 }
0x405b   : > { %v9976_v46 = vpop.f32.mrf.mxu1 }
0x405c   : > { %v9990_v56 = vsel %vm3205_vm6, %v9976_v46, -inf }
0x405d   : > { %9994 = vmax.xlane.f32.xlu0 %v9993_v47  ;;  %9991 = vmax.xlane.f32.xlu1 %v9990_v56 }
0x40e2   : > { %v9989_v49 = vpop.xlane.xlu0 %9988 }
0x40e3   : > { %v9996_v57 = vsub.f32 %v9973_v42, %v9989_v49  ;;  %v12092_v42 = vld [vmem:[%s16981_s6 + $0x3] ss:$0 sm:$0xff] }
0x40e5   : > { %v9999_v50 = vmul.f32 1.442695, %v9996_v57 }
0x40e6   : > { %v9995_v18 = vpop.xlane.xlu0 %9994  ;;  %v9992_v61 = vpop.xlane.xlu1 %9991 }
0x40e7   : > { %13993 = vpow2.f32 %v9999_v50  ;;  %v9998_v51 = vsub.f32 %v13232_v38, %v9995_v18  ;;  %v9997_v28 = vsub.f32 %v9976_v46, %v9992_v61 }
0x40e9   : > { %v10003_v35 = vmul.f32 1.442695, %v9998_v51  ;;  %v10001_v59 = vmul.f32 1.442695, %v9997_v28  ;;  %v9716_v51 = vadd.f32 %v16585_v37, %v16609_v25 }
0x40eb   : > { %13995 = vpow2.f32 %v10003_v35 }
0x40ec   : > { %13997 = vpow2.f32 %v10001_v59 }
0x40f4   : > { %v13994_v31 = vpop.eup %13993 }
0x40f5   : > { %v10005_v52 = vsel %vm3205_vm6, %v13994_v31, 0.0 }
0x40f6   : > { %10006 = vadd.xlane.f32.xlu1 %v10005_v52 }
0x40f8   : > { %v13996_v9 = vpop.eup %13995 }
0x40f9   : > { %v13998_v0 = vpop.eup %13997  ;;  %v10011_v22 = vsel %vm3205_vm6, %v13996_v9, 0.0 }
0x40fa   : > { %10012 = vadd.xlane.f32.xlu1 %v10011_v22  ;;  %v10008_v60 = vsel %vm3205_vm6, %v13998_v0, 0.0  ;;  %v12083_v22 = vld [vmem:[%s16979_s5 + $0x3] ss:$0 sm:$0xff] }
0x40fb   : > { %10009 = vadd.xlane.f32.xlu0 %v10008_v60 }
0x417f   : > { %v10007_v63 = vpop.xlane.xlu1 %10006 }
0x4180   : > { %13999 = vrcp.f32 %v10007_v63 }
0x4183   : > { %v10013_v3 = vpop.xlane.xlu1 %10012 }
0x4184   : > { %v10010_v4 = vpop.xlane.xlu0 %10009  ;;  %14001 = vrcp.f32 %v10013_v3 }
0x4185   : > { %14003 = vrcp.f32 %v10010_v4 }
0x418d   : > { %v14000_v5 = vpop.eup %13999 }
0x418e   : > { %v10017_v58 = vmul.f32 %v14000_v5, %v13994_v31 }
0x4191   : > { %v14002_v2 = vpop.eup %14001 }
0x4192   : > { %v14004_v7 = vpop.eup %14003  ;;  %v10019_v40 = vmul.f32 %v14002_v2, %v13996_v9  ;;  %v9711_v9 = vadd.f32 %v16594_v33, %v16613_v12 }
0x4193   : > { %v10018_v24 = vmul.f32 %v14004_v7, %v13998_v0 }
0x4194   : > { %v10021_v14 = vpack.c.bf16 %v10019_v40, %v10019_v40 }
0x4195   : > { %v10020_v15 = vpack.c.bf16 %v10018_v24, %v10017_v58 }
0x4197   : > { %13236 = vmatprep.mubr.msk.bf16.mxu0 %vm3205_vm6, %v10020_v15 }
0x4198   : > { %13237 = vmatmul.mubr.msk.bf16.vlgmr.msra.gmra.mxu0 %vm3205_vm6, %v10021_v14 }
0x4199   : > { %13247 = vmatpush3.bf16.msra.mxu0 %v13829_v62  ;;  %13250 = vmatprep.mubr.msk.bf16.mxu0 %vm3028_vm5, %v16475_v48  ;;  %v12065_v48 = vld [vmem:[%s16982_s8 + $0x8] sm:$0xf] }
0x419a   : > { %13248 = vmatprep.subr.bf16.mxu0 %v13830_v39  ;;  %13344 = vmatprep.subr.msk.bf16.mxu1 %vm3647_vm8, %v12065_v48  ;;  %v10091_v16 = vsel %vm3647_vm8, %v12065_v48, 0 }
0x419b   : > { %13241 = vmatpush3.bf16.msra.mxu1 %v10091_v16 }
0x419c   : > { %13254 = vmatprep.subr.bf16.mxu1 %v14946_v1 }
0x419d   : > { %13249 = vmatpush3.bf16.msra.mxu0 %v13830_v39 }
0x419e   : > { %13262 = vmatprep.subr.bf16.mxu0 %v14946_v1 }
0x41a0   : > { %13251 = vmatmul.mubr.msk.bf16.vlgmr.msra.gmra.mxu0 %vm3028_vm5, %v16480_v41 }
0x41a1   : > { %13263 = vmatpush3.bf16.msra.mxu0 %v13831_v54  ;;  %13266 = vmatprep.mubr.msk.bf16.mxu0 %vm14947_vm0, %v14946_v1 }
0x41a2   : > { %13264 = vmatprep.subr.bf16.mxu0 %v14946_v1 }
0x41a5   : > { %13265 = vmatpush3.bf16.msra.mxu0 %v13832_v44 }
0x41a8   : > { %13267 = vmatmul.mubr.msk.bf16.vlgmr.msra.gmra.mxu0 %vm3028_vm5, %v16486_v13 }
0x4258   : > { %v13238_v41 = vpop.f32.mrf.mxu0 }
0x4259   : > { %v10081_v55 = vpack.c.bf16 %v13238_v41, %v13238_v41 }
0x425a   : > { %v10066_v17 = vpop.f32.mrf.mxu0 }
0x425c   : > { %v13239_v53 = vpop.f32.mrf.mxu0 }
0x425e   : > { %v10069_v20 = vpop.f32.mrf.mxu0 }
0x425f   : > { %v10080_v26 = vpack.c.bf16 %v10069_v20, %v10066_v17 }
0x4260   : > { %v13252_v29 = vpop.f32.mrf.mxu0 }
0x4261   : > { %v10212_v30 = vadd.f32 %v13252_v29, %v12073_v23  ;;  %13242 = vmatprep.mubr.msk.bf16.mxu1 %vm3205_vm6, %v10080_v26 }
0x4262   : > { %13243 = vmatmul.mubr.msk.bf16.vlgmr.msra.gmra.mxu1 %vm3205_vm6, %v10081_v55  ;;  %v10203_v32 = vpop.f32.mrf.mxu0 }
0x4263   : > { %13255 = vmatpush3.bf16.msra.mxu1 %v13833_v27  ;;  %13258 = vmatprep.mubr.msk.bf16.mxu1 %vm14947_vm0, %v14946_v1  ;;  %v10204_v36 = vadd.f32 %v12073_v23, %v10203_v32  ;;  %v10349_v4 = vmul.f32 0.35355338, %v10212_v30 }
0x4264   : > { %v13253_v19 = vpop.f32.mrf.mxu0  ;;  %13256 = vmatprep.subr.bf16.mxu1 %v14946_v1 }
0x4265   : > { %v10347_v46 = vmul.f32 0.35355338, %v10204_v36  ;;  %v10351_v5 = vpack.c.bf16 %v10349_v4, %v10349_v4 }
0x4266   : > { %v10206_v38 = vpop.f32.mrf.mxu0 }
0x4267   : > { %v10207_v43 = vadd.f32 %v12073_v23, %v10206_v38  ;;  %13257 = vmatpush3.bf16.msra.mxu1 %v13834_v34 }
0x4268   : > { %v10341_v45 = vpop.f32.mrf.mxu0 }
0x4269   : > { %v10348_v47 = vmul.f32 0.35355338, %v10207_v43  ;;  %v10342_v56 = vadd.f32 %v12092_v42, %v10341_v45 }
0x426a   : > { %13259 = vmatmul.mubr.msk.bf16.vlgmr.msra.gmra.mxu1 %vm3028_vm5, %v16486_v13  ;;  %v13268_v49 = vpop.f32.mrf.mxu0  ;;  %v9708_v13 = vadd.f32 %v16590_v6, %v16611_v11 }
0x426b   : > { %v10350_v57 = vpack.c.bf16 %v10348_v47, %v10347_v46  ;;  %v10445_v50 = vpack.c.bf16 %v10342_v56, %v10342_v56  ;;  %v12100_v47 = vld [vmem:[%s16982_s8 + $0xc] sm:$0xf] }
0x426c   : > { %v10344_v18 = vpop.f32.mrf.mxu0  ;;  %v10514_v56 = vsel %vm3647_vm8, %v12100_v47, 0 }
0x426d   : > { %v10453_v61 = vsel %vm3647_vm8, %v10445_v50, 0  ;;  %13272 = vmatprep.mubr.msk.bf16.mxu1 %vm3205_vm6, %v10350_v57  ;;  %13346 = vmatprep.subr.msk.bf16.mxu0 %vm3647_vm8, %v10445_v50 }
0x426e   : > { %v13269_v1 = vpop.f32.mrf.mxu0  ;;  %13277 = vmatpush3.bf16.msra.mxu0 %v10453_v61 }
0x4322   : > { %v13244_v28 = vpop.f32.mrf.mxu1 }
0x4323   : > { %v16665_v35 = vadd.f32 %v13244_v28, %v9716_v51 }
0x4324   : > { %v10127_v59 = vpop.f32.mrf.mxu1 }
0x4325   : > { %v16667_v31 = vadd.f32 %v10127_v59, %v9708_v13  ;;  %v12103_v13 = vld [vmem:[%s16983_s1] ss:$0 sm:$0xff]  ;;  %s16984_s1 = sld [smem:[#allocation78_spill]] }
0x4326   : > { %v13245_v52 = vpop.f32.mrf.mxu1 }
0x4328   : > { %v10130_v0 = vpop.f32.mrf.mxu1 }
0x4329   : > { %v16672_v60 = vadd.f32 %v10130_v0, %v9711_v9 }
0x432a   : > { %v10276_v62 = vpop.f32.mrf.mxu1 }
0x432b   : > { %v10277_v63 = vadd.f32 %v12083_v22, %v10276_v62 }
0x432c   : > { %v13260_v37 = vpop.f32.mrf.mxu1 }
0x432d   : > { %v10352_v25 = vpack.c.bf16 %v10277_v63, %v10277_v63 }
0x432e   : > { %v10279_v3 = vpop.f32.mrf.mxu1 }
0x432f   : > { %v10360_v6 = vsel %vm3205_vm6, %v10352_v25, 0  ;;  %13345 = vmatprep.subr.msk.bf16.mxu1 %vm3205_vm6, %v10352_v25 }
0x4330   : > { %v13261_v11 = vpop.f32.mrf.mxu1  ;;  %13271 = vmatpush3.bf16.xpose.msra.mxu1 %v10360_v6 }
0x4331   : > { %13347 = vmatprep.subr.msk.bf16.mxu1 %vm3647_vm8, %v12100_v47 }
0x4337   : > { %13273 = vmatmul.mubr.msk.bf16.vlgmr.msra.gmra.mxu1 %vm3205_vm6, %v10351_v5 }
0x4338   : > { %13283 = vmatpush3.bf16.msra.mxu1 %v10514_v56 }
0x43f7   : > { %v13274_v33 = vpop.f32.mrf.mxu1 }
0x43f8   : > { %v10416_v58 = vsel %vm3205_vm6, %v13274_v33, -inf }
0x43f9   : > { %v10396_v12 = vpop.f32.mrf.mxu1 }
0x43fa   : > { %v10410_v2 = vsel %vm3205_vm6, %v10396_v12, -inf }
0x43fb   : > { %10411 = vmax.xlane.f32.xlu0 %v10410_v2  ;;  %v13275_v7 = vpop.f32.mrf.mxu1 }
0x43fd   : > { %v10399_v40 = vpop.f32.mrf.mxu1 }
0x43fe   : > { %v10413_v24 = vsel %vm3205_vm6, %v10399_v40, -inf }
0x43ff   : > { %10417 = vmax.xlane.f32.xlu0 %v10416_v58  ;;  %10414 = vmax.xlane.f32.xlu1 %v10413_v24 }
0x4484   : > { %v10412_v14 = vpop.xlane.xlu0 %10411 }
0x4485   : > { %v10419_v15 = vsub.f32 %v10396_v12, %v10412_v14 }
0x4487   : > { %v10422_v39 = vmul.f32 1.442695, %v10419_v15 }
0x4488   : > { %v10418_v54 = vpop.xlane.xlu0 %10417  ;;  %v10415_v44 = vpop.xlane.xlu1 %10414 }
0x4489   : > { %14005 = vpow2.f32 %v10422_v39  ;;  %v10421_v48 = vsub.f32 %v13274_v33, %v10418_v54  ;;  %v10420_v16 = vsub.f32 %v10399_v40, %v10415_v44  ;;  %v13835_v39 = vld [vmem:[%s16984_s1 + $0x8] sm:$0xff]   ;;  %v13836_v54 = vld [vmem:[%s16984_s1] sm:$0xff]   ;;  %s16985_s1 = sld [smem:[#allocation80_spill]] }
0x448a   : > { %13288 = vmatprep.subr.bf16.mxu0 %v13835_v39 }
0x448b   : > { %v10426_v41 = vmul.f32 1.442695, %v10421_v48  ;;  %v10424_v17 = vmul.f32 1.442695, %v10420_v16 }
0x448d   : > { %14007 = vpow2.f32 %v10426_v41 }
0x448e   : > { %14009 = vpow2.f32 %v10424_v17 }
0x4496   : > { %v14006_v53 = vpop.eup %14005 }
0x4497   : > { %v10428_v20 = vsel %vm3205_vm6, %v14006_v53, 0.0 }
0x4498   : > { %10429 = vadd.xlane.f32.xlu1 %v10428_v20 }
0x449a   : > { %v14008_v23 = vpop.eup %14007 }
0x449b   : > { %v14010_v26 = vpop.eup %14009  ;;  %v10434_v27 = vsel %vm3205_vm6, %v14008_v23, 0.0 }
0x449c   : > { %10435 = vadd.xlane.f32.xlu1 %v10434_v27  ;;  %v10431_v55 = vsel %vm3205_vm6, %v14010_v26, 0.0 }
0x449d   : > { %10432 = vadd.xlane.f32.xlu0 %v10431_v55 }
0x4521   : > { %v10430_v29 = vpop.xlane.xlu1 %10429 }
0x4522   : > { %14011 = vrcp.f32 %v10430_v29  ;;  %v12104_v29 = vld [vmem:[#allocation6] ss:$0 sm:$0xff] }
0x4525   : > { %v10436_v30 = vpop.xlane.xlu1 %10435 }
0x4526   : > { %v10433_v32 = vpop.xlane.xlu0 %10432  ;;  %14013 = vrcp.f32 %v10436_v30 }
0x4527   : > { %14015 = vrcp.f32 %v10433_v32 }
0x452f   : > { %v14012_v34 = vpop.eup %14011 }
0x4530   : > { %v10440_v42 = vmul.f32 %v14012_v34, %v14006_v53 }
0x4533   : > { %v14014_v19 = vpop.eup %14013 }
0x4534   : > { %v14016_v36 = vpop.eup %14015  ;;  %v10442_v38 = vmul.f32 %v14014_v19, %v14008_v23 }
0x4535   : > { %v10441_v43 = vmul.f32 %v14016_v36, %v14010_v26 }
0x4536   : > { %v10444_v45 = vpack.c.bf16 %v10442_v38, %v10442_v38 }
0x4537   : > { %v10443_v46 = vpack.c.bf16 %v10441_v43, %v10440_v42  ;;  %v12105_v42 = vld [vmem:[#allocation4] ss:$0 sm:$0xff] }
0x4539   : > { %13278 = vmatprep.mubr.msk.bf16.mxu0 %vm3205_vm6, %v10443_v46 }
0x453a   : > { %13279 = vmatmul.mubr.msk.bf16.vlgmr.msra.gmra.mxu0 %vm3205_vm6, %v10444_v45 }
0x453b   : > { %13289 = vmatpush3.bf16.msra.mxu0 %v13835_v39 }
0x453c   : > { %13290 = vmatprep.subr.bf16.mxu0 %v13836_v54 }
0x453f   : > { %13291 = vmatpush3.bf16.msra.mxu0 %v13836_v54 }
0x45fa   : > { %v13280_v49 = vpop.f32.mrf.mxu0 }
0x45fb   : > { %v10504_v1 = vpack.c.bf16 %v13280_v49, %v13280_v49 }
0x45fc   : > { %v10489_v57 = vpop.f32.mrf.mxu0 }
0x45fe   : > { %v13281_v50 = vpop.f32.mrf.mxu0 }
0x45ff   : > { %v13838_v50 = vld [vmem:[%s16985_s1 + $0x10] sm:$0xff]  }
0x4600   : > { %v10492_v18 = vpop.f32.mrf.mxu0 }
0x4601   : > { %v10503_v61 = vpack.c.bf16 %v10492_v18, %v10489_v57  ;;  %v13837_v57 = vld [vmem:[%s16985_s1 + $0x18] sm:$0xff]   ;;  %v13839_v18 = vld [vmem:[%s16985_s1 + $0x8] sm:$0xff]  }
0x4602   : > { %13296 = vmatprep.subr.bf16.mxu1 %v13837_v57 }
0x4603   : > { %13284 = vmatprep.mubr.msk.bf16.mxu1 %vm3205_vm6, %v10503_v61  ;;  %v13840_v61 = vld [vmem:[%s16985_s1] sm:$0xff]  }
0x4604   : > { %13285 = vmatmul.mubr.msk.bf16.vlgmr.msra.gmra.mxu1 %vm3205_vm6, %v10504_v1  ;;  %v12106_v1 = vld [vmem:[%s16986_s2] ss:$0 sm:$0xff]  ;;  %s16987_s2 = sld [smem:[#allocation79_spill]] }
0x4605   : > { %13297 = vmatpush3.bf16.msra.mxu1 %v13837_v57 }
0x4606   : > { %13298 = vmatprep.subr.bf16.mxu1 %v13838_v50 }
0x4609   : > { %13299 = vmatpush3.bf16.msra.mxu1 %v13838_v50 }
0x460a   : > { %13300 = vmatprep.subr.bf16.mxu1 %v13839_v18 }
0x460d   : > { %13301 = vmatpush3.bf16.msra.mxu1 %v13839_v18 }
0x460e   : > { %13302 = vmatprep.subr.bf16.mxu1 %v13840_v61 }
0x4611   : > { %13303 = vmatpush3.bf16.msra.mxu1 %v13840_v61 }
0x46c4   : > { %v13286_v51 = vpop.f32.mrf.mxu1 }
0x46c5   : > { %v10566_v28 = vadd.f32 %v13286_v51, %v16665_v35 }
0x46c6   : > { %v10550_v59 = vpop.f32.mrf.mxu1 }
0x46c7   : > { %v10564_v52 = vadd.f32 %v10550_v59, %v16667_v31  ;;  %v10576_v0 = vadd.f32 %v12103_v13, %v10566_v28 }
0x46c8   : > { %v13287_v9 = vpop.f32.mrf.mxu1 }
0x46c9   : > { %v10574_v22 = vadd.f32 %v12103_v13, %v10564_v52  ;;  %v10579_v6 = vadd.f32 %v10576_v0, %v16471_v21 }
0x46ca   : > { %v10553_v62 = vpop.f32.mrf.mxu1 }
0x46cb   : > { %v10565_v63 = vadd.f32 %v10553_v62, %v16672_v60  ;;  %v10577_v37 = vadd.f32 %v10574_v22, %v16467_v8  ;;  %v10586_v31 = vsel %vm3028_vm5, %v10579_v6, 0.0 }
0x46cd   : > { %v10575_v25 = vadd.f32 %v12103_v13, %v10565_v63  ;;  %v10580_v3 = vsel %vm3028_vm5, %v10577_v37, 0.0 }
0x46ce   : > { %10581 = vadd.xlane.f32.xlu0 %v10580_v3 }
0x46cf   : > { %v10578_v35 = vadd.f32 %v10575_v25, %v16469_v10 }
0x46d1   : > { %v10583_v11 = vsel %vm3028_vm5, %v10578_v35, 0.0 }
0x46d2   : > { %10584 = vadd.xlane.f32.xlu1 %v10583_v11  ;;  %10587 = vadd.xlane.f32.xlu0 %v10586_v31 }
0x4757   : > { %v10582_v4 = vpop.xlane.xlu0 %10581 }
0x4758   : > { %v10589_v5 = vmul.f32 0.03125, %v10582_v4 }
0x475a   : > { %v10592_v33 = vsub.f32 %v10577_v37, %v10589_v5 }
0x475b   : > { %v10585_v60 = vpop.xlane.xlu1 %10584  ;;  %v10588_v8 = vpop.xlane.xlu0 %10587 }
0x475c   : > { %v10590_v12 = vmul.f32 0.03125, %v10585_v60  ;;  %v10591_v2 = vmul.f32 0.03125, %v10588_v8  ;;  %v10595_v7 = vmul.f32 %v10592_v33, %v10592_v33 }
0x475e   : > { %v10593_v21 = vsub.f32 %v10578_v35, %v10590_v12  ;;  %v10594_v40 = vsub.f32 %v10579_v6, %v10591_v2  ;;  %v10598_v10 = vsel %vm3028_vm5, %v10595_v7, 0.0 }
0x475f   : > { %10599 = vadd.xlane.f32.xlu1 %v10598_v10 }
0x4760   : > { %v10596_v58 = vmul.f32 %v10593_v21, %v10593_v21  ;;  %v10597_v24 = vmul.f32 %v10594_v40, %v10594_v40 }
0x4762   : > { %v10601_v14 = vsel %vm3028_vm5, %v10596_v58, 0.0  ;;  %v10604_v15 = vsel %vm3028_vm5, %v10597_v24, 0.0 }
0x4763   : > { %10602 = vadd.xlane.f32.xlu0 %v10601_v14  ;;  %10605 = vadd.xlane.f32.xlu1 %v10604_v15 }
0x47e8   : > { %v10600_v44 = vpop.xlane.xlu1 %10599 }
0x47e9   : > { %v10607_v48 = vmul.f32 0.03125, %v10600_v44 }
0x47eb   : > { %v10610_v16 = vadd.f32 1e-05, %v10607_v48 }
0x47ec   : > { %v10606_v41 = vpop.xlane.xlu1 %10605  ;;  %v10603_v17 = vpop.xlane.xlu0 %10602 }
0x47ed   : > { %14017 = vrsqrt.f32 %v10610_v16  ;;  %v10609_v53 = vmul.f32 0.03125, %v10606_v41  ;;  %v10608_v20 = vmul.f32 0.03125, %v10603_v17 }
0x47ef   : > { %v10612_v23 = vadd.f32 1e-05, %v10609_v53  ;;  %v10611_v26 = vadd.f32 1e-05, %v10608_v20  ;;  %v12117_v20 = vld [vmem:[%s16987_s2] ss:$0 sm:$0xff]  ;;  %s2769_s2 = scalar_lea.vmem %s15361_s30, %s16148_s0 }
0x47f1   : > { %14019 = vrsqrt.f32 %v10612_v23 }
0x47f2   : > { %14021 = vrsqrt.f32 %v10611_v26 }
0x47fa   : > { %v14018_v27 = vpop.eup %14017 }
0x47fb   : > { %v10616_v55 = vmul.f32 %v14018_v27, %v10592_v33 }
0x47fd   : > { %v10626_v36 = vmul.f32 %v12104_v29, %v10616_v55 }
0x47fe   : > { %v14020_v30 = vpop.eup %14019 }
0x47ff   : > { %v14022_v32 = vpop.eup %14021  ;;  %v10618_v34 = vmul.f32 %v14020_v30, %v10594_v40  ;;  %v16707_v46 = vadd.f32 %v12105_v42, %v10626_v36 }
0x4800   : > { %v10617_v19 = vmul.f32 %v14022_v32, %v10593_v21 }
0x4801   : > { %v10628_v38 = vmul.f32 %v12104_v29, %v10618_v34 }
0x4802   : > { %v10627_v43 = vmul.f32 %v12104_v29, %v10617_v19 }
0x4803   : > { %v16705_v45 = vadd.f32 %v12105_v42, %v10628_v38 }
0x4804   : > { %v16709_v47 = vadd.f32 %v12105_v42, %v10627_v43 }
0x4805   : > { %v10640_v56 = vpack.c.bf16 %v16705_v45, %v16705_v45 }
0x4806   : > { %v10639_v49 = vpack.c.bf16 %v16709_v47, %v16707_v46 }
0x4808   : > { %13292 = vmatprep.mubr.msk.bf16.mxu0 %vm3028_vm5, %v10639_v49 }
0x4809   : > { %13293 = vmatmul.mubr.msk.bf16.vlgmr.msra.gmra.mxu0 %vm3028_vm5, %v10640_v56 }
0x48c9   : > { %v13294_v51 = vpop.f32.mrf.mxu0 }
0x48ca   : > { %v10713_v28 = vadd.f32 %v13294_v51, %v12106_v1 }
0x48cb   : > { %v10704_v13 = vpop.f32.mrf.mxu0 }
0x48cc   : > { %v10723_v59 = vmul.f32 0.044715, %v10713_v28  ;;  %v10705_v52 = vadd.f32 %v12106_v1, %v10704_v13  ;;  %v10720_v10 = vmul.f32 0.5, %v10713_v28 }
0x48cd   : > { %v13295_v9 = vpop.f32.mrf.mxu0 }
0x48ce   : > { %v10726_v0 = vmul.f32 %v10723_v59, %v10713_v28  ;;  %v10721_v22 = vmul.f32 0.044715, %v10705_v52  ;;  %v10718_v58 = vmul.f32 0.5, %v10705_v52 }
0x48cf   : > { %v10707_v62 = vpop.f32.mrf.mxu0 }
0x48d0   : > { %v10729_v63 = vmul.f32 %v10726_v0, %v10713_v28  ;;  %v10724_v37 = vmul.f32 %v10721_v22, %v10705_v52  ;;  %v10708_v25 = vadd.f32 %v12106_v1, %v10707_v62 }
0x48d2   : > { %v10732_v3 = vadd.f32 %v10729_v63, %v10713_v28  ;;  %v10727_v6 = vmul.f32 %v10724_v37, %v10705_v52  ;;  %v10722_v35 = vmul.f32 0.044715, %v10708_v25  ;;  %v10719_v24 = vmul.f32 0.5, %v10708_v25 }
0x48d4   : > { %v10735_v11 = vmul.f32 0.7978846, %v10732_v3  ;;  %v10730_v31 = vadd.f32 %v10727_v6, %v10705_v52  ;;  %v10725_v4 = vmul.f32 %v10722_v35, %v10708_v25  ;;  %v12119_v6 = vld [vmem:[#allocation7] ss:$0 sm:$0xff] }
0x48d6   : > { %v10733_v5 = vmul.f32 0.7978846, %v10730_v31  ;;  %v10728_v33 = vmul.f32 %v10725_v4, %v10708_v25  ;;  %14023 = vtanh.f32 %v10735_v11 }
0x48d8   : > { %14025 = vtanh.f32 %v10733_v5  ;;  %v10731_v60 = vadd.f32 %v10728_v33, %v10708_v25  ;;  %v12118_v25 = vld [vmem:[#allocation9] ss:$0 sm:$0xff] }
0x48da   : > { %v10734_v8 = vmul.f32 0.7978846, %v10731_v60 }
0x48dc   : > { %14027 = vtanh.f32 %v10734_v8 }
0x48e3   : > { %v14024_v12 = vpop.eup %14023 }
0x48e4   : > { %v10741_v7 = vadd.f32 1.0, %v14024_v12 }
0x48e5   : > { %v14026_v2 = vpop.eup %14025 }
0x48e6   : > { %v10739_v21 = vadd.f32 1.0, %v14026_v2  ;;  %v10744_v15 = vmul.f32 %v10741_v7, %v10720_v10 }
0x48e8   : > { %v10742_v39 = vmul.f32 %v10739_v21, %v10718_v58  ;;  %v10746_v48 = vpack.c.bf16 %v10744_v15, %v10744_v15 }
0x48e9   : > { %v14028_v40 = vpop.eup %14027 }
0x48ea   : > { %v10740_v14 = vadd.f32 1.0, %v14028_v40 }
0x48ec   : > { %v10743_v54 = vmul.f32 %v10740_v14, %v10719_v24 }
0x48ee   : > { %v10745_v44 = vpack.c.bf16 %v10743_v54, %v10742_v39 }
0x48f0   : > { %13304 = vmatprep.mubr.msk.bf16.mxu1 %vm4652_vm9, %v10745_v44 }
0x48f1   : > { %13305 = vmatmul.mubr.msk.bf16.vlgmr.msra.gmra.mxu1 %vm4652_vm9, %v10746_v48 }
0x49b1   : > { %v13306_v16 = vpop.f32.mrf.mxu1 }
0x49b2   : > { %v10835_v17 = vadd.f32 %v13306_v16, %v16705_v45 }
0x49b3   : > { %v10819_v41 = vpop.f32.mrf.mxu1 }
0x49b4   : > { %v10833_v53 = vadd.f32 %v10819_v41, %v16707_v46  ;;  %v10845_v55 = vadd.f32 %v12117_v20, %v10835_v17 }
0x49b5   : > { %v13307_v23 = vpop.f32.mrf.mxu1 }
0x49b6   : > { %v10843_v26 = vadd.f32 %v12117_v20, %v10833_v53  ;;  %v10852_v34 = vsel %vm3028_vm5, %v10845_v55, 0.0 }
0x49b7   : > { %v10822_v27 = vpop.f32.mrf.mxu1 }
0x49b8   : > { %v10834_v29 = vadd.f32 %v10822_v27, %v16709_v47  ;;  %v10846_v30 = vsel %vm3028_vm5, %v10843_v26, 0.0  ;;  %v13842_v27 = vld [vmem:[%s15356_s17] sm:$0xff]  }
0x49b9   : > { %10847 = vadd.xlane.f32.xlu0 %v10846_v30 }
0x49ba   : > { %v10844_v32 = vadd.f32 %v12117_v20, %v10834_v29 }
0x49bc   : > { %v10849_v19 = vsel %vm3028_vm5, %v10844_v32, 0.0 }
0x49bd   : > { %10853 = vadd.xlane.f32.xlu0 %v10852_v34  ;;  %10850 = vadd.xlane.f32.xlu1 %v10849_v19 }
0x4a42   : > { %v10848_v36 = vpop.xlane.xlu0 %10847 }
0x4a43   : > { %v10855_v38 = vmul.f32 0.03125, %v10848_v36 }
0x4a45   : > { %v10858_v42 = vsub.f32 %v10843_v26, %v10855_v38  ;;  %v13841_v26 = vld [vmem:[%s15356_s17 + $0x8] sm:$0xff]  }
0x4a46   : > { %v10854_v43 = vpop.xlane.xlu0 %10853  ;;  %v10851_v45 = vpop.xlane.xlu1 %10850  ;;  %13308 = vmatprep.subr.bf16.mxu0 %v13841_v26 }
0x4a47   : > { %v10857_v46 = vmul.f32 0.03125, %v10854_v43  ;;  %v10856_v56 = vmul.f32 0.03125, %v10851_v45  ;;  %v10861_v49 = vmul.f32 %v10858_v42, %v10858_v42  ;;  %13309 = vmatpush3.bf16.msra.mxu0 %v13841_v26 }
0x4a48   : > { %13310 = vmatprep.subr.bf16.mxu0 %v13842_v27 }
0x4a49   : > { %v10860_v57 = vsub.f32 %v10845_v55, %v10857_v46  ;;  %v10859_v47 = vsub.f32 %v10844_v32, %v10856_v56  ;;  %v10864_v50 = vsel %vm3028_vm5, %v10861_v49, 0.0  ;;  %v12120_v46 = vld [vmem:[#allocation13] ss:$0 sm:$0xff] }
0x4a4a   : > { %10865 = vadd.xlane.f32.xlu1 %v10864_v50 }
0x4a4b   : > { %v10863_v18 = vmul.f32 %v10860_v57, %v10860_v57  ;;  %v10862_v61 = vmul.f32 %v10859_v47, %v10859_v47  ;;  %13311 = vmatpush3.bf16.msra.mxu0 %v13842_v27 }
0x4a4d   : > { %v10870_v1 = vsel %vm3028_vm5, %v10863_v18, 0.0  ;;  %v10867_v51 = vsel %vm3028_vm5, %v10862_v61, 0.0  ;;  %v12121_v18 = vld [vmem:[#allocation12] ss:$0 sm:$0xff] }
0x4a4e   : > { %10871 = vadd.xlane.f32.xlu1 %v10870_v1  ;;  %10868 = vadd.xlane.f32.xlu0 %v10867_v51 }
0x4ad3   : > { %v10866_v28 = vpop.xlane.xlu1 %10865 }
0x4ad4   : > { %v10873_v13 = vmul.f32 0.03125, %v10866_v28 }
0x4ad6   : > { %v10876_v59 = vadd.f32 1e-05, %v10873_v13 }
0x4ad7   : > { %v10869_v52 = vpop.xlane.xlu0 %10868  ;;  %v10872_v9 = vpop.xlane.xlu1 %10871 }
0x4ad8   : > { %14029 = vrsqrt.f32 %v10876_v59  ;;  %v10874_v0 = vmul.f32 0.03125, %v10869_v52  ;;  %v10875_v22 = vmul.f32 0.03125, %v10872_v9  ;;  %v12122_v9 = vld [vmem:[#allocation43] ss:$0 sm:$0xff] }
0x4ada   : > { %v10877_v62 = vadd.f32 1e-05, %v10874_v0  ;;  %v10878_v63 = vadd.f32 1e-05, %v10875_v22 }
0x4adc   : > { %14031 = vrsqrt.f32 %v10877_v62 }
0x4add   : > { %14033 = vrsqrt.f32 %v10878_v63 }
0x4ae5   : > { %v14030_v37 = vpop.eup %14029 }
0x4ae6   : > { %v10882_v3 = vmul.f32 %v14030_v37, %v10858_v42 }
0x4ae8   : > { %v10892_v35 = vmul.f32 %v12118_v25, %v10882_v3 }
0x4ae9   : > { %v14032_v11 = vpop.eup %14031 }
0x4aea   : > { %v14034_v31 = vpop.eup %14033  ;;  %v10902_v4 = vadd.f32 %v12119_v6, %v10892_v35  ;;  %v10883_v5 = vmul.f32 %v14032_v11, %v10859_v47 }
0x4aeb   : > { %v10884_v33 = vmul.f32 %v14034_v31, %v10860_v57 }
0x4aec   : > { %v10905_v60 = vsel %vm3028_vm5, %v10902_v4, 0.0  ;;  %v10893_v8 = vmul.f32 %v12118_v25, %v10883_v5 }
0x4aed   : > { %10906 = vadd.xlane.f32.xlu0 %v10905_v60  ;;  %v10894_v12 = vmul.f32 %v12118_v25, %v10884_v33 }
0x4aee   : > { %v10903_v2 = vadd.f32 %v12119_v6, %v10893_v8 }
0x4aef   : > { %v10904_v7 = vadd.f32 %v12119_v6, %v10894_v12 }
0x4af0   : > { %v10908_v21 = vsel %vm3028_vm5, %v10903_v2, 0.0 }
0x4af1   : > { %10909 = vadd.xlane.f32.xlu1 %v10908_v21  ;;  %v10911_v40 = vsel %vm3028_vm5, %v10904_v7, 0.0 }
0x4af2   : > { %10912 = vadd.xlane.f32.xlu0 %v10911_v40 }
0x4b76   : > { %v10907_v10 = vpop.xlane.xlu0 %10906 }
0x4b77   : > { %v10914_v58 = vmul.f32 0.03125, %v10907_v10 }
0x4b79   : > { %v10917_v24 = vsub.f32 %v10902_v4, %v10914_v58 }
0x4b7a   : > { %v10910_v14 = vpop.xlane.xlu1 %10909 }
0x4b7b   : > { %v10913_v15 = vpop.xlane.xlu0 %10912  ;;  %v10915_v39 = vmul.f32 0.03125, %v10910_v14  ;;  %v10920_v54 = vmul.f32 %v10917_v24, %v10917_v24 }
0x4b7c   : > { %v10916_v44 = vmul.f32 0.03125, %v10913_v15 }
0x4b7d   : > { %v10918_v48 = vsub.f32 %v10903_v2, %v10915_v39  ;;  %v10923_v16 = vsel %vm3028_vm5, %v10920_v54, 0.0 }
0x4b7e   : > { %v10919_v41 = vsub.f32 %v10904_v7, %v10916_v44  ;;  %10924 = vadd.xlane.f32.xlu1 %v10923_v16 }
0x4b7f   : > { %v10921_v17 = vmul.f32 %v10918_v48, %v10918_v48 }
0x4b80   : > { %v10922_v53 = vmul.f32 %v10919_v41, %v10919_v41 }
0x4b81   : > { %v10926_v20 = vsel %vm3028_vm5, %v10921_v17, 0.0 }
0x4b82   : > { %v10929_v23 = vsel %vm3028_vm5, %v10922_v53, 0.0  ;;  %10927 = vadd.xlane.f32.xlu0 %v10926_v20 }
0x4b83   : > { %10930 = vadd.xlane.f32.xlu1 %v10929_v23 }
0x4c07   : > { %v10925_v55 = vpop.xlane.xlu1 %10924 }
0x4c08   : > { %v10932_v29 = vmul.f32 0.03125, %v10925_v55 }
0x4c0a   : > { %v10935_v30 = vadd.f32 1e-05, %v10932_v29 }
0x4c0b   : > { %v10928_v32 = vpop.xlane.xlu0 %10927 }
0x4c0c   : > { %14035 = vrsqrt.f32 %v10935_v30  ;;  %v10933_v34 = vmul.f32 0.03125, %v10928_v32  ;;  %v10931_v19 = vpop.xlane.xlu1 %10930 }
0x4c0d   : > { %v10934_v36 = vmul.f32 0.03125, %v10931_v19 }
0x4c0e   : > { %v10936_v38 = vadd.f32 1e-05, %v10933_v34 }
0x4c0f   : > { %v10937_v42 = vadd.f32 1e-05, %v10934_v36 }
0x4c10   : > { %14037 = vrsqrt.f32 %v10936_v38 }
0x4c11   : > { %14039 = vrsqrt.f32 %v10937_v42 }
0x4c19   : > { %v14036_v43 = vpop.eup %14035 }
0x4c1a   : > { %v10941_v45 = vmul.f32 %v14036_v43, %v10917_v24 }
0x4c1c   : > { %v10951_v47 = vmul.f32 %v12120_v46, %v10941_v45 }
0x4c1d   : > { %v14038_v56 = vpop.eup %14037 }
0x4c1e   : > { %v14040_v49 = vpop.eup %14039  ;;  %v10942_v57 = vmul.f32 %v14038_v56, %v10918_v48  ;;  %v10961_v51 = vadd.f32 %v12121_v18, %v10951_v47 }
0x4c1f   : > { %v10943_v50 = vmul.f32 %v14040_v49, %v10919_v41 }
0x4c20   : > { %v10952_v61 = vmul.f32 %v12120_v46, %v10942_v57 }
0x4c21   : > { %v10953_v1 = vmul.f32 %v12120_v46, %v10943_v50 }
0x4c22   : > { %v10962_v28 = vadd.f32 %v12121_v18, %v10952_v61 }
0x4c23   : > { %v10963_v13 = vadd.f32 %v12121_v18, %v10953_v1 }
0x4c24   : > { %v10964_v59 = vpack.c.bf16 %v10962_v28, %v10961_v51 }
0x4c25   : > { %v10965_v52 = vpack.c.bf16 %v10963_v13, %v10963_v13 }
0x4c26   : > { %13312 = vmatprep.mubr.msk.bf16.mxu0 %vm3028_vm5, %v10964_v59 }
0x4c27   : > { %13313 = vmatmul.mubr.msk.bf16.vlgmr.msra.gmra.mxu0 %vm3028_vm5, %v10965_v52 }
0x4ce7   : > { %v13314_v0 = vpop.f32.mrf.mxu0 }
0x4ce8   : > { %v11038_v22 = vadd.f32 %v13314_v0, %v12122_v9 }
0x4ce9   : > { %v11029_v62 = vpop.f32.mrf.mxu0 }
0x4cea   : > { %11045 = vst [vmem:[%s2769_s2 + $0x10] sm:$0xff] %v11038_v22  ;;  %v11030_v63 = vadd.f32 %v12122_v9, %v11029_v62 }
0x4ceb   : > { %v13315_v37 = vpop.f32.mrf.mxu0 }
0x4cec   : > { %11043 = vst [vmem:[%s2769_s2] sm:$0xff] %v11030_v63 }
0x4ced   : > { %v11032_v25 = vpop.f32.mrf.mxu0 }
0x4cee   : > { %v11033_v3 = vadd.f32 %v12122_v9, %v11032_v25 }
0x4cf0   : > { %11044 = vst [vmem:[%s2769_s2 + $0x8] sm:$0xff] %v11033_v3 }
0x4cf1 PF: > { %s188_s7 = sadd.s32 1, %s14835_s7  }
0x4cf2   : > { %p185_p8 = scmp.ge.s32.totalorder %s188_s7, 4  }
0x4cf4   :  { %187 = sbr.rel (!%p185_p8) target bundleno = 168 (0xa8), region = 667 }
0x4cf9   :  { %11067 = vsyncpa [#allocation3], 1 }
0x4cfa   :  { %11069 = vsyncpa [#allocation3 + $0x1], 1 }
0x4cfb   :  { %11070 = vsyncpa [#allocation5], 1 }
0x4cfc   :  { %11071 = vsyncpa [#allocation8], 1 }
0x4cfd   :  { %11072 = vsyncpa [#allocation11], 1 }
0x4cfe   :  { %11073 = vsyncpa [#allocation14], 1 }
0x4cff   :  { %11074 = vsyncpa [#allocation17], 1 }
0x4d00   :  { %11075 = vsyncpa [#allocation20], 1 }
0x4d01   :  { %11076 = vsyncpa [#allocation23], 1 }
0x4d02   :  { %11077 = vsyncpa [#allocation26], 1 }
0x4d03   :  { %11078 = vsyncpa [#allocation29], 1 }
0x4d04   :  { %11079 = vsyncpa [#allocation32], 1 }
0x4d05   :  { %11080 = vsyncpa [#allocation35], 1 }
0x4d06   :  { %11081 = vsyncpa [#allocation38], 1 }
0x4d07   :  { %11082 = vsyncpa [#allocation41], 1 }
0x4d08   :  { %11083 = vsyncpa [#allocation44], 1 }

</bundles_post_ra>
